<compile_context>
chip_gen: v7x
topology: tpu7x:2x2x1
jax: 0.10.0
libtpu: 0.0.40
codegen_flags: <defaults>
</compile_context>

<pallas_src>
import functools

import jax
import jax.numpy as jnp
from jax import lax
from jax.experimental import pallas as pl
from jax.experimental.pallas import tpu as pltpu


# ---------------------------------------------------------------------------
# Parameter construction (deterministic, synthetic) + Conv1x1/BN folding
# ---------------------------------------------------------------------------
def _fold_conv_bn(w, b, gamma, beta, mean, var, eps=1e-5):
    # w: (cout, cin) 1x1-conv weight, b: (cout,) conv bias.
    # eval-mode BN: y = gamma * (conv(x) - mean) / sqrt(var + eps) + beta
    s = gamma / jnp.sqrt(var + eps)
    return w * s[:, None], (b - mean) * s + beta        # (cout, cin), (cout,)


def init_params(key, feat_dim, msg_dim, feat_out_dim):
    F, M = feat_dim, msg_dim
    H1 = M // 2                # phi_e hidden
    H2 = 2 * M                 # phi_x hidden
    H3 = 2 * (F + M)           # phi_h hidden
    C_e = 2 * F + 1            # phi_e input channels (edge_dim = 0)

    keys = iter(jax.random.split(key, 36))

    def conv_bn(cin, cout):
        w = jax.random.normal(next(keys), (cout, cin), jnp.float32) / jnp.sqrt(cin)
        b = 0.1 * jax.random.normal(next(keys), (cout,), jnp.float32)
        gamma = 1.0 + 0.1 * jax.random.normal(next(keys), (cout,), jnp.float32)
        beta = 0.1 * jax.random.normal(next(keys), (cout,), jnp.float32)
        mean = 0.1 * jax.random.normal(next(keys), (cout,), jnp.float32)
        var = jax.random.uniform(next(keys), (cout,), jnp.float32,
                                 minval=0.5, maxval=1.5)
        return _fold_conv_bn(w, b, gamma, beta, mean, var)

    we1, be1 = conv_bn(C_e, H1)           # phi_e layer 1
    we2, be2 = conv_bn(H1, M)             # phi_e layer 2
    wx1, bx1 = conv_bn(M, H2)             # phi_x layer 1
    wx2, bx2 = conv_bn(H2, 1)             # phi_x layer 2
    wh1, bh1 = conv_bn(F + M, H3)         # phi_h layer 1
    wh2, bh2 = conv_bn(H3, feat_out_dim)  # phi_h layer 2
    return dict(we1=we1, be1=be1, we2=we2, be2=be2,
                wx1=wx1, bx1=bx1, wx2=wx2, bx2=bx2,
                wh1=wh1, bh1=bh1, wh2=wh2, bh2=bh2)


def _round_up(v, m):
    return (v + m - 1) // m * m


def _pack_params(params, F, N):
    """Pack all folded Conv1x1+BN layers into one (rows, 128) f32 array of
    8-row-aligned blocks; returns (packed, layout, Fop)."""
    H1 = params['we1'].shape[0]
    Fo = params['wh2'].shape[0]
    Fop = _round_up(Fo, 8)

    we1, be1 = params['we1'], params['be1']            # (H1, 2F+1), (H1,)
    # phi_e layer-1 block, stacked so a_i/a_j come from a single matmul:
    #   rows 0:H1  -> [W_hi | w_d | b_e1]
    #   rows H1:2H1-> [W_hj |  0  |  0  ]
    top = jnp.concatenate([we1[:, 0:F], we1[:, 2 * F:2 * F + 1],
                           be1[:, None]], axis=1)               # (H1, F+2)
    bot = jnp.concatenate([we1[:, F:2 * F],
                           jnp.zeros((H1, 2), jnp.float32)], axis=1)
    blk0 = jnp.concatenate([top, bot], axis=0)                  # (2H1, F+2)

    def cat_wb(w, b):
        return jnp.concatenate([w, b[:, None]], axis=1)

    # Fold 1/(N-1) into phi_x layer 2 and pad its single row up to 8 rows so
    # every weight block / matmul output is a full sublane tile.
    inv = 1.0 / (N - 1.0)
    wx2 = jnp.zeros((8, params['wx2'].shape[1]), jnp.float32
                    ).at[0].set(params['wx2'][0] * inv)
    bx2 = jnp.zeros((8,), jnp.float32).at[0].set(params['bx2'][0] * inv)
    # Pad phi_h layer-2 rows to Fop so h_new is written as full 8-row tiles.
    wh2 = jnp.zeros((Fop, params['wh2'].shape[1]), jnp.float32
                    ).at[:Fo].set(params['wh2'])
    bh2 = jnp.zeros((Fop,), jnp.float32).at[:Fo].set(params['bh2'])

    blocks = [blk0,
              cat_wb(params['we2'], params['be2']),
              cat_wb(params['wx1'], params['bx1']),
              cat_wb(wx2, bx2),
              cat_wb(params['wh1'], params['bh1']),
              cat_wb(wh2, bh2)]

    Cp = _round_up(max(b.shape[1] for b in blocks), 128)        # lane-pad 128
    rows, layout, off = [], [], 0
    for b in blocks:
        r, c = b.shape
        pad_r = (-r) % 8
        rows.append(jnp.pad(b.astype(jnp.float32), ((0, pad_r), (0, Cp - c))))
        layout.append((off, r, c))
        off += r + pad_r
    return jnp.concatenate(rows, axis=0), tuple(layout), Fop


def _vmem_estimate(block_batch, N, Dp, F, H1, M, H3, Fop,
                   packed_bytes, edge_bytes):
    """Rough per-grid-step VMEM footprint used to cap block_batch."""
    BN = block_batch * N
    E = BN * N
    sel = 2 * BN * E * edge_bytes                       # R, T (single copy)
    edge_c = 3 * Dp + 2 * H1 + 4 * M + 4                # live (C, E) temps
    edge = int(edge_c * E * 4 * 1.5)                    # f32 + bf16 MXU copies
    node_c = 2 * (2 * Dp + F + Fop) + 2 * H1 + M + H3   # 2-buffered i/o + temps
    node = node_c * BN * 4
    return sel + edge + node + 2 * packed_bytes


# ---------------------------------------------------------------------------
# Pallas kernel: one block of block_batch graphs per grid step, channel-first
# ---------------------------------------------------------------------------
def _egcn_kernel(x_ref, h_ref, r_hbm, t_hbm, p_hbm, out_ref,
                 r_vmem, t_vmem, p_vmem, sem, *, layout):
    # One-time copy of the grid-invariant operands into single-buffered VMEM
    # scratch (grid axis is "arbitrary"/sequential, so step 0 runs first).
    @pl.when(pl.program_id(0) == 0)
    def _copy_invariants():
        cps = [pltpu.make_async_copy(r_hbm, r_vmem, sem.at[0]),
               pltpu.make_async_copy(t_hbm, t_vmem, sem.at[1]),
               pltpu.make_async_copy(p_hbm, p_vmem, sem.at[2])]
        for cp in cps:
            cp.start()
        for cp in cps:
            cp.wait()

    x = x_ref[0]                      # (Dp, BN) f32, rows D..Dp-1 are zero
    h = h_ref[0]                      # (F,  BN) f32
    R = r_vmem[...]                   # (BN, E)  receiver selector (0/1)
    T = t_vmem[...]                   # (BN, E)  sender selector   (0/1)

    ed = r_vmem.dtype                 # edge-path MXU dtype (bf16 or f32)
    f32 = jnp.float32
    Dp = x.shape[0]
    F = h.shape[0]
    H1 = layout[0][1] // 2
    M = layout[1][1]
    Fop = layout[5][1]

    dot = lambda a, b: jnp.dot(a, b, preferred_element_type=f32)

    def contract_e(a, sel):
        # (C, E) x (BN, E) -> (C, BN): contract directly over the edge axis of
        # the selector (no transposed RT array shipped / resident).
        return lax.dot_general(a.astype(ed), sel, (((1,), (1,)), ((), ())),
                               preferred_element_type=f32)

    def blk(i):                       # static, 8-row-aligned packed-param slices
        off, r, c = layout[i]
        return p_vmem[off:off + r, 0:c]

    def wb(i):
        b = blk(i)
        return b[:, :-1], b[:, -1:]

    # Folded Conv1x1 + BatchNorm(eval) weights.
    B0 = blk(0)                       # (2H1, F+2): [[W_hi|w_d|b_e1],[W_hj|0|0]]
    W_hij = B0[:, 0:F]
    w_d = B0[0:H1, F:F + 1]
    b_e1 = B0[0:H1, F + 1:F + 2]
    W_e2, b_e2 = wb(1)                # (M, H1)
    W_x1, b_x1 = wb(2)                # (2M, M)
    W_x2, b_x2 = wb(3)                # (8, 2M), rows 1..7 zero, 1/(N-1) folded
    W_h1, b_h1 = wb(4)                # (H3, F+M)
    W_h2, b_h2 = wb(5)                # (Fop, H3), rows Fo..Fop-1 zero

    # phi_e layer-1 node partials: single fused matmul; b_e1 added per node.
    A = dot(W_hij, h)                 # (2H1, BN)
    a_i = A[0:H1] + b_e1
    a_j = A[H1:2 * H1]

    # Per-edge coordinate differences, lane-dense (Dp, E).
    xe = x.astype(ed)
    x_i = dot(xe, R)                  # exact gather (0/1 selector)
    x_j = dot(xe, T)
    dxf = x_i - x_j
    dist2 = jnp.sum(dxf * dxf, axis=0, keepdims=True)           # (1, E)

    # phi_e: messages m_ij, channel-first (C, E).
    m1 = jnp.maximum(dot(a_i.astype(ed), R) + dot(a_j.astype(ed), T)
                     + w_d * dist2, 0.0)                        # (H1, E)
    m = dot(W_e2.astype(ed), m1.astype(ed)) + b_e2              # (M,  E)

    # phi_x: per-edge scalar coordinate weight (already divided by N-1).
    p1 = jnp.maximum(dot(W_x1.astype(ed), m.astype(ed)) + b_x1, 0.0)
    cw = (dot(W_x2.astype(ed), p1.astype(ed)) + b_x2)[0:1, :]   # (1, E)

    # Aggregations back onto nodes: single E-contractions against R.
    x_new = x + contract_e(dxf * cw, R)                         # (Dp, BN)
    m_i = contract_e(m, R)                                      # (M,  BN)

    # phi_h on cat(h, m_i) via split-column matmuls (no in-kernel concat).
    q1 = jnp.maximum(dot(W_h1[:, 0:F], h) + dot(W_h1[:, F:F + M], m_i)
                     + b_h1, 0.0)                               # (H3, BN)
    h_new = dot(W_h2, q1) + b_h2                                # (Fop, BN)

    # Two full, 8-row-aligned stores into the combined output block.
    out_ref[0, 0:Dp, :] = x_new
    out_ref[0, Dp:Dp + Fop, :] = h_new


# ---------------------------------------------------------------------------
# Wrapper (PyTorch channel-first layout in / out)
# ---------------------------------------------------------------------------
def egcn_forward(x, h, params, *, block_batch=None, edge_dtype=jnp.bfloat16,
                 vmem_budget_bytes=40 * 1024 * 1024,
                 vmem_limit_bytes=48 * 1024 * 1024):
    """x: (B, D, N), h: (B, F, N)  ->  (x_new (B, D, N), h_new (B, F_out, N))."""
    B, D, N = x.shape
    F = h.shape[1]
    H1 = params['we1'].shape[0]
    M = params['we2'].shape[0]
    H3 = params['wh1'].shape[0]
    Fo = params['wh2'].shape[0]
    Dp = _round_up(max(D, 1), 8)

    packed, layout, Fop = _pack_params(params, F, N)
    packed_bytes = packed.size * 4
    edge_bytes = jnp.finfo(edge_dtype).bits // 8

    # Batch blocking: prefer a lane-dense BN = block_batch*N (multiple of 128,
    # else >= 128, else as large as possible) within the VMEM budget.
    if block_batch is None:
        cands = [c for c in range(1, B + 1) if B % c == 0]
        fits = [c for c in cands
                if _vmem_estimate(c, N, Dp, F, H1, M, H3, Fop,
                                  packed_bytes, edge_bytes) <= vmem_budget_bytes]
        if not fits:
            fits = [1]
        block_batch = max(
            fits, key=lambda c: ((c * N) % 128 == 0, c * N >= 128, c * N))
    assert B % block_batch == 0, "block_batch must divide the batch size"
    nb = B // block_batch
    BN = block_batch * N
    E = block_batch * N * N

    # Channel-first is already PyTorch's layout; pad coords to Dp channels and
    # fold block_batch graphs onto the node/lane axis.
    def pack_nodes(t):                 # (B, C, N) -> (nb, C, BN)
        C = t.shape[1]
        return (t.astype(jnp.float32)
                 .reshape(nb, block_batch, C, N)
                 .transpose(0, 2, 1, 3)
                 .reshape(nb, C, BN))

    x_cf = pack_nodes(jnp.pad(x.astype(jnp.float32),
                              ((0, 0), (0, Dp - D), (0, 0))))   # (nb, Dp, BN)
    h_cf = pack_nodes(h)                                        # (nb, F,  BN)

    # Block-diagonal 0/1 edge selectors (exact in bf16): edge e = g*N*N+i*N+j,
    # receiver node g*N+i, sender node g*N+j (intra-graph edges only).
    e_idx = jnp.arange(E)
    g = e_idx // (N * N)
    recv = g * N + (e_idx // N) % N
    send = g * N + e_idx % N
    node = jnp.arange(BN)[:, None]
    R = (node == recv[None, :]).astype(edge_dtype)     # (BN, E)
    T = (node == send[None, :]).astype(edge_dtype)     # (BN, E)

    kernel = functools.partial(_egcn_kernel, layout=layout)

    out = pl.pallas_call(
        kernel,
        out_shape=jax.ShapeDtypeStruct((nb, Dp + Fop, BN), jnp.float32),
        grid=(nb,),
        in_specs=[
            pl.BlockSpec((1, Dp, BN), lambda b: (b, 0, 0)),
            pl.BlockSpec((1, F, BN), lambda b: (b, 0, 0)),
            # Grid-invariant operands stay in HBM (pl.ANY) and are copied once
            # into single-buffered VMEM scratch inside the kernel (no 2-deep
            # pipeline buffers for data whose block index never changes).
            pl.BlockSpec(memory_space=pl.ANY),
            pl.BlockSpec(memory_space=pl.ANY),
            pl.BlockSpec(memory_space=pl.ANY),
        ],
        out_specs=pl.BlockSpec((1, Dp + Fop, BN), lambda b: (b, 0, 0)),
        scratch_shapes=[
            pltpu.VMEM((BN, E), edge_dtype),        # R (receiver selector)
            pltpu.VMEM((BN, E), edge_dtype),        # T (sender selector)
            pltpu.VMEM(packed.shape, jnp.float32),  # folded Conv+BN weights
            pltpu.SemaphoreType.DMA((3,)),
        ],
        compiler_params=pltpu.CompilerParams(
            # "arbitrary": sequential grid so the one-time invariant copy at
            # step 0 is valid on every generation (see TODO re v7x megacore).
            dimension_semantics=("arbitrary",),
            vmem_limit_bytes=vmem_limit_bytes),
    )(x_cf, h_cf, R, T, packed)

    def unpack_nodes(t):               # (nb, C, BN) -> (B, C, N)
        C = t.shape[1]
        return (t.reshape(nb, C, block_batch, N)
                 .transpose(0, 2, 1, 3)
                 .reshape(B, C, N))

    return unpack_nodes(out[:, 0:D, :]), unpack_nodes(out[:, Dp:Dp + Fo, :])


# ---------------------------------------------------------------------------
# Plain-JAX reference (mirrors the PyTorch forward, channel-first layout)
# ---------------------------------------------------------------------------
def egcn_reference(x, h, p):
    B, D, N = x.shape
    F = h.shape[1]
    dx = x[:, :, :, None] - x[:, :, None, :]                  # (B, D, N, N)
    dist2 = jnp.sum(dx * dx, axis=1, keepdims=True)           # (B, 1, N, N)
    h_i = jnp.broadcast_to(h[:, :, :, None], (B, F, N, N))
    h_j = jnp.broadcast_to(h[:, :, None, :], (B, F, N, N))
    e_in = jnp.concatenate([h_i, h_j, dist2], axis=1)

    def c2d(t, w, b):
        return jnp.einsum('bcij,oc->boij', t, w) + b[None, :, None, None]

    def c1d(t, w, b):
        return jnp.einsum('bci,oc->boi', t, w) + b[None, :, None]

    m1 = jax.nn.relu(c2d(e_in, p['we1'], p['be1']))
    m = c2d(m1, p['we2'], p['be2'])                           # (B, M, N, N)
    cw = c2d(jax.nn.relu(c2d(m, p['wx1'], p['bx1'])),
             p['wx2'], p['bx2'])[:, 0]                        # (B, N, N)
    x_new = x + jnp.einsum('bdij,bij->bdi', dx, cw) / (N - 1)
    m_i = jnp.sum(m, axis=-1)                                 # (B, M, N)
    hm = jnp.concatenate([h, m_i], axis=1)
    h_new = c1d(jax.nn.relu(c1d(hm, p['wh1'], p['bh1'])), p['wh2'], p['bh2'])
    return x_new, h_new


# ---------------------------------------------------------------------------
if __name__ == "__main__":
    B, D, N = 16, 3, 16          # batch, coord_dim, n_nodes
    F, M = 4, 32                 # feat_dim, msg_dim (feat_out_dim = feat_dim)

    key = jax.random.PRNGKey(0)
    kx, kh, kp = jax.random.split(key, 3)
    x = jax.random.normal(kx, (B, D, N), jnp.float32)
    h = jax.random.normal(kh, (B, F, N), jnp.float32)
    params = init_params(kp, feat_dim=F, msg_dim=M, feat_out_dim=F)

    x_r, h_r = egcn_reference(x, h, params)

    # 1) f32 edge path with explicit blocking -> 2 grid steps (exercises the
    #    one-time invariant copy + reuse across steps); tight tolerance.
    x_a, h_a = egcn_forward(x, h, params, block_batch=8,
                            edge_dtype=jnp.float32)
    # 2) default config: bf16 edge path, VMEM-budget / lane-density blocking.
    x_b, h_b = egcn_forward(x, h, params)
    jax.block_until_ready((x_a, h_a, x_b, h_b))

    assert x_a.shape == (B, D, N) and h_a.shape == (B, F, N)
    assert x_b.shape == (B, D, N) and h_b.shape == (B, F, N)

    assert jnp.allclose(x_a, x_r, rtol=5e-3, atol=5e-3), "coord mismatch (f32)"
    assert jnp.allclose(h_a, h_r, rtol=5e-3, atol=5e-3), "feat mismatch (f32)"

    # bf16 MXU inputs with f32 accumulation: bound the max error relative to
    # each output tensor's scale (a few tens of bf16 ulps of dynamic range).
    def max_rel_err(got, ref):
        return jnp.max(jnp.abs(got - ref)) / jnp.maximum(
            jnp.max(jnp.abs(ref)), 1e-6)

    assert max_rel_err(x_b, x_r) < 4e-2, "coord mismatch (bf16)"
    assert max_rel_err(h_b, h_r) < 4e-2, "feat mismatch (bf16)"

    print("KERNEL_OK")
</pallas_src>

<mosaic_0001>
module attributes {stable_mosaic.version = 11 : i64} {
  func.func @_egcn_kernel(%arg0: i32, %arg1: memref<1x8x128xf32, #tpu.memory_space<vmem>>, %arg2: memref<1x4x128xf32, #tpu.memory_space<vmem>>, %arg3: memref<128x2048xf32, #tpu.memory_space<any>>, %arg4: memref<128x2048xf32, #tpu.memory_space<any>>, %arg5: memref<216x128xf32, #tpu.memory_space<any>>, %arg6: memref<1x16x128xf32, #tpu.memory_space<vmem>>, %arg7: memref<128x2048xf32, #tpu.memory_space<vmem>>, %arg8: memref<128x2048xf32, #tpu.memory_space<vmem>>, %arg9: memref<216x128xf32, #tpu.memory_space<vmem>>, %arg10: memref<3x!tpu.dma_semaphore, #tpu.memory_space<semaphore_mem>>) attributes {dimension_semantics = [#tpu.dimension_semantics<arbitrary>], iteration_bounds = array<i64: 2>, scalar_prefetch = 0 : i64, scratch_operands = 4 : i64, tpu.core_type = #tpu.core_type<tc>, window_params = [{transform_indices = @transform_0, window_bounds = array<i64: 1, 8, 128>}, {transform_indices = @transform_1, window_bounds = array<i64: 1, 4, 128>}, {}, {}, {}, {transform_indices = @transform_5, window_bounds = array<i64: 1, 16, 128>}]} {
    %c0_i32 = arith.constant 0 : i32
    %0 = arith.cmpi eq, %arg0, %c0_i32 : i32
    %1 = arith.extui %0 : i1 to i32
    %c0_i32_0 = arith.constant 0 : i32
    %2 = arith.cmpi ne, %1, %c0_i32_0 : i32
    scf.if %2 {
      %c0_i32_38 = arith.constant 0 : i32
      %83 = tpu.memref_slice %arg10[%c0_i32_38] : memref<3x!tpu.dma_semaphore, #tpu.memory_space<semaphore_mem>> -> memref<1x!tpu.dma_semaphore, #tpu.memory_space<semaphore_mem>>
      %84 = tpu.memref_squeeze %83 : memref<1x!tpu.dma_semaphore, #tpu.memory_space<semaphore_mem>> -> memref<!tpu.dma_semaphore, #tpu.memory_space<semaphore_mem>>
      tpu.enqueue_dma source(%arg3 : memref<128x2048xf32, #tpu.memory_space<any>>) target(%arg7 : memref<128x2048xf32, #tpu.memory_space<vmem>>) target_semaphore(%84 : memref<!tpu.dma_semaphore, #tpu.memory_space<semaphore_mem>>)
      %c1_i32 = arith.constant 1 : i32
      %85 = tpu.memref_slice %arg10[%c1_i32] : memref<3x!tpu.dma_semaphore, #tpu.memory_space<semaphore_mem>> -> memref<1x!tpu.dma_semaphore, #tpu.memory_space<semaphore_mem>>
      %86 = tpu.memref_squeeze %85 : memref<1x!tpu.dma_semaphore, #tpu.memory_space<semaphore_mem>> -> memref<!tpu.dma_semaphore, #tpu.memory_space<semaphore_mem>>
      tpu.enqueue_dma source(%arg4 : memref<128x2048xf32, #tpu.memory_space<any>>) target(%arg8 : memref<128x2048xf32, #tpu.memory_space<vmem>>) target_semaphore(%86 : memref<!tpu.dma_semaphore, #tpu.memory_space<semaphore_mem>>)
      %c2_i32 = arith.constant 2 : i32
      %87 = tpu.memref_slice %arg10[%c2_i32] : memref<3x!tpu.dma_semaphore, #tpu.memory_space<semaphore_mem>> -> memref<1x!tpu.dma_semaphore, #tpu.memory_space<semaphore_mem>>
      %88 = tpu.memref_squeeze %87 : memref<1x!tpu.dma_semaphore, #tpu.memory_space<semaphore_mem>> -> memref<!tpu.dma_semaphore, #tpu.memory_space<semaphore_mem>>
      tpu.enqueue_dma source(%arg5 : memref<216x128xf32, #tpu.memory_space<any>>) target(%arg9 : memref<216x128xf32, #tpu.memory_space<vmem>>) target_semaphore(%88 : memref<!tpu.dma_semaphore, #tpu.memory_space<semaphore_mem>>)
      %c0_i32_39 = arith.constant 0 : i32
      %89 = tpu.memref_slice %arg10[%c0_i32_39] : memref<3x!tpu.dma_semaphore, #tpu.memory_space<semaphore_mem>> -> memref<1x!tpu.dma_semaphore, #tpu.memory_space<semaphore_mem>>
      %90 = tpu.memref_squeeze %89 : memref<1x!tpu.dma_semaphore, #tpu.memory_space<semaphore_mem>> -> memref<!tpu.dma_semaphore, #tpu.memory_space<semaphore_mem>>
      tpu.wait_dma2 semaphore(%90 : memref<!tpu.dma_semaphore, #tpu.memory_space<semaphore_mem>>) src(%arg3 : memref<128x2048xf32, #tpu.memory_space<any>>) dst(%arg7 : memref<128x2048xf32, #tpu.memory_space<vmem>>)
      %c1_i32_40 = arith.constant 1 : i32
      %91 = tpu.memref_slice %arg10[%c1_i32_40] : memref<3x!tpu.dma_semaphore, #tpu.memory_space<semaphore_mem>> -> memref<1x!tpu.dma_semaphore, #tpu.memory_space<semaphore_mem>>
      %92 = tpu.memref_squeeze %91 : memref<1x!tpu.dma_semaphore, #tpu.memory_space<semaphore_mem>> -> memref<!tpu.dma_semaphore, #tpu.memory_space<semaphore_mem>>
      tpu.wait_dma2 semaphore(%92 : memref<!tpu.dma_semaphore, #tpu.memory_space<semaphore_mem>>) src(%arg4 : memref<128x2048xf32, #tpu.memory_space<any>>) dst(%arg8 : memref<128x2048xf32, #tpu.memory_space<vmem>>)
      %c2_i32_41 = arith.constant 2 : i32
      %93 = tpu.memref_slice %arg10[%c2_i32_41] : memref<3x!tpu.dma_semaphore, #tpu.memory_space<semaphore_mem>> -> memref<1x!tpu.dma_semaphore, #tpu.memory_space<semaphore_mem>>
      %94 = tpu.memref_squeeze %93 : memref<1x!tpu.dma_semaphore, #tpu.memory_space<semaphore_mem>> -> memref<!tpu.dma_semaphore, #tpu.memory_space<semaphore_mem>>
      tpu.wait_dma2 semaphore(%94 : memref<!tpu.dma_semaphore, #tpu.memory_space<semaphore_mem>>) src(%arg5 : memref<216x128xf32, #tpu.memory_space<any>>) dst(%arg9 : memref<216x128xf32, #tpu.memory_space<vmem>>)
    } else {
    }
    %c0 = arith.constant 0 : index
    %c0_1 = arith.constant 0 : index
    %c0_2 = arith.constant 0 : index
    %3 = vector.load %arg1[%c0, %c0_1, %c0_2] : memref<1x8x128xf32, #tpu.memory_space<vmem>>, vector<1x8x128xf32>
    %4 = vector.shape_cast %3 : vector<1x8x128xf32> to vector<8x128xf32>
    %c0_3 = arith.constant 0 : index
    %c0_4 = arith.constant 0 : index
    %c0_5 = arith.constant 0 : index
    %5 = vector.load %arg2[%c0_3, %c0_4, %c0_5] : memref<1x4x128xf32, #tpu.memory_space<vmem>>, vector<1x4x128xf32>
    %6 = vector.shape_cast %5 : vector<1x4x128xf32> to vector<4x128xf32>
    %c0_6 = arith.constant 0 : index
    %c0_7 = arith.constant 0 : index
    %7 = vector.load %arg7[%c0_6, %c0_7] : memref<128x2048xf32, #tpu.memory_space<vmem>>, vector<128x2048xf32>
    %c0_8 = arith.constant 0 : index
    %c0_9 = arith.constant 0 : index
    %8 = vector.load %arg8[%c0_8, %c0_9] : memref<128x2048xf32, #tpu.memory_space<vmem>>, vector<128x2048xf32>
    %c0_10 = arith.constant 0 : index
    %c0_11 = arith.constant 0 : index
    %9 = vector.load %arg9[%c0_10, %c0_11] : memref<216x128xf32, #tpu.memory_space<vmem>>, vector<32x6xf32>
    %10 = vector.extract_strided_slice %9 {offsets = [0, 0], sizes = [32, 4], strides = [1, 1]} : vector<32x6xf32> to vector<32x4xf32>
    %11 = vector.extract_strided_slice %9 {offsets = [0, 4], sizes = [16, 1], strides = [1, 1]} : vector<32x6xf32> to vector<16x1xf32>
    %12 = vector.extract_strided_slice %9 {offsets = [0, 5], sizes = [16, 1], strides = [1, 1]} : vector<32x6xf32> to vector<16x1xf32>
    %c32 = arith.constant 32 : index
    %c0_12 = arith.constant 0 : index
    %13 = vector.load %arg9[%c32, %c0_12] : memref<216x128xf32, #tpu.memory_space<vmem>>, vector<32x17xf32>
    %14 = vector.extract_strided_slice %13 {offsets = [0, 0], sizes = [32, 16], strides = [1, 1]} : vector<32x17xf32> to vector<32x16xf32>
    %15 = vector.extract_strided_slice %13 {offsets = [0, 16], sizes = [32, 1], strides = [1, 1]} : vector<32x17xf32> to vector<32x1xf32>
    %c64 = arith.constant 64 : index
    %c0_13 = arith.constant 0 : index
    %16 = vector.load %arg9[%c64, %c0_13] : memref<216x128xf32, #tpu.memory_space<vmem>>, vector<64x33xf32>
    %17 = vector.extract_strided_slice %16 {offsets = [0, 0], sizes = [64, 32], strides = [1, 1]} : vector<64x33xf32> to vector<64x32xf32>
    %18 = vector.extract_strided_slice %16 {offsets = [0, 32], sizes = [64, 1], strides = [1, 1]} : vector<64x33xf32> to vector<64x1xf32>
    %c128 = arith.constant 128 : index
    %c0_14 = arith.constant 0 : index
    %19 = vector.load %arg9[%c128, %c0_14] : memref<216x128xf32, #tpu.memory_space<vmem>>, vector<8x65xf32>
    %20 = vector.extract_strided_slice %19 {offsets = [0, 0], sizes = [8, 64], strides = [1, 1]} : vector<8x65xf32> to vector<8x64xf32>
    %21 = vector.extract_strided_slice %19 {offsets = [0, 64], sizes = [8, 1], strides = [1, 1]} : vector<8x65xf32> to vector<8x1xf32>
    %c136 = arith.constant 136 : index
    %c0_15 = arith.constant 0 : index
    %22 = vector.load %arg9[%c136, %c0_15] : memref<216x128xf32, #tpu.memory_space<vmem>>, vector<72x37xf32>
    %23 = vector.extract_strided_slice %22 {offsets = [0, 0], sizes = [72, 36], strides = [1, 1]} : vector<72x37xf32> to vector<72x36xf32>
    %24 = vector.extract_strided_slice %22 {offsets = [0, 36], sizes = [72, 1], strides = [1, 1]} : vector<72x37xf32> to vector<72x1xf32>
    %c208 = arith.constant 208 : index
    %c0_16 = arith.constant 0 : index
    %25 = vector.load %arg9[%c208, %c0_16] : memref<216x128xf32, #tpu.memory_space<vmem>>, vector<8x73xf32>
    %26 = vector.extract_strided_slice %25 {offsets = [0, 0], sizes = [8, 72], strides = [1, 1]} : vector<8x73xf32> to vector<8x72xf32>
    %27 = vector.extract_strided_slice %25 {offsets = [0, 72], sizes = [8, 1], strides = [1, 1]} : vector<8x73xf32> to vector<8x1xf32>
    %cst = arith.constant dense<0.000000e+00> : vector<32x128xf32>
    %28 = tpu.matmul %10, %6, %cst {dimension_numbers = #tpu.dot_dimension_numbers<[1], [0], [0], [1], [0, 0, 1, 1], [], []>} : vector<32x4xf32>, vector<4x128xf32>, vector<32x128xf32> -> vector<32x128xf32>
    %29 = vector.extract_strided_slice %28 {offsets = [0, 0], sizes = [16, 128], strides = [1, 1]} : vector<32x128xf32> to vector<16x128xf32>
    %30 = vector.broadcast %12 : vector<16x1xf32> to vector<16x128xf32>
    %31 = arith.addf %29, %30 : vector<16x128xf32>
    %32 = vector.extract_strided_slice %28 {offsets = [16, 0], sizes = [16, 128], strides = [1, 1]} : vector<32x128xf32> to vector<16x128xf32>
    %cst_17 = arith.constant dense<0.000000e+00> : vector<8x2048xf32>
    %33 = tpu.matmul %4, %7, %cst_17 {dimension_numbers = #tpu.dot_dimension_numbers<[1], [0], [0], [1], [0, 0, 1, 1], [], []>} : vector<8x128xf32>, vector<128x2048xf32>, vector<8x2048xf32> -> vector<8x2048xf32>
    %cst_18 = arith.constant dense<0.000000e+00> : vector<8x2048xf32>
    %34 = tpu.matmul %4, %8, %cst_18 {dimension_numbers = #tpu.dot_dimension_numbers<[1], [0], [0], [1], [0, 0, 1, 1], [], []>} : vector<8x128xf32>, vector<128x2048xf32>, vector<8x2048xf32> -> vector<8x2048xf32>
    %35 = arith.subf %33, %34 : vector<8x2048xf32>
    %36 = arith.mulf %35, %35 : vector<8x2048xf32>
    %cst_19 = arith.constant dense<0.000000e+00> : vector<2048xf32>
    %37 = vector.multi_reduction <add>, %36, %cst_19 [0] : vector<8x2048xf32> to vector<2048xf32>
    %38 = vector.shape_cast %37 : vector<2048xf32> to vector<1x2048xf32>
    %cst_20 = arith.constant dense<0.000000e+00> : vector<16x2048xf32>
    %39 = tpu.matmul %31, %7, %cst_20 {dimension_numbers = #tpu.dot_dimension_numbers<[1], [0], [0], [1], [0, 0, 1, 1], [], []>} : vector<16x128xf32>, vector<128x2048xf32>, vector<16x2048xf32> -> vector<16x2048xf32>
    %cst_21 = arith.constant dense<0.000000e+00> : vector<16x2048xf32>
    %40 = tpu.matmul %32, %8, %cst_21 {dimension_numbers = #tpu.dot_dimension_numbers<[1], [0], [0], [1], [0, 0, 1, 1], [], []>} : vector<16x128xf32>, vector<128x2048xf32>, vector<16x2048xf32> -> vector<16x2048xf32>
    %41 = arith.addf %39, %40 : vector<16x2048xf32>
    %42 = vector.broadcast %11 : vector<16x1xf32> to vector<16x2048xf32>
    %43 = vector.broadcast %38 : vector<1x2048xf32> to vector<16x2048xf32>
    %44 = arith.mulf %42, %43 : vector<16x2048xf32>
    %45 = arith.addf %41, %44 : vector<16x2048xf32>
    %cst_22 = arith.constant 0.000000e+00 : f32
    %46 = vector.broadcast %cst_22 : f32 to vector<16x2048xf32>
    %47 = arith.maximumf %45, %46 : vector<16x2048xf32>
    %cst_23 = arith.constant dense<0.000000e+00> : vector<32x2048xf32>
    %48 = tpu.matmul %14, %47, %cst_23 {dimension_numbers = #tpu.dot_dimension_numbers<[1], [0], [0], [1], [0, 0, 1, 1], [], []>} : vector<32x16xf32>, vector<16x2048xf32>, vector<32x2048xf32> -> vector<32x2048xf32>
    %49 = vector.broadcast %15 : vector<32x1xf32> to vector<32x2048xf32>
    %50 = arith.addf %48, %49 : vector<32x2048xf32>
    %cst_24 = arith.constant dense<0.000000e+00> : vector<64x2048xf32>
    %51 = tpu.matmul %17, %50, %cst_24 {dimension_numbers = #tpu.dot_dimension_numbers<[1], [0], [0], [1], [0, 0, 1, 1], [], []>} : vector<64x32xf32>, vector<32x2048xf32>, vector<64x2048xf32> -> vector<64x2048xf32>
    %52 = vector.broadcast %18 : vector<64x1xf32> to vector<64x2048xf32>
    %53 = arith.addf %51, %52 : vector<64x2048xf32>
    %cst_25 = arith.constant 0.000000e+00 : f32
    %54 = vector.broadcast %cst_25 : f32 to vector<64x2048xf32>
    %55 = arith.maximumf %53, %54 : vector<64x2048xf32>
    %cst_26 = arith.constant dense<0.000000e+00> : vector<8x2048xf32>
    %56 = tpu.matmul %20, %55, %cst_26 {dimension_numbers = #tpu.dot_dimension_numbers<[1], [0], [0], [1], [0, 0, 1, 1], [], []>} : vector<8x64xf32>, vector<64x2048xf32>, vector<8x2048xf32> -> vector<8x2048xf32>
    %57 = vector.broadcast %21 : vector<8x1xf32> to vector<8x2048xf32>
    %58 = arith.addf %56, %57 : vector<8x2048xf32>
    %59 = vector.extract_strided_slice %58 {offsets = [0, 0], sizes = [1, 2048], strides = [1, 1]} : vector<8x2048xf32> to vector<1x2048xf32>
    %60 = vector.broadcast %59 : vector<1x2048xf32> to vector<8x2048xf32>
    %61 = arith.mulf %35, %60 : vector<8x2048xf32>
    %cst_27 = arith.constant dense<0.000000e+00> : vector<8x128xf32>
    %62 = tpu.matmul %61, %7, %cst_27 {dimension_numbers = #tpu.dot_dimension_numbers<[1], [1], [0], [0], [0, 0, 1, 0], [], []>} : vector<8x2048xf32>, vector<128x2048xf32>, vector<8x128xf32> -> vector<8x128xf32>
    %63 = arith.addf %4, %62 : vector<8x128xf32>
    %cst_28 = arith.constant dense<0.000000e+00> : vector<32x128xf32>
    %64 = tpu.matmul %50, %7, %cst_28 {dimension_numbers = #tpu.dot_dimension_numbers<[1], [1], [0], [0], [0, 0, 1, 0], [], []>} : vector<32x2048xf32>, vector<128x2048xf32>, vector<32x128xf32> -> vector<32x128xf32>
    %65 = vector.extract_strided_slice %23 {offsets = [0, 0], sizes = [72, 4], strides = [1, 1]} : vector<72x36xf32> to vector<72x4xf32>
    %cst_29 = arith.constant dense<0.000000e+00> : vector<72x128xf32>
    %66 = tpu.matmul %65, %6, %cst_29 {dimension_numbers = #tpu.dot_dimension_numbers<[1], [0], [0], [1], [0, 0, 1, 1], [], []>} : vector<72x4xf32>, vector<4x128xf32>, vector<72x128xf32> -> vector<72x128xf32>
    %67 = vector.extract_strided_slice %23 {offsets = [0, 4], sizes = [72, 32], strides = [1, 1]} : vector<72x36xf32> to vector<72x32xf32>
    %cst_30 = arith.constant dense<0.000000e+00> : vector<72x128xf32>
    %68 = tpu.matmul %67, %64, %cst_30 {dimension_numbers = #tpu.dot_dimension_numbers<[1], [0], [0], [1], [0, 0, 1, 1], [], []>} : vector<72x32xf32>, vector<32x128xf32>, vector<72x128xf32> -> vector<72x128xf32>
    %69 = arith.addf %66, %68 : vector<72x128xf32>
    %70 = vector.broadcast %24 : vector<72x1xf32> to vector<72x128xf32>
    %71 = arith.addf %69, %70 : vector<72x128xf32>
    %cst_31 = arith.constant 0.000000e+00 : f32
    %72 = vector.broadcast %cst_31 : f32 to vector<72x128xf32>
    %73 = arith.maximumf %71, %72 : vector<72x128xf32>
    %cst_32 = arith.constant dense<0.000000e+00> : vector<8x128xf32>
    %74 = tpu.matmul %26, %73, %cst_32 {dimension_numbers = #tpu.dot_dimension_numbers<[1], [0], [0], [1], [0, 0, 1, 1], [], []>} : vector<8x72xf32>, vector<72x128xf32>, vector<8x128xf32> -> vector<8x128xf32>
    %75 = vector.broadcast %27 : vector<8x1xf32> to vector<8x128xf32>
    %76 = arith.addf %74, %75 : vector<8x128xf32>
    %c0_33 = arith.constant 0 : index
    %c0_34 = arith.constant 0 : index
    %c0_35 = arith.constant 0 : index
    %77 = vector.load %arg6[%c0_33, %c0_34, %c0_35] : memref<1x16x128xf32, #tpu.memory_space<vmem>>, vector<1x8x128xf32>
    %78 = vector.shape_cast %77 : vector<1x8x128xf32> to vector<8x128xf32>
    %79 = vector.shape_cast %63 : vector<8x128xf32> to vector<1x8x128xf32>
    tpu.vector_store %arg6[%c0_33, %c0_34, %c0_35], %79 {strides = array<i32>} : memref<1x16x128xf32, #tpu.memory_space<vmem>>, vector<1x8x128xf32>,
    %c0_36 = arith.constant 0 : index
    %c8 = arith.constant 8 : index
    %c0_37 = arith.constant 0 : index
    %80 = vector.load %arg6[%c0_36, %c8, %c0_37] : memref<1x16x128xf32, #tpu.memory_space<vmem>>, vector<1x8x128xf32>
    %81 = vector.shape_cast %80 : vector<1x8x128xf32> to vector<8x128xf32>
    %82 = vector.shape_cast %76 : vector<8x128xf32> to vector<1x8x128xf32>
    tpu.vector_store %arg6[%c0_36, %c8, %c0_37], %82 {strides = array<i32>} : memref<1x16x128xf32, #tpu.memory_space<vmem>>, vector<1x8x128xf32>,
    return
  }
  func.func @transform_0(%arg0: i32) -> (i32, i32, i32) {
    %c0_i32 = arith.constant 0 : i32
    %c0_i32_0 = arith.constant 0 : i32
    %c0_i32_1 = arith.constant 0 : i32
    return %arg0, %c0_i32, %c0_i32_0 : i32, i32, i32
  }
  func.func @transform_1(%arg0: i32) -> (i32, i32, i32) {
    %c0_i32 = arith.constant 0 : i32
    %c0_i32_0 = arith.constant 0 : i32
    %c0_i32_1 = arith.constant 0 : i32
    return %arg0, %c0_i32, %c0_i32_0 : i32, i32, i32
  }
  func.func @transform_5(%arg0: i32) -> (i32, i32, i32) {
    %c0_i32 = arith.constant 0 : i32
    %c0_i32_0 = arith.constant 0 : i32
    %c0_i32_1 = arith.constant 0 : i32
    return %arg0, %c0_i32, %c0_i32_0 : i32, i32, i32
  }
}

</mosaic_0001>

<bundles_post_ra>
// kernel: tpu_custom_call.1
= control target key start
LH: loop header
LB: loop body
LE: loop exit
PB: predicated region body
PF: predicated region fallthrough
CT: control target
= control target key end

     0   :  { %10 = vsyncpa [#allocation7], 0  ;;  %s13134_s0 = inlined_call_operand.hbm [shape: f32[2,8,128], index: 0, kind: input, shape index: {}]   ;;  %s13135_s1 = inlined_call_operand.hbm [shape: f32[2,4,128], index: 1, kind: input, shape index: {}]   ;;  %s13136_s2 = inlined_call_operand.hbm [shape: f32[128,2048], index: 2, kind: input, shape index: {}]   ;;  %s13137_s3 = inlined_call_operand.hbm [shape: f32[128,2048], index: 3, kind: input, shape index: {}]   ;;  %s13138_s4 = inlined_call_operand.hbm [shape: f32[216,128], index: 4, kind: input, shape index: {}]   ;;  %s13139_s5 = inlined_call_operand.hbm [shape: f32[2,16,128], index: 5, kind: output, shape index: {}]  }
   0x1   :  { %12 = vsyncpa [#allocation7 + $0x1], 0 }
   0x2   :  { %13 = vsyncpa [#allocation10], 0 }
   0x3   :  { %15 = vsyncpa [#allocation10 + $0x1], 0 }
   0x4   :  { %16 = vsyncpa [#allocation8], 0 }
   0x5   :  { %18 = vsyncpa [#allocation8 + $0x1], 0  ;;  %s10282_s18 = smov 0   ;;  %s10284_s19 = smov 0  }
   0x6   :  { %s10286_s20 = smov 0   ;;  %s10288_s21 = smov 0  }
   0x7 LB: > { %s10303_s22 = sadd.s32 4294967295, %s10231_s21   ;;  %s7774_s23 = sadd.s32 4294967294, %s10231_s21   ;;  %s10231_s21 = sphi %s10288_s21, %s14210_s21   ;;  %s10227_s20 = sphi %s10286_s20, %s14209_s20   ;;  %s10223_s19 = sphi %s10284_s19, %s14208_s19   ;;  %s10219_s18 = sphi %s10282_s18, %s14207_s18  }
   0x8   : > { %s10307_s24 = sadd.s32 1, %s10231_s21   ;;  %s31_s25 = sadd.s32 1, %s10227_s20 }
   0x9   : > { %s28_s26 = ssub.s32 %s10231_s21, %s10307_s24  ;;  %p38_p0 = scmp.ne.s32.totalorder %s10227_s20, %s10223_s19 }
   0xa   : > { %p29_p1 = scmp.eq.s32.totalorder %s28_s26, 0  ;;  %p39_p2 = scmp.eq.s32.totalorder %s10231_s21, 0 }
   0xb   : > { %p44_p3 = scmp.ne.s32.totalorder %s10223_s19, %s10219_s18  ;;  %p13140_p4 = scmp.eq.s32.totalorder %s10303_s22, 0 }
   0xc   : > { %s10319_s27 = scalar_select %p29_p1, %s10227_s20, %s31_s25  }
   0xd   : > { %p10321_p5 = por %p39_p2, %p38_p0  ;;  %p10327_p6 = por %p13140_p4, %p44_p3 }
   0xe   : > { %p94_p7 = scmp.eq.s32.totalorder %s10303_s22, 1  ;;  %p100_p8 = scmp.eq.s32.totalorder %s7774_s23, 1 }
   0xf   : > { %s13543_s29 = scalar_select %p10327_p6, 1, 0 }
  0x10   : > { %p9945_p10 = scmp.lt.s32.totalorder %s10231_s21, 2  ;;  %p10334_p11 = por %p94_p7, %p38_p0 }
  0x11   : > { %p10338_p12 = por %p100_p8, %p44_p3  ;;  %s10343_s7 = sand.u32 1, %s10227_s20  }
  0x12   : > { %s13544_s30 = scalar_select %p10334_p11, 1, 0 }
  0x13   : > { %s13545_s6 = scalar_select %p10338_p12, 1, 0 }
  0x14   : > { %s7778_s8 = sshll.u32 %s10231_s21, 7  ;;  %s7777_s9 = sshll.u32 %s10343_s7, 3 }
  0x15   : > { %s10350_s12 = scalar_lea.hbm %s13134_s0, %s7778_s8  ;;  %s124_s13 = scalar_lea.vmem [#allocation6], %s7777_s9 }
  0x16   : > { %s131_s14 = sshll.u32 %s124_s13, 4  ;;  %p10354_p13 = pnand %p9945_p10, %p10321_p5  ;;  %s10358_s14 = int_to_ptr.vmem [resolvable:$true] %s131_s14 }
  0x17   : > { %s121_s16 = scalar_lea.sflag [#allocation7], %s10343_s7  ;;  %s10011_s17 = scalar_lea.hbm %s10350_s12, 128 }
  0x18   : > { %p10012_p2 = scmp.ne.s32.totalorder %s10350_s12, %s10011_s17  ;;  %p10013_p3 = pneg %p10354_p13 }
  0x19   : > { %s10016_s26 = scalar_lea.hbm %s13134_s0, 256  ;;  %p10017_p5 = scmp.lt.u32.totalorder %s10350_s12, %s13134_s0 }
  0x1a   : > { %p10014_p7 = pnand %p10013_p3, %p10012_p2  ;;  %p10018_p10 = scmp.lt.u32.totalorder %s10016_s26, %s10011_s17 }
  0x1b   : > { %p10020_p4 = scmp.lt.u32.totalorder %s10011_s17, %s10350_s12 }
  0x1c   : > { %p10015_p8 = pneg %p10014_p7  ;;  %p10019_p9 = por %p10018_p10, %p10017_p5 }
  0x1e   : > { %p10021_p0 = por %p10020_p4, %p10019_p9 }
  0x20   : > { %p10022_p1 = pnand %p10021_p0, %p10015_p8 }
  0x22   : > { %10025 = shalt.err (!%p10022_p1)
}
  0x23   : > { %s10026_s9 = scalar_lea.vmem %s10358_s14, 128  ;;  %s10233_s10 = smov [#allocation6]  }
  0x24   : > { %p10027_p2 = scmp.ne.s32.totalorder %s10358_s14, %s10026_s9  ;;  %s10031_s11 = sshll.u32 %s10233_s10, 4  ;;  %s10032_s11 = int_to_ptr.vmem [resolvable:$false] %s10031_s11 }
  0x25   : > { %s10033_s13 = scalar_lea.vmem %s10032_s11, 256  ;;  %p10034_p11 = scmp.lt.s32.totalorder %s10358_s14, %s10032_s11 }
  0x26   : > { %p10029_p7 = pnand %p10027_p2, %p10013_p3  ;;  %p10035_p5 = scmp.lt.s32.totalorder %s10033_s13, %s10026_s9 }
  0x28   : > { %p10030_p12 = pneg %p10029_p7  ;;  %p10036_p10 = por %p10035_p5, %p10034_p11 }
  0x2a   : > { %p10037_p4 = pnand %p10036_p10, %p10030_p12 }
  0x2c   : > { %10040 = shalt.err (!%p10037_p4)
}
  0x2d   : > { %9937 = dma.hbm_to_vmem [thread:$0]  (!%p10354_p13), %s10350_s12, 128, %s10358_s14, %s121_s16  }
  0x2e   : > { %p13547_p9 = scmp.lt.s32.totalorder %s10231_s21, 3  ;;  %p13548_p0 = scmp.ge.s32.totalorder %s10231_s21, 1 }
  0x2f   : > { %s7779_s23 = sshll.u32 %s10343_s7, 2  ;;  %s7780_s25 = sshll.u32 %s10231_s21, 6 }
  0x30   : > { %p10392_p1 = pnand %p13548_p0, %p13547_p9  ;;  %s10401_s8 = scalar_lea.hbm %s13135_s1, %s7780_s25 }
  0x31   : > { %s142_s9 = scalar_lea.vmem [#allocation9], %s7779_s23  ;;  %s139_s12 = scalar_lea.sflag [#allocation10], %s10343_s7 }
  0x32   : > { %s13549_s17 = scalar_select %p10392_p1, 1, 0 }
  0x33   : > { %s149_s10 = sshll.u32 %s142_s9, 4  ;;  %s10041_s14 = scalar_lea.hbm %s10401_s8, 64  ;;  %s150_s10 = int_to_ptr.vmem [resolvable:$true] %s149_s10 }
  0x34   : > { %p10042_p11 = scmp.ne.s32.totalorder %s10401_s8, %s10041_s14  ;;  %s10046_s13 = scalar_lea.hbm %s13135_s1, 128 }
  0x35   : > { %p10047_p2 = scmp.lt.u32.totalorder %s10401_s8, %s13135_s1  ;;  %p10048_p7 = scmp.lt.u32.totalorder %s10046_s13, %s10041_s14 }
  0x36   : > { %p10044_p12 = pnand %p10042_p11, %p10013_p3  ;;  %p10050_p10 = scmp.lt.u32.totalorder %s10041_s14, %s10401_s8 }
  0x37   : > { %p10049_p5 = por %p10048_p7, %p10047_p2 }
  0x38   : > { %p10045_p8 = pneg %p10044_p12 }
  0x39   : > { %p10051_p4 = por %p10050_p10, %p10049_p5 }
  0x3b   : > { %p10052_p9 = pnand %p10051_p4, %p10045_p8 }
  0x3d   : > { %10055 = shalt.err (!%p10052_p9)
}
  0x3e   : > { %s10056_s7 = scalar_lea.vmem %s150_s10, 64  ;;  %s10234_s23 = smov [#allocation9]  }
  0x3f   : > { %p10057_p0 = scmp.ne.s32.totalorder %s150_s10, %s10056_s7  ;;  %s10061_s28 = sshll.u32 %s10234_s23, 4  ;;  %s10062_s28 = int_to_ptr.vmem [resolvable:$false] %s10061_s28 }
  0x40   : > { %s10063_s9 = scalar_lea.vmem %s10062_s28, 128  ;;  %p10064_p6 = scmp.lt.s32.totalorder %s150_s10, %s10062_s28 }
  0x41   : > { %p10059_p11 = pnand %p10057_p0, %p10013_p3  ;;  %p10065_p1 = scmp.lt.s32.totalorder %s10063_s9, %s10056_s7 }
  0x43   : > { %p10060_p12 = pneg %p10059_p11  ;;  %p10066_p2 = por %p10065_p1, %p10064_p6 }
  0x45   : > { %p10067_p7 = pnand %p10066_p2, %p10060_p12 }
  0x47   : > { %10070 = shalt.err (!%p10067_p7)
}
  0x48   : > { %9940 = dma.hbm_to_vmem [thread:$0]  (!%p10354_p13), %s10401_s8, 64, %s150_s10, %s139_s12  }
  0x49   : > { %p13550_p8 = scmp.ne.s32.totalorder %s13549_s17, 0 }
  0x4b   : > { %158 = sbr.rel (%p13550_p8) target bundleno = 2843 (0xb1b), region = 28 }
  0x52   : > { %s10426_s14 = sand.u32 1, %s10223_s19   ;;  %p13551_p6 = scmp.ne.s32.totalorder %s13543_s29, 0 }
  0x53   : > { %s7782_s16 = sshll.u32 %s10426_s14, 3  ;;  %s161_s11 = scalar_lea.sflag [#allocation7], %s10426_s14 }
  0x54   : > { %s10430_s13 = scalar_lea.vmem [#allocation6], %s7782_s16 }
  0x55   : > { %10194 = dma.done.wait (%p13551_p6), %s161_s11, 128  }
  0x56   : > { %10196 = vsyncadd (%p13551_p6), %s161_s11, 4294967168  ;;  %s7783_s15 = sshll.u32 %s10426_s14, 2  ;;  %s170_s17 = scalar_lea.sflag [#allocation10], %s10426_s14 }
  0x57   : > { %s10438_s8 = scalar_lea.vmem [#allocation9], %s7783_s15 }
  0x58   : > { %10198 = dma.done.wait (%p13551_p6), %s170_s17, 64  }
  0x59   : > { %10200 = vsyncadd (%p13551_p6), %s170_s17, 4294967232  ;;  %s7784_s10 = sshll.u32 %s10426_s14, 4  ;;  %s10235_s12 = smov [#allocation2]  }
  0x5a   : > { %s210_s25 = sshll.u32 %s10235_s12, 4  ;;  %s10236_s26 = smov [#allocation3]   ;;  %s211_s25 = int_to_ptr.vmem [resolvable:$true] %s210_s25 }
  0x5b   : > { %s222_s7 = sshll.u32 %s10236_s26, 4  ;;  %s10071_s9 = scalar_lea.hbm %s13136_s2, 32768  ;;  %s223_s7 = int_to_ptr.vmem [resolvable:$true] %s222_s7 }
  0x5c   : > { %p10072_p13 = scmp.ne.s32.totalorder %s13136_s2, %s10071_s9  ;;  %p13552_p3 = scmp.eq.s32.totalorder %s10303_s22, 0 }
  0x5d   : > { %p10077_p10 = scmp.lt.u32.totalorder %s10071_s9, %s13136_s2 }
  0x5e   : > { %p10073_p1 = pnand %p10072_p13, %p13552_p3 }
  0x60   : > { %p10074_p5 = pneg %p10073_p1 }
  0x62   : > { %p10079_p4 = pnand %p10077_p10, %p10074_p5 }
  0x64   : > { %10082 = shalt.err (!%p10079_p4)  }
  0x65   : > { %s10083_s17 = scalar_lea.vmem %s211_s25, 32768  ;;  %p13553_p0 = pmov %p13552_p3 }
  0x66   : > { %p10084_p9 = scmp.ne.s32.totalorder %s211_s25, %s10083_s17  ;;  %p10090_p2 = scmp.lt.s32.totalorder %s211_s25, %s211_s25 }
  0x67   : > { %p10091_p7 = scmp.lt.s32.totalorder %s10083_s17, %s10083_s17 }
  0x68   : > { %p10085_p11 = pnand %p10084_p9, %p13553_p0 }
  0x69   : > { %p10092_p8 = por %p10091_p7, %p10090_p2 }
  0x6a   : > { %p10086_p12 = pneg %p10085_p11 }
  0x6c   : > { %p10093_p6 = pnand %p10092_p8, %p10086_p12 }
  0x6e   : > { %10096 = shalt.err (!%p10093_p6)  }
  0x6f   : > { %p13554_p13 = pmov %p13553_p0  ;;  %s10097_s9 = scalar_lea.hbm %s13137_s3, 32768 }
  0x70   : > { %p10098_p3 = scmp.ne.s32.totalorder %s13137_s3, %s10097_s9  ;;  %p13555_p1 = pmov %p13553_p0 }
  0x71   : > { %9926 = dma.hbm_to_vmem [thread:$0]  (%p13554_p13), %s13136_s2, 32768, %s211_s25, [#allocation5] }
  0x72   : > { %p10099_p5 = pnand %p10098_p3, %p13555_p1  ;;  %p10103_p4 = scmp.lt.u32.totalorder %s10097_s9, %s13137_s3 }
  0x74   : > { %p10100_p10 = pneg %p10099_p5 }
  0x76   : > { %p10105_p9 = pnand %p10103_p4, %p10100_p10 }
  0x78   : > { %10108 = shalt.err (!%p10105_p9)  }
  0x79   : > { %s10109_s17 = scalar_lea.vmem %s223_s7, 32768  ;;  %p13556_p11 = pmov %p13555_p1 }
  0x7a   : > { %p10110_p0 = scmp.ne.s32.totalorder %s223_s7, %s10109_s17  ;;  %p10116_p7 = scmp.lt.s32.totalorder %s223_s7, %s223_s7 }
  0x7b   : > { %p10117_p8 = scmp.lt.s32.totalorder %s10109_s17, %s10109_s17 }
  0x7c   : > { %p10111_p12 = pnand %p10110_p0, %p13556_p11 }
  0x7d   : > { %p10118_p6 = por %p10117_p8, %p10116_p7 }
  0x7e   : > { %p10112_p2 = pneg %p10111_p12 }
  0x80   : > { %p10119_p13 = pnand %p10118_p6, %p10112_p2 }
  0x82   : > { %10122 = shalt.err (!%p10119_p13)  }
  0x83   : > { %p13557_p3 = pmov %p13555_p1  ;;  %s10237_s26 = smov [#allocation4]  }
  0x84   : > { %s234_s23 = sshll.u32 %s10237_s26, 4  ;;  %s10123_s16 = scalar_lea.hbm %s13138_s4, 3456  ;;  %s235_s23 = int_to_ptr.vmem [resolvable:$true] %s234_s23 }
  0x85   : > { %9927 = dma.hbm_to_vmem [thread:$0]  (%p13557_p3), %s13137_s3, 32768, %s223_s7, [#allocation5 + $0x1] }
  0x86   : > { %p10124_p1 = scmp.ne.s32.totalorder %s13138_s4, %s10123_s16  ;;  %p13558_p5 = pmov %p13557_p3 }
  0x87   : > { %p10129_p9 = scmp.lt.u32.totalorder %s10123_s16, %s13138_s4 }
  0x88   : > { %p10125_p10 = pnand %p10124_p1, %p13558_p5 }
  0x8a   : > { %p10126_p4 = pneg %p10125_p10 }
  0x8c   : > { %p10131_p0 = pnand %p10129_p9, %p10126_p4 }
  0x8e   : > { %10134 = shalt.err (!%p10131_p0)  }
  0x8f   : > { %s10135_s7 = scalar_lea.vmem %s235_s23, 3456  ;;  %p13559_p12 = pmov %p13557_p3 }
  0x90   : > { %p10136_p11 = scmp.ne.s32.totalorder %s235_s23, %s10135_s7  ;;  %p10142_p8 = scmp.lt.s32.totalorder %s235_s23, %s235_s23 }
  0x91   : > { %p10143_p6 = scmp.lt.s32.totalorder %s10135_s7, %s10135_s7 }
  0x92   : > { %p10137_p2 = pnand %p10136_p11, %p13559_p12 }
  0x93   : > { %p10144_p13 = por %p10143_p6, %p10142_p8 }
  0x94   : > { %p10138_p7 = pneg %p10137_p2 }
  0x96   : > { %p10145_p3 = pnand %p10144_p13, %p10138_p7 }
  0x98   : > { %10148 = shalt.err (!%p10145_p3)  }
  0x99   : > { %p13560_p1 = pmov %p13558_p5  ;;  %s10501_s26 = scalar_lea.vmem [#allocation11], %s7784_s10 }
  0x9b   : > { %9928 = dma.hbm_to_vmem [thread:$0]  (%p13560_p1), %s13138_s4, 3456, %s235_s23, [#allocation5 + $0x2] }
  0x9c   : > { %p13561_p5 = pmov %p13560_p1 }
  0x9d   : > { %p13562_p10 = pmov %p13560_p1 }
  0x9e   : > { %10202 = dma.done.wait (%p13561_p5), [#allocation5], 32768 }
  0x9f   : > { %10204 = vsyncadd (%p13562_p10), [#allocation5], 4294934528  ;;  %p13563_p4 = pmov %p13560_p1 }
  0xa0   : > { %p13564_p9 = pmov %p13560_p1 }
  0xa1   : > { %10206 = dma.done.wait (%p13563_p4), [#allocation5 + $0x1], 32768 }
  0xa2   : > { %10208 = vsyncadd (%p13564_p9), [#allocation5 + $0x1], 4294934528  ;;  %p13565_p0 = pmov %p13560_p1 }
  0xa4   : > { %10210 = dma.done.wait (%p13565_p0), [#allocation5 + $0x2], 3456  ;;  %p13566_p11 = pmov %p13565_p0 }
  0xa5   : > { %v13143_v0 = vmov 0.0   ;;  %v10239_v1 = vmov 5   ;;  %vm801_vm0 = vcmask 1043456   ;;  %vm788_vm1 = vcmask 31744   ;;  %v248_v2 = vld [vmem:[%s10438_s8] sm:$0xf] }
  0xa6   : > { %10212 = vsyncadd (%p13566_p11), [#allocation5 + $0x2], 4294963840  ;;  %964 = vmatprep.mubr.f32.mxu0 %v13143_v0  ;;  %9996 = vset.pattern.permute.xlu0 %v10239_v1  ;;  %v10517_v3 = vld [vmem:[#allocation4] sm:$0xff]  ;;  %v10519_v4 = vld [vmem:[#allocation4 + $0x8] sm:$0xff]  ;;  %vm3520_vm2 = vcmask 130048   ;;  %vm4281_vm3 = vcmask 261120  }
  0xa7   : > { %7962 = vmatprep.subr.msk.mxu1 %vm801_vm0, %v248_v2  ;;  %7964 = vmatprep.mubr.msk.f32.mxu1 %vm788_vm1, %v10517_v3  ;;  %v250_v5 = vld [vmem:[#allocation2 + $0x8] sm:$0xff]  ;;  %v249_v10 = vld [vmem:[#allocation2] sm:$0xff]  ;;  %vm5335_vm4 = vcmask 523264   ;;  %s10244_s10 = smov 124   ;;  %vm10246_vm5 = vmmov 0   ;;  %vm7569_vm6 = vcmask 588800  }
  0xa8   : > { %v266_v6 = vld [vmem:[#allocation2 + $0x88] sm:$0xff]  ;;  %7963 = vmatpush3.msk.msra.mxu1 %vm801_vm0, %v248_v2  ;;  %v265_v11 = vld [vmem:[#allocation2 + $0x80] sm:$0xff]  ;;  %891 = vperm.xlu0 %9996, %v10517_v3   ;;  %s7645_s16 = scalar_lea.sflag [#allocation8], %s10426_s14  ;;  %p14204_p2 = scmp.ne.s32.totalorder %s13544_s30, 0 }
  0xa9   : > { %v254_v7 = vld [vmem:[#allocation2 + $0x28] sm:$0xff]  ;;  %v10525_v8 = vpack.c.bf16 %v266_v6, %v250_v5  ;;  %7965 = vmatmul.mubr.msk.f32.vlgmr.msra.gmra.mrb[0].mxu1 %vm788_vm1, %v10519_v4  ;;  %v10532_v13 = vpack.c.bf16 %v265_v11, %v249_v10  ;;  %v253_v14 = vld [vmem:[#allocation2 + $0x20] sm:$0xff] }
  0xaa   : > { %v270_v9 = vld [vmem:[#allocation2 + $0xa8] sm:$0xff]  ;;  %v269_v15 = vld [vmem:[#allocation2 + $0xa0] sm:$0xff] }
  0xab   : > { %13567 = vst [vmem:[#allocation26_spill] sm:$0xff] %v10525_v8  ;;  %v10530_v12 = vpack.c.bf16 %v270_v9, %v254_v7  ;;  %13569 = vst [vmem:[#allocation28_spill] sm:$0xff] %v10532_v13  ;;  %v282_v16 = vld [vmem:[#allocation2 + $0x108] sm:$0xff]  ;;  %8056 = vmatprep.subr.bf16.mxu0 %v10525_v8  ;;  %v10535_v17 = vpack.c.bf16 %v269_v15, %v253_v14  ;;  %v281_v23 = vld [vmem:[#allocation2 + $0x100] sm:$0xff] }
  0xac   : > { %v298_v18 = vld [vmem:[#allocation2 + $0x188] sm:$0xff]  ;;  %8058 = vmatpush1.bf16.msra.mxu0 %v10532_v13  ;;  %v297_v24 = vld [vmem:[#allocation2 + $0x180] sm:$0xff]  ;;  %895 = vperm.xlu0 %9996, %v10519_v4  }
  0xad   : > { %13568 = vst [vmem:[#allocation27_spill] sm:$0xff] %v10530_v12  ;;  %13570 = vst [vmem:[#allocation29_spill] sm:$0xff] %v10535_v17  ;;  %v286_v19 = vld [vmem:[#allocation2 + $0x128] sm:$0xff]  ;;  %8120 = vmatprep.subr.bf16.mxu1 %v10530_v12  ;;  %v10539_v21 = vpack.c.bf16 %v298_v18, %v282_v16  ;;  %v285_v25 = vld [vmem:[#allocation2 + $0x120] sm:$0xff]  ;;  %v10544_v26 = vpack.c.bf16 %v297_v24, %v281_v23 }
  0xae   : > { %v302_v20 = vld [vmem:[#allocation2 + $0x1a8] sm:$0xff]  ;;  %8122 = vmatpush1.bf16.msra.mxu1 %v10535_v17  ;;  %v301_v27 = vld [vmem:[#allocation2 + $0x1a0] sm:$0xff]  ;;  %v488_v17 = vld [vmem:[#allocation2 + $0x778] sm:$0xff] }
  0xaf   : > { %13571 = vst [vmem:[#allocation30_spill] sm:$0xff] %v10539_v21  ;;  %v10541_v22 = vpack.c.bf16 %v302_v20, %v286_v19  ;;  %13573 = vst [vmem:[#allocation32_spill] sm:$0xff] %v10544_v26  ;;  %v314_v28 = vld [vmem:[#allocation2 + $0x208] sm:$0xff]  ;;  %8060 = vmatprep.subr.bf16.mxu0 %v10539_v21  ;;  %v10549_v30 = vpack.c.bf16 %v301_v27, %v285_v25  ;;  %v313_v34 = vld [vmem:[#allocation2 + $0x200] sm:$0xff] }
  0xb0   : > { %v330_v29 = vld [vmem:[#allocation2 + $0x288] sm:$0xff]  ;;  %v329_v36 = vld [vmem:[#allocation2 + $0x280] sm:$0xff]  ;;  %8062 = vmatpush1.bf16.msra.mxu0 %v10544_v26  ;;  %v763_v20 = vld [vmem:[#allocation4 + $0x10] sm:$0xff] }
  0xb1   : > { %13572 = vst [vmem:[#allocation31_spill] sm:$0xff] %v10541_v22  ;;  %8124 = vmatprep.subr.bf16.mxu1 %v10541_v22  ;;  %13574 = vst [vmem:[#allocation33_spill] sm:$0xff] %v10549_v30  ;;  %v10551_v31 = vpack.c.bf16 %v330_v29, %v314_v28  ;;  %v318_v32 = vld [vmem:[#allocation2 + $0x228] sm:$0xff]  ;;  %v317_v37 = vld [vmem:[#allocation2 + $0x220] sm:$0xff]  ;;  %v10556_v39 = vpack.c.bf16 %v329_v36, %v313_v34  ;;  %7967 = vmatprep.mubr.msk.f32.mxu1 %vm788_vm1, %v763_v20 }
  0xb2   : > { %v334_v33 = vld [vmem:[#allocation2 + $0x2a8] sm:$0xff]  ;;  %v333_v38 = vld [vmem:[#allocation2 + $0x2a0] sm:$0xff]  ;;  %8126 = vmatpush1.bf16.msra.mxu1 %v10549_v30  ;;  %v764_v25 = vld [vmem:[#allocation4 + $0x18] sm:$0xff] }
  0xb3   : > { %13575 = vst [vmem:[#allocation34_spill] sm:$0xff] %v10551_v31  ;;  %v10553_v35 = vpack.c.bf16 %v334_v33, %v318_v32  ;;  %13577 = vst [vmem:[#allocation36_spill] sm:$0xff] %v10556_v39  ;;  %v346_v40 = vld [vmem:[#allocation2 + $0x308] sm:$0xff]  ;;  %8064 = vmatprep.subr.bf16.mxu0 %v10551_v31  ;;  %v10560_v43 = vpack.c.bf16 %v333_v38, %v317_v37  ;;  %v345_v46 = vld [vmem:[#allocation2 + $0x300] sm:$0xff]  ;;  %7968 = vmatmul.mubr.msk.f32.gmra.mrb[2].mxu1 %vm788_vm1, %v764_v25 }
  0xb4   : > { %v362_v41 = vld [vmem:[#allocation2 + $0x388] sm:$0xff]  ;;  %v361_v47 = vld [vmem:[#allocation2 + $0x380] sm:$0xff]  ;;  %8066 = vmatpush1.bf16.msra.mxu0 %v10556_v39  ;;  %1106 = vmatprep.mubr.f32.mxu1 %v13143_v0  ;;  %v456_v30 = vld [vmem:[#allocation2 + $0x678] sm:$0xff] }
  0xb5   : > { %13576 = vst [vmem:[#allocation35_spill] sm:$0xff] %v10553_v35  ;;  %v350_v42 = vld [vmem:[#allocation2 + $0x328] sm:$0xff]  ;;  %13578 = vst [vmem:[#allocation37_spill] sm:$0xff] %v10560_v43  ;;  %v10562_v44 = vpack.c.bf16 %v362_v41, %v346_v40  ;;  %8128 = vmatprep.subr.bf16.mxu1 %v10553_v35  ;;  %v349_v49 = vld [vmem:[#allocation2 + $0x320] sm:$0xff]  ;;  %v10568_v55 = vpack.c.bf16 %v361_v47, %v345_v46 }
  0xb6   : > { %v366_v45 = vld [vmem:[#allocation2 + $0x3a8] sm:$0xff]  ;;  %v365_v50 = vld [vmem:[#allocation2 + $0x3a0] sm:$0xff]  ;;  %8130 = vmatpush1.bf16.msra.mxu1 %v10560_v43  ;;  %v424_v43 = vld [vmem:[#allocation2 + $0x578] sm:$0xff] }
  0xb7   : > { %13579 = vst [vmem:[#allocation38_spill] sm:$0xff] %v10562_v44  ;;  %v10565_v48 = vpack.c.bf16 %v366_v45, %v350_v42  ;;  %v378_v51 = vld [vmem:[#allocation2 + $0x408] sm:$0xff]  ;;  %13581 = vst [vmem:[#allocation40_spill] sm:$0xff] %v10568_v55  ;;  %8068 = vmatprep.subr.bf16.mxu0 %v10562_v44  ;;  %v10572_v56 = vpack.c.bf16 %v365_v50, %v349_v49  ;;  %v377_v58 = vld [vmem:[#allocation2 + $0x400] sm:$0xff] }
  0xb8   : > { %v394_v52 = vld [vmem:[#allocation2 + $0x488] sm:$0xff]  ;;  %v393_v59 = vld [vmem:[#allocation2 + $0x480] sm:$0xff]  ;;  %8070 = vmatpush1.bf16.msra.mxu0 %v10568_v55  ;;  %v604_v55 = vld [vmem:[#allocation3 + $0x318] sm:$0xff] }
  0xb9   : > { %13580 = vst [vmem:[#allocation39_spill] sm:$0xff] %v10565_v48  ;;  %v382_v53 = vld [vmem:[#allocation2 + $0x428] sm:$0xff]  ;;  %13582 = vst [vmem:[#allocation41_spill] sm:$0xff] %v10572_v56  ;;  %v10574_v57 = vpack.c.bf16 %v394_v52, %v378_v51  ;;  %v381_v60 = vld [vmem:[#allocation2 + $0x420] sm:$0xff]  ;;  %8132 = vmatprep.subr.bf16.mxu1 %v10565_v48  ;;  %v10580_v6 = vpack.c.bf16 %v393_v59, %v377_v58 }
  0xba   : > { %v398_v54 = vld [vmem:[#allocation2 + $0x4a8] sm:$0xff]  ;;  %v397_v62 = vld [vmem:[#allocation2 + $0x4a0] sm:$0xff]  ;;  %8134 = vmatpush1.bf16.msra.mxu1 %v10572_v56  ;;  %v268_v58 = vld [vmem:[#allocation2 + $0x98] sm:$0xff] }
  0xbb   : > { %13583 = vst [vmem:[#allocation42_spill] sm:$0xff] %v10574_v57  ;;  %v10577_v61 = vpack.c.bf16 %v398_v54, %v382_v53  ;;  %v410_v63 = vld [vmem:[#allocation2 + $0x508] sm:$0xff]  ;;  %13585 = vst [vmem:[#allocation44_spill] sm:$0xff] %v10580_v6  ;;  %v409_v7 = vld [vmem:[#allocation2 + $0x500] sm:$0xff]  ;;  %8072 = vmatprep.subr.bf16.mxu0 %v10574_v57  ;;  %v10584_v9 = vpack.c.bf16 %v397_v62, %v381_v60 }
  0xbc   : > { %v426_v1 = vld [vmem:[#allocation2 + $0x588] sm:$0xff]  ;;  %v425_v11 = vld [vmem:[#allocation2 + $0x580] sm:$0xff]  ;;  %8074 = vmatpush1.bf16.msra.mxu0 %v10580_v6  ;;  %v252_v54 = vld [vmem:[#allocation2 + $0x18] sm:$0xff] }
  0xbd   : > { %13584 = vst [vmem:[#allocation43_spill] sm:$0xff] %v10577_v61  ;;  %v414_v2 = vld [vmem:[#allocation2 + $0x528] sm:$0xff]  ;;  %13586 = vst [vmem:[#allocation45_spill] sm:$0xff] %v10584_v9  ;;  %v10586_v10 = vpack.c.bf16 %v426_v1, %v410_v63  ;;  %v413_v14 = vld [vmem:[#allocation2 + $0x520] sm:$0xff]  ;;  %8136 = vmatprep.subr.bf16.mxu1 %v10577_v61  ;;  %v10593_v27 = vpack.c.bf16 %v425_v11, %v409_v7  ;;  %v10625_v1 = vpack.c.bf16 %v268_v58, %v252_v54 }
  0xbe   : > { %v430_v5 = vld [vmem:[#allocation2 + $0x5a8] sm:$0xff]  ;;  %v429_v15 = vld [vmem:[#allocation2 + $0x5a0] sm:$0xff]  ;;  %8138 = vmatpush1.bf16.msra.mxu1 %v10584_v9  ;;  %v315_v58 = vld [vmem:[#allocation2 + $0x210] sm:$0xff] }
  0xbf   : > { %13587 = vst [vmem:[#allocation46_spill] sm:$0xff] %v10586_v10  ;;  %v10589_v16 = vpack.c.bf16 %v430_v5, %v414_v2  ;;  %v442_v18 = vld [vmem:[#allocation2 + $0x608] sm:$0xff]  ;;  %13589 = vst [vmem:[#allocation48_spill] sm:$0xff] %v10593_v27  ;;  %8076 = vmatprep.subr.bf16.mxu0 %v10586_v10  ;;  %v10598_v28 = vpack.c.bf16 %v429_v15, %v413_v14  ;;  %v441_v32 = vld [vmem:[#allocation2 + $0x600] sm:$0xff] }
  0xc0   : > { %v458_v19 = vld [vmem:[#allocation2 + $0x688] sm:$0xff]  ;;  %v457_v33 = vld [vmem:[#allocation2 + $0x680] sm:$0xff]  ;;  %8078 = vmatpush1.bf16.msra.mxu0 %v10593_v27  ;;  %13599 = vst [vmem:[#allocation58_spill] sm:$0xff] %v10625_v1  ;;  %v251_v2 = vld [vmem:[#allocation2 + $0x10] sm:$0xff] }
  0xc1   : > { %13588 = vst [vmem:[#allocation47_spill] sm:$0xff] %v10589_v16  ;;  %v446_v23 = vld [vmem:[#allocation2 + $0x628] sm:$0xff]  ;;  %13590 = vst [vmem:[#allocation49_spill] sm:$0xff] %v10598_v28  ;;  %v10600_v29 = vpack.c.bf16 %v458_v19, %v442_v18  ;;  %v445_v34 = vld [vmem:[#allocation2 + $0x620] sm:$0xff]  ;;  %8140 = vmatprep.subr.bf16.mxu1 %v10589_v16  ;;  %v10607_v45 = vpack.c.bf16 %v457_v33, %v441_v32 }
  0xc2   : > { %v462_v24 = vld [vmem:[#allocation2 + $0x6a8] sm:$0xff]  ;;  %v461_v37 = vld [vmem:[#allocation2 + $0x6a0] sm:$0xff]  ;;  %8142 = vmatpush1.bf16.msra.mxu1 %v10598_v28  ;;  %v267_v5 = vld [vmem:[#allocation2 + $0x90] sm:$0xff] }
  0xc3   : > { %13591 = vst [vmem:[#allocation50_spill] sm:$0xff] %v10600_v29  ;;  %v10603_v36 = vpack.c.bf16 %v462_v24, %v446_v23  ;;  %v474_v38 = vld [vmem:[#allocation2 + $0x708] sm:$0xff]  ;;  %13593 = vst [vmem:[#allocation52_spill] sm:$0xff] %v10607_v45  ;;  %8080 = vmatprep.subr.bf16.mxu0 %v10600_v29  ;;  %v10611_v46 = vpack.c.bf16 %v461_v37, %v445_v34  ;;  %v473_v49 = vld [vmem:[#allocation2 + $0x700] sm:$0xff]  ;;  %v10634_v24 = vpack.c.bf16 %v267_v5, %v251_v2 }
  0xc4   : > { %v490_v40 = vld [vmem:[#allocation2 + $0x788] sm:$0xff]  ;;  %v489_v50 = vld [vmem:[#allocation2 + $0x780] sm:$0xff]  ;;  %8082 = vmatpush1.bf16.msra.mxu0 %v10607_v45  ;;  %v284_v15 = vld [vmem:[#allocation2 + $0x118] sm:$0xff] }
  0xc5   : > { %13592 = vst [vmem:[#allocation51_spill] sm:$0xff] %v10603_v36  ;;  %v478_v41 = vld [vmem:[#allocation2 + $0x728] sm:$0xff]  ;;  %13594 = vst [vmem:[#allocation53_spill] sm:$0xff] %v10611_v46  ;;  %v10613_v47 = vpack.c.bf16 %v490_v40, %v474_v38  ;;  %v477_v51 = vld [vmem:[#allocation2 + $0x720] sm:$0xff]  ;;  %8144 = vmatprep.subr.bf16.mxu1 %v10603_v36  ;;  %v10619_v62 = vpack.c.bf16 %v489_v50, %v473_v49 }
  0xc6   : > { %v494_v42 = vld [vmem:[#allocation2 + $0x7a8] sm:$0xff]  ;;  %v493_v53 = vld [vmem:[#allocation2 + $0x7a0] sm:$0xff]  ;;  %8146 = vmatpush1.bf16.msra.mxu1 %v10611_v46  ;;  %v300_v18 = vld [vmem:[#allocation2 + $0x198] sm:$0xff]  ;;  %13601 = vst [vmem:[#allocation60_spill] sm:$0xff] %v10634_v24 }
  0xc7   : > { %13595 = vst [vmem:[#allocation54_spill] sm:$0xff] %v10613_v47  ;;  %v10616_v52 = vpack.c.bf16 %v494_v42, %v478_v41  ;;  %v258_v59 = vld [vmem:[#allocation2 + $0x48] sm:$0xff]  ;;  %13597 = vst [vmem:[#allocation56_spill] sm:$0xff] %v10619_v62  ;;  %8084 = vmatprep.subr.bf16.mxu0 %v10613_v47  ;;  %v10623_v63 = vpack.c.bf16 %v493_v53, %v477_v51  ;;  %v257_v7 = vld [vmem:[#allocation2 + $0x40] sm:$0xff]  ;;  %v10640_v32 = vpack.c.bf16 %v300_v18, %v284_v15 }
  0xc8   : > { %v274_v60 = vld [vmem:[#allocation2 + $0xc8] sm:$0xff]  ;;  %v273_v14 = vld [vmem:[#allocation2 + $0xc0] sm:$0xff]  ;;  %8086 = vmatpush1.bf16.msra.mxu0 %v10619_v62  ;;  %v283_v33 = vld [vmem:[#allocation2 + $0x110] sm:$0xff] }
  0xc9   : > { %13596 = vst [vmem:[#allocation55_spill] sm:$0xff] %v10616_v52  ;;  %13598 = vst [vmem:[#allocation57_spill] sm:$0xff] %v10623_v63  ;;  %8148 = vmatprep.subr.bf16.mxu1 %v10616_v52  ;;  %v10628_v11 = vpack.c.bf16 %v274_v60, %v258_v59  ;;  %v290_v19 = vld [vmem:[#allocation2 + $0x148] sm:$0xff]  ;;  %v10632_v23 = vld [vmem:[%s10430_s13] sm:$0xff]  ;;  %8088 = vmatprep.subr.bf16.mxu0 %v10625_v1  ;;  %v10638_v25 = vpack.c.bf16 %v273_v14, %v257_v7 }
  0xca   : > { %v306_v20 = vld [vmem:[#allocation2 + $0x1c8] sm:$0xff]  ;;  %8150 = vmatpush1.bf16.msra.mxu1 %v10623_v63  ;;  %13603 = vst [vmem:[#allocation62_spill] sm:$0xff] %v10640_v32  ;;  %v299_v34 = vld [vmem:[#allocation2 + $0x190] sm:$0xff]  ;;  %v289_v37 = vld [vmem:[#allocation2 + $0x140] sm:$0xff] }
  0xcb   : > { %13600 = vst [vmem:[#allocation59_spill] sm:$0xff] %v10628_v11  ;;  %13602 = vst [vmem:[#allocation61_spill] sm:$0xff] %v10638_v25  ;;  %8184 = vmatprep.subr.bf16.mxu1 %v10628_v11  ;;  %v10643_v38 = vpack.c.bf16 %v306_v20, %v290_v19  ;;  %v305_v40 = vld [vmem:[#allocation2 + $0x1c0] sm:$0xff]  ;;  %v316_v41 = vld [vmem:[#allocation2 + $0x218] sm:$0xff]  ;;  %965 = vmatmul.mubr.f32.vlgmr.msra.gmra.mrb[0].mxu0 %v10632_v23  ;;  %v10648_v51 = vpack.c.bf16 %v299_v34, %v283_v33 }
  0xcc   : > { %v332_v42 = vld [vmem:[#allocation2 + $0x298] sm:$0xff]  ;;  %v322_v49 = vld [vmem:[#allocation2 + $0x248] sm:$0xff]  ;;  %8090 = vmatpush1.bf16.msra.mxu0 %v10634_v24  ;;  %v10652_v53 = vpack.c.bf16 %v305_v40, %v289_v37  ;;  %v331_v59 = vld [vmem:[#allocation2 + $0x290] sm:$0xff]  ;;  %1035 = vmatprep.mubr.f32.mxu0 %v13143_v0 }
  0xcd   : > { %13604 = vst [vmem:[#allocation63_spill] sm:$0xff] %v10643_v38  ;;  %v338_v50 = vld [vmem:[#allocation2 + $0x2c8] sm:$0xff]  ;;  %1107 = vmatmul.mubr.f32.vlgmr.msra.gmra.mrb[4].mxu1 %v10632_v23  ;;  %13605 = vst [vmem:[#allocation64_spill] sm:$0xff] %v10648_v51  ;;  %8092 = vmatprep.subr.bf16.mxu0 %v10640_v32  ;;  %v10654_v54 = vpack.c.bf16 %v332_v42, %v316_v41  ;;  %v321_v60 = vld [vmem:[#allocation2 + $0x240] sm:$0xff]  ;;  %v10662_v19 = vpack.c.bf16 %v331_v59, %v315_v58 }
  0xce   : > { %8186 = vmatpush1.bf16.msra.mxu1 %v10638_v25  ;;  %13606 = vst [vmem:[#allocation65_spill] sm:$0xff] %v10652_v53  ;;  %v10657_v2 = vpack.c.bf16 %v338_v50, %v322_v49  ;;  %v337_v5 = vld [vmem:[#allocation2 + $0x2c0] sm:$0xff]  ;;  %v348_v7 = vld [vmem:[#allocation2 + $0x318] sm:$0xff]  ;;  %1248 = vmatprep.mubr.f32.mxu1 %v13143_v0  ;;  %v354_v15 = vld [vmem:[#allocation2 + $0x348] sm:$0xff] }
  0xcf   : > { %13607 = vst [vmem:[#allocation66_spill] sm:$0xff] %v10654_v54  ;;  %8188 = vmatprep.subr.bf16.mxu1 %v10643_v38  ;;  %v364_v14 = vld [vmem:[#allocation2 + $0x398] sm:$0xff]  ;;  %v370_v18 = vld [vmem:[#allocation2 + $0x3c8] sm:$0xff]  ;;  %13609 = vst [vmem:[#allocation68_spill] sm:$0xff] %v10662_v19  ;;  %v10666_v20 = vpack.c.bf16 %v337_v5, %v321_v60 }
  0xd0   : > { %13608 = vst [vmem:[#allocation67_spill] sm:$0xff] %v10657_v2  ;;  %8094 = vmatpush1.bf16.msra.mxu0 %v10648_v51  ;;  %v10668_v33 = vpack.c.bf16 %v364_v14, %v348_v7  ;;  %v347_v34 = vld [vmem:[#allocation2 + $0x310] sm:$0xff]  ;;  %v353_v40 = vld [vmem:[#allocation2 + $0x340] sm:$0xff]  ;;  %v10671_v41 = vpack.c.bf16 %v370_v18, %v354_v15  ;;  %v380_v49 = vld [vmem:[#allocation2 + $0x418] sm:$0xff] }
  0xd1   : > { %8096 = vmatprep.subr.bf16.mxu0 %v10654_v54  ;;  %13610 = vst [vmem:[#allocation69_spill] sm:$0xff] %v10666_v20  ;;  %v363_v37 = vld [vmem:[#allocation2 + $0x390] sm:$0xff]  ;;  %v369_v42 = vld [vmem:[#allocation2 + $0x3c0] sm:$0xff]  ;;  %v396_v50 = vld [vmem:[#allocation2 + $0x498] sm:$0xff] }
  0xd2   : > { %8190 = vmatpush1.bf16.msra.mxu1 %v10652_v53  ;;  %13611 = vst [vmem:[#allocation70_spill] sm:$0xff] %v10668_v33  ;;  %13612 = vst [vmem:[#allocation71_spill] sm:$0xff] %v10671_v41  ;;  %v386_v58 = vld [vmem:[#allocation2 + $0x448] sm:$0xff]  ;;  %v10674_v0 = vpack.c.bf16 %v363_v37, %v347_v34  ;;  %v10678_v60 = vpack.c.bf16 %v369_v42, %v353_v40  ;;  %v10680_v5 = vpack.c.bf16 %v396_v50, %v380_v49  ;;  %v379_v7 = vld [vmem:[#allocation2 + $0x410] sm:$0xff] }
  0xd3   : > { %8192 = vmatprep.subr.bf16.mxu1 %v10657_v2  ;;  %v402_v59 = vld [vmem:[#allocation2 + $0x4c8] sm:$0xff]  ;;  %v395_v14 = vld [vmem:[#allocation2 + $0x490] sm:$0xff]  ;;  %v385_v15 = vld [vmem:[#allocation2 + $0x440] sm:$0xff] }
  0xd4   : > { %8098 = vmatpush1.bf16.msra.mxu0 %v10662_v19  ;;  %13613 = vst [vmem:[#allocation72_spill] sm:$0xff] %v10674_v0  ;;  %13614 = vst [vmem:[#allocation73_spill] sm:$0xff] %v10678_v60  ;;  %v10683_v18 = vpack.c.bf16 %v402_v59, %v386_v58  ;;  %v401_v2 = vld [vmem:[#allocation2 + $0x4c0] sm:$0xff]  ;;  %v412_v54 = vld [vmem:[#allocation2 + $0x518] sm:$0xff] }
  0xd5   : > { %8100 = vmatprep.subr.bf16.mxu0 %v10668_v33  ;;  %13615 = vst [vmem:[#allocation74_spill] sm:$0xff] %v10680_v5  ;;  %v428_v19 = vld [vmem:[#allocation2 + $0x598] sm:$0xff]  ;;  %v418_v34 = vld [vmem:[#allocation2 + $0x548] sm:$0xff]  ;;  %v10690_v40 = vpack.c.bf16 %v401_v2, %v385_v15  ;;  %v411_v49 = vld [vmem:[#allocation2 + $0x510] sm:$0xff] }
  0xd6   : > { %8194 = vmatpush1.bf16.msra.mxu1 %v10666_v20  ;;  %13616 = vst [vmem:[#allocation75_spill] sm:$0xff] %v10683_v18  ;;  %v434_v37 = vld [vmem:[#allocation2 + $0x5c8] sm:$0xff]  ;;  %v10686_v20 = vpack.c.bf16 %v395_v14, %v379_v7  ;;  %v10692_v42 = vpack.c.bf16 %v428_v19, %v412_v54  ;;  %v427_v50 = vld [vmem:[#allocation2 + $0x590] sm:$0xff]  ;;  %v417_v58 = vld [vmem:[#allocation2 + $0x540] sm:$0xff] }
  0xd7   : > { %8196 = vmatprep.subr.bf16.mxu1 %v10671_v41  ;;  %13618 = vst [vmem:[#allocation77_spill] sm:$0xff] %v10690_v40  ;;  %v10695_v59 = vpack.c.bf16 %v434_v37, %v418_v34  ;;  %v433_v41 = vld [vmem:[#allocation2 + $0x5c0] sm:$0xff]  ;;  %v444_v33 = vld [vmem:[#allocation2 + $0x618] sm:$0xff]  ;;  %v450_v7 = vld [vmem:[#allocation2 + $0x648] sm:$0xff] }
  0xd8   : > { %8102 = vmatpush1.bf16.msra.mxu0 %v10674_v0  ;;  %13617 = vst [vmem:[#allocation76_spill] sm:$0xff] %v10686_v20  ;;  %13619 = vst [vmem:[#allocation78_spill] sm:$0xff] %v10692_v42  ;;  %v460_v0 = vld [vmem:[#allocation2 + $0x698] sm:$0xff]  ;;  %v466_v14 = vld [vmem:[#allocation2 + $0x6c8] sm:$0xff]  ;;  %v10702_v54 = vpack.c.bf16 %v433_v41, %v417_v58 }
  0xd9   : > { %8104 = vmatprep.subr.bf16.mxu0 %v10680_v5  ;;  %13620 = vst [vmem:[#allocation79_spill] sm:$0xff] %v10695_v59  ;;  %v10704_v2 = vpack.c.bf16 %v460_v0, %v444_v33  ;;  %v443_v19 = vld [vmem:[#allocation2 + $0x610] sm:$0xff]  ;;  %v449_v34 = vld [vmem:[#allocation2 + $0x640] sm:$0xff]  ;;  %v10707_v37 = vpack.c.bf16 %v466_v14, %v450_v7  ;;  %v476_v5 = vld [vmem:[#allocation2 + $0x718] sm:$0xff] }
  0xda   : > { %8198 = vmatpush1.bf16.msra.mxu1 %v10678_v60  ;;  %v10698_v60 = vpack.c.bf16 %v427_v50, %v411_v49  ;;  %13622 = vst [vmem:[#allocation81_spill] sm:$0xff] %v10702_v54  ;;  %v459_v15 = vld [vmem:[#allocation2 + $0x690] sm:$0xff]  ;;  %v482_v49 = vld [vmem:[#allocation2 + $0x748] sm:$0xff]  ;;  %v481_v7 = vld [vmem:[#allocation2 + $0x740] sm:$0xff] }
  0xdb   : > { %8200 = vmatprep.subr.bf16.mxu1 %v10683_v18  ;;  %13623 = vst [vmem:[#allocation82_spill] sm:$0xff] %v10704_v2  ;;  %13624 = vst [vmem:[#allocation83_spill] sm:$0xff] %v10707_v37  ;;  %v465_v18 = vld [vmem:[#allocation2 + $0x6c0] sm:$0xff]  ;;  %v498_v50 = vld [vmem:[#allocation2 + $0x7c8] sm:$0xff] }
  0xdc   : > { %8106 = vmatpush1.bf16.msra.mxu0 %v10686_v20  ;;  %13621 = vst [vmem:[#allocation80_spill] sm:$0xff] %v10698_v60  ;;  %v492_v20 = vld [vmem:[#allocation2 + $0x798] sm:$0xff]  ;;  %v10714_v0 = vpack.c.bf16 %v465_v18, %v449_v34  ;;  %v475_v41 = vld [vmem:[#allocation2 + $0x710] sm:$0xff]  ;;  %v10719_v14 = vpack.c.bf16 %v498_v50, %v482_v49  ;;  %v261_v49 = vld [vmem:[#allocation2 + $0x60] sm:$0xff] }
  0xdd   : > { %8108 = vmatprep.subr.bf16.mxu0 %v10692_v42  ;;  %v10716_v33 = vpack.c.bf16 %v492_v20, %v476_v5  ;;  %v491_v58 = vld [vmem:[#allocation2 + $0x790] sm:$0xff]  ;;  %v256_v42 = vld [vmem:[#allocation2 + $0x38] sm:$0xff]  ;;  %v621_v61 = vld [vmem:[#allocation3 + $0x3a0] sm:$0xff] }
  0xde   : > { %8202 = vmatpush1.bf16.msra.mxu1 %v10690_v40  ;;  %v10710_v40 = vpack.c.bf16 %v459_v15, %v443_v19  ;;  %13626 = vst [vmem:[#allocation85_spill] sm:$0xff] %v10714_v0  ;;  %13628 = vst [vmem:[#allocation87_spill] sm:$0xff] %v10719_v14  ;;  %v262_v19 = vld [vmem:[#allocation2 + $0x68] sm:$0xff]  ;;  %v255_v18 = vld [vmem:[#allocation2 + $0x30] sm:$0xff] }
  0xdf   : > { %8204 = vmatprep.subr.bf16.mxu1 %v10695_v59  ;;  %13627 = vst [vmem:[#allocation86_spill] sm:$0xff] %v10716_v33  ;;  %v497_v59 = vld [vmem:[#allocation2 + $0x7c0] sm:$0xff]  ;;  %v278_v15 = vld [vmem:[#allocation2 + $0xe8] sm:$0xff]  ;;  %v271_v34 = vld [vmem:[#allocation2 + $0xb0] sm:$0xff] }
  0xe0   : > { %8110 = vmatpush1.bf16.msra.mxu0 %v10698_v60  ;;  %13625 = vst [vmem:[#allocation84_spill] sm:$0xff] %v10710_v40  ;;  %v272_v60 = vld [vmem:[#allocation2 + $0xb8] sm:$0xff]  ;;  %v10726_v20 = vpack.c.bf16 %v497_v59, %v481_v7  ;;  %v10731_v50 = vpack.c.bf16 %v278_v15, %v262_v19  ;;  %v287_v59 = vld [vmem:[#allocation2 + $0x130] sm:$0xff]  ;;  %v293_v19 = vld [vmem:[#allocation2 + $0x160] sm:$0xff] }
  0xe1   : > { %8112 = vmatprep.subr.bf16.mxu0 %v10704_v2  ;;  %v10728_v5 = vpack.c.bf16 %v272_v60, %v256_v42  ;;  %v288_v2 = vld [vmem:[#allocation2 + $0x138] sm:$0xff]  ;;  %v303_v7 = vld [vmem:[#allocation2 + $0x1b0] sm:$0xff]  ;;  %v561_v29 = vld [vmem:[#allocation3 + $0x1c0] sm:$0xff] }
  0xe2   : > { %8206 = vmatpush1.bf16.msra.mxu1 %v10702_v54  ;;  %v10722_v54 = vpack.c.bf16 %v491_v58, %v475_v41  ;;  %13630 = vst [vmem:[#allocation89_spill] sm:$0xff] %v10726_v20  ;;  %13632 = vst [vmem:[#allocation91_spill] sm:$0xff] %v10731_v50  ;;  %v294_v41 = vld [vmem:[#allocation2 + $0x168] sm:$0xff]  ;;  %v384_v53 = vld [vmem:[#allocation2 + $0x438] sm:$0xff] }
  0xe3   : > { %8208 = vmatprep.subr.bf16.mxu1 %v10707_v37  ;;  %13631 = vst [vmem:[#allocation90_spill] sm:$0xff] %v10728_v5  ;;  %v277_v37 = vld [vmem:[#allocation2 + $0xe0] sm:$0xff]  ;;  %v310_v58 = vld [vmem:[#allocation2 + $0x1e8] sm:$0xff]  ;;  %v388_v51 = vld [vmem:[#allocation2 + $0x458] sm:$0xff] }
  0xe4   : > { %8114 = vmatpush1.bf16.msra.mxu0 %v10710_v40  ;;  %13629 = vst [vmem:[#allocation88_spill] sm:$0xff] %v10722_v54  ;;  %v304_v40 = vld [vmem:[#allocation2 + $0x1b8] sm:$0xff]  ;;  %v10738_v60 = vpack.c.bf16 %v277_v37, %v261_v49  ;;  %v10743_v15 = vpack.c.bf16 %v310_v58, %v294_v41  ;;  %v319_v49 = vld [vmem:[#allocation2 + $0x230] sm:$0xff]  ;;  %v325_v58 = vld [vmem:[#allocation2 + $0x260] sm:$0xff] }
  0xe5   : > { %8116 = vmatprep.subr.bf16.mxu0 %v10716_v33  ;;  %v10740_v42 = vpack.c.bf16 %v304_v40, %v288_v2  ;;  %v320_v33 = vld [vmem:[#allocation2 + $0x238] sm:$0xff]  ;;  %v10748_v40 = vpack.c.bf16 %v303_v7, %v287_v59  ;;  %v335_v41 = vld [vmem:[#allocation2 + $0x2b0] sm:$0xff]  ;;  %v13641_v59 = vmov 0.0   ;;  %v358_v7 = vld [vmem:[#allocation2 + $0x368] sm:$0xff] }
  0xe6   : > { %8210 = vmatpush1.bf16.msra.mxu1 %v10714_v0  ;;  %v10734_v0 = vpack.c.bf16 %v271_v34, %v255_v18  ;;  %13634 = vst [vmem:[#allocation93_spill] sm:$0xff] %v10738_v60  ;;  %13636 = vst [vmem:[#allocation95_spill] sm:$0xff] %v10743_v15  ;;  %v326_v18 = vld [vmem:[#allocation2 + $0x268] sm:$0xff]  ;;  %v420_v32 = vld [vmem:[#allocation2 + $0x558] sm:$0xff] }
  0xe7   : > { %8212 = vmatprep.subr.bf16.mxu1 %v10719_v14  ;;  %13635 = vst [vmem:[#allocation94_spill] sm:$0xff] %v10740_v42  ;;  %v309_v14 = vld [vmem:[#allocation2 + $0x1e0] sm:$0xff]  ;;  %v342_v34 = vld [vmem:[#allocation2 + $0x2e8] sm:$0xff]  ;;  %13637 = vst [vmem:[#allocation96_spill] sm:$0xff] %v10748_v40 }
  0xe8   : > { %8118 = vmatpush1.bf16.msra.mxu0 %v10722_v54  ;;  %13633 = vst [vmem:[#allocation92_spill] sm:$0xff] %v10734_v0  ;;  %v336_v54 = vld [vmem:[#allocation2 + $0x2b8] sm:$0xff]  ;;  %v10752_v2 = vpack.c.bf16 %v309_v14, %v293_v19  ;;  %v351_v19 = vld [vmem:[#allocation2 + $0x330] sm:$0xff]  ;;  %v594_v10 = vld [vmem:[#allocation3 + $0x2c8] sm:$0xff] }
  0xe9   : > { %8152 = vmatprep.subr.bf16.mxu0 %v10728_v5  ;;  %v10754_v37 = vpack.c.bf16 %v336_v54, %v320_v33  ;;  %v341_v5 = vld [vmem:[#allocation2 + $0x2e0] sm:$0xff]  ;;  %v10762_v54 = vpack.c.bf16 %v335_v41, %v319_v49  ;;  %v390_v49 = vld [vmem:[#allocation2 + $0x468] sm:$0xff]  ;;  %v452_v24 = vld [vmem:[#allocation2 + $0x658] sm:$0xff] }
  0xea   : > { %8214 = vmatpush1.bf16.msra.mxu1 %v10726_v20  ;;  %13638 = vst [vmem:[#allocation97_spill] sm:$0xff] %v10752_v2  ;;  %v352_v20 = vld [vmem:[#allocation2 + $0x338] sm:$0xff]  ;;  %v10766_v33 = vpack.c.bf16 %v341_v5, %v325_v58  ;;  %v406_v41 = vld [vmem:[#allocation2 + $0x4e8] sm:$0xff]  ;;  %v383_v5 = vld [vmem:[#allocation2 + $0x430] sm:$0xff] }
  0xeb   : > { %8248 = vmatprep.subr.bf16.mxu1 %v10731_v50  ;;  %1036 = vmatmul.mubr.f32.vlgmr.msra.gmra.mrb[2].mxu0 %v10632_v23  ;;  %13639 = vst [vmem:[#allocation98_spill] sm:$0xff] %v10754_v37  ;;  %v10757_v50 = vpack.c.bf16 %v342_v34, %v326_v18  ;;  %13642 = vst [vmem:[#allocation100_spill] sm:$0xff] %v10762_v54  ;;  %v367_v18 = vld [vmem:[#allocation2 + $0x3b0] sm:$0xff]  ;;  %v357_v34 = vld [vmem:[#allocation2 + $0x360] sm:$0xff] }
  0xec   : > { %8154 = vmatpush1.bf16.msra.mxu0 %v10734_v0  ;;  %v368_v0 = vld [vmem:[#allocation2 + $0x3b8] sm:$0xff]  ;;  %1177 = vmatprep.mubr.f32.mxu0 %v13641_v59  ;;  %13643 = vst [vmem:[#allocation101_spill] sm:$0xff] %v10766_v33  ;;  %v389_v58 = vld [vmem:[#allocation2 + $0x460] sm:$0xff] }
  0xed   : > { %1249 = vmatmul.mubr.f32.vlgmr.msra.gmra.mrb[6].mxu1 %v10632_v23  ;;  %8156 = vmatprep.subr.bf16.mxu0 %v10740_v42  ;;  %13640 = vst [vmem:[#allocation99_spill] sm:$0xff] %v10757_v50  ;;  %v10768_v14 = vpack.c.bf16 %v368_v0, %v352_v20  ;;  %v373_v42 = vld [vmem:[#allocation2 + $0x3e0] sm:$0xff]  ;;  %v484_v1 = vld [vmem:[#allocation2 + $0x758] sm:$0xff] }
  0xee   : > { %8250 = vmatpush1.bf16.msra.mxu1 %v10738_v60  ;;  %1390 = vmatprep.mubr.f32.mxu1 %v13641_v59  ;;  %v374_v60 = vld [vmem:[#allocation2 + $0x3e8] sm:$0xff]  ;;  %v10778_v0 = vpack.c.bf16 %v373_v42, %v357_v34  ;;  %v431_v34 = vld [vmem:[#allocation2 + $0x5b0] sm:$0xff]  ;;  %v264_v52 = vld [vmem:[#allocation2 + $0x78] sm:$0xff] }
  0xef   : > { %8252 = vmatprep.subr.bf16.mxu1 %v10743_v15  ;;  %13644 = vst [vmem:[#allocation102_spill] sm:$0xff] %v10768_v14  ;;  %v10771_v15 = vpack.c.bf16 %v374_v60, %v358_v7  ;;  %v399_v60 = vld [vmem:[#allocation2 + $0x4b0] sm:$0xff]  ;;  %v10783_v7 = vpack.c.bf16 %v406_v41, %v390_v49  ;;  %v421_v49 = vld [vmem:[#allocation2 + $0x560] sm:$0xff]  ;;  %v296_v36 = vld [vmem:[#allocation2 + $0x178] sm:$0xff] }
  0xf0   : > { %8158 = vmatpush1.bf16.msra.mxu0 %v10748_v40  ;;  %v400_v40 = vld [vmem:[#allocation2 + $0x4b8] sm:$0xff]  ;;  %13647 = vst [vmem:[#allocation105_spill] sm:$0xff] %v10778_v0  ;;  %v593_v57 = vld [vmem:[#allocation3 + $0x2c0] sm:$0xff] }
  0xf1   : > { %8160 = vmatprep.subr.bf16.mxu0 %v10754_v37  ;;  %13645 = vst [vmem:[#allocation103_spill] sm:$0xff] %v10771_v15  ;;  %v10780_v20 = vpack.c.bf16 %v400_v40, %v384_v53  ;;  %13649 = vst [vmem:[#allocation107_spill] sm:$0xff] %v10783_v7  ;;  %v416_v37 = vld [vmem:[#allocation2 + $0x538] sm:$0xff]  ;;  %v415_v40 = vld [vmem:[#allocation2 + $0x530] sm:$0xff] }
  0xf2   : > { %8254 = vmatpush1.bf16.msra.mxu1 %v10752_v2  ;;  %v10774_v2 = vpack.c.bf16 %v367_v18, %v351_v19  ;;  %v422_v19 = vld [vmem:[#allocation2 + $0x568] sm:$0xff]  ;;  %v328_v16 = vld [vmem:[#allocation2 + $0x278] sm:$0xff]  ;;  %v625_v31 = vld [vmem:[#allocation3 + $0x3c0] sm:$0xff] }
  0xf3   : > { %8256 = vmatprep.subr.bf16.mxu1 %v10757_v50  ;;  %13648 = vst [vmem:[#allocation106_spill] sm:$0xff] %v10780_v20  ;;  %v405_v50 = vld [vmem:[#allocation2 + $0x4e0] sm:$0xff]  ;;  %v438_v18 = vld [vmem:[#allocation2 + $0x5e8] sm:$0xff]  ;;  %v360_v9 = vld [vmem:[#allocation2 + $0x378] sm:$0xff] }
  0xf4   : > { %8162 = vmatpush1.bf16.msra.mxu0 %v10762_v54  ;;  %13646 = vst [vmem:[#allocation104_spill] sm:$0xff] %v10774_v2  ;;  %v432_v54 = vld [vmem:[#allocation2 + $0x5b8] sm:$0xff]  ;;  %v10790_v53 = vpack.c.bf16 %v405_v50, %v389_v58  ;;  %v10795_v41 = vpack.c.bf16 %v438_v18, %v422_v19  ;;  %v463_v58 = vld [vmem:[#allocation2 + $0x6b0] sm:$0xff]  ;;  %v453_v19 = vld [vmem:[#allocation2 + $0x660] sm:$0xff] }
  0xf5   : > { %8164 = vmatprep.subr.bf16.mxu0 %v10768_v14  ;;  %v10792_v42 = vpack.c.bf16 %v432_v54, %v416_v37  ;;  %v448_v14 = vld [vmem:[#allocation2 + $0x638] sm:$0xff]  ;;  %v447_v54 = vld [vmem:[#allocation2 + $0x630] sm:$0xff]  ;;  %v657_v8 = vld [vmem:[#allocation3 + $0x4c0] sm:$0xff] }
  0xf6   : > { %8258 = vmatpush1.bf16.msra.mxu1 %v10766_v33  ;;  %v10786_v33 = vpack.c.bf16 %v399_v60, %v383_v5  ;;  %13651 = vst [vmem:[#allocation109_spill] sm:$0xff] %v10790_v53  ;;  %13653 = vst [vmem:[#allocation111_spill] sm:$0xff] %v10795_v41  ;;  %v454_v5 = vld [vmem:[#allocation2 + $0x668] sm:$0xff]  ;;  %v392_v56 = vld [vmem:[#allocation2 + $0x478] sm:$0xff] }
  0xf7   : > { %8260 = vmatprep.subr.bf16.mxu1 %v10771_v15  ;;  %13652 = vst [vmem:[#allocation110_spill] sm:$0xff] %v10792_v42  ;;  %v437_v15 = vld [vmem:[#allocation2 + $0x5e0] sm:$0xff]  ;;  %v470_v60 = vld [vmem:[#allocation2 + $0x6e8] sm:$0xff]  ;;  %v508_v62 = vld [vmem:[#allocation3 + $0x18] sm:$0xff] }
  0xf8   : > { %8166 = vmatpush1.bf16.msra.mxu0 %v10774_v2  ;;  %13650 = vst [vmem:[#allocation108_spill] sm:$0xff] %v10786_v33  ;;  %v464_v2 = vld [vmem:[#allocation2 + $0x6b8] sm:$0xff]  ;;  %v10802_v50 = vpack.c.bf16 %v437_v15, %v421_v49  ;;  %v10807_v18 = vpack.c.bf16 %v470_v60, %v454_v5  ;;  %v495_v49 = vld [vmem:[#allocation2 + $0x7b0] sm:$0xff]  ;;  %v485_v5 = vld [vmem:[#allocation2 + $0x760] sm:$0xff] }
  0xf9   : > { %8168 = vmatprep.subr.bf16.mxu0 %v10780_v20  ;;  %v10804_v37 = vpack.c.bf16 %v464_v2, %v448_v14  ;;  %v480_v20 = vld [vmem:[#allocation2 + $0x738] sm:$0xff]  ;;  %v479_v14 = vld [vmem:[#allocation2 + $0x730] sm:$0xff] }
  0xfa   : > { %8262 = vmatpush1.bf16.msra.mxu1 %v10778_v0  ;;  %v10798_v0 = vpack.c.bf16 %v431_v34, %v415_v40  ;;  %13655 = vst [vmem:[#allocation113_spill] sm:$0xff] %v10802_v50  ;;  %13657 = vst [vmem:[#allocation115_spill] sm:$0xff] %v10807_v18  ;;  %v486_v40 = vld [vmem:[#allocation2 + $0x768] sm:$0xff]  ;;  %v540_v45 = vld [vmem:[#allocation3 + $0x118] sm:$0xff] }
  0xfb   : > { %8264 = vmatprep.subr.bf16.mxu1 %v10783_v7  ;;  %13656 = vst [vmem:[#allocation114_spill] sm:$0xff] %v10804_v37  ;;  %v469_v7 = vld [vmem:[#allocation2 + $0x6e0] sm:$0xff]  ;;  %v502_v34 = vld [vmem:[#allocation2 + $0x7e8] sm:$0xff]  ;;  %v572_v27 = vld [vmem:[#allocation3 + $0x218] sm:$0xff] }
  0xfc   : > { %8170 = vmatpush1.bf16.msra.mxu0 %v10786_v33  ;;  %13654 = vst [vmem:[#allocation112_spill] sm:$0xff] %v10798_v0  ;;  %v496_v33 = vld [vmem:[#allocation2 + $0x7b8] sm:$0xff]  ;;  %v10814_v15 = vpack.c.bf16 %v469_v7, %v453_v19  ;;  %v10819_v60 = vpack.c.bf16 %v502_v34, %v486_v40  ;;  %v259_v7 = vld [vmem:[#allocation2 + $0x50] sm:$0xff]  ;;  %v505_v40 = vld [vmem:[#allocation3] sm:$0xff] }
  0xfd   : > { %8172 = vmatprep.subr.bf16.mxu0 %v10792_v42  ;;  %v10816_v2 = vpack.c.bf16 %v496_v33, %v480_v20  ;;  %v260_v42 = vld [vmem:[#allocation2 + $0x58] sm:$0xff]  ;;  %v275_v19 = vld [vmem:[#allocation2 + $0xd0] sm:$0xff] }
  0xfe   : > { %8266 = vmatpush1.bf16.msra.mxu1 %v10790_v53  ;;  %v10810_v53 = vpack.c.bf16 %v463_v58, %v447_v54  ;;  %13659 = vst [vmem:[#allocation117_spill] sm:$0xff] %v10814_v15  ;;  %13661 = vst [vmem:[#allocation119_spill] sm:$0xff] %v10819_v60  ;;  %v506_v54 = vld [vmem:[#allocation3 + $0x8] sm:$0xff]  ;;  %v620_v44 = vld [vmem:[#allocation3 + $0x398] sm:$0xff] }
  0xff   : > { %8268 = vmatprep.subr.bf16.mxu1 %v10795_v41  ;;  %13660 = vst [vmem:[#allocation118_spill] sm:$0xff] %v10816_v2  ;;  %v501_v41 = vld [vmem:[#allocation2 + $0x7e0] sm:$0xff]  ;;  %v522_v58 = vld [vmem:[#allocation3 + $0x88] sm:$0xff]  ;;  %v636_v26 = vld [vmem:[#allocation3 + $0x418] sm:$0xff] }
 0x100   : > { %8174 = vmatpush1.bf16.msra.mxu0 %v10798_v0  ;;  %13658 = vst [vmem:[#allocation116_spill] sm:$0xff] %v10810_v53  ;;  %v276_v0 = vld [vmem:[#allocation2 + $0xd8] sm:$0xff]  ;;  %v10826_v33 = vpack.c.bf16 %v501_v41, %v485_v5  ;;  %v10831_v34 = vpack.c.bf16 %v522_v58, %v506_v54  ;;  %v291_v41 = vld [vmem:[#allocation2 + $0x150] sm:$0xff]  ;;  %v537_v54 = vld [vmem:[#allocation3 + $0x100] sm:$0xff] }
 0x101   : > { %8176 = vmatprep.subr.bf16.mxu0 %v10804_v37  ;;  %v10828_v20 = vpack.c.bf16 %v276_v0, %v260_v42  ;;  %v292_v37 = vld [vmem:[#allocation2 + $0x158] sm:$0xff]  ;;  %v307_v5 = vld [vmem:[#allocation2 + $0x1d0] sm:$0xff] }
 0x102   : > { %8270 = vmatpush1.bf16.msra.mxu1 %v10802_v50  ;;  %v10822_v50 = vpack.c.bf16 %v495_v49, %v479_v14  ;;  %13663 = vst [vmem:[#allocation121_spill] sm:$0xff] %v10826_v33  ;;  %v538_v14 = vld [vmem:[#allocation3 + $0x108] sm:$0xff]  ;;  %v652_v21 = vld [vmem:[#allocation3 + $0x498] sm:$0xff] }
 0x103   : > { %8272 = vmatprep.subr.bf16.mxu1 %v10807_v18  ;;  %13664 = vst [vmem:[#allocation122_spill] sm:$0xff] %v10828_v20  ;;  %v521_v18 = vld [vmem:[#allocation3 + $0x80] sm:$0xff]  ;;  %v554_v49 = vld [vmem:[#allocation3 + $0x188] sm:$0xff] }
 0x104   : > { %8178 = vmatpush1.bf16.msra.mxu0 %v10810_v53  ;;  %13662 = vst [vmem:[#allocation120_spill] sm:$0xff] %v10822_v50  ;;  %v308_v53 = vld [vmem:[#allocation2 + $0x1d8] sm:$0xff]  ;;  %v10838_v0 = vpack.c.bf16 %v521_v18, %v505_v40  ;;  %v10843_v58 = vpack.c.bf16 %v554_v49, %v538_v14  ;;  %v323_v40 = vld [vmem:[#allocation2 + $0x250] sm:$0xff]  ;;  %v569_v49 = vld [vmem:[#allocation3 + $0x200] sm:$0xff] }
 0x105   : > { %8180 = vmatprep.subr.bf16.mxu0 %v10816_v2  ;;  %v10840_v42 = vpack.c.bf16 %v308_v53, %v292_v37  ;;  %v324_v2 = vld [vmem:[#allocation2 + $0x258] sm:$0xff]  ;;  %v10849_v53 = vpack.c.bf16 %v307_v5, %v291_v41  ;;  %v339_v14 = vld [vmem:[#allocation2 + $0x2d0] sm:$0xff]  ;;  %v602_v41 = vld [vmem:[#allocation3 + $0x308] sm:$0xff] }
 0x106   : > { %8274 = vmatpush1.bf16.msra.mxu1 %v10814_v15  ;;  %v10834_v15 = vpack.c.bf16 %v275_v19, %v259_v7  ;;  %v10240_v7 = vmov 4   ;;  %v570_v19 = vld [vmem:[#allocation3 + $0x208] sm:$0xff] }
 0x107   : > { %8276 = vmatprep.subr.bf16.mxu1 %v10819_v60  ;;  %13666 = vst [vmem:[#allocation124_spill] sm:$0xff] %v10840_v42  ;;  %v553_v60 = vld [vmem:[#allocation3 + $0x180] sm:$0xff]  ;;  %9997 = vset.pattern.permute.xlu1 %v10240_v7  ;;  %13667 = vst [vmem:[#allocation125_spill] sm:$0xff] %v10849_v53  ;;  %v618_v5 = vld [vmem:[#allocation3 + $0x388] sm:$0xff] }
 0x108   : > { %8182 = vmatpush1.bf16.msra.mxu0 %v10822_v50  ;;  %13665 = vst [vmem:[#allocation123_spill] sm:$0xff] %v10834_v15  ;;  %v340_v50 = vld [vmem:[#allocation2 + $0x2d8] sm:$0xff]  ;;  %3397 = vperm.xlu1 %9997, %v10517_v3   ;;  %v10853_v37 = vpack.c.bf16 %v553_v60, %v537_v54  ;;  %v585_v7 = vld [vmem:[#allocation3 + $0x280] sm:$0xff]  ;;  %v371_v54 = vld [vmem:[#allocation2 + $0x3d0] sm:$0xff] }
 0x109   : > { %8216 = vmatprep.subr.bf16.mxu0 %v10828_v20  ;;  %v586_v20 = vld [vmem:[#allocation3 + $0x288] sm:$0xff]  ;;  %v10855_v18 = vpack.c.bf16 %v340_v50, %v324_v2  ;;  %v10864_v50 = vpack.c.bf16 %v339_v14, %v323_v40  ;;  %v10868_v2 = vpack.c.bf16 %v585_v7, %v569_v49  ;;  %v387_v49 = vld [vmem:[#allocation2 + $0x450] sm:$0xff] }
 0x10a   : > { %8278 = vmatpush1.bf16.msra.mxu1 %v10826_v33  ;;  %v10858_v3 = vpack.c.bf16 %v586_v20, %v570_v19  ;;  %v356_v33 = vld [vmem:[#allocation2 + $0x358] sm:$0xff]  ;;  %v355_v20 = vld [vmem:[#allocation2 + $0x350] sm:$0xff]  ;;  %v601_v19 = vld [vmem:[#allocation3 + $0x300] sm:$0xff] }
 0x10b   : > { %8312 = vmatprep.subr.bf16.mxu1 %v10831_v34  ;;  %1178 = vmatmul.mubr.f32.vlgmr.msra.gmra.mrb[4].mxu0 %v10632_v23  ;;  %13668 = vst [vmem:[#allocation126_spill] sm:$0xff] %v10855_v18  ;;  %13669 = vst [vmem:[#allocation127_spill] sm:$0xff] %v10864_v50  ;;  %v634_v40 = vld [vmem:[#allocation3 + $0x408] sm:$0xff]  ;;  %v10876_v38 = vpack.c.bf16 %v371_v54, %v355_v20  ;;  %v403_v7 = vld [vmem:[#allocation2 + $0x4d0] sm:$0xff] }
 0x10c   : > { %8218 = vmatpush1.bf16.msra.mxu0 %v10834_v15  ;;  %v372_v15 = vld [vmem:[#allocation2 + $0x3d8] sm:$0xff]  ;;  %1319 = vmatprep.mubr.f32.mxu0 %v13641_v59  ;;  %v650_v14 = vld [vmem:[#allocation3 + $0x488] sm:$0xff]  ;;  %v10888_v25 = vpack.c.bf16 %v403_v7, %v387_v49 }
 0x10d   : > { %1391 = vmatmul.mubr.f32.vlgmr.msra.gmra.mrb[8].mxu1 %v10632_v23  ;;  %8220 = vmatprep.subr.bf16.mxu0 %v10840_v42  ;;  %v10870_v60 = vpack.c.bf16 %v372_v15, %v356_v33  ;;  %v10873_v42 = vpack.c.bf16 %v618_v5, %v602_v41  ;;  %13671 = vst [vmem:[#allocation129_spill] sm:$0xff] %v10876_v38  ;;  %v633_v41 = vld [vmem:[#allocation3 + $0x400] sm:$0xff]  ;;  %v666_v20 = vld [vmem:[#allocation3 + $0x508] sm:$0xff] }
 0x10e   : > { %8314 = vmatpush1.bf16.msra.mxu1 %v10838_v0  ;;  %1532 = vmatprep.mubr.f32.mxu1 %v13641_v59  ;;  %v10885_v5 = vpack.c.bf16 %v650_v14, %v634_v40  ;;  %v682_v54 = vld [vmem:[#allocation3 + $0x588] sm:$0xff]  ;;  %13673 = vst [vmem:[#allocation131_spill] sm:$0xff] %v10888_v25  ;;  %v665_v40 = vld [vmem:[#allocation3 + $0x500] sm:$0xff] }
 0x10f   : > { %8316 = vmatprep.subr.bf16.mxu1 %v10843_v58  ;;  %3401 = vperm.xlu1 %9997, %v10519_v4   ;;  %13670 = vst [vmem:[#allocation128_spill] sm:$0xff] %v10870_v60  ;;  %v617_v4 = vld [vmem:[#allocation3 + $0x380] sm:$0xff]  ;;  %v10897_v14 = vpack.c.bf16 %v682_v54, %v666_v20  ;;  %v698_v49 = vld [vmem:[#allocation3 + $0x608] sm:$0xff] }
 0x110   : > { %8222 = vmatpush1.bf16.msra.mxu0 %v10849_v53  ;;  %v404_v53 = vld [vmem:[#allocation2 + $0x4d8] sm:$0xff]  ;;  %v10880_v15 = vpack.c.bf16 %v617_v4, %v601_v19  ;;  %v419_v19 = vld [vmem:[#allocation2 + $0x550] sm:$0xff]  ;;  %v714_v7 = vld [vmem:[#allocation3 + $0x688] sm:$0xff] }
 0x111   : > { %8224 = vmatprep.subr.bf16.mxu0 %v10855_v18  ;;  %v10882_v33 = vpack.c.bf16 %v404_v53, %v388_v51  ;;  %v649_v18 = vld [vmem:[#allocation3 + $0x480] sm:$0xff]  ;;  %v435_v4 = vld [vmem:[#allocation2 + $0x5d0] sm:$0xff]  ;;  %v10909_v54 = vpack.c.bf16 %v714_v7, %v698_v49 }
 0x112   : > { %8318 = vmatpush1.bf16.msra.mxu1 %v10853_v37  ;;  %v10892_v51 = vpack.c.bf16 %v649_v18, %v633_v41  ;;  %v10900_v11 = vpack.c.bf16 %v435_v4, %v419_v19  ;;  %v467_v41 = vld [vmem:[#allocation2 + $0x6d0] sm:$0xff]  ;;  %v697_v20 = vld [vmem:[#allocation3 + $0x600] sm:$0xff]  ;;  %v730_v19 = vld [vmem:[#allocation3 + $0x708] sm:$0xff] }
 0x113   : > { %8320 = vmatprep.subr.bf16.mxu1 %v10858_v3  ;;  %13672 = vst [vmem:[#allocation130_spill] sm:$0xff] %v10882_v33  ;;  %v746_v4 = vld [vmem:[#allocation3 + $0x788] sm:$0xff]  ;;  %v729_v49 = vld [vmem:[#allocation3 + $0x700] sm:$0xff] }
 0x114   : > { %8226 = vmatpush1.bf16.msra.mxu0 %v10864_v50  ;;  %v436_v50 = vld [vmem:[#allocation2 + $0x5d8] sm:$0xff]  ;;  %13675 = vst [vmem:[#allocation133_spill] sm:$0xff] %v10900_v11  ;;  %v10921_v7 = vpack.c.bf16 %v746_v4, %v730_v19  ;;  %v509_v19 = vld [vmem:[#allocation3 + $0x20] sm:$0xff] }
 0x115   : > { %8228 = vmatprep.subr.bf16.mxu0 %v10870_v60  ;;  %v10894_v53 = vpack.c.bf16 %v436_v50, %v420_v32  ;;  %v681_v60 = vld [vmem:[#allocation3 + $0x580] sm:$0xff]  ;;  %v451_v50 = vld [vmem:[#allocation2 + $0x650] sm:$0xff] }
 0x116   : > { %8322 = vmatpush1.bf16.msra.mxu1 %v10868_v2  ;;  %v10904_v32 = vpack.c.bf16 %v681_v60, %v665_v40  ;;  %v10912_v63 = vpack.c.bf16 %v467_v41, %v451_v50  ;;  %v483_v60 = vld [vmem:[#allocation2 + $0x750] sm:$0xff]  ;;  %v510_v50 = vld [vmem:[#allocation3 + $0x28] sm:$0xff] }
 0x117   : > { %8324 = vmatprep.subr.bf16.mxu1 %v10873_v42  ;;  %13674 = vst [vmem:[#allocation132_spill] sm:$0xff] %v10894_v53  ;;  %v499_v40 = vld [vmem:[#allocation2 + $0x7d0] sm:$0xff]  ;;  %v526_v41 = vld [vmem:[#allocation3 + $0xa8] sm:$0xff] }
 0x118   : > { %8230 = vmatpush1.bf16.msra.mxu0 %v10876_v38  ;;  %v468_v38 = vld [vmem:[#allocation2 + $0x6d8] sm:$0xff]  ;;  %13677 = vst [vmem:[#allocation135_spill] sm:$0xff] %v10912_v63  ;;  %v10924_v46 = vpack.c.bf16 %v499_v40, %v483_v60  ;;  %v10933_v4 = vpack.c.bf16 %v526_v41, %v510_v50  ;;  %v542_v60 = vld [vmem:[#allocation3 + $0x128] sm:$0xff]  ;;  %v541_v50 = vld [vmem:[#allocation3 + $0x120] sm:$0xff] }
 0x119   : > { %8232 = vmatprep.subr.bf16.mxu0 %v10882_v33  ;;  %v10906_v18 = vpack.c.bf16 %v468_v38, %v452_v24  ;;  %v713_v33 = vld [vmem:[#allocation3 + $0x680] sm:$0xff]  ;;  %v558_v40 = vld [vmem:[#allocation3 + $0x1a8] sm:$0xff] }
 0x11a   : > { %8326 = vmatpush1.bf16.msra.mxu1 %v10880_v15  ;;  %v10916_v24 = vpack.c.bf16 %v713_v33, %v697_v20  ;;  %13679 = vst [vmem:[#allocation137_spill] sm:$0xff] %v10924_v46  ;;  %v263_v33 = vld [vmem:[#allocation2 + $0x70] sm:$0xff]  ;;  %v10945_v41 = vpack.c.bf16 %v558_v40, %v542_v60  ;;  %v573_v40 = vld [vmem:[#allocation3 + $0x220] sm:$0xff] }
 0x11b   : > { %8328 = vmatprep.subr.bf16.mxu1 %v10885_v5  ;;  %13676 = vst [vmem:[#allocation134_spill] sm:$0xff] %v10906_v18  ;;  %v279_v20 = vld [vmem:[#allocation2 + $0xf0] sm:$0xff] }
 0x11c   : > { %8234 = vmatpush1.bf16.msra.mxu0 %v10888_v25  ;;  %v500_v25 = vld [vmem:[#allocation2 + $0x7d8] sm:$0xff]  ;;  %v10936_v28 = vpack.c.bf16 %v279_v20, %v263_v33  ;;  %v574_v33 = vld [vmem:[#allocation3 + $0x228] sm:$0xff]  ;;  %v343_v60 = vld [vmem:[#allocation2 + $0x2f0] sm:$0xff] }
 0x11d   : > { %8236 = vmatprep.subr.bf16.mxu0 %v10894_v53  ;;  %v10918_v38 = vpack.c.bf16 %v500_v25, %v484_v1  ;;  %v745_v53 = vld [vmem:[#allocation3 + $0x780] sm:$0xff]  ;;  %v590_v20 = vld [vmem:[#allocation3 + $0x2a8] sm:$0xff] }
 0x11e   : > { %8330 = vmatpush1.bf16.msra.mxu1 %v10892_v51  ;;  %v10928_v1 = vpack.c.bf16 %v745_v53, %v729_v49  ;;  %13681 = vst [vmem:[#allocation139_spill] sm:$0xff] %v10936_v28  ;;  %v295_v53 = vld [vmem:[#allocation2 + $0x170] sm:$0xff] }
 0x11f   : > { %8332 = vmatprep.subr.bf16.mxu1 %v10897_v14  ;;  %13678 = vst [vmem:[#allocation136_spill] sm:$0xff] %v10918_v38  ;;  %v311_v49 = vld [vmem:[#allocation2 + $0x1f0] sm:$0xff] }
 0x120   : > { %8238 = vmatpush1.bf16.msra.mxu0 %v10900_v11  ;;  %v280_v11 = vld [vmem:[#allocation2 + $0xf8] sm:$0xff] }
 0x121   : > { %8240 = vmatprep.subr.bf16.mxu0 %v10906_v18  ;;  %v10930_v25 = vpack.c.bf16 %v280_v11, %v264_v52  ;;  %v525_v18 = vld [vmem:[#allocation3 + $0xa0] sm:$0xff] }
 0x122   : > { %8334 = vmatpush1.bf16.msra.mxu1 %v10904_v32  ;;  %v10940_v52 = vpack.c.bf16 %v525_v18, %v509_v19  ;;  %v327_v19 = vld [vmem:[#allocation2 + $0x270] sm:$0xff] }
 0x123   : > { %8336 = vmatprep.subr.bf16.mxu1 %v10909_v54  ;;  %13680 = vst [vmem:[#allocation138_spill] sm:$0xff] %v10930_v25 }
 0x124   : > { %8242 = vmatpush1.bf16.msra.mxu0 %v10912_v63  ;;  %v312_v63 = vld [vmem:[#allocation2 + $0x1f8] sm:$0xff] }
 0x125   : > { %8244 = vmatprep.subr.bf16.mxu0 %v10918_v38  ;;  %v10942_v11 = vpack.c.bf16 %v312_v63, %v296_v36  ;;  %v557_v38 = vld [vmem:[#allocation3 + $0x1a0] sm:$0xff]  ;;  %v10950_v36 = vpack.c.bf16 %v311_v49, %v295_v53  ;;  %v606_v53 = vld [vmem:[#allocation3 + $0x328] sm:$0xff] }
 0x126   : > { %8338 = vmatpush1.bf16.msra.mxu1 %v10916_v24  ;;  %v10954_v63 = vpack.c.bf16 %v557_v38, %v541_v50  ;;  %v622_v49 = vld [vmem:[#allocation3 + $0x3a8] sm:$0xff]  ;;  %v359_v50 = vld [vmem:[#allocation2 + $0x370] sm:$0xff] }
 0x127   : > { %8340 = vmatprep.subr.bf16.mxu1 %v10921_v7  ;;  %13682 = vst [vmem:[#allocation140_spill] sm:$0xff] %v10942_v11  ;;  %13683 = vst [vmem:[#allocation141_spill] sm:$0xff] %v10950_v36 }
 0x128   : > { %8246 = vmatpush1.bf16.msra.mxu0 %v10924_v46  ;;  %v344_v46 = vld [vmem:[#allocation2 + $0x2f8] sm:$0xff] }
 0x129   : > { %8280 = vmatprep.subr.bf16.mxu0 %v10930_v25  ;;  %v10956_v18 = vpack.c.bf16 %v344_v46, %v328_v16  ;;  %v10959_v25 = vpack.c.bf16 %v590_v20, %v574_v33  ;;  %v10964_v16 = vpack.c.bf16 %v343_v60, %v327_v19  ;;  %v375_v33 = vld [vmem:[#allocation2 + $0x3f0] sm:$0xff]  ;;  %v605_v20 = vld [vmem:[#allocation3 + $0x320] sm:$0xff]  ;;  %v638_v19 = vld [vmem:[#allocation3 + $0x428] sm:$0xff] }
 0x12a   : > { %8342 = vmatpush1.bf16.msra.mxu1 %v10928_v1  ;;  %v654_v60 = vld [vmem:[#allocation3 + $0x4a8] sm:$0xff]  ;;  %v10976_v48 = vpack.c.bf16 %v375_v33, %v359_v50 }
 0x12b   : > { %8376 = vmatprep.subr.bf16.mxu1 %v10933_v4  ;;  %1320 = vmatmul.mubr.f32.vlgmr.msra.gmra.mrb[6].mxu0 %v10632_v23  ;;  %13684 = vst [vmem:[#allocation142_spill] sm:$0xff] %v10956_v18  ;;  %13685 = vst [vmem:[#allocation143_spill] sm:$0xff] %v10964_v16  ;;  %v670_v50 = vld [vmem:[#allocation3 + $0x528] sm:$0xff] }
 0x12c   : > { %8282 = vmatpush1.bf16.msra.mxu0 %v10936_v28  ;;  %v376_v28 = vld [vmem:[#allocation2 + $0x3f8] sm:$0xff]  ;;  %1461 = vmatprep.mubr.f32.mxu0 %v13641_v59  ;;  %13687 = vst [vmem:[#allocation145_spill] sm:$0xff] %v10976_v48  ;;  %v686_v33 = vld [vmem:[#allocation3 + $0x5a8] sm:$0xff] }
 0x12d   : > { %1533 = vmatmul.mubr.f32.vlgmr.msra.gmra.mrb[10].mxu1 %v10632_v23  ;;  %8284 = vmatprep.subr.bf16.mxu0 %v10942_v11  ;;  %v589_v23 = vld [vmem:[#allocation3 + $0x2a0] sm:$0xff]  ;;  %v10970_v38 = vpack.c.bf16 %v376_v28, %v360_v9  ;;  %v10973_v11 = vpack.c.bf16 %v622_v49, %v606_v53  ;;  %v10980_v9 = vpack.c.bf16 %v621_v61, %v605_v20  ;;  %v439_v20 = vld [vmem:[#allocation2 + $0x5f0] sm:$0xff] }
 0x12e   : > { %8378 = vmatpush1.bf16.msra.mxu1 %v10940_v52  ;;  %1674 = vmatprep.mubr.f32.mxu1 %v13641_v59  ;;  %v10968_v46 = vpack.c.bf16 %v589_v23, %v573_v40  ;;  %v391_v40 = vld [vmem:[#allocation2 + $0x470] sm:$0xff]  ;;  %v637_v53 = vld [vmem:[#allocation3 + $0x420] sm:$0xff]  ;;  %v10985_v49 = vpack.c.bf16 %v654_v60, %v638_v19  ;;  %v10997_v60 = vpack.c.bf16 %v686_v33, %v670_v50 }
 0x12f   : > { %8380 = vmatprep.subr.bf16.mxu1 %v10945_v41  ;;  %13686 = vst [vmem:[#allocation144_spill] sm:$0xff] %v10970_v38  ;;  %v407_v23 = vld [vmem:[#allocation2 + $0x4f0] sm:$0xff]  ;;  %v669_v19 = vld [vmem:[#allocation3 + $0x520] sm:$0xff] }
 0x130   : > { %8286 = vmatpush1.bf16.msra.mxu0 %v10950_v36  ;;  %v408_v36 = vld [vmem:[#allocation2 + $0x4f8] sm:$0xff]  ;;  %v10988_v35 = vpack.c.bf16 %v407_v23, %v391_v40  ;;  %v702_v40 = vld [vmem:[#allocation3 + $0x628] sm:$0xff]  ;;  %v701_v50 = vld [vmem:[#allocation3 + $0x620] sm:$0xff] }
 0x131   : > { %8288 = vmatprep.subr.bf16.mxu0 %v10956_v18  ;;  %v10982_v28 = vpack.c.bf16 %v408_v36, %v392_v56  ;;  %v653_v18 = vld [vmem:[#allocation3 + $0x4a0] sm:$0xff]  ;;  %v423_v36 = vld [vmem:[#allocation2 + $0x570] sm:$0xff]  ;;  %v718_v23 = vld [vmem:[#allocation3 + $0x6a8] sm:$0xff] }
 0x132   : > { %8382 = vmatpush1.bf16.msra.mxu1 %v10954_v63  ;;  %13689 = vst [vmem:[#allocation147_spill] sm:$0xff] %v10988_v35  ;;  %v10992_v56 = vpack.c.bf16 %v653_v18, %v637_v53  ;;  %v11000_v22 = vpack.c.bf16 %v439_v20, %v423_v36  ;;  %v471_v53 = vld [vmem:[#allocation2 + $0x6f0] sm:$0xff]  ;;  %v11009_v33 = vpack.c.bf16 %v718_v23, %v702_v40  ;;  %v734_v36 = vld [vmem:[#allocation3 + $0x728] sm:$0xff]  ;;  %v733_v40 = vld [vmem:[#allocation3 + $0x720] sm:$0xff] }
 0x133   : > { %8384 = vmatprep.subr.bf16.mxu1 %v10959_v25  ;;  %13688 = vst [vmem:[#allocation146_spill] sm:$0xff] %v10982_v28  ;;  %v750_v20 = vld [vmem:[#allocation3 + $0x7a8] sm:$0xff] }
 0x134   : > { %8290 = vmatpush1.bf16.msra.mxu0 %v10964_v16  ;;  %v440_v16 = vld [vmem:[#allocation2 + $0x5f8] sm:$0xff]  ;;  %13691 = vst [vmem:[#allocation149_spill] sm:$0xff] %v11000_v22  ;;  %v11021_v23 = vpack.c.bf16 %v750_v20, %v734_v36  ;;  %v513_v36 = vld [vmem:[#allocation3 + $0x40] sm:$0xff] }
 0x135   : > { %8292 = vmatprep.subr.bf16.mxu0 %v10970_v38  ;;  %v10994_v61 = vpack.c.bf16 %v440_v16, %v424_v43  ;;  %v685_v38 = vld [vmem:[#allocation3 + $0x5a0] sm:$0xff]  ;;  %v455_v16 = vld [vmem:[#allocation2 + $0x670] sm:$0xff] }
 0x136   : > { %8386 = vmatpush1.bf16.msra.mxu1 %v10968_v46  ;;  %v11004_v43 = vpack.c.bf16 %v685_v38, %v669_v19  ;;  %v11012_v12 = vpack.c.bf16 %v471_v53, %v455_v16  ;;  %v487_v38 = vld [vmem:[#allocation2 + $0x770] sm:$0xff]  ;;  %v514_v16 = vld [vmem:[#allocation3 + $0x48] sm:$0xff] }
 0x137   : > { %8388 = vmatprep.subr.bf16.mxu1 %v10973_v11  ;;  %13690 = vst [vmem:[#allocation148_spill] sm:$0xff] %v10994_v61  ;;  %v503_v19 = vld [vmem:[#allocation2 + $0x7f0] sm:$0xff]  ;;  %v530_v53 = vld [vmem:[#allocation3 + $0xc8] sm:$0xff] }
 0x138   : > { %8294 = vmatpush1.bf16.msra.mxu0 %v10976_v48  ;;  %v472_v48 = vld [vmem:[#allocation2 + $0x6f8] sm:$0xff]  ;;  %13693 = vst [vmem:[#allocation151_spill] sm:$0xff] %v11012_v12  ;;  %v11024_v47 = vpack.c.bf16 %v503_v19, %v487_v38  ;;  %v11033_v20 = vpack.c.bf16 %v530_v53, %v514_v16  ;;  %v546_v38 = vld [vmem:[#allocation3 + $0x148] sm:$0xff]  ;;  %v545_v16 = vld [vmem:[#allocation3 + $0x140] sm:$0xff] }
 0x139   : > { %8296 = vmatprep.subr.bf16.mxu0 %v10982_v28  ;;  %v11006_v18 = vpack.c.bf16 %v472_v48, %v456_v30  ;;  %v717_v28 = vld [vmem:[#allocation3 + $0x6a0] sm:$0xff]  ;;  %v562_v19 = vld [vmem:[#allocation3 + $0x1c8] sm:$0xff] }
 0x13a   : > { %8390 = vmatpush1.bf16.msra.mxu1 %v10980_v9  ;;  %v11016_v30 = vpack.c.bf16 %v717_v28, %v701_v50  ;;  %13695 = vst [vmem:[#allocation153_spill] sm:$0xff] %v11024_v47  ;;  %v507_v28 = vld [vmem:[#allocation3 + $0x10] sm:$0xff]  ;;  %v11045_v53 = vpack.c.bf16 %v562_v19, %v546_v38  ;;  %v577_v19 = vld [vmem:[#allocation3 + $0x240] sm:$0xff] }
 0x13b   : > { %8392 = vmatprep.subr.bf16.mxu1 %v10985_v49  ;;  %13692 = vst [vmem:[#allocation150_spill] sm:$0xff] %v11006_v18  ;;  %v523_v50 = vld [vmem:[#allocation3 + $0x90] sm:$0xff] }
 0x13c   : > { %8298 = vmatpush1.bf16.msra.mxu0 %v10988_v35  ;;  %v504_v35 = vld [vmem:[#allocation2 + $0x7f8] sm:$0xff]  ;;  %v587_v38 = vld [vmem:[#allocation3 + $0x290] sm:$0xff] }
 0x13d   : > { %8300 = vmatprep.subr.bf16.mxu0 %v10994_v61  ;;  %v11018_v48 = vpack.c.bf16 %v504_v35, %v488_v17  ;;  %v749_v61 = vld [vmem:[#allocation3 + $0x7a0] sm:$0xff] }
 0x13e   : > { %8394 = vmatpush1.bf16.msra.mxu1 %v10992_v56  ;;  %v11028_v17 = vpack.c.bf16 %v749_v61, %v733_v40  ;;  %v539_v61 = vld [vmem:[#allocation3 + $0x110] sm:$0xff] }
 0x13f   : > { %8396 = vmatprep.subr.bf16.mxu1 %v10997_v60  ;;  %13694 = vst [vmem:[#allocation152_spill] sm:$0xff] %v11018_v48  ;;  %v555_v40 = vld [vmem:[#allocation3 + $0x190] sm:$0xff] }
 0x140   : > { %8302 = vmatpush1.bf16.msra.mxu0 %v11000_v22  ;;  %v524_v22 = vld [vmem:[#allocation3 + $0x98] sm:$0xff] }
 0x141   : > { %8304 = vmatprep.subr.bf16.mxu0 %v11006_v18  ;;  %v11030_v35 = vpack.c.bf16 %v524_v22, %v508_v62  ;;  %v529_v18 = vld [vmem:[#allocation3 + $0xc0] sm:$0xff] }
 0x142   : > { %8398 = vmatpush1.bf16.msra.mxu1 %v11004_v43  ;;  %v11040_v22 = vpack.c.bf16 %v529_v18, %v513_v36  ;;  %v571_v36 = vld [vmem:[#allocation3 + $0x210] sm:$0xff] }
 0x143   : > { %8400 = vmatprep.subr.bf16.mxu1 %v11009_v33 }
 0x144   : > { %8306 = vmatpush1.bf16.msra.mxu0 %v11012_v12  ;;  %v556_v12 = vld [vmem:[#allocation3 + $0x198] sm:$0xff] }
 0x145   : > { %8308 = vmatprep.subr.bf16.mxu0 %v11018_v48  ;;  %v11036_v48 = vpack.c.bf16 %v523_v50, %v507_v28  ;;  %v11042_v62 = vpack.c.bf16 %v556_v12, %v540_v45  ;;  %v11048_v28 = vld [vmem:[%s10430_s13] sm:$0xff]  ;;  %v578_v50 = vld [vmem:[#allocation3 + $0x248] sm:$0xff]  ;;  %v11053_v12 = vpack.c.bf16 %v555_v40, %v539_v61  ;;  %v11057_v45 = vpack.c.bf16 %v561_v29, %v545_v16  ;;  %v619_v16 = vld [vmem:[#allocation3 + $0x390] sm:$0xff] }
 0x146   : > { %8402 = vmatpush1.bf16.msra.mxu1 %v11016_v30  ;;  %v11062_v6 = vpack.c.bf16 %v594_v10, %v578_v50  ;;  %v610_v61 = vld [vmem:[#allocation3 + $0x348] sm:$0xff]  ;;  %v11071_v29 = vpack.c.bf16 %v593_v57, %v577_v19  ;;  %v11073_v10 = vpack.c.bf16 %v620_v44, %v604_v55  ;;  %v609_v50 = vld [vmem:[#allocation3 + $0x340] sm:$0xff]  ;;  %v11085_v55 = vpack.c.bf16 %v652_v21, %v636_v26  ;;  %v635_v57 = vld [vmem:[#allocation3 + $0x410] sm:$0xff] }
 0x147   : > { %8404 = vmatprep.subr.bf16.mxu1 %v11021_v23  ;;  %v626_v40 = vld [vmem:[#allocation3 + $0x3c8] sm:$0xff]  ;;  %v11083_v44 = vpack.c.bf16 %v625_v31, %v609_v50  ;;  %v651_v19 = vld [vmem:[#allocation3 + $0x490] sm:$0xff] }
 0x148   : > { %8310 = vmatpush1.bf16.msra.mxu0 %v11024_v47  ;;  %v588_v47 = vld [vmem:[#allocation3 + $0x298] sm:$0xff]  ;;  %13696 = vst [vmem:[#allocation154_spill] sm:$0xff] %v11062_v6  ;;  %13698 = vst [vmem:[#allocation156_spill] sm:$0xff] %v11071_v29  ;;  %v11076_v39 = vpack.c.bf16 %v626_v40, %v610_v61  ;;  %v641_v61 = vld [vmem:[#allocation3 + $0x440] sm:$0xff] }
 0x149   : > { %8344 = vmatprep.subr.bf16.mxu0 %v11030_v35  ;;  %v11059_v18 = vpack.c.bf16 %v588_v47, %v572_v27  ;;  %v11067_v27 = vpack.c.bf16 %v587_v38, %v571_v36  ;;  %13699 = vst [vmem:[#allocation157_spill] sm:$0xff] %v11073_v10  ;;  %v603_v47 = vld [vmem:[#allocation3 + $0x310] sm:$0xff]  ;;  %v642_v36 = vld [vmem:[#allocation3 + $0x448] sm:$0xff]  ;;  %13702 = vst [vmem:[#allocation160_spill] sm:$0xff] %v11083_v44  ;;  %v11095_v21 = vpack.c.bf16 %v657_v8, %v641_v61 }
 0x14a   : > { %8406 = vmatpush1.bf16.msra.mxu1 %v11028_v17  ;;  %13700 = vst [vmem:[#allocation158_spill] sm:$0xff] %v11076_v39  ;;  %v658_v38 = vld [vmem:[#allocation3 + $0x4c8] sm:$0xff]  ;;  %v11079_v13 = vpack.c.bf16 %v619_v16, %v603_v47  ;;  %13703 = vst [vmem:[#allocation161_spill] sm:$0xff] %v11085_v55  ;;  %v667_v31 = vld [vmem:[#allocation3 + $0x510] sm:$0xff] }
 0x14b   : > { %8440 = vmatprep.subr.bf16.mxu1 %v11033_v20  ;;  %1462 = vmatmul.mubr.f32.vlgmr.msra.gmra.mrb[8].mxu0 %v11048_v28  ;;  %13697 = vst [vmem:[#allocation155_spill] sm:$0xff] %v11067_v27  ;;  %v11088_v40 = vpack.c.bf16 %v658_v38, %v642_v36  ;;  %v674_v47 = vld [vmem:[#allocation3 + $0x548] sm:$0xff]  ;;  %13706 = vst [vmem:[#allocation164_spill] sm:$0xff] %v11095_v21  ;;  %v683_v50 = vld [vmem:[#allocation3 + $0x590] sm:$0xff] }
 0x14c   : > { %8346 = vmatpush1.bf16.msra.mxu0 %v11036_v48  ;;  %1603 = vmatprep.mubr.f32.mxu0 %v13641_v59  ;;  %13701 = vst [vmem:[#allocation159_spill] sm:$0xff] %v11079_v13  ;;  %v690_v16 = vld [vmem:[#allocation3 + $0x5c8] sm:$0xff]  ;;  %v673_v36 = vld [vmem:[#allocation3 + $0x540] sm:$0xff]  ;;  %v715_v61 = vld [vmem:[#allocation3 + $0x690] sm:$0xff] }
 0x14d   : > { %1675 = vmatmul.mubr.f32.vlgmr.msra.gmra.mrb[12].mxu1 %v11048_v28  ;;  %8348 = vmatprep.subr.bf16.mxu0 %v11042_v62  ;;  %13704 = vst [vmem:[#allocation162_spill] sm:$0xff] %v11088_v40  ;;  %v11100_v38 = vpack.c.bf16 %v690_v16, %v674_v47  ;;  %v705_v47 = vld [vmem:[#allocation3 + $0x640] sm:$0xff] }
 0x14e   : > { %8442 = vmatpush1.bf16.msra.mxu1 %v11040_v22  ;;  %1816 = vmatprep.mubr.f32.mxu1 %v13641_v59 }
 0x14f   : > { %8444 = vmatprep.subr.bf16.mxu1 %v11045_v53  ;;  %13708 = vst [vmem:[#allocation166_spill] sm:$0xff] %v11100_v38 }
 0x150   : > { %8350 = vmatpush1.bf16.msra.mxu0 %v11053_v12 }
 0x151   : > { %8352 = vmatprep.subr.bf16.mxu0 %v11059_v18 }
 0x152   : > { %8446 = vmatpush1.bf16.msra.mxu1 %v11057_v45 }
 0x153   : > { %8448 = vmatprep.subr.bf16.mxu1 %v11062_v6  ;;  %v668_v6 = vld [vmem:[#allocation3 + $0x518] sm:$0xff] }
 0x154   : > { %8354 = vmatpush1.bf16.msra.mxu0 %v11067_v27  ;;  %v684_v27 = vld [vmem:[#allocation3 + $0x598] sm:$0xff] }
 0x155   : > { %8356 = vmatprep.subr.bf16.mxu0 %v11073_v10  ;;  %v11097_v26 = vpack.c.bf16 %v684_v27, %v668_v6  ;;  %v700_v10 = vld [vmem:[#allocation3 + $0x618] sm:$0xff]  ;;  %v699_v27 = vld [vmem:[#allocation3 + $0x610] sm:$0xff] }
 0x156   : > { %8450 = vmatpush1.bf16.msra.mxu1 %v11071_v29  ;;  %v11091_v29 = vpack.c.bf16 %v651_v19, %v635_v57  ;;  %v706_v57 = vld [vmem:[#allocation3 + $0x648] sm:$0xff] }
 0x157   : > { %8452 = vmatprep.subr.bf16.mxu1 %v11076_v39  ;;  %13707 = vst [vmem:[#allocation165_spill] sm:$0xff] %v11097_v26  ;;  %v689_v39 = vld [vmem:[#allocation3 + $0x5c0] sm:$0xff]  ;;  %v722_v19 = vld [vmem:[#allocation3 + $0x6c8] sm:$0xff] }
 0x158   : > { %8358 = vmatpush1.bf16.msra.mxu0 %v11079_v13  ;;  %13705 = vst [vmem:[#allocation163_spill] sm:$0xff] %v11091_v29  ;;  %v716_v13 = vld [vmem:[#allocation3 + $0x698] sm:$0xff]  ;;  %v11107_v8 = vpack.c.bf16 %v689_v39, %v673_v36  ;;  %v11112_v16 = vpack.c.bf16 %v722_v19, %v706_v57  ;;  %v747_v36 = vld [vmem:[#allocation3 + $0x790] sm:$0xff]  ;;  %v737_v57 = vld [vmem:[#allocation3 + $0x740] sm:$0xff] }
 0x159   : > { %8360 = vmatprep.subr.bf16.mxu0 %v11085_v55  ;;  %v11109_v6 = vpack.c.bf16 %v716_v13, %v700_v10  ;;  %v732_v55 = vld [vmem:[#allocation3 + $0x718] sm:$0xff]  ;;  %v731_v10 = vld [vmem:[#allocation3 + $0x710] sm:$0xff] }
 0x15a   : > { %8454 = vmatpush1.bf16.msra.mxu1 %v11083_v44  ;;  %v11103_v44 = vpack.c.bf16 %v683_v50, %v667_v31  ;;  %13710 = vst [vmem:[#allocation168_spill] sm:$0xff] %v11107_v8  ;;  %13712 = vst [vmem:[#allocation170_spill] sm:$0xff] %v11112_v16  ;;  %v738_v31 = vld [vmem:[#allocation3 + $0x748] sm:$0xff] }
 0x15b   : > { %8456 = vmatprep.subr.bf16.mxu1 %v11088_v40  ;;  %13711 = vst [vmem:[#allocation169_spill] sm:$0xff] %v11109_v6  ;;  %v721_v40 = vld [vmem:[#allocation3 + $0x6c0] sm:$0xff]  ;;  %v754_v50 = vld [vmem:[#allocation3 + $0x7c8] sm:$0xff] }
 0x15c   : > { %8362 = vmatpush1.bf16.msra.mxu0 %v11091_v29  ;;  %13709 = vst [vmem:[#allocation167_spill] sm:$0xff] %v11103_v44  ;;  %v748_v29 = vld [vmem:[#allocation3 + $0x798] sm:$0xff]  ;;  %v11119_v13 = vpack.c.bf16 %v721_v40, %v705_v47  ;;  %v11124_v19 = vpack.c.bf16 %v754_v50, %v738_v31  ;;  %v511_v40 = vld [vmem:[#allocation3 + $0x30] sm:$0xff]  ;;  %v517_v31 = vld [vmem:[#allocation3 + $0x60] sm:$0xff] }
 0x15d   : > { %8364 = vmatprep.subr.bf16.mxu0 %v11097_v26  ;;  %v11121_v39 = vpack.c.bf16 %v748_v29, %v732_v55  ;;  %v512_v26 = vld [vmem:[#allocation3 + $0x38] sm:$0xff]  ;;  %v527_v47 = vld [vmem:[#allocation3 + $0xb0] sm:$0xff] }
 0x15e   : > { %8458 = vmatpush1.bf16.msra.mxu1 %v11095_v21  ;;  %v11115_v21 = vpack.c.bf16 %v715_v61, %v699_v27  ;;  %13714 = vst [vmem:[#allocation172_spill] sm:$0xff] %v11119_v13  ;;  %13716 = vst [vmem:[#allocation174_spill] sm:$0xff] %v11124_v19  ;;  %v518_v27 = vld [vmem:[#allocation3 + $0x68] sm:$0xff] }
 0x15f   : > { %8460 = vmatprep.subr.bf16.mxu1 %v11100_v38  ;;  %13715 = vst [vmem:[#allocation173_spill] sm:$0xff] %v11121_v39  ;;  %v753_v38 = vld [vmem:[#allocation3 + $0x7c0] sm:$0xff]  ;;  %v534_v61 = vld [vmem:[#allocation3 + $0xe8] sm:$0xff] }
 0x160   : > { %8366 = vmatpush1.bf16.msra.mxu0 %v11103_v44  ;;  %13713 = vst [vmem:[#allocation171_spill] sm:$0xff] %v11115_v21  ;;  %v528_v44 = vld [vmem:[#allocation3 + $0xb8] sm:$0xff]  ;;  %v11131_v29 = vpack.c.bf16 %v753_v38, %v737_v57  ;;  %v11136_v50 = vpack.c.bf16 %v534_v61, %v518_v27  ;;  %v543_v38 = vld [vmem:[#allocation3 + $0x130] sm:$0xff]  ;;  %v549_v27 = vld [vmem:[#allocation3 + $0x160] sm:$0xff] }
 0x161   : > { %8368 = vmatprep.subr.bf16.mxu0 %v11109_v6  ;;  %v11133_v55 = vpack.c.bf16 %v528_v44, %v512_v26  ;;  %v544_v6 = vld [vmem:[#allocation3 + $0x138] sm:$0xff]  ;;  %v559_v57 = vld [vmem:[#allocation3 + $0x1b0] sm:$0xff] }
 0x162   : > { %8462 = vmatpush1.bf16.msra.mxu1 %v11107_v8  ;;  %v11127_v8 = vpack.c.bf16 %v747_v36, %v731_v10  ;;  %13718 = vst [vmem:[#allocation176_spill] sm:$0xff] %v11131_v29  ;;  %13720 = vst [vmem:[#allocation178_spill] sm:$0xff] %v11136_v50  ;;  %v550_v10 = vld [vmem:[#allocation3 + $0x168] sm:$0xff] }
 0x163   : > { %8464 = vmatprep.subr.bf16.mxu1 %v11112_v16  ;;  %13719 = vst [vmem:[#allocation177_spill] sm:$0xff] %v11133_v55  ;;  %v533_v16 = vld [vmem:[#allocation3 + $0xe0] sm:$0xff]  ;;  %v566_v36 = vld [vmem:[#allocation3 + $0x1e8] sm:$0xff] }
 0x164   : > { %8370 = vmatpush1.bf16.msra.mxu0 %v11115_v21  ;;  %13717 = vst [vmem:[#allocation175_spill] sm:$0xff] %v11127_v8  ;;  %v560_v21 = vld [vmem:[#allocation3 + $0x1b8] sm:$0xff]  ;;  %v11143_v44 = vpack.c.bf16 %v533_v16, %v517_v31  ;;  %v11148_v61 = vpack.c.bf16 %v566_v36, %v550_v10  ;;  %v575_v31 = vld [vmem:[#allocation3 + $0x230] sm:$0xff]  ;;  %v581_v36 = vld [vmem:[#allocation3 + $0x260] sm:$0xff] }
 0x165   : > { %8372 = vmatprep.subr.bf16.mxu0 %v11121_v39  ;;  %v11145_v26 = vpack.c.bf16 %v560_v21, %v544_v6  ;;  %v576_v39 = vld [vmem:[#allocation3 + $0x238] sm:$0xff]  ;;  %v11153_v21 = vpack.c.bf16 %v559_v57, %v543_v38  ;;  %v591_v10 = vld [vmem:[#allocation3 + $0x2b0] sm:$0xff]  ;;  %v614_v38 = vld [vmem:[#allocation3 + $0x368] sm:$0xff] }
 0x166   : > { %8466 = vmatpush1.bf16.msra.mxu1 %v11119_v13  ;;  %v11139_v13 = vpack.c.bf16 %v527_v47, %v511_v40  ;;  %13722 = vst [vmem:[#allocation180_spill] sm:$0xff] %v11143_v44  ;;  %13724 = vst [vmem:[#allocation182_spill] sm:$0xff] %v11148_v61  ;;  %v582_v40 = vld [vmem:[#allocation3 + $0x268] sm:$0xff] }
 0x167   : > { %8468 = vmatprep.subr.bf16.mxu1 %v11124_v19  ;;  %13723 = vst [vmem:[#allocation181_spill] sm:$0xff] %v11145_v26  ;;  %v565_v19 = vld [vmem:[#allocation3 + $0x1e0] sm:$0xff]  ;;  %v598_v47 = vld [vmem:[#allocation3 + $0x2e8] sm:$0xff]  ;;  %13725 = vst [vmem:[#allocation183_spill] sm:$0xff] %v11153_v21 }
 0x168   : > { %8374 = vmatpush1.bf16.msra.mxu0 %v11127_v8  ;;  %13721 = vst [vmem:[#allocation179_spill] sm:$0xff] %v11139_v13  ;;  %v592_v8 = vld [vmem:[#allocation3 + $0x2b8] sm:$0xff]  ;;  %v11157_v6 = vpack.c.bf16 %v565_v19, %v549_v27  ;;  %v630_v57 = vld [vmem:[#allocation3 + $0x3e8] sm:$0xff]  ;;  %v607_v27 = vld [vmem:[#allocation3 + $0x330] sm:$0xff] }
 0x169   : > { %8408 = vmatprep.subr.bf16.mxu0 %v11133_v55  ;;  %v11159_v16 = vpack.c.bf16 %v592_v8, %v576_v39  ;;  %v597_v55 = vld [vmem:[#allocation3 + $0x2e0] sm:$0xff]  ;;  %v11167_v8 = vpack.c.bf16 %v591_v10, %v575_v31  ;;  %v646_v31 = vld [vmem:[#allocation3 + $0x468] sm:$0xff] }
 0x16a   : > { %8470 = vmatpush1.bf16.msra.mxu1 %v11131_v29  ;;  %13726 = vst [vmem:[#allocation184_spill] sm:$0xff] %v11157_v6  ;;  %v608_v29 = vld [vmem:[#allocation3 + $0x338] sm:$0xff]  ;;  %v11171_v39 = vpack.c.bf16 %v597_v55, %v581_v36  ;;  %v662_v10 = vld [vmem:[#allocation3 + $0x4e8] sm:$0xff]  ;;  %v639_v55 = vld [vmem:[#allocation3 + $0x430] sm:$0xff] }
 0x16b   : > { %8504 = vmatprep.subr.bf16.mxu1 %v11136_v50  ;;  %1604 = vmatmul.mubr.f32.vlgmr.msra.gmra.mrb[10].mxu0 %v11048_v28  ;;  %13727 = vst [vmem:[#allocation185_spill] sm:$0xff] %v11159_v16  ;;  %v11162_v50 = vpack.c.bf16 %v598_v47, %v582_v40  ;;  %13729 = vst [vmem:[#allocation187_spill] sm:$0xff] %v11167_v8  ;;  %v623_v40 = vld [vmem:[#allocation3 + $0x3b0] sm:$0xff]  ;;  %v613_v47 = vld [vmem:[#allocation3 + $0x360] sm:$0xff] }
 0x16c   : > { %8410 = vmatpush1.bf16.msra.mxu0 %v11139_v13  ;;  %v624_v13 = vld [vmem:[#allocation3 + $0x3b8] sm:$0xff]  ;;  %1745 = vmatprep.mubr.f32.mxu0 %v13641_v59  ;;  %13730 = vst [vmem:[#allocation188_spill] sm:$0xff] %v11171_v39  ;;  %v655_v36 = vld [vmem:[#allocation3 + $0x4b0] sm:$0xff] }
 0x16d   : > { %1817 = vmatmul.mubr.f32.vlgmr.msra.gmra.mrb[14].mxu1 %v11048_v28  ;;  %8412 = vmatprep.subr.bf16.mxu0 %v11145_v26  ;;  %13728 = vst [vmem:[#allocation186_spill] sm:$0xff] %v11162_v50  ;;  %v11173_v19 = vpack.c.bf16 %v624_v13, %v608_v29  ;;  %v629_v26 = vld [vmem:[#allocation3 + $0x3e0] sm:$0xff] }
 0x16e   : > { %8506 = vmatpush1.bf16.msra.mxu1 %v11143_v44  ;;  %1958 = vmatprep.mubr.f32.mxu1 %v13641_v59  ;;  %v640_v44 = vld [vmem:[#allocation3 + $0x438] sm:$0xff]  ;;  %v11183_v13 = vpack.c.bf16 %v629_v26, %v613_v47  ;;  %v687_v47 = vld [vmem:[#allocation3 + $0x5b0] sm:$0xff] }
 0x16f   : > { %8508 = vmatprep.subr.bf16.mxu1 %v11148_v61  ;;  %13731 = vst [vmem:[#allocation189_spill] sm:$0xff] %v11173_v19  ;;  %v11176_v61 = vpack.c.bf16 %v630_v57, %v614_v38  ;;  %v645_v38 = vld [vmem:[#allocation3 + $0x460] sm:$0xff]  ;;  %v11188_v57 = vpack.c.bf16 %v662_v10, %v646_v31 }
 0x170   : > { %8414 = vmatpush1.bf16.msra.mxu0 %v11153_v21  ;;  %v656_v21 = vld [vmem:[#allocation3 + $0x4b8] sm:$0xff]  ;;  %13734 = vst [vmem:[#allocation192_spill] sm:$0xff] %v11183_v13  ;;  %v677_v31 = vld [vmem:[#allocation3 + $0x560] sm:$0xff] }
 0x171   : > { %8416 = vmatprep.subr.bf16.mxu0 %v11159_v16  ;;  %13732 = vst [vmem:[#allocation190_spill] sm:$0xff] %v11176_v61  ;;  %v11185_v29 = vpack.c.bf16 %v656_v21, %v640_v44  ;;  %13736 = vst [vmem:[#allocation194_spill] sm:$0xff] %v11188_v57  ;;  %v672_v16 = vld [vmem:[#allocation3 + $0x538] sm:$0xff]  ;;  %v671_v21 = vld [vmem:[#allocation3 + $0x530] sm:$0xff] }
 0x172   : > { %8510 = vmatpush1.bf16.msra.mxu1 %v11157_v6  ;;  %v11179_v6 = vpack.c.bf16 %v623_v40, %v607_v27  ;;  %v678_v27 = vld [vmem:[#allocation3 + $0x568] sm:$0xff] }
 0x173   : > { %8512 = vmatprep.subr.bf16.mxu1 %v11162_v50  ;;  %13735 = vst [vmem:[#allocation193_spill] sm:$0xff] %v11185_v29  ;;  %v661_v50 = vld [vmem:[#allocation3 + $0x4e0] sm:$0xff]  ;;  %v694_v40 = vld [vmem:[#allocation3 + $0x5e8] sm:$0xff] }
 0x174   : > { %8418 = vmatpush1.bf16.msra.mxu0 %v11167_v8  ;;  %13733 = vst [vmem:[#allocation191_spill] sm:$0xff] %v11179_v6  ;;  %v688_v8 = vld [vmem:[#allocation3 + $0x5b8] sm:$0xff]  ;;  %v11195_v44 = vpack.c.bf16 %v661_v50, %v645_v38  ;;  %v11200_v10 = vpack.c.bf16 %v694_v40, %v678_v27  ;;  %v703_v38 = vld [vmem:[#allocation3 + $0x630] sm:$0xff]  ;;  %v709_v40 = vld [vmem:[#allocation3 + $0x660] sm:$0xff] }
 0x175   : > { %8420 = vmatprep.subr.bf16.mxu0 %v11173_v19  ;;  %v11197_v26 = vpack.c.bf16 %v688_v8, %v672_v16  ;;  %v704_v19 = vld [vmem:[#allocation3 + $0x638] sm:$0xff]  ;;  %v719_v27 = vld [vmem:[#allocation3 + $0x6b0] sm:$0xff] }
 0x176   : > { %8514 = vmatpush1.bf16.msra.mxu1 %v11171_v39  ;;  %v11191_v39 = vpack.c.bf16 %v655_v36, %v639_v55  ;;  %13738 = vst [vmem:[#allocation196_spill] sm:$0xff] %v11195_v44  ;;  %13740 = vst [vmem:[#allocation198_spill] sm:$0xff] %v11200_v10  ;;  %v710_v55 = vld [vmem:[#allocation3 + $0x668] sm:$0xff] }
 0x177   : > { %8516 = vmatprep.subr.bf16.mxu1 %v11176_v61  ;;  %13739 = vst [vmem:[#allocation197_spill] sm:$0xff] %v11197_v26  ;;  %v693_v61 = vld [vmem:[#allocation3 + $0x5e0] sm:$0xff]  ;;  %v726_v36 = vld [vmem:[#allocation3 + $0x6e8] sm:$0xff] }
 0x178   : > { %8422 = vmatpush1.bf16.msra.mxu0 %v11179_v6  ;;  %13737 = vst [vmem:[#allocation195_spill] sm:$0xff] %v11191_v39  ;;  %v720_v6 = vld [vmem:[#allocation3 + $0x6b8] sm:$0xff]  ;;  %v11209_v16 = vpack.c.bf16 %v693_v61, %v677_v31  ;;  %v11219_v61 = vpack.c.bf16 %v719_v27, %v703_v38  ;;  %v735_v31 = vld [vmem:[#allocation3 + $0x730] sm:$0xff] }
 0x179   : > { %8424 = vmatprep.subr.bf16.mxu0 %v11185_v29  ;;  %v11211_v8 = vpack.c.bf16 %v720_v6, %v704_v19  ;;  %v742_v29 = vld [vmem:[#allocation3 + $0x768] sm:$0xff] }
 0x17a   : > { %8518 = vmatpush1.bf16.msra.mxu1 %v11183_v13  ;;  %v11203_v13 = vpack.c.bf16 %v687_v47, %v671_v21  ;;  %v725_v21 = vld [vmem:[#allocation3 + $0x6e0] sm:$0xff]  ;;  %v736_v47 = vld [vmem:[#allocation3 + $0x738] sm:$0xff] }
 0x17b   : > { %8520 = vmatprep.subr.bf16.mxu1 %v11188_v57  ;;  %v11223_v6 = vpack.c.bf16 %v725_v21, %v709_v40  ;;  %v515_v40 = vld [vmem:[#allocation3 + $0x50] sm:$0xff] }
 0x17c   : > { %8426 = vmatpush1.bf16.msra.mxu0 %v11191_v39  ;;  %13741 = vst [vmem:[#allocation199_spill] sm:$0xff] %v11203_v13  ;;  %v11206_v50 = vpop.f32.mrb[0].mxu1  ;;  %v11216_v39 = vpack.c.bf16 %v726_v36, %v710_v55  ;;  %v751_v55 = vld [vmem:[#allocation3 + $0x7b0] sm:$0xff]  ;;  %v741_v36 = vld [vmem:[#allocation3 + $0x760] sm:$0xff] }
 0x17d   : > { %13742 = vst [vmem:[#allocation200_spill] sm:$0xff] %v11206_v50  ;;  %8428 = vmatprep.subr.bf16.mxu0 %v11197_v26  ;;  %v11213_v57 = vpop.f32.mrb[1].mxu1  ;;  %v758_v50 = vld [vmem:[#allocation3 + $0x7e8] sm:$0xff]  ;;  %v516_v26 = vld [vmem:[#allocation3 + $0x58] sm:$0xff]  ;;  %v11231_v38 = vpack.c.bf16 %v751_v55, %v735_v31  ;;  %v531_v21 = vld [vmem:[#allocation3 + $0xd0] sm:$0xff] }
 0x17e   : > { %8522 = vmatpush1.bf16.msra.mxu1 %v11195_v44  ;;  %13743 = vst [vmem:[#allocation201_spill] sm:$0xff] %v11213_v57  ;;  %v752_v44 = vld [vmem:[#allocation3 + $0x7b8] sm:$0xff]  ;;  %v11228_v57 = vpack.c.bf16 %v758_v50, %v742_v29  ;;  %v563_v55 = vld [vmem:[#allocation3 + $0x1d0] sm:$0xff] }
 0x17f   : > { %8524 = vmatprep.subr.bf16.mxu1 %v11200_v10  ;;  %v11225_v19 = vpack.c.bf16 %v752_v44, %v736_v47  ;;  %v757_v10 = vld [vmem:[#allocation3 + $0x7e0] sm:$0xff]  ;;  %v548_v29 = vld [vmem:[#allocation3 + $0x158] sm:$0xff]  ;;  %v11241_v47 = vpack.c.bf16 %v531_v21, %v515_v40  ;;  %v579_v21 = vld [vmem:[#allocation3 + $0x250] sm:$0xff] }
 0x180   : > { %8430 = vmatpush1.bf16.msra.mxu0 %v11203_v13  ;;  %v532_v13 = vld [vmem:[#allocation3 + $0xd8] sm:$0xff]  ;;  %v11235_v44 = vpack.c.bf16 %v757_v10, %v741_v36  ;;  %v547_v10 = vld [vmem:[#allocation3 + $0x150] sm:$0xff] }
 0x181   : > { %8432 = vmatprep.subr.bf16.mxu0 %v11211_v8  ;;  %v11237_v27 = vpack.c.bf16 %v532_v13, %v516_v26  ;;  %v564_v50 = vld [vmem:[#allocation3 + $0x1d8] sm:$0xff]  ;;  %13745 = vst [vmem:[#allocation203_spill] sm:$0xff] %v11241_v47  ;;  %v11251_v36 = vpack.c.bf16 %v563_v55, %v547_v10 }
 0x182   : > { %8526 = vmatpush1.bf16.msra.mxu1 %v11209_v16  ;;  %v11245_v31 = vpack.c.bf16 %v564_v50, %v548_v29  ;;  %v580_v13 = vld [vmem:[#allocation3 + $0x258] sm:$0xff]  ;;  %v595_v29 = vld [vmem:[#allocation3 + $0x2d0] sm:$0xff] }
 0x183   : > { %8528 = vmatprep.subr.bf16.mxu1 %v11216_v39  ;;  %13744 = vst [vmem:[#allocation202_spill] sm:$0xff] %v11237_v27  ;;  %v596_v26 = vld [vmem:[#allocation3 + $0x2d8] sm:$0xff]  ;;  %v11263_v10 = vpack.c.bf16 %v595_v29, %v579_v21  ;;  %v659_v29 = vld [vmem:[#allocation3 + $0x4d0] sm:$0xff] }
 0x184   : > { %8434 = vmatpush1.bf16.msra.mxu0 %v11219_v61  ;;  %13746 = vst [vmem:[#allocation204_spill] sm:$0xff] %v11245_v31  ;;  %v11255_v40 = vpack.c.bf16 %v596_v26, %v580_v13  ;;  %v628_v50 = vld [vmem:[#allocation3 + $0x3d8] sm:$0xff]  ;;  %v627_v13 = vld [vmem:[#allocation3 + $0x3d0] sm:$0xff] }
 0x185   : > { %8436 = vmatprep.subr.bf16.mxu0 %v11225_v19  ;;  %v644_v26 = vld [vmem:[#allocation3 + $0x458] sm:$0xff] }
 0x186   : > { %8530 = vmatpush1.bf16.msra.mxu1 %v11223_v6 }
 0x187   : > { %8532 = vmatprep.subr.bf16.mxu1 %v11228_v57 }
 0x188   : > { %8438 = vmatpush1.bf16.msra.mxu0 %v11231_v38 }
 0x189   : > { %8472 = vmatprep.subr.bf16.mxu0 %v11237_v27  ;;  %v11259_v27 = vpop.f32.mrb[2].mxu1 }
 0x18a   : > { %8534 = vmatpush1.bf16.msra.mxu1 %v11235_v44 }
 0x18b   : > { %8568 = vmatprep.subr.bf16.mxu1 %v10831_v34  ;;  %1746 = vmatmul.mubr.f32.vlgmr.msra.gmra.mrb[12].mxu0 %v11048_v28  ;;  %v612_v34 = vld [vmem:[#allocation3 + $0x358] sm:$0xff] }
 0x18c   : > { %8474 = vmatpush1.bf16.msra.mxu0 %v11241_v47  ;;  %1887 = vmatprep.mubr.f32.mxu0 %v13641_v59  ;;  %v11269_v55 = vpack.c.bf16 %v628_v50, %v612_v34  ;;  %v676_v34 = vld [vmem:[#allocation3 + $0x558] sm:$0xff] }
 0x18d   : > { %1959 = vmatmul.mubr.f32.vlgmr.msra.gmra.mrb[16].mxu1 %v11048_v28  ;;  %8476 = vmatprep.subr.bf16.mxu0 %v11245_v31  ;;  %v660_v31 = vld [vmem:[#allocation3 + $0x4d8] sm:$0xff] }
 0x18e   : > { %8570 = vmatpush1.bf16.msra.mxu1 %v10838_v0  ;;  %2228 = vmatprep.mubr.f32.mxu1 %v13641_v59  ;;  %v11265_v0 = vpop.f32.mrb[3].mxu1  ;;  %v11277_v21 = vpack.c.bf16 %v660_v31, %v644_v26  ;;  %v692_v50 = vld [vmem:[#allocation3 + $0x5d8] sm:$0xff] }
 0x18f   : > { %8572 = vmatprep.subr.bf16.mxu1 %v10843_v58  ;;  %v611_v58 = vld [vmem:[#allocation3 + $0x350] sm:$0xff]  ;;  %v708_v31 = vld [vmem:[#allocation3 + $0x658] sm:$0xff] }
 0x190   : > { %8478 = vmatpush1.bf16.msra.mxu0 %v11251_v36  ;;  %v11273_v47 = vpack.c.bf16 %v627_v13, %v611_v58  ;;  %13748 = vst [vmem:[#allocation206_spill] sm:$0xff] %v11277_v21  ;;  %v11285_v58 = vpack.c.bf16 %v692_v50, %v676_v34  ;;  %v691_v13 = vld [vmem:[#allocation3 + $0x5d0] sm:$0xff]  ;;  %v724_v26 = vld [vmem:[#allocation3 + $0x6d8] sm:$0xff] }
 0x191   : > { %8480 = vmatprep.subr.bf16.mxu0 %v11255_v40  ;;  %v740_v34 = vld [vmem:[#allocation3 + $0x758] sm:$0xff] }
 0x192   : > { %8574 = vmatpush1.bf16.msra.mxu1 %v10853_v37  ;;  %13747 = vst [vmem:[#allocation205_spill] sm:$0xff] %v11273_v47  ;;  %v643_v37 = vld [vmem:[#allocation3 + $0x450] sm:$0xff]  ;;  %13749 = vst [vmem:[#allocation207_spill] sm:$0xff] %v11285_v58  ;;  %v756_v50 = vld [vmem:[#allocation3 + $0x7d8] sm:$0xff] }
 0x193   : > { %8576 = vmatprep.subr.bf16.mxu1 %v10858_v3  ;;  %v11281_v3 = vpack.c.bf16 %v659_v29, %v643_v37  ;;  %v11293_v37 = vpack.c.bf16 %v724_v26, %v708_v31  ;;  %v723_v29 = vld [vmem:[#allocation3 + $0x6d0] sm:$0xff]  ;;  %v520_v26 = vld [vmem:[#allocation3 + $0x78] sm:$0xff] }
 0x194   : > { %8482 = vmatpush1.bf16.msra.mxu0 %v11263_v10  ;;  %v755_v31 = vld [vmem:[#allocation3 + $0x7d0] sm:$0xff] }
 0x195   : > { %8484 = vmatprep.subr.bf16.mxu0 %v11269_v55 }
 0x196   : > { %8578 = vmatpush1.bf16.msra.mxu1 %v10868_v2  ;;  %v675_v2 = vld [vmem:[#allocation3 + $0x550] sm:$0xff] }
 0x197   : > { %8580 = vmatprep.subr.bf16.mxu1 %v10873_v42  ;;  %v11289_v42 = vpack.c.bf16 %v691_v13, %v675_v2  ;;  %v11309_v13 = vpack.c.bf16 %v756_v50, %v740_v34  ;;  %v552_v34 = vld [vmem:[#allocation3 + $0x178] sm:$0xff] }
 0x198   : > { %8486 = vmatpush1.bf16.msra.mxu0 %v11273_v47  ;;  %v568_v50 = vld [vmem:[#allocation3 + $0x1f8] sm:$0xff] }
 0x199   : > { %8488 = vmatprep.subr.bf16.mxu0 %v11277_v21 }
 0x19a   : > { %8582 = vmatpush1.bf16.msra.mxu1 %v10880_v15  ;;  %v707_v15 = vld [vmem:[#allocation3 + $0x650] sm:$0xff] }
 0x19b   : > { %8584 = vmatprep.subr.bf16.mxu1 %v10885_v5 }
 0x19c   : > { %8490 = vmatpush1.bf16.msra.mxu0 %v11281_v3 }
 0x19d   : > { %8492 = vmatprep.subr.bf16.mxu0 %v11285_v58 }
 0x19e   : > { %8586 = vmatpush1.bf16.msra.mxu1 %v10892_v51  ;;  %v11296_v21 = vpop.f32.mrb[0].mxu0  ;;  %v11305_v51 = vpack.c.bf16 %v723_v29, %v707_v15  ;;  %v535_v29 = vld [vmem:[#allocation3 + $0xf0] sm:$0xff] }
 0x19f   : > { %8588 = vmatprep.subr.bf16.mxu1 %v10897_v14  ;;  %v11300_v47 = vpop.f32.mrb[1].mxu0  ;;  %v739_v14 = vld [vmem:[#allocation3 + $0x750] sm:$0xff] }
 0x1a0   : > { %v11298_v5 = vpop.f32.mrb[4].mxu1  ;;  %8494 = vmatpush1.bf16.msra.mxu0 %v11289_v42  ;;  %v11313_v58 = vpack.c.bf16 %v755_v31, %v739_v14  ;;  %v551_v14 = vld [vmem:[#allocation3 + $0x170] sm:$0xff]  ;;  %v584_v31 = vld [vmem:[#allocation3 + $0x278] sm:$0xff] }
 0x1a1   : > { %13750 = vst [vmem:[#allocation208_spill] sm:$0xff] %v11298_v5  ;;  %v11302_v2 = vpop.f32.mrb[5].mxu1  ;;  %8496 = vmatprep.subr.bf16.mxu0 %v11293_v37  ;;  %v536_v5 = vld [vmem:[#allocation3 + $0xf8] sm:$0xff] }
 0x1a2   : > { %8590 = vmatpush1.bf16.msra.mxu1 %v10904_v32  ;;  %v11317_v15 = vpack.c.bf16 %v536_v5, %v520_v26  ;;  %v519_v32 = vld [vmem:[#allocation3 + $0x70] sm:$0xff]  ;;  %v11326_v5 = vpack.c.bf16 %v568_v50, %v552_v34  ;;  %v600_v26 = vld [vmem:[#allocation3 + $0x2f8] sm:$0xff] }
 0x1a3   : > { %8592 = vmatprep.subr.bf16.mxu1 %v10909_v54  ;;  %v11321_v54 = vpack.c.bf16 %v535_v29, %v519_v32  ;;  %v583_v32 = vld [vmem:[#allocation3 + $0x270] sm:$0xff]  ;;  %v616_v29 = vld [vmem:[#allocation3 + $0x378] sm:$0xff] }
 0x1a4   : > { %8498 = vmatpush1.bf16.msra.mxu0 %v11305_v51  ;;  %v632_v34 = vld [vmem:[#allocation3 + $0x3f8] sm:$0xff] }
 0x1a5   : > { %8500 = vmatprep.subr.bf16.mxu0 %v11309_v13 }
 0x1a6   : > { %8594 = vmatpush1.bf16.msra.mxu1 %v10916_v24  ;;  %v567_v24 = vld [vmem:[#allocation3 + $0x1f0] sm:$0xff] }
 0x1a7   : > { %8596 = vmatprep.subr.bf16.mxu1 %v10921_v7  ;;  %v11331_v7 = vpack.c.bf16 %v567_v24, %v551_v14  ;;  %v615_v14 = vld [vmem:[#allocation3 + $0x370] sm:$0xff] }
 0x1a8   : > { %8502 = vmatpush1.bf16.msra.mxu0 %v11313_v58  ;;  %v631_v24 = vld [vmem:[#allocation3 + $0x3f0] sm:$0xff] }
 0x1a9   : > { %8536 = vmatprep.subr.bf16.mxu0 %v11317_v15 }
 0x1aa   : > { %8598 = vmatpush1.bf16.msra.mxu1 %v10928_v1  ;;  %v11335_v1 = vpack.c.bf16 %v600_v26, %v584_v31  ;;  %v664_v31 = vld [vmem:[#allocation3 + $0x4f8] sm:$0xff]  ;;  %v11351_v26 = vpack.c.bf16 %v631_v24, %v615_v14  ;;  %v695_v24 = vld [vmem:[#allocation3 + $0x5f0] sm:$0xff] }
 0x1ab   : > { %8632 = vmatprep.subr.bf16.mxu1 %v10933_v4  ;;  %1888 = vmatmul.mubr.f32.vlgmr.msra.gmra.mrb[14].mxu0 %v11048_v28  ;;  %v599_v4 = vld [vmem:[#allocation3 + $0x2f0] sm:$0xff] }
 0x1ac   : > { %8538 = vmatpush1.bf16.msra.mxu0 %v11321_v54  ;;  %2029 = vmatprep.mubr.f32.mxu0 %v13641_v59  ;;  %v11342_v50 = vpack.c.bf16 %v599_v4, %v583_v32  ;;  %v647_v32 = vld [vmem:[#allocation3 + $0x470] sm:$0xff] }
 0x1ad   : > { %2229 = vmatmul.mubr.f32.vlgmr.msra.gmra.mrb[18].mxu1 %v11265_v0  ;;  %8540 = vmatprep.subr.bf16.mxu0 %v11326_v5  ;;  %v663_v4 = vld [vmem:[#allocation3 + $0x4f0] sm:$0xff] }
 0x1ae   : > { %8634 = vmatpush1.bf16.msra.mxu1 %v10940_v52  ;;  %2234 = vmatprep.mubr.f32.mxu1 %v13641_v59  ;;  %v11346_v52 = vpack.c.bf16 %v632_v34, %v616_v29  ;;  %v680_v29 = vld [vmem:[#allocation3 + $0x578] sm:$0xff]  ;;  %v11359_v34 = vpack.c.bf16 %v663_v4, %v647_v32  ;;  %v727_v4 = vld [vmem:[#allocation3 + $0x6f0] sm:$0xff] }
 0x1af   : > { %8636 = vmatprep.subr.bf16.mxu1 %v10945_v41  ;;  %v648_v41 = vld [vmem:[#allocation3 + $0x478] sm:$0xff] }
 0x1b0   : > { %8542 = vmatpush1.bf16.msra.mxu0 %v11331_v7 }
 0x1b1   : > { %2235 = vmatmul.mubr.f32.gmra.mrb[20].mxu1 %v11259_v27  ;;  %8544 = vmatprep.subr.bf16.mxu0 %v11335_v1 }
 0x1b2   : > { %8638 = vmatpush1.bf16.msra.mxu1 %v10954_v63  ;;  %2382 = vmatprep.mubr.f32.mxu1 %v13641_v59  ;;  %v11355_v63 = vpack.c.bf16 %v664_v31, %v648_v41  ;;  %v712_v41 = vld [vmem:[#allocation3 + $0x678] sm:$0xff] }
 0x1b3   : > { %8640 = vmatprep.subr.bf16.mxu1 %v10959_v25  ;;  %v696_v25 = vld [vmem:[#allocation3 + $0x5f8] sm:$0xff] }
 0x1b4   : > { %8546 = vmatpush1.bf16.msra.mxu0 %v11342_v50  ;;  %13751 = vst [vmem:[#allocation209_spill] sm:$0xff] %v11355_v63  ;;  %v11363_v14 = vpack.c.bf16 %v696_v25, %v680_v29  ;;  %v728_v31 = vld [vmem:[#allocation3 + $0x6f8] sm:$0xff] }
 0x1b5   : > { %8548 = vmatprep.subr.bf16.mxu0 %v11346_v52  ;;  %v11371_v32 = vpack.c.bf16 %v728_v31, %v712_v41  ;;  %v744_v29 = vld [vmem:[#allocation3 + $0x778] sm:$0xff]  ;;  %v759_v41 = vld [vmem:[#allocation3 + $0x7f0] sm:$0xff] }
 0x1b6   : > { %8642 = vmatpush1.bf16.msra.mxu1 %v10968_v46  ;;  %v679_v46 = vld [vmem:[#allocation3 + $0x570] sm:$0xff]  ;;  %v760_v25 = vld [vmem:[#allocation3 + $0x7f8] sm:$0xff] }
 0x1b7   : > { %8644 = vmatprep.subr.bf16.mxu1 %v10973_v11  ;;  %v11367_v11 = vpack.c.bf16 %v695_v24, %v679_v46  ;;  %v743_v24 = vld [vmem:[#allocation3 + $0x770] sm:$0xff]  ;;  %v13765_v31 = vld [vmem:[#allocation167_spill] sm:$0xff] }
 0x1b8   : > { %8550 = vmatpush1.bf16.msra.mxu0 %v11351_v26 }
 0x1b9   : > { %8552 = vmatprep.subr.bf16.mxu0 %v11355_v63 }
 0x1ba   : > { %8646 = vmatpush1.bf16.msra.mxu1 %v10980_v9  ;;  %v711_v9 = vld [vmem:[#allocation3 + $0x670] sm:$0xff] }
 0x1bb   : > { %8648 = vmatprep.subr.bf16.mxu1 %v10985_v49  ;;  %v11379_v46 = vpack.c.bf16 %v727_v4, %v711_v9  ;;  %v13766_v9 = vld [vmem:[#allocation168_spill] sm:$0xff]  ;;  %v13767_v4 = vld [vmem:[#allocation169_spill] sm:$0xff] }
 0x1bc   : > { %8554 = vmatpush1.bf16.msra.mxu0 %v11359_v34 }
 0x1bd   : > { %8556 = vmatprep.subr.bf16.mxu0 %v11363_v14 }
 0x1be   : > { %8650 = vmatpush1.bf16.msra.mxu1 %v10992_v56  ;;  %v11383_v56 = vpack.c.bf16 %v760_v25, %v744_v29  ;;  %v13768_v29 = vld [vmem:[#allocation170_spill] sm:$0xff]  ;;  %v13769_v25 = vld [vmem:[#allocation171_spill] sm:$0xff] }
 0x1bf   : > { %8652 = vmatprep.subr.bf16.mxu1 %v10997_v60  ;;  %v11387_v60 = vpack.c.bf16 %v759_v41, %v743_v24  ;;  %v13770_v24 = vld [vmem:[#allocation172_spill] sm:$0xff]  ;;  %v13771_v41 = vld [vmem:[#allocation173_spill] sm:$0xff] }
 0x1c0   : > { %v11374_v63 = vpop.f32.mrb[6].mxu1  ;;  %8558 = vmatpush1.bf16.msra.mxu0 %v11367_v11 }
 0x1c1   : > { %v11376_v49 = vpop.f32.mrb[7].mxu1  ;;  %8560 = vmatprep.subr.bf16.mxu0 %v11371_v32 }
 0x1c2   : > { %8654 = vmatpush1.bf16.msra.mxu1 %v11004_v43  ;;  %v13752_v43 = vld [vmem:[#allocation154_spill] sm:$0xff] }
 0x1c3   : > { %8656 = vmatprep.subr.bf16.mxu1 %v11009_v33  ;;  %v13753_v33 = vld [vmem:[#allocation155_spill] sm:$0xff] }
 0x1c4   : > { %8562 = vmatpush1.bf16.msra.mxu0 %v11379_v46 }
 0x1c5   : > { %8564 = vmatprep.subr.bf16.mxu0 %v11383_v56 }
 0x1c6   : > { %8658 = vmatpush1.bf16.msra.mxu1 %v11016_v30  ;;  %v13754_v30 = vld [vmem:[#allocation156_spill] sm:$0xff] }
 0x1c7   : > { %8660 = vmatprep.subr.bf16.mxu1 %v11021_v23  ;;  %v13756_v23 = vld [vmem:[#allocation158_spill] sm:$0xff] }
 0x1c8   : > { %8566 = vmatpush1.bf16.msra.mxu0 %v11387_v60 }
 0x1c9   : > { %8600 = vmatprep.subr.bf16.mxu0 %v11030_v35  ;;  %v13758_v35 = vld [vmem:[#allocation160_spill] sm:$0xff] }
 0x1ca   : > { %8662 = vmatpush1.bf16.msra.mxu1 %v11028_v17  ;;  %v13757_v17 = vld [vmem:[#allocation159_spill] sm:$0xff] }
 0x1cb   : > { %8696 = vmatprep.subr.bf16.mxu1 %v11033_v20  ;;  %2030 = vmatmul.mubr.f32.vlgmr.msra.gmra.mrb[16].mxu0 %v11048_v28  ;;  %v13759_v20 = vld [vmem:[#allocation161_spill] sm:$0xff] }
 0x1cc   : > { %8602 = vmatpush1.bf16.msra.mxu0 %v11036_v48  ;;  %2305 = vmatprep.mubr.f32.mxu0 %v13641_v59  ;;  %v13755_v48 = vld [vmem:[#allocation157_spill] sm:$0xff] }
 0x1cd   : > { %2383 = vmatmul.mubr.f32.vlgmr.msra.gmra.mrb[22].mxu1 %v11265_v0  ;;  %8604 = vmatprep.subr.bf16.mxu0 %v11042_v62  ;;  %v13761_v62 = vld [vmem:[#allocation163_spill] sm:$0xff]  ;;  %v13763_v28 = vld [vmem:[#allocation165_spill] sm:$0xff] }
 0x1ce   : > { %8698 = vmatpush1.bf16.msra.mxu1 %v11040_v22  ;;  %2388 = vmatprep.mubr.f32.mxu1 %v13641_v59  ;;  %v13760_v22 = vld [vmem:[#allocation162_spill] sm:$0xff] }
 0x1cf   : > { %8700 = vmatprep.subr.bf16.mxu1 %v11045_v53  ;;  %v13762_v53 = vld [vmem:[#allocation164_spill] sm:$0xff] }
 0x1d0   : > { %8606 = vmatpush1.bf16.msra.mxu0 %v11053_v12  ;;  %v13764_v12 = vld [vmem:[#allocation166_spill] sm:$0xff] }
 0x1d1   : > { %2389 = vmatmul.mubr.f32.gmra.mrb[24].mxu1 %v11259_v27  ;;  %8608 = vmatprep.subr.bf16.mxu0 %v11059_v18 }
 0x1d2   : > { %8702 = vmatpush1.bf16.msra.mxu1 %v11057_v45  ;;  %2536 = vmatprep.mubr.f32.mxu1 %v13641_v59 }
 0x1d3   : > { %8704 = vmatprep.subr.bf16.mxu1 %v13752_v43  ;;  %v13772_v43 = vld [vmem:[#allocation174_spill] sm:$0xff] }
 0x1d4   : > { %8610 = vmatpush1.bf16.msra.mxu0 %v13753_v33  ;;  %v13773_v33 = vld [vmem:[#allocation175_spill] sm:$0xff] }
 0x1d5   : > { %8612 = vmatprep.subr.bf16.mxu0 %v13755_v48  ;;  %v13775_v48 = vld [vmem:[#allocation177_spill] sm:$0xff] }
 0x1d6   : > { %8706 = vmatpush1.bf16.msra.mxu1 %v13754_v30  ;;  %v13774_v30 = vld [vmem:[#allocation176_spill] sm:$0xff] }
 0x1d7   : > { %8708 = vmatprep.subr.bf16.mxu1 %v13756_v23  ;;  %v13776_v23 = vld [vmem:[#allocation178_spill] sm:$0xff] }
 0x1d8   : > { %8614 = vmatpush1.bf16.msra.mxu0 %v13757_v17  ;;  %v13777_v17 = vld [vmem:[#allocation179_spill] sm:$0xff] }
 0x1d9   : > { %8616 = vmatprep.subr.bf16.mxu0 %v13759_v20  ;;  %v13779_v20 = vld [vmem:[#allocation181_spill] sm:$0xff] }
 0x1da   : > { %8710 = vmatpush1.bf16.msra.mxu1 %v13758_v35  ;;  %v13778_v35 = vld [vmem:[#allocation180_spill] sm:$0xff] }
 0x1db   : > { %8712 = vmatprep.subr.bf16.mxu1 %v13760_v22  ;;  %v13780_v22 = vld [vmem:[#allocation182_spill] sm:$0xff] }
 0x1dc   : > { %8618 = vmatpush1.bf16.msra.mxu0 %v13761_v62  ;;  %v13781_v62 = vld [vmem:[#allocation183_spill] sm:$0xff] }
 0x1dd   : > { %8620 = vmatprep.subr.bf16.mxu0 %v13763_v28  ;;  %v13783_v28 = vld [vmem:[#allocation185_spill] sm:$0xff] }
 0x1de   : > { %8714 = vmatpush1.bf16.msra.mxu1 %v13762_v53  ;;  %v13782_v53 = vld [vmem:[#allocation184_spill] sm:$0xff] }
 0x1df   : > { %8716 = vmatprep.subr.bf16.mxu1 %v13764_v12  ;;  %v13784_v12 = vld [vmem:[#allocation186_spill] sm:$0xff] }
 0x1e0   : > { %v11422_v45 = vpop.f32.mrb[8].mxu1  ;;  %8622 = vmatpush1.bf16.msra.mxu0 %v13765_v31  ;;  %v13785_v31 = vld [vmem:[#allocation187_spill] sm:$0xff] }
 0x1e1   : > { %v11424_v18 = vpop.f32.mrb[9].mxu1  ;;  %8624 = vmatprep.subr.bf16.mxu0 %v13767_v4  ;;  %v13787_v4 = vld [vmem:[#allocation189_spill] sm:$0xff] }
 0x1e2   : > { %8718 = vmatpush1.bf16.msra.mxu1 %v13766_v9  ;;  %v13786_v9 = vld [vmem:[#allocation188_spill] sm:$0xff] }
 0x1e3   : > { %8720 = vmatprep.subr.bf16.mxu1 %v13768_v29  ;;  %v13788_v29 = vld [vmem:[#allocation190_spill] sm:$0xff] }
 0x1e4   : > { %8626 = vmatpush1.bf16.msra.mxu0 %v13769_v25  ;;  %v13789_v25 = vld [vmem:[#allocation191_spill] sm:$0xff] }
 0x1e5   : > { %8628 = vmatprep.subr.bf16.mxu0 %v13771_v41  ;;  %v13791_v41 = vld [vmem:[#allocation193_spill] sm:$0xff] }
 0x1e6   : > { %8722 = vmatpush1.bf16.msra.mxu1 %v13770_v24  ;;  %v13790_v24 = vld [vmem:[#allocation192_spill] sm:$0xff] }
 0x1e7   : > { %8724 = vmatprep.subr.bf16.mxu1 %v13772_v43  ;;  %v13792_v43 = vld [vmem:[#allocation194_spill] sm:$0xff] }
 0x1e8   : > { %8630 = vmatpush1.bf16.msra.mxu0 %v13773_v33  ;;  %v13793_v33 = vld [vmem:[#allocation195_spill] sm:$0xff] }
 0x1e9   : > { %8664 = vmatprep.subr.bf16.mxu0 %v13775_v48  ;;  %v13795_v48 = vld [vmem:[#allocation197_spill] sm:$0xff] }
 0x1ea   : > { %8726 = vmatpush1.bf16.msra.mxu1 %v13774_v30  ;;  %v13794_v30 = vld [vmem:[#allocation196_spill] sm:$0xff] }
 0x1eb   : > { %8760 = vmatprep.subr.bf16.mxu1 %v13776_v23  ;;  %2306 = vmatmul.mubr.f32.vlgmr.msra.gmra.mrb[18].mxu0 %v11265_v0  ;;  %v13796_v23 = vld [vmem:[#allocation198_spill] sm:$0xff] }
 0x1ec   : > { %8666 = vmatpush1.bf16.msra.mxu0 %v13777_v17  ;;  %2311 = vmatprep.mubr.f32.mxu0 %v13641_v59 }
 0x1ed   : > { %2537 = vmatmul.mubr.f32.vlgmr.msra.gmra.mrb[26].mxu1 %v11265_v0  ;;  %8668 = vmatprep.subr.bf16.mxu0 %v13779_v20 }
 0x1ee   : > { %8762 = vmatpush1.bf16.msra.mxu1 %v13778_v35  ;;  %2542 = vmatprep.mubr.f32.mxu1 %v13641_v59 }
 0x1ef   : > { %2312 = vmatmul.mubr.f32.gmra.mrb[20].mxu0 %v11259_v27  ;;  %8764 = vmatprep.subr.bf16.mxu1 %v13780_v22  ;;  %v13798_v22 = vld [vmem:[#allocation199_spill] sm:$0xff] }
 0x1f0   : > { %8670 = vmatpush1.bf16.msra.mxu0 %v13781_v62  ;;  %2459 = vmatprep.mubr.f32.mxu0 %v13641_v59 }
 0x1f1   : > { %2543 = vmatmul.mubr.f32.gmra.mrb[28].mxu1 %v11259_v27  ;;  %8672 = vmatprep.subr.bf16.mxu0 %v13783_v28  ;;  %v13814_v28 = vld [vmem:[#allocation44_spill] sm:$0xff] }
 0x1f2   : > { %8766 = vmatpush1.bf16.msra.mxu1 %v13782_v53  ;;  %2690 = vmatprep.mubr.f32.mxu1 %v13641_v59  ;;  %v13812_v53 = vld [vmem:[#allocation206_spill] sm:$0xff] }
 0x1f3   : > { %8768 = vmatprep.subr.bf16.mxu1 %v13784_v12  ;;  %v13815_v12 = vld [vmem:[#allocation207_spill] sm:$0xff] }
 0x1f4   : > { %8674 = vmatpush1.bf16.msra.mxu0 %v13785_v31 }
 0x1f5   : > { %8676 = vmatprep.subr.bf16.mxu0 %v13787_v4 }
 0x1f6   : > { %8770 = vmatpush1.bf16.msra.mxu1 %v13786_v9 }
 0x1f7   : > { %8772 = vmatprep.subr.bf16.mxu1 %v13788_v29 }
 0x1f8   : > { %8678 = vmatpush1.bf16.msra.mxu0 %v13789_v25  ;;  %v13820_v25 = vld [vmem:[#allocation48_spill] sm:$0xff] }
 0x1f9   : > { %8680 = vmatprep.subr.bf16.mxu0 %v13791_v41  ;;  %v13822_v41 = vld [vmem:[#allocation52_spill] sm:$0xff] }
 0x1fa   : > { %8774 = vmatpush1.bf16.msra.mxu1 %v13790_v24  ;;  %v892_v24 = vpop.permute.xlu0 %891 }
 0x1fb   : > { %8776 = vmatprep.subr.bf16.mxu1 %v13792_v43  ;;  %v13823_v43 = vld [vmem:[#allocation54_spill] sm:$0xff] }
 0x1fc   : > { %8682 = vmatpush1.bf16.msra.mxu0 %v13793_v33 }
 0x1fd   : > { %8684 = vmatprep.subr.bf16.mxu0 %v13795_v48  ;;  %v13831_v48 = vld [vmem:[#allocation35_spill] sm:$0xff] }
 0x1fe   : > { %8778 = vmatpush1.bf16.msra.mxu1 %v13794_v30  ;;  %v896_v30 = vpop.permute.xlu0 %895 }
 0x1ff   : > { %8780 = vmatprep.subr.bf16.mxu1 %v13796_v23  ;;  %v13833_v23 = vld [vmem:[#allocation39_spill] sm:$0xff] }
 0x200   : > { %v1534_v17 = vpop.f32.mrb[10].mxu1  ;;  %8686 = vmatpush1.bf16.msra.mxu0 %v13798_v22 }
 0x201   : > { %v11467_v35 = vsub.f32 %v11296_v21, %v1534_v17  ;;  %v1536_v20 = vpop.f32.mrb[11].mxu1  ;;  %8688 = vmatprep.subr.bf16.mxu0 %v11211_v8  ;;  %v13801_v21 = vld [vmem:[#allocation26_spill] sm:$0xff]  ;;  %v13835_v17 = vld [vmem:[#allocation209_spill] sm:$0xff] }
 0x202   : > { %v11471_v62 = vsub.f32 %v11300_v47, %v1536_v20  ;;  %8782 = vmatpush1.bf16.msra.mxu1 %v11209_v16  ;;  %v13800_v47 = vld [vmem:[#allocation202_spill] sm:$0xff]  ;;  %v13803_v16 = vld [vmem:[#allocation28_spill] sm:$0xff]  ;;  %v13837_v20 = vld [vmem:[#allocation45_spill] sm:$0xff] }
 0x203   : > { %13797 = vst [vmem:[#allocation154_spill] sm:$0xff] %v11467_v35  ;;  %8784 = vmatprep.subr.bf16.mxu1 %v11216_v39  ;;  %v13802_v39 = vld [vmem:[#allocation203_spill] sm:$0xff]  ;;  %v13805_v8 = vld [vmem:[#allocation30_spill] sm:$0xff] }
 0x204   : > { %13799 = vst [vmem:[#allocation155_spill] sm:$0xff] %v11471_v62  ;;  %8690 = vmatpush1.bf16.msra.mxu0 %v11219_v61  ;;  %v13806_v61 = vld [vmem:[#allocation32_spill] sm:$0xff] }
 0x205   : > { %8692 = vmatprep.subr.bf16.mxu0 %v11225_v19  ;;  %v13808_v19 = vld [vmem:[#allocation36_spill] sm:$0xff] }
 0x206   : > { %8786 = vmatpush1.bf16.msra.mxu1 %v11223_v6  ;;  %v13807_v6 = vld [vmem:[#allocation34_spill] sm:$0xff] }
 0x207   : > { %8788 = vmatprep.subr.bf16.mxu1 %v11228_v57  ;;  %v13804_v57 = vld [vmem:[#allocation204_spill] sm:$0xff] }
 0x208   : > { %8694 = vmatpush1.bf16.msra.mxu0 %v11231_v38  ;;  %v13809_v38 = vld [vmem:[#allocation38_spill] sm:$0xff] }
 0x209   : > { %8728 = vmatprep.subr.bf16.mxu0 %v13800_v47 }
 0x20a   : > { %8790 = vmatpush1.bf16.msra.mxu1 %v11235_v44  ;;  %v13810_v44 = vld [vmem:[#allocation205_spill] sm:$0xff] }
 0x20b   : > { %8824 = vmatprep.subr.bf16.mxu1 %v13801_v21  ;;  %2460 = vmatmul.mubr.f32.vlgmr.msra.gmra.mrb[22].mxu0 %v11265_v0 }
 0x20c   : > { %8730 = vmatpush1.bf16.msra.mxu0 %v13802_v39  ;;  %2465 = vmatprep.mubr.f32.mxu0 %v13641_v59  ;;  %v13841_v39 = vld [vmem:[#allocation49_spill] sm:$0xff] }
 0x20d   : > { %2691 = vmatmul.mubr.f32.vlgmr.msra.gmra.mrb[30].mxu1 %v11265_v0  ;;  %8732 = vmatprep.subr.bf16.mxu0 %v13804_v57  ;;  %v13847_v57 = vld [vmem:[#allocation59_spill] sm:$0xff] }
 0x20e   : > { %8826 = vmatpush1.bf16.msra.mxu1 %v13803_v16  ;;  %2696 = vmatprep.mubr.f32.mxu1 %v13641_v59 }
 0x20f   : > { %2466 = vmatmul.mubr.f32.gmra.mrb[24].mxu0 %v11259_v27  ;;  %8828 = vmatprep.subr.bf16.mxu1 %v13805_v8 }
 0x210   : > { %8734 = vmatpush1.bf16.msra.mxu0 %v11251_v36  ;;  %2613 = vmatprep.mubr.f32.mxu0 %v13641_v59  ;;  %v13811_v36 = vld [vmem:[#allocation40_spill] sm:$0xff] }
 0x211   : > { %2697 = vmatmul.mubr.f32.gmra.mrb[32].mxu1 %v11259_v27  ;;  %8736 = vmatprep.subr.bf16.mxu0 %v11255_v40  ;;  %v13813_v40 = vld [vmem:[#allocation42_spill] sm:$0xff] }
 0x212   : > { %8830 = vmatpush1.bf16.msra.mxu1 %v13806_v61  ;;  %2844 = vmatprep.mubr.f32.mxu1 %v13641_v59 }
 0x213   : > { %8832 = vmatprep.subr.bf16.mxu1 %v13807_v6 }
 0x214   : > { %8738 = vmatpush1.bf16.msra.mxu0 %v11263_v10  ;;  %v13816_v10 = vld [vmem:[#allocation46_spill] sm:$0xff] }
 0x215   : > { %8740 = vmatprep.subr.bf16.mxu0 %v11269_v55  ;;  %v13817_v55 = vld [vmem:[#allocation208_spill] sm:$0xff] }
 0x216   : > { %8834 = vmatpush1.bf16.msra.mxu1 %v13808_v19 }
 0x217   : > { %8836 = vmatprep.subr.bf16.mxu1 %v13809_v38 }
 0x218   : > { %8742 = vmatpush1.bf16.msra.mxu0 %v13810_v44  ;;  %v1037_v44 = vpop.f32.mrb[2].mxu0 }
 0x219   : > { %8744 = vmatprep.subr.bf16.mxu0 %v13812_v53  ;;  %v1039_v53 = vpop.f32.mrb[3].mxu0 }
 0x21a   : > { %8838 = vmatpush1.bf16.msra.mxu1 %v13811_v36 }
 0x21b   : > { %8840 = vmatprep.subr.bf16.mxu1 %v13813_v40 }
 0x21c   : > { %8746 = vmatpush1.bf16.msra.mxu0 %v11281_v3  ;;  %v13821_v3 = vld [vmem:[#allocation50_spill] sm:$0xff] }
 0x21d   : > { %8748 = vmatprep.subr.bf16.mxu0 %v13815_v12  ;;  %v13853_v12 = vld [vmem:[#allocation65_spill] sm:$0xff] }
 0x21e   : > { %8842 = vmatpush1.bf16.msra.mxu1 %v13814_v28 }
 0x21f   : > { %8844 = vmatprep.subr.bf16.mxu1 %v13816_v10 }
 0x220   : > { %v1676_v31 = vpop.f32.mrb[12].mxu1  ;;  %8750 = vmatpush1.bf16.msra.mxu0 %v11289_v42  ;;  %v13824_v42 = vld [vmem:[#allocation56_spill] sm:$0xff] }
 0x221   : > { %v11513_v9 = vsub.f32 %v13817_v55, %v1676_v31  ;;  %v1678_v4 = vpop.f32.mrb[13].mxu1  ;;  %8752 = vmatprep.subr.bf16.mxu0 %v11293_v37  ;;  %v13826_v37 = vld [vmem:[#allocation27_spill] sm:$0xff]  ;;  %v13854_v31 = vld [vmem:[#allocation66_spill] sm:$0xff]  ;;  %v1179_v55 = vpop.f32.mrb[4].mxu0 }
 0x222   : > { %v11517_v29 = vsub.f32 %v11302_v2, %v1678_v4  ;;  %8846 = vmatpush1.bf16.msra.mxu1 %v13820_v25  ;;  %v13825_v2 = vld [vmem:[#allocation201_spill] sm:$0xff]  ;;  %v13855_v4 = vld [vmem:[#allocation67_spill] sm:$0xff] }
 0x223   : > { %13818 = vst [vmem:[#allocation156_spill] sm:$0xff] %v11513_v9  ;;  %8848 = vmatprep.subr.bf16.mxu1 %v13821_v3  ;;  %v11530_v33 = vadd.f32 %v892_v24, %v13825_v2  ;;  %v1181_v24 = vpop.f32.mrb[5].mxu0  ;;  %v13856_v2 = vld [vmem:[#allocation68_spill] sm:$0xff] }
 0x224   : > { %13819 = vst [vmem:[#allocation157_spill] sm:$0xff] %v11517_v29  ;;  %8754 = vmatpush1.bf16.msra.mxu0 %v11305_v51  ;;  %v13827_v51 = vld [vmem:[#allocation29_spill] sm:$0xff] }
 0x225   : > { %8756 = vmatprep.subr.bf16.mxu0 %v11309_v13 }
 0x226   : > { %8850 = vmatpush1.bf16.msra.mxu1 %v13822_v41 }
 0x227   : > { %8852 = vmatprep.subr.bf16.mxu1 %v13823_v43 }
 0x228   : > { %8758 = vmatpush1.bf16.msra.mxu0 %v11313_v58  ;;  %v13828_v58 = vld [vmem:[#allocation200_spill] sm:$0xff] }
 0x229   : > { %8792 = vmatprep.subr.bf16.mxu0 %v11317_v15  ;;  %v11539_v13 = vadd.f32 %v13828_v58, %v896_v30  ;;  %v13829_v15 = vld [vmem:[#allocation31_spill] sm:$0xff]  ;;  %v13857_v58 = vld [vmem:[#allocation69_spill] sm:$0xff] }
 0x22a   : > { %8854 = vmatpush1.bf16.msra.mxu1 %v13824_v42 }
 0x22b   : > { %8888 = vmatprep.subr.bf16.mxu1 %v13826_v37  ;;  %2614 = vmatmul.mubr.f32.vlgmr.msra.gmra.mrb[26].mxu0 %v11265_v0  ;;  %v13899_v37 = vld [vmem:[#allocation106_spill] sm:$0xff] }
 0x22c   : > { %8794 = vmatpush1.bf16.msra.mxu0 %v11321_v54  ;;  %2619 = vmatprep.mubr.f32.mxu0 %v13641_v59  ;;  %v13830_v54 = vld [vmem:[#allocation33_spill] sm:$0xff] }
 0x22d   : > { %2845 = vmatmul.mubr.f32.vlgmr.msra.gmra.mrb[18].mxu1 %v11530_v33  ;;  %8796 = vmatprep.subr.bf16.mxu0 %v11326_v5  ;;  %v13832_v5 = vld [vmem:[#allocation37_spill] sm:$0xff] }
 0x22e   : > { %8890 = vmatpush1.bf16.msra.mxu1 %v13827_v51  ;;  %2850 = vmatprep.mubr.f32.mxu1 %v13641_v59  ;;  %v13897_v51 = vld [vmem:[#allocation104_spill] sm:$0xff] }
 0x22f   : > { %2620 = vmatmul.mubr.f32.gmra.mrb[28].mxu0 %v11259_v27  ;;  %8892 = vmatprep.subr.bf16.mxu1 %v13829_v15  ;;  %v13896_v15 = vld [vmem:[#allocation103_spill] sm:$0xff] }
 0x230   : > { %8798 = vmatpush1.bf16.msra.mxu0 %v11331_v7  ;;  %2767 = vmatprep.mubr.f32.mxu0 %v13641_v59  ;;  %v13834_v7 = vld [vmem:[#allocation41_spill] sm:$0xff] }
 0x231   : > { %2851 = vmatmul.mubr.f32.gmra.mrb[20].mxu1 %v11539_v13  ;;  %8800 = vmatprep.subr.bf16.mxu0 %v11335_v1  ;;  %v13836_v1 = vld [vmem:[#allocation43_spill] sm:$0xff] }
 0x232   : > { %8894 = vmatpush1.bf16.msra.mxu1 %v13830_v54  ;;  %2998 = vmatprep.mubr.f32.mxu1 %v13641_v59  ;;  %v13895_v54 = vld [vmem:[#allocation102_spill] sm:$0xff] }
 0x233   : > { %8896 = vmatprep.subr.bf16.mxu1 %v13831_v48  ;;  %v13893_v48 = vld [vmem:[#allocation100_spill] sm:$0xff] }
 0x234   : > { %8802 = vmatpush1.bf16.msra.mxu0 %v11342_v50  ;;  %v13838_v50 = vld [vmem:[#allocation47_spill] sm:$0xff] }
 0x235   : > { %8804 = vmatprep.subr.bf16.mxu0 %v11346_v52 }
 0x236   : > { %8898 = vmatpush1.bf16.msra.mxu1 %v13832_v5  ;;  %v13881_v5 = vld [vmem:[#allocation88_spill] sm:$0xff] }
 0x237   : > { %8900 = vmatprep.subr.bf16.mxu1 %v13833_v23  ;;  %v13875_v23 = vld [vmem:[#allocation82_spill] sm:$0xff] }
 0x238   : > { %8806 = vmatpush1.bf16.msra.mxu0 %v11351_v26 }
 0x239   : > { %8808 = vmatprep.subr.bf16.mxu0 %v13835_v17  ;;  %v13858_v17 = vld [vmem:[#allocation70_spill] sm:$0xff] }
 0x23a   : > { %8902 = vmatpush1.bf16.msra.mxu1 %v13834_v7 }
 0x23b   : > { %8904 = vmatprep.subr.bf16.mxu1 %v13836_v1 }
 0x23c   : > { %8810 = vmatpush1.bf16.msra.mxu0 %v11359_v34  ;;  %v13842_v34 = vld [vmem:[#allocation51_spill] sm:$0xff] }
 0x23d   : > { %8812 = vmatprep.subr.bf16.mxu0 %v11363_v14  ;;  %v13843_v14 = vld [vmem:[#allocation53_spill] sm:$0xff] }
 0x23e   : > { %8906 = vmatpush1.bf16.msra.mxu1 %v13837_v20 }
 0x23f   : > { %8908 = vmatprep.subr.bf16.mxu1 %v13838_v50  ;;  %v13869_v50 = vld [vmem:[#allocation79_spill] sm:$0xff] }
 0x240   : > { %v1818_v22 = vpop.f32.mrb[14].mxu1  ;;  %8814 = vmatpush1.bf16.msra.mxu0 %v11367_v11  ;;  %v13845_v11 = vld [vmem:[#allocation57_spill] sm:$0xff] }
 0x241   : > { %v11565_v52 = vsub.f32 %v11374_v63, %v1818_v22  ;;  %v1820_v47 = vpop.f32.mrb[15].mxu1  ;;  %8816 = vmatprep.subr.bf16.mxu0 %v11371_v32  ;;  %v13844_v63 = vld [vmem:[#allocation55_spill] sm:$0xff]  ;;  %v13848_v32 = vld [vmem:[#allocation60_spill] sm:$0xff] }
 0x242   : > { %v11569_v26 = vsub.f32 %v11376_v49, %v1820_v47  ;;  %8910 = vmatpush1.bf16.msra.mxu1 %v13841_v39  ;;  %v13846_v49 = vld [vmem:[#allocation58_spill] sm:$0xff]  ;;  %v13859_v47 = vld [vmem:[#allocation71_spill] sm:$0xff]  ;;  %v13867_v39 = vld [vmem:[#allocation77_spill] sm:$0xff] }
 0x243   : > { %13839 = vst [vmem:[#allocation158_spill] sm:$0xff] %v11565_v52  ;;  %8912 = vmatprep.subr.bf16.mxu1 %v13842_v34  ;;  %v13866_v34 = vld [vmem:[#allocation76_spill] sm:$0xff] }
 0x244   : > { %13840 = vst [vmem:[#allocation159_spill] sm:$0xff] %v11569_v26  ;;  %8818 = vmatpush1.bf16.msra.mxu0 %v11379_v46  ;;  %v13849_v46 = vld [vmem:[#allocation61_spill] sm:$0xff] }
 0x245   : > { %8820 = vmatprep.subr.bf16.mxu0 %v11383_v56  ;;  %v13850_v56 = vld [vmem:[#allocation62_spill] sm:$0xff] }
 0x246   : > { %8914 = vmatpush1.bf16.msra.mxu1 %v13843_v14 }
 0x247   : > { %8916 = vmatprep.subr.bf16.mxu1 %v13844_v63  ;;  %v13863_v63 = vld [vmem:[#allocation74_spill] sm:$0xff] }
 0x248   : > { %8822 = vmatpush1.bf16.msra.mxu0 %v11387_v60  ;;  %v13851_v60 = vld [vmem:[#allocation63_spill] sm:$0xff] }
 0x249   : > { %8856 = vmatprep.subr.bf16.mxu0 %v13846_v49  ;;  %v11758_v49 = vpop.permute.xlu1 %3397 }
 0x24a   : > { %8918 = vmatpush1.bf16.msra.mxu1 %v13845_v11  ;;  %v13862_v11 = vld [vmem:[#allocation73_spill] sm:$0xff] }
 0x24b   : > { %8952 = vmatprep.subr.bf16.mxu1 %v13847_v57  ;;  %2768 = vmatmul.mubr.f32.vlgmr.msra.gmra.mrb[30].mxu0 %v11265_v0  ;;  %v13852_v0 = vld [vmem:[#allocation64_spill] sm:$0xff] }
 0x24c   : > { %8858 = vmatpush1.bf16.msra.mxu0 %v13848_v32  ;;  %2773 = vmatprep.mubr.f32.mxu0 %v13641_v59 }
 0x24d   : > { %2999 = vmatmul.mubr.f32.vlgmr.msra.gmra.mrb[22].mxu1 %v11530_v33  ;;  %8860 = vmatprep.subr.bf16.mxu0 %v13850_v56  ;;  %v11760_v41 = vpop.permute.xlu1 %3401 }
 0x24e   : > { %8954 = vmatpush1.bf16.msra.mxu1 %v13849_v46  ;;  %3004 = vmatprep.mubr.f32.mxu1 %v13641_v59 }
 0x24f   : > { %2774 = vmatmul.mubr.f32.gmra.mrb[32].mxu0 %v11259_v27  ;;  %8956 = vmatprep.subr.bf16.mxu1 %v13851_v60  ;;  %v11598_v27 = vpop.f32.mrb[6].mxu0  ;;  %v13860_v60 = vld [vmem:[#allocation72_spill] sm:$0xff] }
 0x250   : > { %8862 = vmatpush1.bf16.msra.mxu0 %v13852_v0  ;;  %2921 = vmatprep.mubr.f32.mxu0 %v13641_v59  ;;  %v11601_v30 = vpop.f32.mrb[7].mxu0  ;;  %v13929_v0 = vld [vmem:[#allocation133_spill] sm:$0xff] }
 0x251   : > { %3005 = vmatmul.mubr.f32.gmra.mrb[24].mxu1 %v11539_v13  ;;  %8864 = vmatprep.subr.bf16.mxu0 %v13854_v31  ;;  %v11605_v22 = vpop.f32.mrb[8].mxu0 }
 0x252   : > { %8958 = vmatpush1.bf16.msra.mxu1 %v13853_v12  ;;  %3152 = vmatprep.mubr.f32.mxu1 %v13641_v59 }
 0x253   : > { %8960 = vmatprep.subr.bf16.mxu1 %v13855_v4  ;;  %v11608_v4 = vpop.f32.mrb[9].mxu0 }
 0x254   : > { %8866 = vmatpush1.bf16.msra.mxu0 %v13856_v2  ;;  %v1605_v12 = vpop.f32.mrb[10].mxu0  ;;  %v13927_v2 = vld [vmem:[#allocation132_spill] sm:$0xff] }
 0x255   : > { %8868 = vmatprep.subr.bf16.mxu0 %v13858_v17  ;;  %v11611_v46 = vsub.f32 %v1037_v44, %v1605_v12  ;;  %v1607_v57 = vpop.f32.mrb[11].mxu0  ;;  %v13925_v17 = vld [vmem:[#allocation130_spill] sm:$0xff] }
 0x256   : > { %8962 = vmatpush1.bf16.msra.mxu1 %v13857_v58  ;;  %v11615_v14 = vsub.f32 %v1039_v53, %v1607_v57  ;;  %v13865_v58 = vld [vmem:[#allocation75_spill] sm:$0xff]  ;;  %v13872_v53 = vld [vmem:[#allocation80_spill] sm:$0xff] }
 0x257   : > { %8964 = vmatprep.subr.bf16.mxu1 %v13859_v47  ;;  %13861 = vst [vmem:[#allocation160_spill] sm:$0xff] %v11611_v46  ;;  %v13868_v47 = vld [vmem:[#allocation78_spill] sm:$0xff] }
 0x258   : > { %8870 = vmatpush1.bf16.msra.mxu0 %v13860_v60  ;;  %13864 = vst [vmem:[#allocation161_spill] sm:$0xff] %v11615_v14  ;;  %v13913_v60 = vld [vmem:[#allocation118_spill] sm:$0xff] }
 0x259   : > { %8872 = vmatprep.subr.bf16.mxu0 %v13863_v63  ;;  %v13911_v63 = vld [vmem:[#allocation116_spill] sm:$0xff] }
 0x25a   : > { %8966 = vmatpush1.bf16.msra.mxu1 %v13862_v11 }
 0x25b   : > { %8968 = vmatprep.subr.bf16.mxu1 %v13865_v58 }
 0x25c   : > { %8874 = vmatpush1.bf16.msra.mxu0 %v13866_v34  ;;  %v13909_v34 = vld [vmem:[#allocation114_spill] sm:$0xff] }
 0x25d   : > { %8876 = vmatprep.subr.bf16.mxu0 %v13868_v47 }
 0x25e   : > { %8970 = vmatpush1.bf16.msra.mxu1 %v13867_v39  ;;  %v1747_v20 = vpop.f32.mrb[12].mxu0  ;;  %v13874_v39 = vld [vmem:[#allocation81_spill] sm:$0xff] }
 0x25f   : > { %8972 = vmatprep.subr.bf16.mxu1 %v13869_v50  ;;  %v11622_v12 = vsub.f32 %v1179_v55, %v1747_v20  ;;  %v1749_v1 = vpop.f32.mrb[13].mxu0  ;;  %v13876_v50 = vld [vmem:[#allocation83_spill] sm:$0xff]  ;;  %v13877_v20 = vld [vmem:[#allocation84_spill] sm:$0xff]  ;;  %v13878_v55 = vld [vmem:[#allocation85_spill] sm:$0xff] }
 0x260   : > { %v1960_v44 = vpop.f32.mrb[16].mxu1  ;;  %8878 = vmatpush1.bf16.msra.mxu0 %v13872_v53  ;;  %v11628_v58 = vsub.f32 %v1181_v24, %v1749_v1  ;;  %v13882_v1 = vld [vmem:[#allocation89_spill] sm:$0xff]  ;;  %v13884_v24 = vld [vmem:[#allocation91_spill] sm:$0xff] }
 0x261   : > { %13870 = vst [vmem:[#allocation162_spill] sm:$0xff] %v11622_v12  ;;  %v11625_v11 = vsub.f32 %v11422_v45, %v1960_v44  ;;  %v1962_v57 = vpop.f32.mrb[17].mxu1  ;;  %8880 = vmatprep.subr.bf16.mxu0 %v13875_v23  ;;  %v13879_v45 = vld [vmem:[#allocation86_spill] sm:$0xff]  ;;  %v13880_v44 = vld [vmem:[#allocation87_spill] sm:$0xff] }
 0x262   : > { %13873 = vst [vmem:[#allocation164_spill] sm:$0xff] %v11628_v58  ;;  %v11631_v7 = vsub.f32 %v11424_v18, %v1962_v57  ;;  %8974 = vmatpush1.bf16.msra.mxu1 %v13874_v39  ;;  %v13883_v18 = vld [vmem:[#allocation90_spill] sm:$0xff]  ;;  %v13885_v57 = vld [vmem:[#allocation92_spill] sm:$0xff]  ;;  %v13890_v39 = vld [vmem:[#allocation97_spill] sm:$0xff] }
 0x263   : > { %13871 = vst [vmem:[#allocation163_spill] sm:$0xff] %v11625_v11  ;;  %8976 = vmatprep.subr.bf16.mxu1 %v13876_v50  ;;  %v13886_v50 = vld [vmem:[#allocation93_spill] sm:$0xff] }
 0x264   : > { %8882 = vmatpush1.bf16.msra.mxu0 %v13877_v20  ;;  %v13903_v20 = vld [vmem:[#allocation110_spill] sm:$0xff] }
 0x265   : > { %8884 = vmatprep.subr.bf16.mxu0 %v13879_v45  ;;  %v13902_v45 = vld [vmem:[#allocation109_spill] sm:$0xff] }
 0x266   : > { %8978 = vmatpush1.bf16.msra.mxu1 %v13878_v55  ;;  %v13889_v55 = vld [vmem:[#allocation96_spill] sm:$0xff] }
 0x267   : > { %8980 = vmatprep.subr.bf16.mxu1 %v13880_v44  ;;  %v13887_v44 = vld [vmem:[#allocation94_spill] sm:$0xff] }
 0x268   : > { %8886 = vmatpush1.bf16.msra.mxu0 %v13881_v5  ;;  %v13901_v5 = vld [vmem:[#allocation108_spill] sm:$0xff] }
 0x269   : > { %8920 = vmatprep.subr.bf16.mxu0 %v13883_v18  ;;  %v13891_v18 = vld [vmem:[#allocation98_spill] sm:$0xff] }
 0x26a   : > { %8982 = vmatpush1.bf16.msra.mxu1 %v13882_v1  ;;  %v13888_v1 = vld [vmem:[#allocation95_spill] sm:$0xff] }
 0x26b   : > { %9016 = vmatprep.subr.bf16.mxu1 %v13884_v24  ;;  %2922 = vmatmul.mubr.f32.vlgmr.msra.gmra.mrb[18].mxu0 %v11530_v33 }
 0x26c   : > { %8922 = vmatpush1.bf16.msra.mxu0 %v13885_v57  ;;  %2927 = vmatprep.mubr.f32.mxu0 %v13641_v59  ;;  %v13892_v57 = vld [vmem:[#allocation99_spill] sm:$0xff] }
 0x26d   : > { %3153 = vmatmul.mubr.f32.vlgmr.msra.gmra.mrb[26].mxu1 %v11530_v33  ;;  %8924 = vmatprep.subr.bf16.mxu0 %v13887_v44  ;;  %v13894_v44 = vld [vmem:[#allocation101_spill] sm:$0xff] }
 0x26e   : > { %9018 = vmatpush1.bf16.msra.mxu1 %v13886_v50  ;;  %3158 = vmatprep.mubr.f32.mxu1 %v13641_v59 }
 0x26f   : > { %2928 = vmatmul.mubr.f32.gmra.mrb[20].mxu0 %v11539_v13  ;;  %9020 = vmatprep.subr.bf16.mxu1 %v13888_v1 }
 0x270   : > { %8926 = vmatpush1.bf16.msra.mxu0 %v13889_v55  ;;  %3075 = vmatprep.mubr.f32.mxu0 %v13641_v59  ;;  %v13898_v55 = vld [vmem:[#allocation105_spill] sm:$0xff] }
 0x271   : > { %3159 = vmatmul.mubr.f32.gmra.mrb[28].mxu1 %v11539_v13  ;;  %8928 = vmatprep.subr.bf16.mxu0 %v13891_v18  ;;  %v13900_v18 = vld [vmem:[#allocation107_spill] sm:$0xff] }
 0x272   : > { %9022 = vmatpush1.bf16.msra.mxu1 %v13890_v39  ;;  %3306 = vmatprep.mubr.f32.mxu1 %v13641_v59 }
 0x273   : > { %9024 = vmatprep.subr.bf16.mxu1 %v13892_v57 }
 0x274   : > { %8930 = vmatpush1.bf16.msra.mxu0 %v13893_v48  ;;  %v13904_v48 = vld [vmem:[#allocation111_spill] sm:$0xff] }
 0x275   : > { %8932 = vmatprep.subr.bf16.mxu0 %v13895_v54 }
 0x276   : > { %9026 = vmatpush1.bf16.msra.mxu1 %v13894_v44 }
 0x277   : > { %9028 = vmatprep.subr.bf16.mxu1 %v13896_v15 }
 0x278   : > { %8934 = vmatpush1.bf16.msra.mxu0 %v13897_v51  ;;  %v13906_v51 = vld [vmem:[#allocation112_spill] sm:$0xff] }
 0x279   : > { %8936 = vmatprep.subr.bf16.mxu0 %v13899_v37  ;;  %v13908_v37 = vld [vmem:[#allocation113_spill] sm:$0xff] }
 0x27a   : > { %9030 = vmatpush1.bf16.msra.mxu1 %v13898_v55 }
 0x27b   : > { %9032 = vmatprep.subr.bf16.mxu1 %v13900_v18 }
 0x27c   : > { %8938 = vmatpush1.bf16.msra.mxu0 %v13901_v5  ;;  %v13910_v5 = vld [vmem:[#allocation115_spill] sm:$0xff] }
 0x27d   : > { %8940 = vmatprep.subr.bf16.mxu0 %v13903_v20  ;;  %v13912_v20 = vld [vmem:[#allocation117_spill] sm:$0xff] }
 0x27e   : > { %9034 = vmatpush1.bf16.msra.mxu1 %v13902_v45  ;;  %v1889_v23 = vpop.f32.mrb[14].mxu0 }
 0x27f   : > { %9036 = vmatprep.subr.bf16.mxu1 %v13904_v48  ;;  %v11673_v54 = vsub.f32 %v11598_v27, %v1889_v23  ;;  %v1891_v53 = vpop.f32.mrb[15].mxu0  ;;  %v13914_v23 = vld [vmem:[#allocation119_spill] sm:$0xff]  ;;  %v13915_v27 = vld [vmem:[#allocation120_spill] sm:$0xff] }
 0x280   : > { %8942 = vmatpush1.bf16.msra.mxu0 %v13906_v51  ;;  %v11677_v47 = vsub.f32 %v11601_v30, %v1891_v53  ;;  %v13916_v51 = vld [vmem:[#allocation121_spill] sm:$0xff]  ;;  %v13917_v30 = vld [vmem:[#allocation122_spill] sm:$0xff]  ;;  %v13918_v53 = vld [vmem:[#allocation123_spill] sm:$0xff] }
 0x281   : > { %13905 = vst [vmem:[#allocation165_spill] sm:$0xff] %v11673_v54  ;;  %8944 = vmatprep.subr.bf16.mxu0 %v13909_v34  ;;  %v13924_v34 = vld [vmem:[#allocation129_spill] sm:$0xff] }
 0x282   : > { %13907 = vst [vmem:[#allocation166_spill] sm:$0xff] %v11677_v47  ;;  %9038 = vmatpush1.bf16.msra.mxu1 %v13908_v37 }
 0x283   : > { %9040 = vmatprep.subr.bf16.mxu1 %v13910_v5 }
 0x284   : > { %8946 = vmatpush1.bf16.msra.mxu0 %v13911_v63  ;;  %v13919_v63 = vld [vmem:[#allocation124_spill] sm:$0xff] }
 0x285   : > { %8948 = vmatprep.subr.bf16.mxu0 %v13913_v60  ;;  %v13921_v60 = vld [vmem:[#allocation126_spill] sm:$0xff] }
 0x286   : > { %9042 = vmatpush1.bf16.msra.mxu1 %v13912_v20 }
 0x287   : > { %9044 = vmatprep.subr.bf16.mxu1 %v13914_v23 }
 0x288   : > { %8950 = vmatpush1.bf16.msra.mxu0 %v13915_v27  ;;  %v13920_v27 = vld [vmem:[#allocation125_spill] sm:$0xff] }
 0x289   : > { %8984 = vmatprep.subr.bf16.mxu0 %v13917_v30  ;;  %v13922_v30 = vld [vmem:[#allocation127_spill] sm:$0xff] }
 0x28a   : > { %9046 = vmatpush1.bf16.msra.mxu1 %v13916_v51 }
 0x28b   : > { %3076 = vmatmul.mubr.f32.vlgmr.msra.gmra.mrb[22].mxu0 %v11530_v33 }
 0x28c   : > { %8986 = vmatpush1.bf16.msra.mxu0 %v13918_v53  ;;  %3081 = vmatprep.mubr.f32.mxu0 %v13641_v59  ;;  %v13923_v53 = vld [vmem:[#allocation128_spill] sm:$0xff] }
 0x28d   : > { %3307 = vmatmul.mubr.f32.vlgmr.msra.gmra.mrb[30].mxu1 %v11530_v33  ;;  %8988 = vmatprep.subr.bf16.mxu0 %v13919_v63  ;;  %v13926_v63 = vld [vmem:[#allocation131_spill] sm:$0xff] }
 0x28e   : > { %3312 = vmatprep.mubr.f32.mxu1 %v13641_v59 }
 0x28f   : > { %3082 = vmatmul.mubr.f32.gmra.mrb[24].mxu0 %v11539_v13 }
 0x290   : > { %8990 = vmatpush1.bf16.msra.mxu0 %v13920_v27  ;;  %3229 = vmatprep.mubr.f32.mxu0 %v13641_v59 }
 0x291   : > { %3313 = vmatmul.mubr.f32.gmra.mrb[32].mxu1 %v11539_v13  ;;  %8992 = vmatprep.subr.bf16.mxu0 %v13921_v60 }
 0x292   : > { %3593 = vmatprep.mubr.f32.mxu1 %v13641_v59 }
 0x294   : > { %8994 = vmatpush1.bf16.msra.mxu0 %v13922_v30  ;;  %v13931_v30 = vld [vmem:[#allocation134_spill] sm:$0xff] }
 0x295   : > { %8996 = vmatprep.subr.bf16.mxu0 %v13923_v53  ;;  %v13932_v53 = vld [vmem:[#allocation135_spill] sm:$0xff] }
 0x298   : > { %8998 = vmatpush1.bf16.msra.mxu0 %v13924_v34  ;;  %v13933_v34 = vld [vmem:[#allocation136_spill] sm:$0xff] }
 0x299   : > { %9000 = vmatprep.subr.bf16.mxu0 %v13925_v17  ;;  %v13934_v17 = vld [vmem:[#allocation137_spill] sm:$0xff] }
 0x29c   : > { %9002 = vmatpush1.bf16.msra.mxu0 %v13926_v63  ;;  %v13935_v63 = vld [vmem:[#allocation138_spill] sm:$0xff] }
 0x29d   : > { %9004 = vmatprep.subr.bf16.mxu0 %v13927_v2  ;;  %v13949_v2 = vld [vmem:[#allocation152_spill] sm:$0xff] }
 0x29e   : > { %v2031_v31 = vpop.f32.mrb[16].mxu0 }
 0x29f   : > { %v11708_v27 = vsub.f32 %v11605_v22, %v2031_v31  ;;  %v2033_v60 = vpop.f32.mrb[17].mxu0  ;;  %v13936_v31 = vld [vmem:[#allocation139_spill] sm:$0xff]  ;;  %v13937_v22 = vld [vmem:[#allocation140_spill] sm:$0xff] }
 0x2a0   : > { %9006 = vmatpush1.bf16.msra.mxu0 %v13929_v0  ;;  %v11712_v56 = vsub.f32 %v11608_v4, %v2033_v60  ;;  %v13938_v60 = vld [vmem:[#allocation141_spill] sm:$0xff]  ;;  %v13939_v4 = vld [vmem:[#allocation142_spill] sm:$0xff] }
 0x2a1   : > { %13928 = vst [vmem:[#allocation167_spill] sm:$0xff] %v11708_v27  ;;  %9008 = vmatprep.subr.bf16.mxu0 %v13931_v30  ;;  %v13945_v30 = vld [vmem:[#allocation148_spill] sm:$0xff]  ;;  %v13947_v0 = vld [vmem:[#allocation150_spill] sm:$0xff] }
 0x2a2   : > { %13930 = vst [vmem:[#allocation168_spill] sm:$0xff] %v11712_v56 }
 0x2a4   : > { %9010 = vmatpush1.bf16.msra.mxu0 %v13932_v53  ;;  %v13943_v53 = vld [vmem:[#allocation146_spill] sm:$0xff] }
 0x2a5   : > { %9012 = vmatprep.subr.bf16.mxu0 %v13933_v34  ;;  %v13940_v34 = vld [vmem:[#allocation143_spill] sm:$0xff] }
 0x2a8   : > { %9014 = vmatpush1.bf16.msra.mxu0 %v13934_v17  ;;  %v13941_v17 = vld [vmem:[#allocation144_spill] sm:$0xff] }
 0x2a9   : > { %9048 = vmatprep.subr.bf16.mxu0 %v13935_v63  ;;  %v13942_v63 = vld [vmem:[#allocation145_spill] sm:$0xff] }
 0x2ab   : > { %3230 = vmatmul.mubr.f32.vlgmr.msra.gmra.mrb[26].mxu0 %v11530_v33 }
 0x2ac   : > { %9050 = vmatpush1.bf16.msra.mxu0 %v13936_v31  ;;  %3235 = vmatprep.mubr.f32.mxu0 %v13641_v59  ;;  %v13944_v31 = vld [vmem:[#allocation147_spill] sm:$0xff] }
 0x2ad   : > { %9052 = vmatprep.subr.bf16.mxu0 %v13937_v22  ;;  %v13946_v22 = vld [vmem:[#allocation149_spill] sm:$0xff] }
 0x2af   : > { %3236 = vmatmul.mubr.f32.gmra.mrb[28].mxu0 %v11539_v13 }
 0x2b0   : > { %9054 = vmatpush1.bf16.msra.mxu0 %v13938_v60  ;;  %3383 = vmatprep.mubr.f32.mxu0 %v13641_v59  ;;  %v13948_v60 = vld [vmem:[#allocation151_spill] sm:$0xff] }
 0x2b1   : > { %9056 = vmatprep.subr.bf16.mxu0 %v13939_v4  ;;  %v13950_v4 = vld [vmem:[#allocation153_spill] sm:$0xff] }
 0x2b4   : > { %9058 = vmatpush1.bf16.msra.mxu0 %v13940_v34 }
 0x2b5   : > { %9060 = vmatprep.subr.bf16.mxu0 %v13941_v17 }
 0x2b8   : > { %9062 = vmatpush1.bf16.msra.mxu0 %v13942_v63 }
 0x2b9   : > { %9064 = vmatprep.subr.bf16.mxu0 %v13943_v53 }
 0x2bc   : > { %9066 = vmatpush1.bf16.msra.mxu0 %v13944_v31  ;;  %v11742_v31 = vld [vmem:[#allocation4 + $0x20] sm:$0xff] }
 0x2bd   : > { %9068 = vmatprep.subr.bf16.mxu0 %v13945_v30  ;;  %v11744_v30 = vld [vmem:[#allocation4 + $0x28] sm:$0xff] }
 0x2c0   : > { %9070 = vmatpush1.bf16.msra.mxu0 %v13946_v22  ;;  %v10241_v22 = vmov 16  }
 0x2c1   : > { %9072 = vmatprep.subr.bf16.mxu0 %v13947_v0  ;;  %9999 = vset.pattern.permute.xlu1 %v10241_v22 }
 0x2c2   : > { %9998 = vset.pattern.permute.xlu0 %v10241_v22  ;;  %3507 = vperm.xlu1 %9999, %v11744_v30  }
 0x2c3   : > { %3502 = vperm.xlu0 %9998, %v11742_v31  }
 0x2c4   : > { %9074 = vmatpush1.bf16.msra.mxu0 %v13948_v60 }
 0x2c5   : > { %9076 = vmatprep.subr.bf16.mxu0 %v13949_v2  ;;  %v11754_v2 = vld [vmem:[#allocation4 + $0x38] sm:$0xff] }
 0x2c7   : > { %3517 = vperm.xlu0 %9998, %v11754_v2  }
 0x2c8   : > { %9078 = vmatpush1.bf16.msra.mxu0 %v13950_v4  ;;  %v2053_v4 = vmul.f32 %v11471_v62, %v11471_v62 }
 0x2ca   : > { %v2074_v22 = vrot.slane %v2053_v4, 4 }
 0x2cb   : > { %3384 = vmatmul.mubr.f32.vlgmr.msra.gmra.mrb[30].mxu0 %v11530_v33  ;;  %v2052_v33 = vmul.f32 %v11467_v35, %v11467_v35 }
 0x2cc   : > { %3389 = vmatprep.mubr.f32.mxu0 %v13641_v59  ;;  %v2075_v53 = vadd.f32 %v2074_v22, %v2053_v4 }
 0x2cd   : > { %v2068_v60 = vrot.slane %v2052_v33, 4 }
 0x2ce   : > { %v2076_v17 = vrot.slane %v2075_v53, 2 }
 0x2cf   : > { %3390 = vmatmul.mubr.f32.gmra.mrb[32].mxu0 %v11539_v13  ;;  %v11752_v13 = vld [vmem:[#allocation4 + $0x30] sm:$0xff]  ;;  %v2069_v0 = vadd.f32 %v2068_v60, %v2052_v33 }
 0x2d0   : > { %3682 = vmatprep.mubr.f32.mxu0 %v13641_v59  ;;  %3512 = vperm.xlu1 %9999, %v11752_v13   ;;  %v2077_v32 = vadd.f32 %v2076_v17, %v2075_v53  ;;  %v2056_v17 = vmul.f32 %v11513_v9, %v11513_v9 }
 0x2d1   : > { %v2070_v63 = vrot.slane %v2069_v0, 2 }
 0x2d2   : > { %v2078_v42 = vrot.slane %v2077_v32, 1 }
 0x2d3   : > { %v2071_v34 = vadd.f32 %v2070_v63, %v2069_v0 }
 0x2d4   : > { %v2079_v43 = vadd.f32 %v2078_v42, %v2077_v32 }
 0x2d5   : > { %v2072_v35 = vrot.slane %v2071_v34, 1 }
 0x2d6   : > { %v3405_v28 = vmul.f32 %v11758_v49, %v2079_v43  ;;  %v3421_v0 = vmul.f32 %v11760_v41, %v2079_v43 }
 0x2d7   : > { %v2073_v62 = vadd.f32 %v2072_v35, %v2071_v34  ;;  %v2057_v34 = vmul.f32 %v11517_v29, %v11517_v29 }
 0x2d9   : > { %v3404_v25 = vmul.f32 %v11758_v49, %v2073_v62  ;;  %v3420_v4 = vmul.f32 %v11760_v41, %v2073_v62  ;;  %v2098_v62 = vrot.slane %v2057_v34, 4 }
 0x2db   : > { %v2099_v43 = vadd.f32 %v2098_v62, %v2057_v34 }
 0x300   : > { %v2846_v3 = vpop.f32.mrb[18].mxu1 }
 0x301   : > { %v2848_v10 = vpop.f32.mrb[19].mxu1  ;;  %v3436_v60 = vadd.f32 %v3404_v25, %v2846_v3  ;;  %v2092_v25 = vrot.slane %v2056_v17, 4 }
 0x302   : > { %v3437_v33 = vadd.f32 %v3405_v28, %v2848_v10 }
 0x303   : > { %v3468_v53 = vmax.f32 %v3436_v60, 0.0  ;;  %v2093_v10 = vadd.f32 %v2092_v25, %v2056_v17  ;;  %v2054_v25 = vmul.f32 %v11611_v46, %v11611_v46 }
 0x304   : > { %v2852_v63 = vpop.f32.mrb[20].mxu1  ;;  %v3469_v40 = vmax.f32 %v3437_v33, 0.0 }
 0x305   : > { %v3452_v35 = vadd.f32 %v3420_v4, %v2852_v63  ;;  %v2854_v42 = vpop.f32.mrb[21].mxu1  ;;  %v2094_v4 = vrot.slane %v2093_v10, 2  ;;  %v2100_v63 = vrot.slane %v2099_v43, 2 }
 0x306   : > { %v3453_v32 = vadd.f32 %v3421_v0, %v2854_v42 }
 0x307   : > { %v3484_v22 = vmax.f32 %v3452_v35, 0.0  ;;  %v2095_v60 = vadd.f32 %v2094_v4, %v2093_v10  ;;  %v2101_v33 = vadd.f32 %v2100_v63, %v2099_v43  ;;  %v2060_v10 = vmul.f32 %v11565_v52, %v11565_v52 }
 0x308   : > { %v3485_v36 = vmax.f32 %v3453_v32, 0.0  ;;  %v2055_v43 = vmul.f32 %v11615_v14, %v11615_v14 }
 0x309   : > { %v9081_v3 = vpack.c.bf16 %v3484_v22, %v3468_v53 }
 0x30a   : > { %v9079_v28 = vpack.c.bf16 %v3485_v36, %v3469_v40  ;;  %v2096_v36 = vrot.slane %v2095_v60, 1  ;;  %v2102_v40 = vrot.slane %v2101_v33, 1 }
 0x30c   : > { %9080 = vmatprep.subr.bf16.mxu1 %v9079_v28  ;;  %v2097_v0 = vadd.f32 %v2096_v36, %v2095_v60  ;;  %v2103_v17 = vadd.f32 %v2102_v40, %v2101_v33  ;;  %v2061_v60 = vmul.f32 %v11569_v26, %v11569_v26 }
 0x30d   : > { %9082 = vmatpush1.bf16.msra.mxu1 %v9081_v3 }
 0x30e   : > { %v3408_v42 = vmul.f32 %v11758_v49, %v2097_v0  ;;  %v3409_v32 = vmul.f32 %v11758_v49, %v2103_v17  ;;  %v3424_v22 = vmul.f32 %v11760_v41, %v2097_v0  ;;  %v3425_v28 = vmul.f32 %v11760_v41, %v2103_v17 }
 0x30f   : > { %v2080_v0 = vrot.slane %v2054_v25, 4  ;;  %v2122_v9 = vrot.slane %v2061_v60, 4 }
 0x310   : > { %7791 = vmatmul.mubr.msk.f32.vlgmr.msra.gmra.mrb[34].mxu1 %vm3520_vm2, %v11742_v31 }
 0x311   : > { %3599 = vmatprep.mubr.f32.mxu1 %v13641_v59  ;;  %v2081_v52 = vadd.f32 %v2080_v0, %v2054_v25 }
 0x314   : > { %7792 = vmatmul.mubr.msk.f32.gmra.mrb[36].mxu1 %vm3520_vm2, %v11744_v30 }
 0x315   : > { %3605 = vmatprep.mubr.f32.mxu1 %v13641_v59 }
 0x318   : > { %7793 = vmatmul.mubr.msk.f32.gmra.mrb[38].mxu1 %vm3520_vm2, %v11752_v13 }
 0x319   : > { %3611 = vmatprep.mubr.f32.mxu1 %v13641_v59 }
 0x31c   : > { %7794 = vmatmul.mubr.msk.f32.gmra.mrb[40].mxu1 %vm3520_vm2, %v11754_v2 }
 0x31d   : > { %3771 = vmatprep.mubr.f32.mxu1 %v13641_v59 }
 0x320   : > { %v3000_v35 = vpop.f32.mrb[22].mxu1 }
 0x321   : > { %v3002_v34 = vpop.f32.mrb[23].mxu1  ;;  %v3440_v53 = vadd.f32 %v3408_v42, %v3000_v35 }
 0x322   : > { %v3441_v3 = vadd.f32 %v3409_v32, %v3002_v34  ;;  %v2116_v34 = vrot.slane %v2060_v10, 4  ;;  %v2086_v32 = vrot.slane %v2055_v43, 4 }
 0x323   : > { %v3472_v36 = vmax.f32 %v3440_v53, 0.0 }
 0x324   : > { %v3006_v62 = vpop.f32.mrb[24].mxu1  ;;  %v3473_v35 = vmax.f32 %v3441_v3, 0.0  ;;  %v2117_v46 = vadd.f32 %v2116_v34, %v2060_v10  ;;  %v2087_v14 = vadd.f32 %v2086_v32, %v2055_v43 }
 0x325   : > { %v3456_v4 = vadd.f32 %v3424_v22, %v3006_v62  ;;  %v3008_v63 = vpop.f32.mrb[25].mxu1  ;;  %v2123_v22 = vadd.f32 %v2122_v9, %v2061_v60  ;;  %v2082_v62 = vrot.slane %v2081_v52, 2 }
 0x326   : > { %v3457_v33 = vadd.f32 %v3425_v28, %v3008_v63  ;;  %v2118_v53 = vrot.slane %v2117_v46, 2  ;;  %v2088_v28 = vrot.slane %v2087_v14, 2 }
 0x327   : > { %v3488_v40 = vmax.f32 %v3456_v4, 0.0  ;;  %v2124_v3 = vrot.slane %v2123_v22, 2  ;;  %v2083_v4 = vadd.f32 %v2082_v62, %v2081_v52 }
 0x328   : > { %v3489_v42 = vmax.f32 %v3457_v33, 0.0  ;;  %v2089_v25 = vadd.f32 %v2088_v28, %v2087_v14 }
 0x329   : > { %v9089_v17 = vpack.c.bf16 %v3488_v40, %v3472_v36  ;;  %v2125_v10 = vadd.f32 %v2124_v3, %v2123_v22  ;;  %v2084_v9 = vrot.slane %v2083_v4, 1 }
 0x32a   : > { %v9087_v29 = vpack.c.bf16 %v3489_v42, %v3473_v35  ;;  %v2090_v63 = vrot.slane %v2089_v25, 1 }
 0x32b   : > { %v2126_v60 = vrot.slane %v2125_v10, 1  ;;  %v2085_v33 = vadd.f32 %v2084_v9, %v2083_v4 }
 0x32c   : > { %9088 = vmatprep.subr.bf16.mxu1 %v9087_v29  ;;  %v2119_v29 = vadd.f32 %v2118_v53, %v2117_v46  ;;  %v2091_v52 = vadd.f32 %v2090_v63, %v2089_v25  ;;  %v2058_v25 = vmul.f32 %v11622_v12, %v11622_v12 }
 0x32d   : > { %9090 = vmatpush1.bf16.msra.mxu1 %v9089_v17  ;;  %v2127_v46 = vadd.f32 %v2126_v60, %v2125_v10  ;;  %v3406_v40 = vmul.f32 %v11758_v49, %v2085_v33  ;;  %v3422_v62 = vmul.f32 %v11760_v41, %v2085_v33  ;;  %v2059_v33 = vmul.f32 %v11628_v58, %v11628_v58 }
 0x32e   : > { %v2120_v43 = vrot.slane %v2119_v29, 1  ;;  %v3407_v34 = vmul.f32 %v11758_v49, %v2091_v52 }
 0x32f   : > { %v3413_v22 = vmul.f32 %v11758_v49, %v2127_v46  ;;  %v3429_v60 = vmul.f32 %v11760_v41, %v2127_v46  ;;  %v2104_v46 = vrot.slane %v2058_v25, 4  ;;  %v2110_v19 = vrot.slane %v2059_v33, 4 }
 0x330   : > { %7799 = vmatmul.mubr.msk.f32.vlgmr.msra.gmra.mrb[42].mxu1 %vm3520_vm2, %v11742_v31  ;;  %v2121_v36 = vadd.f32 %v2120_v43, %v2119_v29  ;;  %v3423_v29 = vmul.f32 %v11760_v41, %v2091_v52  ;;  %v2065_v52 = vmul.f32 %v11631_v7, %v11631_v7 }
 0x331   : > { %3777 = vmatprep.mubr.f32.mxu1 %v13641_v59 }
 0x332   : > { %v3412_v42 = vmul.f32 %v11758_v49, %v2121_v36  ;;  %v3428_v4 = vmul.f32 %v11760_v41, %v2121_v36 }
 0x334   : > { %7800 = vmatmul.mubr.msk.f32.gmra.mrb[44].mxu1 %vm3520_vm2, %v11744_v30 }
 0x335   : > { %3783 = vmatprep.mubr.f32.mxu1 %v13641_v59 }
 0x338   : > { %7801 = vmatmul.mubr.msk.f32.gmra.mrb[46].mxu1 %vm3520_vm2, %v11752_v13 }
 0x339   : > { %3789 = vmatprep.mubr.f32.mxu1 %v13641_v59 }
 0x33c   : > { %7802 = vmatmul.mubr.msk.f32.gmra.mrb[48].mxu1 %vm3520_vm2, %v11754_v2 }
 0x33d   : > { %3949 = vmatprep.mubr.f32.mxu1 %v13641_v59 }
 0x33e   : > { %v2923_v14 = vpop.f32.mrb[18].mxu0 }
 0x33f   : > { %v2925_v35 = vpop.f32.mrb[19].mxu0  ;;  %v3438_v17 = vadd.f32 %v3406_v40, %v2923_v14  ;;  %v2064_v14 = vmul.f32 %v11625_v11, %v11625_v11 }
 0x340   : > { %v3154_v0 = vpop.f32.mrb[26].mxu1  ;;  %v3439_v28 = vadd.f32 %v3407_v34, %v2925_v35 }
 0x341   : > { %v3156_v32 = vpop.f32.mrb[27].mxu1  ;;  %v3444_v53 = vadd.f32 %v3412_v42, %v3154_v0  ;;  %v3470_v35 = vmax.f32 %v3438_v17, 0.0  ;;  %v2140_v38 = vrot.slane %v2064_v14, 4 }
 0x342   : > { %v2929_v3 = vpop.f32.mrb[20].mxu0  ;;  %v3445_v10 = vadd.f32 %v3413_v22, %v3156_v32  ;;  %v3471_v22 = vmax.f32 %v3439_v28, 0.0 }
 0x343   : > { %v3454_v9 = vadd.f32 %v3422_v62, %v2929_v3  ;;  %v2931_v63 = vpop.f32.mrb[21].mxu0  ;;  %v3476_v32 = vmax.f32 %v3444_v53, 0.0  ;;  %v2141_v17 = vadd.f32 %v2140_v38, %v2064_v14 }
 0x344   : > { %v3160_v43 = vpop.f32.mrb[28].mxu1  ;;  %v3455_v0 = vadd.f32 %v3423_v29, %v2931_v63  ;;  %v3477_v26 = vmax.f32 %v3445_v10, 0.0  ;;  %v2146_v29 = vrot.slane %v2065_v52, 4  ;;  %v2105_v63 = vadd.f32 %v2104_v46, %v2058_v25 }
 0x345   : > { %v3460_v40 = vadd.f32 %v3428_v4, %v3160_v43  ;;  %v3162_v36 = vpop.f32.mrb[29].mxu1  ;;  %v3486_v42 = vmax.f32 %v3454_v9, 0.0  ;;  %v2111_v9 = vadd.f32 %v2110_v19, %v2059_v33  ;;  %v2142_v10 = vrot.slane %v2141_v17, 2 }
 0x346   : > { %v3461_v34 = vadd.f32 %v3429_v60, %v3162_v36  ;;  %v3487_v3 = vmax.f32 %v3455_v0, 0.0  ;;  %v2147_v53 = vadd.f32 %v2146_v29, %v2065_v52  ;;  %v2106_v28 = vrot.slane %v2105_v63, 2 }
 0x347   : > { %v3492_v62 = vmax.f32 %v3460_v40, 0.0  ;;  %v9085_v12 = vpack.c.bf16 %v3486_v42, %v3470_v35  ;;  %v2112_v60 = vrot.slane %v2111_v9, 2  ;;  %v2143_v38 = vadd.f32 %v2142_v10, %v2141_v17 }
 0x348   : > { %v3493_v11 = vmax.f32 %v3461_v34, 0.0  ;;  %v9083_v4 = vpack.c.bf16 %v3487_v3, %v3471_v22  ;;  %v2107_v19 = vadd.f32 %v2106_v28, %v2105_v63  ;;  %v2062_v28 = vmul.f32 %v11673_v54, %v11673_v54 }
 0x349   : > { %v9097_v58 = vpack.c.bf16 %v3492_v62, %v3476_v32  ;;  %v2144_v25 = vrot.slane %v2143_v38, 1 }
 0x34a   : > { %v9095_v43 = vpack.c.bf16 %v3493_v11, %v3477_v26  ;;  %9084 = vmatprep.subr.bf16.mxu0 %v9083_v4  ;;  %v2148_v26 = vrot.slane %v2147_v53, 2  ;;  %v2113_v11 = vadd.f32 %v2112_v60, %v2111_v9 }
 0x34b   : > { %9086 = vmatpush1.bf16.msra.mxu0 %v9085_v12  ;;  %v2108_v12 = vrot.slane %v2107_v19, 1  ;;  %v2145_v0 = vadd.f32 %v2144_v25, %v2143_v38 }
 0x34c   : > { %9096 = vmatprep.subr.bf16.mxu1 %v9095_v43  ;;  %v2114_v14 = vrot.slane %v2113_v11, 1 }
 0x34d   : > { %9098 = vmatpush1.bf16.msra.mxu1 %v9097_v58  ;;  %v2149_v58 = vadd.f32 %v2148_v26, %v2147_v53  ;;  %v2109_v40 = vadd.f32 %v2108_v12, %v2107_v19  ;;  %v3416_v22 = vmul.f32 %v11758_v49, %v2145_v0  ;;  %v3432_v9 = vmul.f32 %v11760_v41, %v2145_v0 }
 0x34e   : > { %7795 = vmatmul.mubr.msk.f32.vlgmr.msra.gmra.mrb[34].mxu0 %vm3520_vm2, %v11742_v31  ;;  %v2115_v36 = vadd.f32 %v2114_v14, %v2113_v11  ;;  %v2063_v11 = vmul.f32 %v11677_v47, %v11677_v47 }
 0x34f   : > { %3688 = vmatprep.mubr.f32.mxu0 %v13641_v59  ;;  %v2150_v33 = vrot.slane %v2149_v58, 1  ;;  %v3410_v42 = vmul.f32 %v11758_v49, %v2109_v40  ;;  %v3426_v29 = vmul.f32 %v11760_v41, %v2109_v40 }
 0x350   : > { %7807 = vmatmul.mubr.msk.f32.vlgmr.msra.gmra.mrb[50].mxu1 %vm3520_vm2, %v11742_v31  ;;  %v3411_v62 = vmul.f32 %v11758_v49, %v2115_v36  ;;  %v3427_v53 = vmul.f32 %v11760_v41, %v2115_v36 }
 0x351   : > { %3955 = vmatprep.mubr.f32.mxu1 %v13641_v59  ;;  %v2151_v52 = vadd.f32 %v2150_v33, %v2149_v58 }
 0x352   : > { %7796 = vmatmul.mubr.msk.f32.gmra.mrb[36].mxu0 %vm3520_vm2, %v11744_v30 }
 0x353   : > { %3694 = vmatprep.mubr.f32.mxu0 %v13641_v59  ;;  %v3417_v4 = vmul.f32 %v11758_v49, %v2151_v52  ;;  %v3433_v38 = vmul.f32 %v11760_v41, %v2151_v52 }
 0x354   : > { %7808 = vmatmul.mubr.msk.f32.gmra.mrb[52].mxu1 %vm3520_vm2, %v11744_v30 }
 0x355   : > { %3961 = vmatprep.mubr.f32.mxu1 %v13641_v59 }
 0x356   : > { %7797 = vmatmul.mubr.msk.f32.gmra.mrb[38].mxu0 %vm3520_vm2, %v11752_v13 }
 0x357   : > { %3700 = vmatprep.mubr.f32.mxu0 %v13641_v59 }
 0x358   : > { %7809 = vmatmul.mubr.msk.f32.gmra.mrb[54].mxu1 %vm3520_vm2, %v11752_v13 }
 0x359   : > { %3967 = vmatprep.mubr.f32.mxu1 %v13641_v59 }
 0x35a   : > { %7798 = vmatmul.mubr.msk.f32.gmra.mrb[40].mxu0 %vm3520_vm2, %v11754_v2 }
 0x35b   : > { %3860 = vmatprep.mubr.f32.mxu0 %v13641_v59 }
 0x35c   : > { %7810 = vmatmul.mubr.msk.f32.gmra.mrb[56].mxu1 %vm3520_vm2, %v11754_v2 }
 0x35d   : > { %4127 = vmatprep.mubr.f32.mxu1 %v13641_v59 }
 0x35e   : > { %v3077_v35 = vpop.f32.mrb[22].mxu0 }
 0x35f   : > { %v3079_v32 = vpop.f32.mrb[23].mxu0  ;;  %v3442_v46 = vadd.f32 %v3410_v42, %v3077_v35 }
 0x360   : > { %v3308_v34 = vpop.f32.mrb[30].mxu1  ;;  %v3443_v63 = vadd.f32 %v3411_v62, %v3079_v32 }
 0x361   : > { %v3310_v3 = vpop.f32.mrb[31].mxu1  ;;  %v3448_v43 = vadd.f32 %v3416_v22, %v3308_v34  ;;  %v3474_v14 = vmax.f32 %v3442_v46, 0.0  ;;  %v2128_v34 = vrot.slane %v2062_v28, 4 }
 0x362   : > { %v3083_v17 = vpop.f32.mrb[24].mxu0  ;;  %v3449_v10 = vadd.f32 %v3417_v4, %v3310_v3  ;;  %v3475_v36 = vmax.f32 %v3443_v63, 0.0  ;;  %v2134_v3 = vrot.slane %v2063_v11, 4 }
 0x363   : > { %v3458_v60 = vadd.f32 %v3426_v29, %v3083_v17  ;;  %v3085_v19 = vpop.f32.mrb[25].mxu0  ;;  %v3480_v0 = vmax.f32 %v3448_v43, 0.0  ;;  %v2129_v17 = vadd.f32 %v2128_v34, %v2062_v28 }
 0x364   : > { %v3314_v26 = vpop.f32.mrb[32].mxu1  ;;  %v3459_v12 = vadd.f32 %v3427_v53, %v3085_v19  ;;  %v3481_v32 = vmax.f32 %v3449_v10, 0.0 }
 0x365   : > { %v3464_v58 = vadd.f32 %v3432_v9, %v3314_v26  ;;  %v3316_v25 = vpop.f32.mrb[33].mxu1  ;;  %v3490_v33 = vmax.f32 %v3458_v60, 0.0  ;;  %v2135_v9 = vadd.f32 %v2134_v3, %v2063_v11  ;;  %v2130_v46 = vrot.slane %v2129_v17, 2 }
 0x366   : > { %v3465_v40 = vadd.f32 %v3433_v38, %v3316_v25  ;;  %v3491_v42 = vmax.f32 %v3459_v12, 0.0 }
 0x367   : > { %v3496_v35 = vmax.f32 %v3464_v58, 0.0  ;;  %v9093_v22 = vpack.c.bf16 %v3490_v33, %v3474_v14  ;;  %v2136_v43 = vrot.slane %v2135_v9, 2  ;;  %v2131_v63 = vadd.f32 %v2130_v46, %v2129_v17 }
 0x368   : > { %v3497_v62 = vmax.f32 %v3465_v40, 0.0  ;;  %v9091_v52 = vpack.c.bf16 %v3491_v42, %v3475_v36  ;;  %v2067_v42 = vmul.f32 %v11712_v56, %v11712_v56 }
 0x369   : > { %v9105_v4 = vpack.c.bf16 %v3496_v35, %v3480_v0  ;;  %v2137_v53 = vadd.f32 %v2136_v43, %v2135_v9  ;;  %v2132_v28 = vrot.slane %v2131_v63, 1  ;;  %v2066_v0 = vmul.f32 %v11708_v27, %v11708_v27 }
 0x36a   : > { %v9103_v29 = vpack.c.bf16 %v3497_v62, %v3481_v32  ;;  %9092 = vmatprep.subr.bf16.mxu0 %v9091_v52 }
 0x36b   : > { %9094 = vmatpush1.bf16.msra.mxu0 %v9093_v22  ;;  %v2138_v10 = vrot.slane %v2137_v53, 1  ;;  %v2133_v60 = vadd.f32 %v2132_v28, %v2131_v63 }
 0x36c   : > { %9104 = vmatprep.subr.bf16.mxu1 %v9103_v29  ;;  %v2158_v29 = vrot.slane %v2067_v42, 4 }
 0x36d   : > { %9106 = vmatpush1.bf16.msra.mxu1 %v9105_v4  ;;  %v2139_v26 = vadd.f32 %v2138_v10, %v2137_v53  ;;  %v3414_v38 = vmul.f32 %v11758_v49, %v2133_v60  ;;  %v3430_v25 = vmul.f32 %v11760_v41, %v2133_v60  ;;  %v2152_v4 = vrot.slane %v2066_v0, 4 }
 0x36e   : > { %7803 = vmatmul.mubr.msk.f32.vlgmr.msra.gmra.mrb[42].mxu0 %vm3520_vm2, %v11742_v31  ;;  %v2159_v46 = vadd.f32 %v2158_v29, %v2067_v42  ;;  %v11936_v29 = vld [vmem:[#allocation4 + $0x68] sm:$0xff] }
 0x36f   : > { %3866 = vmatprep.mubr.f32.mxu0 %v13641_v59  ;;  %v3415_v58 = vmul.f32 %v11758_v49, %v2139_v26  ;;  %v3431_v40 = vmul.f32 %v11760_v41, %v2139_v26  ;;  %v2153_v9 = vadd.f32 %v2152_v4, %v2066_v0 }
 0x370   : > { %7815 = vmatmul.mubr.msk.f32.vlgmr.msra.gmra.mrb[58].mxu1 %vm3520_vm2, %v11742_v31  ;;  %v2160_v63 = vrot.slane %v2159_v46, 2 }
 0x371   : > { %4133 = vmatprep.mubr.f32.mxu1 %v13641_v59  ;;  %v2154_v43 = vrot.slane %v2153_v9, 2 }
 0x372   : > { %7804 = vmatmul.mubr.msk.f32.gmra.mrb[44].mxu0 %vm3520_vm2, %v11744_v30  ;;  %v2161_v28 = vadd.f32 %v2160_v63, %v2159_v46  ;;  %v11944_v63 = vpop.permute.xlu0 %3502 }
 0x373   : > { %3872 = vmatprep.mubr.f32.mxu0 %v13641_v59  ;;  %v2155_v53 = vadd.f32 %v2154_v43, %v2153_v9  ;;  %v11942_v43 = vpop.permute.xlu1 %3507 }
 0x374   : > { %7816 = vmatmul.mubr.msk.f32.gmra.mrb[60].mxu1 %vm3520_vm2, %v11744_v30  ;;  %v2162_v60 = vrot.slane %v2161_v28, 1 }
 0x375   : > { %4139 = vmatprep.mubr.f32.mxu1 %v13641_v59  ;;  %v2156_v10 = vrot.slane %v2155_v53, 1 }
 0x376   : > { %7805 = vmatmul.mubr.msk.f32.gmra.mrb[46].mxu0 %vm3520_vm2, %v11752_v13 }
 0x377   : > { %3878 = vmatprep.mubr.f32.mxu0 %v13641_v59  ;;  %v2157_v26 = vadd.f32 %v2156_v10, %v2155_v53 }
 0x378   : > { %7817 = vmatmul.mubr.msk.f32.gmra.mrb[62].mxu1 %vm3520_vm2, %v11752_v13 }
 0x379   : > { %4145 = vmatprep.mubr.f32.mxu1 %v13641_v59 }
 0x37a   : > { %7806 = vmatmul.mubr.msk.f32.gmra.mrb[48].mxu0 %vm3520_vm2, %v11754_v2 }
 0x37b   : > { %4038 = vmatprep.mubr.f32.mxu0 %v13641_v59 }
 0x37c   : > { %7818 = vmatmul.mubr.msk.f32.gmra.mrb[64].mxu1 %vm3520_vm2, %v11754_v2 }
 0x37d   : > { %4362 = vmatprep.mubr.f32.mxu1 %v13641_v59 }
 0x37e   : > { %v3231_v19 = vpop.f32.mrb[26].mxu0 }
 0x37f   : > { %v3233_v11 = vpop.f32.mrb[27].mxu0  ;;  %v3446_v12 = vadd.f32 %v3414_v38, %v3231_v19  ;;  %v2163_v19 = vadd.f32 %v2162_v60, %v2161_v28 }
 0x380   : > { %v3447_v14 = vadd.f32 %v3415_v58, %v3233_v11  ;;  %v3418_v11 = vmul.f32 %v11758_v49, %v2157_v26 }
 0x381   : > { %v3478_v32 = vmax.f32 %v3446_v12, 0.0  ;;  %v3419_v12 = vmul.f32 %v11758_v49, %v2163_v19  ;;  %v3435_v0 = vmul.f32 %v11760_v41, %v2163_v19  ;;  %v11920_v49 = vld [vmem:[#allocation4 + $0x48] sm:$0xff] }
 0x382   : > { %v3237_v33 = vpop.f32.mrb[28].mxu0  ;;  %v3479_v62 = vmax.f32 %v3447_v14, 0.0  ;;  %v3434_v14 = vmul.f32 %v11760_v41, %v2157_v26  ;;  %v11918_v41 = vld [vmem:[#allocation4 + $0x40] sm:$0xff] }
 0x383   : > { %v3462_v36 = vadd.f32 %v3430_v25, %v3237_v33  ;;  %v3239_v35 = vpop.f32.mrb[29].mxu0 }
 0x384   : > { %v3463_v34 = vadd.f32 %v3431_v40, %v3239_v35 }
 0x385   : > { %v3494_v22 = vmax.f32 %v3462_v36, 0.0 }
 0x386   : > { %v3495_v3 = vmax.f32 %v3463_v34, 0.0 }
 0x387   : > { %v9101_v52 = vpack.c.bf16 %v3494_v22, %v3478_v32 }
 0x388   : > { %v9099_v17 = vpack.c.bf16 %v3495_v3, %v3479_v62 }
 0x38a   : > { %9100 = vmatprep.subr.bf16.mxu0 %v9099_v17  ;;  %v11939_v17 = vld [vmem:[#allocation4 + $0x78] sm:$0xff] }
 0x38b   : > { %9102 = vmatpush1.bf16.msra.mxu0 %v9101_v52  ;;  %v11932_v52 = vld [vmem:[#allocation4 + $0x70] sm:$0xff] }
 0x38e   : > { %7811 = vmatmul.mubr.msk.f32.vlgmr.msra.gmra.mrb[50].mxu0 %vm3520_vm2, %v11742_v31 }
 0x38f   : > { %4044 = vmatprep.mubr.f32.mxu0 %v13641_v59 }
 0x392   : > { %7812 = vmatmul.mubr.msk.f32.gmra.mrb[52].mxu0 %vm3520_vm2, %v11744_v30 }
 0x393   : > { %4050 = vmatprep.mubr.f32.mxu0 %v13641_v59 }
 0x396   : > { %7813 = vmatmul.mubr.msk.f32.gmra.mrb[54].mxu0 %vm3520_vm2, %v11752_v13 }
 0x397   : > { %4056 = vmatprep.mubr.f32.mxu0 %v13641_v59 }
 0x39a   : > { %7814 = vmatmul.mubr.msk.f32.gmra.mrb[56].mxu0 %vm3520_vm2, %v11754_v2 }
 0x39b   : > { %4216 = vmatprep.mubr.f32.mxu0 %v13641_v59 }
 0x39e   : > { %v3385_v38 = vpop.f32.mrb[30].mxu0 }
 0x39f   : > { %v3387_v58 = vpop.f32.mrb[31].mxu0  ;;  %v3450_v25 = vadd.f32 %v3418_v11, %v3385_v38 }
 0x3a0   : > { %v3451_v33 = vadd.f32 %v3419_v12, %v3387_v58 }
 0x3a1   : > { %v3482_v34 = vmax.f32 %v3450_v25, 0.0  ;;  %v11962_v25 = vpop.permute.xlu1 %3512 }
 0x3a2   : > { %v3391_v40 = vpop.f32.mrb[32].mxu0  ;;  %v3483_v22 = vmax.f32 %v3451_v33, 0.0  ;;  %v11964_v33 = vpop.permute.xlu0 %3517 }
 0x3a3   : > { %v3466_v36 = vadd.f32 %v3434_v14, %v3391_v40  ;;  %v3393_v35 = vpop.f32.mrb[33].mxu0 }
 0x3a4   : > { %v3467_v42 = vadd.f32 %v3435_v0, %v3393_v35 }
 0x3a5   : > { %v3498_v32 = vmax.f32 %v3466_v36, 0.0 }
 0x3a6   : > { %v3499_v62 = vmax.f32 %v3467_v42, 0.0 }
 0x3a7   : > { %v9109_v3 = vpack.c.bf16 %v3498_v32, %v3482_v34 }
 0x3a8   : > { %v9107_v4 = vpack.c.bf16 %v3499_v62, %v3483_v22 }
 0x3aa   : > { %9108 = vmatprep.subr.bf16.mxu0 %v9107_v4 }
 0x3ab   : > { %9110 = vmatpush1.bf16.msra.mxu0 %v9109_v3 }
 0x3ae   : > { %7819 = vmatmul.mubr.msk.f32.vlgmr.msra.gmra.mrb[58].mxu0 %vm3520_vm2, %v11742_v31  ;;  %v10242_v31 = vmov 32  }
 0x3af   : > { %4222 = vmatprep.mubr.f32.mxu0 %v13641_v59  ;;  %10000 = vset.pattern.permute.xlu1 %v10242_v31 }
 0x3b0   : > { %10001 = vset.pattern.permute.xlu0 %v10242_v31  ;;  %4243 = vperm.xlu1 %10000, %v11918_v41  }
 0x3b1   : > { %4248 = vperm.xlu0 %10001, %v11920_v49  }
 0x3b2   : > { %7820 = vmatmul.mubr.msk.f32.gmra.mrb[60].mxu0 %vm3520_vm2, %v11744_v30  ;;  %v11924_v30 = vld [vmem:[#allocation4 + $0x50] sm:$0xff] }
 0x3b3   : > { %4228 = vmatprep.mubr.f32.mxu0 %v13641_v59 }
 0x3b4   : > { %4253 = vperm.xlu1 %10000, %v11924_v30  }
 0x3b6   : > { %7821 = vmatmul.mubr.msk.f32.gmra.mrb[62].mxu0 %vm3520_vm2, %v11752_v13  ;;  %v11926_v13 = vld [vmem:[#allocation4 + $0x60] sm:$0xff] }
 0x3b7   : > { %4234 = vmatprep.mubr.f32.mxu0 %v13641_v59  ;;  %4263 = vperm.xlu0 %10001, %v11926_v13  }
 0x3ba   : > { %7822 = vmatmul.mubr.msk.f32.gmra.mrb[64].mxu0 %vm3520_vm2, %v11754_v2  ;;  %v11930_v2 = vld [vmem:[#allocation4 + $0x58] sm:$0xff] }
 0x3bb   : > { %4475 = vmatprep.mubr.f32.mxu0 %v13641_v59  ;;  %4258 = vperm.xlu1 %10000, %v11930_v2  }
 0x3bc   : > { %4273 = vperm.xlu0 %10001, %v11932_v52  }
 0x3bf   : > { %4268 = vperm.xlu1 %10000, %v11936_v29  }
 0x3c3   : > { %4278 = vperm.xlu1 %10000, %v11939_v17  }
 0x3e3   : > { %v3595_v9 = vpop.f32.mrb[34].mxu1 }
 0x3e4   : > { %v3597_v46 = vpop.f32.mrb[35].mxu1  ;;  %v11956_v19 = vadd.f32 %v3595_v9, %v11944_v63 }
 0x3e5   : > { %v11950_v60 = vadd.f32 %v3597_v46, %v11944_v63 }
 0x3e7   : > { %v3601_v53 = vpop.f32.mrb[36].mxu1 }
 0x3e8   : > { %v3603_v28 = vpop.f32.mrb[37].mxu1  ;;  %v11947_v10 = vadd.f32 %v3601_v53, %v11942_v43 }
 0x3e9   : > { %v11953_v26 = vadd.f32 %v3603_v28, %v11942_v43 }
 0x3ea   : > { %v9113_v12 = vpack.c.bf16 %v11947_v10, %v11956_v19 }
 0x3eb   : > { %v9111_v38 = vpack.c.bf16 %v11953_v26, %v11950_v60  ;;  %v3607_v11 = vpop.f32.mrb[38].mxu1 }
 0x3ec   : > { %v3609_v58 = vpop.f32.mrb[39].mxu1  ;;  %v11976_v42 = vadd.f32 %v3607_v11, %v11962_v25 }
 0x3ed   : > { %9112 = vmatprep.subr.bf16.mxu1 %v9111_v38  ;;  %v11970_v36 = vadd.f32 %v3609_v58, %v11962_v25 }
 0x3ee   : > { %9114 = vmatpush1.bf16.msra.mxu1 %v9113_v12 }
 0x3ef   : > { %v3613_v14 = vpop.f32.mrb[40].mxu1 }
 0x3f0   : > { %v3615_v40 = vpop.f32.mrb[41].mxu1  ;;  %v11967_v0 = vadd.f32 %v3613_v14, %v11964_v33 }
 0x3f1   : > { %v11973_v35 = vadd.f32 %v3615_v40, %v11964_v33 }
 0x3f2   : > { %13951 = vst [vmem:[#allocation169_spill] sm:$0xff] %v11967_v0  ;;  %v9117_v32 = vpack.c.bf16 %v11967_v0, %v11976_v42 }
 0x3f3   : > { %13952 = vst [vmem:[#allocation170_spill] sm:$0xff] %v11973_v35  ;;  %v9115_v34 = vpack.c.bf16 %v11973_v35, %v11970_v36 }
 0x3f5   : > { %9116 = vmatprep.subr.bf16.mxu1 %v9115_v34 }
 0x3f6   : > { %9118 = vmatpush1.bf16.msra.mxu1 %v9117_v32 }
 0x3f9   : > { %7823 = vmatmul.mubr.msk.f32.vlgmr.msra.gmra.mrb[66].mxu1 %vm4281_vm3, %v11918_v41 }
 0x3fa   : > { %4368 = vmatprep.mubr.f32.mxu1 %v13641_v59 }
 0x3fd   : > { %7824 = vmatmul.mubr.msk.f32.gmra.mrb[68].mxu1 %vm4281_vm3, %v11920_v49 }
 0x3fe   : > { %4374 = vmatprep.mubr.f32.mxu1 %v13641_v59 }
 0x401   : > { %7825 = vmatmul.mubr.msk.f32.gmra.mrb[70].mxu1 %vm4281_vm3, %v11924_v30 }
 0x402   : > { %4380 = vmatprep.mubr.f32.mxu1 %v13641_v59 }
 0x403   : > { %v3773_v22 = vpop.f32.mrb[42].mxu1 }
 0x404   : > { %v3775_v62 = vpop.f32.mrb[43].mxu1  ;;  %v12006_v53 = vadd.f32 %v3773_v22, %v11944_v63 }
 0x405   : > { %7826 = vmatmul.mubr.msk.f32.gmra.mrb[72].mxu1 %vm4281_vm3, %v11930_v2  ;;  %v11998_v9 = vadd.f32 %v3775_v62, %v11944_v63 }
 0x406   : > { %4386 = vmatprep.mubr.f32.mxu1 %v13641_v59  ;;  %13956 = vst [vmem:[#allocation174_spill] sm:$0xff] %v12006_v53 }
 0x407   : > { %v3779_v3 = vpop.f32.mrb[44].mxu1  ;;  %13954 = vst [vmem:[#allocation172_spill] sm:$0xff] %v11998_v9 }
 0x408   : > { %v11995_v4 = vadd.f32 %v3779_v3, %v11942_v43  ;;  %v3781_v31 = vpop.f32.mrb[45].mxu1 }
 0x409   : > { %v12001_v46 = vadd.f32 %v3781_v31, %v11942_v43  ;;  %7827 = vmatmul.mubr.msk.f32.gmra.mrb[74].mxu1 %vm4281_vm3, %v11926_v13 }
 0x40a   : > { %13953 = vst [vmem:[#allocation171_spill] sm:$0xff] %v11995_v4  ;;  %4392 = vmatprep.mubr.f32.mxu1 %v13641_v59  ;;  %v9129_v11 = vpack.c.bf16 %v11995_v4, %v12006_v53 }
 0x40b   : > { %13955 = vst [vmem:[#allocation173_spill] sm:$0xff] %v12001_v46  ;;  %v9127_v28 = vpack.c.bf16 %v12001_v46, %v11998_v9  ;;  %v3785_v38 = vpop.f32.mrb[46].mxu1 }
 0x40c   : > { %v3787_v58 = vpop.f32.mrb[47].mxu1  ;;  %v12028_v22 = vadd.f32 %v3785_v38, %v11962_v25 }
 0x40d   : > { %7828 = vmatmul.mubr.msk.f32.gmra.mrb[76].mxu1 %vm4281_vm3, %v11936_v29  ;;  %9128 = vmatprep.subr.bf16.mxu1 %v9127_v28  ;;  %v12020_v34 = vadd.f32 %v3787_v58, %v11962_v25 }
 0x40e   : > { %9130 = vmatpush1.bf16.msra.mxu1 %v9129_v11  ;;  %4398 = vmatprep.mubr.f32.mxu1 %v13641_v59  ;;  %13960 = vst [vmem:[#allocation178_spill] sm:$0xff] %v12028_v22 }
 0x40f   : > { %v3791_v12 = vpop.f32.mrb[48].mxu1  ;;  %13958 = vst [vmem:[#allocation176_spill] sm:$0xff] %v12020_v34 }
 0x410   : > { %v12017_v14 = vadd.f32 %v3791_v12, %v11964_v33  ;;  %v3793_v40 = vpop.f32.mrb[49].mxu1 }
 0x411   : > { %v12023_v32 = vadd.f32 %v3793_v40, %v11964_v33  ;;  %7829 = vmatmul.mubr.msk.f32.gmra.mrb[78].mxu1 %vm4281_vm3, %v11932_v52 }
 0x412   : > { %13957 = vst [vmem:[#allocation175_spill] sm:$0xff] %v12017_v14  ;;  %4404 = vmatprep.mubr.f32.mxu1 %v13641_v59  ;;  %v9133_v3 = vpack.c.bf16 %v12017_v14, %v12028_v22 }
 0x413   : > { %13959 = vst [vmem:[#allocation177_spill] sm:$0xff] %v12023_v32  ;;  %v9131_v62 = vpack.c.bf16 %v12023_v32, %v12020_v34 }
 0x415   : > { %7830 = vmatmul.mubr.msk.f32.gmra.mrb[80].mxu1 %vm4281_vm3, %v11939_v17  ;;  %9132 = vmatprep.subr.bf16.mxu1 %v9131_v62 }
 0x416   : > { %9134 = vmatpush1.bf16.msra.mxu1 %v9133_v3  ;;  %4588 = vmatprep.mubr.f32.mxu1 %v13641_v59 }
 0x419   : > { %7839 = vmatmul.mubr.msk.f32.vlgmr.msra.gmra.mrb[82].mxu1 %vm4281_vm3, %v11918_v41 }
 0x41a   : > { %4594 = vmatprep.mubr.f32.mxu1 %v13641_v59 }
 0x41d   : > { %7840 = vmatmul.mubr.msk.f32.gmra.mrb[84].mxu1 %vm4281_vm3, %v11920_v49 }
 0x41e   : > { %4600 = vmatprep.mubr.f32.mxu1 %v13641_v59 }
 0x421   : > { %7841 = vmatmul.mubr.msk.f32.gmra.mrb[86].mxu1 %vm4281_vm3, %v11924_v30  ;;  %v3684_v31 = vpop.f32.mrb[34].mxu0 }
 0x422   : > { %4606 = vmatprep.mubr.f32.mxu1 %v13641_v59  ;;  %v3686_v38 = vpop.f32.mrb[35].mxu0 }
 0x423   : > { %v3951_v28 = vpop.f32.mrb[50].mxu1  ;;  %v12051_v62 = vadd.f32 %v3686_v38, %v11944_v63  ;;  %v12071_v38 = vadd.f32 %v3684_v31, %v11944_v63 }
 0x424   : > { %v3953_v11 = vpop.f32.mrb[51].mxu1 }
 0x425   : > { %7842 = vmatmul.mubr.msk.f32.gmra.mrb[88].mxu1 %vm4281_vm3, %v11930_v2  ;;  %v3690_v58 = vpop.f32.mrb[36].mxu0  ;;  %13961 = vst [vmem:[#allocation179_spill] sm:$0xff] %v12051_v62  ;;  %v12063_v14 = vadd.f32 %v3953_v11, %v11944_v63  ;;  %13967 = vst [vmem:[#allocation185_spill] sm:$0xff] %v12071_v38 }
 0x426   : > { %4612 = vmatprep.mubr.f32.mxu1 %v13641_v59  ;;  %v3692_v40 = vpop.f32.mrb[37].mxu0  ;;  %v12054_v3 = vadd.f32 %v3690_v58, %v11942_v43  ;;  %v12074_v58 = vadd.f32 %v3951_v28, %v11944_v63 }
 0x427   : > { %v3957_v12 = vpop.f32.mrb[52].mxu1  ;;  %v12060_v56 = vadd.f32 %v3692_v40, %v11942_v43  ;;  %13965 = vst [vmem:[#allocation183_spill] sm:$0xff] %v12063_v14 }
 0x428   : > { %13962 = vst [vmem:[#allocation180_spill] sm:$0xff] %v12054_v3  ;;  %v12057_v27 = vadd.f32 %v3957_v12, %v11942_v43  ;;  %v3959_v54 = vpop.f32.mrb[53].mxu1  ;;  %13968 = vst [vmem:[#allocation186_spill] sm:$0xff] %v12074_v58  ;;  %v9121_v34 = vpack.c.bf16 %v12054_v3, %v12071_v38 }
 0x429   : > { %13964 = vst [vmem:[#allocation182_spill] sm:$0xff] %v12060_v56  ;;  %v12066_v32 = vadd.f32 %v3959_v54, %v11942_v43  ;;  %7843 = vmatmul.mubr.msk.f32.gmra.mrb[90].mxu1 %vm4281_vm3, %v11926_v13  ;;  %v9119_v12 = vpack.c.bf16 %v12060_v56, %v12051_v62  ;;  %v3696_v40 = vpop.f32.mrb[38].mxu0 }
 0x42a   : > { %13963 = vst [vmem:[#allocation181_spill] sm:$0xff] %v12057_v27  ;;  %4618 = vmatprep.mubr.f32.mxu1 %v13641_v59  ;;  %v3698_v22 = vpop.f32.mrb[39].mxu0  ;;  %v9145_v31 = vpack.c.bf16 %v12057_v27, %v12074_v58 }
 0x42b   : > { %13966 = vst [vmem:[#allocation184_spill] sm:$0xff] %v12066_v32  ;;  %v9143_v11 = vpack.c.bf16 %v12066_v32, %v12063_v14  ;;  %v3963_v54 = vpop.f32.mrb[54].mxu1  ;;  %9120 = vmatprep.subr.bf16.mxu0 %v9119_v12  ;;  %v12089_v32 = vadd.f32 %v3698_v22, %v11962_v25  ;;  %v12109_v22 = vadd.f32 %v3696_v40, %v11962_v25 }
 0x42c   : > { %v3965_v4 = vpop.f32.mrb[55].mxu1  ;;  %9122 = vmatpush1.bf16.msra.mxu0 %v9121_v34 }
 0x42d   : > { %7844 = vmatmul.mubr.msk.f32.gmra.mrb[92].mxu1 %vm4281_vm3, %v11936_v29  ;;  %9144 = vmatprep.subr.bf16.mxu1 %v9143_v11  ;;  %v3702_v28 = vpop.f32.mrb[40].mxu0  ;;  %13969 = vst [vmem:[#allocation187_spill] sm:$0xff] %v12089_v32  ;;  %v12101_v34 = vadd.f32 %v3965_v4, %v11962_v25  ;;  %13975 = vst [vmem:[#allocation193_spill] sm:$0xff] %v12109_v22 }
 0x42e   : > { %9146 = vmatpush1.bf16.msra.mxu1 %v9145_v31  ;;  %v3704_v53 = vpop.f32.mrb[41].mxu0  ;;  %4624 = vmatprep.mubr.f32.mxu1 %v13641_v59  ;;  %v12092_v14 = vadd.f32 %v3702_v28, %v11964_v33  ;;  %v12112_v28 = vadd.f32 %v3963_v54, %v11962_v25 }
 0x42f   : > { %v3969_v46 = vpop.f32.mrb[56].mxu1  ;;  %v12098_v12 = vadd.f32 %v3704_v53, %v11964_v33  ;;  %13973 = vst [vmem:[#allocation191_spill] sm:$0xff] %v12101_v34 }
 0x430   : > { %13970 = vst [vmem:[#allocation188_spill] sm:$0xff] %v12092_v14  ;;  %v12095_v27 = vadd.f32 %v3969_v46, %v11964_v33  ;;  %v3971_v11 = vpop.f32.mrb[57].mxu1  ;;  %13976 = vst [vmem:[#allocation194_spill] sm:$0xff] %v12112_v28  ;;  %v9125_v53 = vpack.c.bf16 %v12092_v14, %v12109_v22 }
 0x431   : > { %13972 = vst [vmem:[#allocation190_spill] sm:$0xff] %v12098_v12  ;;  %v12104_v31 = vadd.f32 %v3971_v11, %v11964_v33  ;;  %7845 = vmatmul.mubr.msk.f32.gmra.mrb[94].mxu1 %vm4281_vm3, %v11932_v52  ;;  %v9123_v46 = vpack.c.bf16 %v12098_v12, %v12089_v32 }
 0x432   : > { %13971 = vst [vmem:[#allocation189_spill] sm:$0xff] %v12095_v27  ;;  %4630 = vmatprep.mubr.f32.mxu1 %v13641_v59  ;;  %v9149_v11 = vpack.c.bf16 %v12095_v27, %v12112_v28 }
 0x433   : > { %13974 = vst [vmem:[#allocation192_spill] sm:$0xff] %v12104_v31  ;;  %v9147_v4 = vpack.c.bf16 %v12104_v31, %v12101_v34  ;;  %9124 = vmatprep.subr.bf16.mxu0 %v9123_v46 }
 0x434   : > { %9126 = vmatpush1.bf16.msra.mxu0 %v9125_v53 }
 0x435   : > { %7846 = vmatmul.mubr.msk.f32.gmra.mrb[96].mxu1 %vm4281_vm3, %v11939_v17  ;;  %9148 = vmatprep.subr.bf16.mxu1 %v9147_v4 }
 0x436   : > { %9150 = vmatpush1.bf16.msra.mxu1 %v9149_v11  ;;  %4814 = vmatprep.mubr.f32.mxu1 %v13641_v59 }
 0x437   : > { %7831 = vmatmul.mubr.msk.f32.vlgmr.msra.gmra.mrb[66].mxu0 %vm4281_vm3, %v11918_v41 }
 0x438   : > { %4481 = vmatprep.mubr.f32.mxu0 %v13641_v59 }
 0x439   : > { %7855 = vmatmul.mubr.msk.f32.vlgmr.msra.gmra.mrb[98].mxu1 %vm4281_vm3, %v11918_v41 }
 0x43a   : > { %4820 = vmatprep.mubr.f32.mxu1 %v13641_v59 }
 0x43b   : > { %7832 = vmatmul.mubr.msk.f32.gmra.mrb[68].mxu0 %vm4281_vm3, %v11920_v49 }
 0x43c   : > { %4487 = vmatprep.mubr.f32.mxu0 %v13641_v59 }
 0x43d   : > { %7856 = vmatmul.mubr.msk.f32.gmra.mrb[100].mxu1 %vm4281_vm3, %v11920_v49 }
 0x43e   : > { %4826 = vmatprep.mubr.f32.mxu1 %v13641_v59 }
 0x43f   : > { %7833 = vmatmul.mubr.msk.f32.gmra.mrb[70].mxu0 %vm4281_vm3, %v11924_v30 }
 0x440   : > { %4493 = vmatprep.mubr.f32.mxu0 %v13641_v59 }
 0x441   : > { %7857 = vmatmul.mubr.msk.f32.gmra.mrb[102].mxu1 %vm4281_vm3, %v11924_v30  ;;  %v3862_v40 = vpop.f32.mrb[42].mxu0 }
 0x442   : > { %4832 = vmatprep.mubr.f32.mxu1 %v13641_v59  ;;  %v3864_v46 = vpop.f32.mrb[43].mxu0 }
 0x443   : > { %v4129_v54 = vpop.f32.mrb[58].mxu1  ;;  %7834 = vmatmul.mubr.msk.f32.gmra.mrb[72].mxu0 %vm4281_vm3, %v11930_v2  ;;  %v12151_v31 = vadd.f32 %v3864_v46, %v11944_v63  ;;  %v12173_v46 = vadd.f32 %v3862_v40, %v11944_v63 }
 0x444   : > { %v4131_v4 = vpop.f32.mrb[59].mxu1  ;;  %4499 = vmatprep.mubr.f32.mxu0 %v13641_v59 }
 0x445   : > { %7858 = vmatmul.mubr.msk.f32.gmra.mrb[104].mxu1 %vm4281_vm3, %v11930_v2  ;;  %v3868_v53 = vpop.f32.mrb[44].mxu0  ;;  %13977 = vst [vmem:[#allocation195_spill] sm:$0xff] %v12151_v31  ;;  %v12160_v47 = vadd.f32 %v4131_v4, %v11944_v63  ;;  %13983 = vst [vmem:[#allocation26_spill] sm:$0xff] %v12173_v46 }
 0x446   : > { %4838 = vmatprep.mubr.f32.mxu1 %v13641_v59  ;;  %v3870_v27 = vpop.f32.mrb[45].mxu0  ;;  %v12154_v28 = vadd.f32 %v3868_v53, %v11942_v43 }
 0x447   : > { %v4135_v11 = vpop.f32.mrb[60].mxu1  ;;  %v12157_v34 = vadd.f32 %v3870_v27, %v11942_v43  ;;  %13980 = vst [vmem:[#allocation198_spill] sm:$0xff] %v12160_v47  ;;  %7835 = vmatmul.mubr.msk.f32.gmra.mrb[74].mxu0 %vm4281_vm3, %v11926_v13 }
 0x448   : > { %13978 = vst [vmem:[#allocation196_spill] sm:$0xff] %v12154_v28  ;;  %v4137_v58 = vpop.f32.mrb[61].mxu1  ;;  %v12163_v9 = vadd.f32 %v4135_v11, %v11942_v43  ;;  %4505 = vmatprep.mubr.f32.mxu0 %v13641_v59  ;;  %v9137_v40 = vpack.c.bf16 %v12154_v28, %v12173_v46 }
 0x449   : > { %13979 = vst [vmem:[#allocation197_spill] sm:$0xff] %v12157_v34  ;;  %v12166_v14 = vadd.f32 %v4137_v58, %v11942_v43  ;;  %7859 = vmatmul.mubr.msk.f32.gmra.mrb[106].mxu1 %vm4281_vm3, %v11926_v13  ;;  %v9135_v27 = vpack.c.bf16 %v12157_v34, %v12151_v31  ;;  %v3874_v4 = vpop.f32.mrb[46].mxu0  ;;  %v12180_v58 = vadd.f32 %v4129_v54, %v11944_v63 }
 0x44a   : > { %13981 = vst [vmem:[#allocation199_spill] sm:$0xff] %v12163_v9  ;;  %4844 = vmatprep.mubr.f32.mxu1 %v13641_v59  ;;  %v3876_v12 = vpop.f32.mrb[47].mxu0 }
 0x44b   : > { %13982 = vst [vmem:[#allocation202_spill] sm:$0xff] %v12166_v14  ;;  %13984 = vst [vmem:[#allocation203_spill] sm:$0xff] %v12180_v58  ;;  %v9159_v53 = vpack.c.bf16 %v12166_v14, %v12160_v47  ;;  %v4141_v11 = vpop.f32.mrb[62].mxu1  ;;  %9136 = vmatprep.subr.bf16.mxu0 %v9135_v27  ;;  %v9161_v34 = vpack.c.bf16 %v12163_v9, %v12180_v58  ;;  %7836 = vmatmul.mubr.msk.f32.gmra.mrb[76].mxu0 %vm4281_vm3, %v11936_v29 }
 0x44c   : > { %v4143_v22 = vpop.f32.mrb[63].mxu1  ;;  %9138 = vmatpush1.bf16.msra.mxu0 %v9137_v40  ;;  %4511 = vmatprep.mubr.f32.mxu0 %v13641_v59  ;;  %v12194_v28 = vadd.f32 %v3876_v12, %v11962_v25 }
 0x44d   : > { %7860 = vmatmul.mubr.msk.f32.gmra.mrb[108].mxu1 %vm4281_vm3, %v11936_v29  ;;  %9160 = vmatprep.subr.bf16.mxu1 %v9159_v53  ;;  %v3880_v54 = vpop.f32.mrb[48].mxu0  ;;  %v12204_v53 = vadd.f32 %v4143_v22, %v11962_v25 }
 0x44e   : > { %9162 = vmatpush1.bf16.msra.mxu1 %v9161_v34  ;;  %v3882_v47 = vpop.f32.mrb[49].mxu0  ;;  %13985 = vst [vmem:[#allocation28_spill] sm:$0xff] %v12194_v28  ;;  %v12197_v27 = vadd.f32 %v3880_v54, %v11964_v33  ;;  %4850 = vmatprep.mubr.f32.mxu1 %v13641_v59 }
 0x44f   : > { %v4147_v14 = vpop.f32.mrb[64].mxu1  ;;  %v12200_v9 = vadd.f32 %v3882_v47, %v11964_v33  ;;  %13988 = vst [vmem:[#allocation32_spill] sm:$0xff] %v12204_v53  ;;  %7837 = vmatmul.mubr.msk.f32.gmra.mrb[78].mxu0 %vm4281_vm3, %v11932_v52  ;;  %v12217_v47 = vadd.f32 %v3874_v4, %v11962_v25 }
 0x450   : > { %13986 = vst [vmem:[#allocation204_spill] sm:$0xff] %v12197_v27  ;;  %v4149_v58 = vpop.f32.mrb[65].mxu1  ;;  %v12207_v34 = vadd.f32 %v4147_v14, %v11964_v33  ;;  %4517 = vmatprep.mubr.f32.mxu0 %v13641_v59  ;;  %v12224_v14 = vadd.f32 %v4141_v11, %v11962_v25 }
 0x451   : > { %13987 = vst [vmem:[#allocation30_spill] sm:$0xff] %v12200_v9  ;;  %v12210_v40 = vadd.f32 %v4149_v58, %v11964_v33  ;;  %7861 = vmatmul.mubr.msk.f32.gmra.mrb[110].mxu1 %vm4281_vm3, %v11932_v52  ;;  %13991 = vst [vmem:[#allocation206_spill] sm:$0xff] %v12217_v47  ;;  %v9139_v12 = vpack.c.bf16 %v12200_v9, %v12194_v28  ;;  %v9141_v58 = vpack.c.bf16 %v12197_v27, %v12217_v47 }
 0x452   : > { %13989 = vst [vmem:[#allocation34_spill] sm:$0xff] %v12207_v34  ;;  %4856 = vmatprep.mubr.f32.mxu1 %v13641_v59  ;;  %13992 = vst [vmem:[#allocation207_spill] sm:$0xff] %v12224_v14  ;;  %v9165_v4 = vpack.c.bf16 %v12207_v34, %v12224_v14 }
 0x453   : > { %13990 = vst [vmem:[#allocation205_spill] sm:$0xff] %v12210_v40  ;;  %v9163_v22 = vpack.c.bf16 %v12210_v40, %v12204_v53  ;;  %9140 = vmatprep.subr.bf16.mxu0 %v9139_v12  ;;  %7838 = vmatmul.mubr.msk.f32.gmra.mrb[80].mxu0 %vm4281_vm3, %v11939_v17 }
 0x454   : > { %9142 = vmatpush1.bf16.msra.mxu0 %v9141_v58  ;;  %4701 = vmatprep.mubr.f32.mxu0 %v13641_v59 }
 0x455   : > { %7862 = vmatmul.mubr.msk.f32.gmra.mrb[112].mxu1 %vm4281_vm3, %v11939_v17  ;;  %9164 = vmatprep.subr.bf16.mxu1 %v9163_v22 }
 0x456   : > { %9166 = vmatpush1.bf16.msra.mxu1 %v9165_v4  ;;  %5040 = vmatprep.mubr.f32.mxu1 %v13641_v59 }
 0x457   : > { %7847 = vmatmul.mubr.msk.f32.vlgmr.msra.gmra.mrb[82].mxu0 %vm4281_vm3, %v11918_v41 }
 0x458   : > { %4707 = vmatprep.mubr.f32.mxu0 %v13641_v59 }
 0x459   : > { %7871 = vmatmul.mubr.msk.f32.vlgmr.msra.gmra.mrb[114].mxu1 %vm4281_vm3, %v11918_v41 }
 0x45a   : > { %5046 = vmatprep.mubr.f32.mxu1 %v13641_v59 }
 0x45b   : > { %7848 = vmatmul.mubr.msk.f32.gmra.mrb[84].mxu0 %vm4281_vm3, %v11920_v49 }
 0x45c   : > { %4713 = vmatprep.mubr.f32.mxu0 %v13641_v59 }
 0x45d   : > { %7872 = vmatmul.mubr.msk.f32.gmra.mrb[116].mxu1 %vm4281_vm3, %v11920_v49 }
 0x45e   : > { %5052 = vmatprep.mubr.f32.mxu1 %v13641_v59 }
 0x45f   : > { %7849 = vmatmul.mubr.msk.f32.gmra.mrb[86].mxu0 %vm4281_vm3, %v11924_v30 }
 0x460   : > { %4719 = vmatprep.mubr.f32.mxu0 %v13641_v59 }
 0x461   : > { %7873 = vmatmul.mubr.msk.f32.gmra.mrb[118].mxu1 %vm4281_vm3, %v11924_v30  ;;  %v4040_v11 = vpop.f32.mrb[50].mxu0 }
 0x462   : > { %v4042_v54 = vpop.f32.mrb[51].mxu0  ;;  %5058 = vmatprep.mubr.f32.mxu1 %v13641_v59  ;;  %v12274_v40 = vadd.f32 %v4040_v11, %v11944_v63 }
 0x463   : > { %7850 = vmatmul.mubr.msk.f32.gmra.mrb[88].mxu0 %vm4281_vm3, %v11930_v2  ;;  %v12263_v58 = vadd.f32 %v4042_v54, %v11944_v63 }
 0x464   : > { %4725 = vmatprep.mubr.f32.mxu0 %v13641_v59  ;;  %13996 = vst [vmem:[#allocation209_spill] sm:$0xff] %v12274_v40 }
 0x465   : > { %7874 = vmatmul.mubr.msk.f32.gmra.mrb[120].mxu1 %vm4281_vm3, %v11930_v2  ;;  %v4046_v12 = vpop.f32.mrb[52].mxu0  ;;  %13993 = vst [vmem:[#allocation208_spill] sm:$0xff] %v12263_v58 }
 0x466   : > { %v4048_v22 = vpop.f32.mrb[53].mxu0  ;;  %5064 = vmatprep.mubr.f32.mxu1 %v13641_v59  ;;  %v12266_v4 = vadd.f32 %v4046_v12, %v11942_v43 }
 0x467   : > { %v12269_v34 = vadd.f32 %v4048_v22, %v11942_v43  ;;  %7851 = vmatmul.mubr.msk.f32.gmra.mrb[90].mxu0 %vm4281_vm3, %v11926_v13 }
 0x468   : > { %13994 = vst [vmem:[#allocation201_spill] sm:$0xff] %v12266_v4  ;;  %4731 = vmatprep.mubr.f32.mxu0 %v13641_v59  ;;  %v9153_v22 = vpack.c.bf16 %v12266_v4, %v12274_v40 }
 0x469   : > { %13995 = vst [vmem:[#allocation200_spill] sm:$0xff] %v12269_v34  ;;  %v9151_v14 = vpack.c.bf16 %v12269_v34, %v12263_v58  ;;  %7875 = vmatmul.mubr.msk.f32.gmra.mrb[122].mxu1 %vm4281_vm3, %v11926_v13  ;;  %v4052_v54 = vpop.f32.mrb[54].mxu0 }
 0x46a   : > { %v4054_v12 = vpop.f32.mrb[55].mxu0  ;;  %5070 = vmatprep.mubr.f32.mxu1 %v13641_v59 }
 0x46b   : > { %9152 = vmatprep.subr.bf16.mxu0 %v9151_v14  ;;  %7852 = vmatmul.mubr.msk.f32.gmra.mrb[92].mxu0 %vm4281_vm3, %v11936_v29  ;;  %v12291_v34 = vadd.f32 %v4054_v12, %v11962_v25 }
 0x46c   : > { %9154 = vmatpush1.bf16.msra.mxu0 %v9153_v22  ;;  %4737 = vmatprep.mubr.f32.mxu0 %v13641_v59  ;;  %v12302_v22 = vadd.f32 %v4052_v54, %v11962_v25 }
 0x46d   : > { %7876 = vmatmul.mubr.msk.f32.gmra.mrb[124].mxu1 %vm4281_vm3, %v11936_v29  ;;  %v4058_v11 = vpop.f32.mrb[56].mxu0  ;;  %13997 = vst [vmem:[#allocation91_spill] sm:$0xff] %v12291_v34 }
 0x46e   : > { %v4060_v53 = vpop.f32.mrb[57].mxu0  ;;  %5076 = vmatprep.mubr.f32.mxu1 %v13641_v59  ;;  %v12294_v58 = vadd.f32 %v4058_v11, %v11964_v33  ;;  %14000 = vst [vmem:[#allocation211_spill] sm:$0xff] %v12302_v22 }
 0x46f   : > { %v12297_v14 = vadd.f32 %v4060_v53, %v11964_v33  ;;  %7853 = vmatmul.mubr.msk.f32.gmra.mrb[94].mxu0 %vm4281_vm3, %v11932_v52 }
 0x470   : > { %13998 = vst [vmem:[#allocation93_spill] sm:$0xff] %v12294_v58  ;;  %4743 = vmatprep.mubr.f32.mxu0 %v13641_v59  ;;  %v9157_v53 = vpack.c.bf16 %v12294_v58, %v12302_v22 }
 0x471   : > { %13999 = vst [vmem:[#allocation210_spill] sm:$0xff] %v12297_v14  ;;  %v9155_v4 = vpack.c.bf16 %v12297_v14, %v12291_v34  ;;  %7877 = vmatmul.mubr.msk.f32.gmra.mrb[126].mxu1 %vm4281_vm3, %v11932_v52 }
 0x472   : > { %5082 = vmatprep.mubr.f32.mxu1 %v13641_v59 }
 0x473   : > { %9156 = vmatprep.subr.bf16.mxu0 %v9155_v4  ;;  %7854 = vmatmul.mubr.msk.f32.gmra.mrb[96].mxu0 %vm4281_vm3, %v11939_v17 }
 0x474   : > { %9158 = vmatpush1.bf16.msra.mxu0 %v9157_v53  ;;  %4927 = vmatprep.mubr.f32.mxu0 %v13641_v59 }
 0x475   : > { %7878 = vmatmul.mubr.msk.f32.gmra.mrb[128].mxu1 %vm4281_vm3, %v11939_v17 }
 0x476   : > { %5402 = vmatprep.mubr.f32.mxu1 %v13641_v59 }
 0x477   : > { %7863 = vmatmul.mubr.msk.f32.vlgmr.msra.gmra.mrb[98].mxu0 %vm4281_vm3, %v11918_v41 }
 0x478   : > { %4933 = vmatprep.mubr.f32.mxu0 %v13641_v59 }
 0x47b   : > { %7864 = vmatmul.mubr.msk.f32.gmra.mrb[100].mxu0 %vm4281_vm3, %v11920_v49 }
 0x47c   : > { %4939 = vmatprep.mubr.f32.mxu0 %v13641_v59 }
 0x47f   : > { %7865 = vmatmul.mubr.msk.f32.gmra.mrb[102].mxu0 %vm4281_vm3, %v11924_v30 }
 0x480   : > { %4945 = vmatprep.mubr.f32.mxu0 %v13641_v59 }
 0x481   : > { %v4218_v4 = vpop.f32.mrb[58].mxu0 }
 0x482   : > { %v4220_v54 = vpop.f32.mrb[59].mxu0  ;;  %v12342_v22 = vadd.f32 %v4218_v4, %v11944_v63 }
 0x483   : > { %7866 = vmatmul.mubr.msk.f32.gmra.mrb[104].mxu0 %vm4281_vm3, %v11930_v2  ;;  %v12331_v53 = vadd.f32 %v4220_v54, %v11944_v63 }
 0x484   : > { %4951 = vmatprep.mubr.f32.mxu0 %v13641_v59  ;;  %14004 = vst [vmem:[#allocation215_spill] sm:$0xff] %v12342_v22 }
 0x485   : > { %v4224_v12 = vpop.f32.mrb[60].mxu0  ;;  %14001 = vst [vmem:[#allocation212_spill] sm:$0xff] %v12331_v53 }
 0x486   : > { %v4226_v11 = vpop.f32.mrb[61].mxu0  ;;  %v12334_v58 = vadd.f32 %v4224_v12, %v11942_v43 }
 0x487   : > { %v12337_v14 = vadd.f32 %v4226_v11, %v11942_v43  ;;  %7867 = vmatmul.mubr.msk.f32.gmra.mrb[106].mxu0 %vm4281_vm3, %v11926_v13 }
 0x488   : > { %14002 = vst [vmem:[#allocation213_spill] sm:$0xff] %v12334_v58  ;;  %4957 = vmatprep.mubr.f32.mxu0 %v13641_v59  ;;  %v9169_v12 = vpack.c.bf16 %v12334_v58, %v12342_v22 }
 0x489   : > { %14003 = vst [vmem:[#allocation214_spill] sm:$0xff] %v12337_v14  ;;  %v9167_v34 = vpack.c.bf16 %v12337_v14, %v12331_v53  ;;  %v4230_v40 = vpop.f32.mrb[62].mxu0 }
 0x48a   : > { %v4232_v54 = vpop.f32.mrb[63].mxu0 }
 0x48b   : > { %9168 = vmatprep.subr.bf16.mxu0 %v9167_v34  ;;  %7868 = vmatmul.mubr.msk.f32.gmra.mrb[108].mxu0 %vm4281_vm3, %v11936_v29  ;;  %v12353_v4 = vadd.f32 %v4232_v54, %v11962_v25  ;;  %v12364_v34 = vadd.f32 %v4230_v40, %v11962_v25 }
 0x48c   : > { %9170 = vmatpush1.bf16.msra.mxu0 %v9169_v12  ;;  %4963 = vmatprep.mubr.f32.mxu0 %v13641_v59 }
 0x48d   : > { %v4236_v43 = vpop.f32.mrb[64].mxu0  ;;  %14005 = vst [vmem:[#allocation216_spill] sm:$0xff] %v12353_v4  ;;  %14008 = vst [vmem:[#allocation219_spill] sm:$0xff] %v12364_v34 }
 0x48e   : > { %v4238_v63 = vpop.f32.mrb[65].mxu0  ;;  %v12356_v11 = vadd.f32 %v4236_v43, %v11964_v33 }
 0x48f   : > { %v12359_v14 = vadd.f32 %v4238_v63, %v11964_v33  ;;  %7869 = vmatmul.mubr.msk.f32.gmra.mrb[110].mxu0 %vm4281_vm3, %v11932_v52 }
 0x490   : > { %14006 = vst [vmem:[#allocation217_spill] sm:$0xff] %v12356_v11  ;;  %4969 = vmatprep.mubr.f32.mxu0 %v13641_v59  ;;  %v9173_v54 = vpack.c.bf16 %v12356_v11, %v12364_v34 }
 0x491   : > { %14007 = vst [vmem:[#allocation218_spill] sm:$0xff] %v12359_v14  ;;  %v9171_v12 = vpack.c.bf16 %v12359_v14, %v12353_v4 }
 0x493   : > { %9172 = vmatprep.subr.bf16.mxu0 %v9171_v12  ;;  %7870 = vmatmul.mubr.msk.f32.gmra.mrb[112].mxu0 %vm4281_vm3, %v11939_v17 }
 0x494   : > { %9174 = vmatpush1.bf16.msra.mxu0 %v9173_v54  ;;  %5153 = vmatprep.mubr.f32.mxu0 %v13641_v59 }
 0x497   : > { %7879 = vmatmul.mubr.msk.f32.vlgmr.msra.gmra.mrb[114].mxu0 %vm4281_vm3, %v11918_v41  ;;  %v12398_v41 = vld [vmem:[#allocation4 + $0x80] sm:$0xff] }
 0x498   : > { %5159 = vmatprep.mubr.f32.mxu0 %v13641_v59 }
 0x49b   : > { %7880 = vmatmul.mubr.msk.f32.gmra.mrb[116].mxu0 %vm4281_vm3, %v11920_v49  ;;  %v10243_v49 = vmov 64  }
 0x49c   : > { %5165 = vmatprep.mubr.f32.mxu0 %v13641_v59  ;;  %10002 = vset.pattern.permute.xlu0 %v10243_v49 }
 0x49d   : > { %5332 = vperm.xlu0 %10002, %v12398_v41  }
 0x49f   : > { %7881 = vmatmul.mubr.msk.f32.gmra.mrb[118].mxu0 %vm4281_vm3, %v11924_v30 }
 0x4a0   : > { %5171 = vmatprep.mubr.f32.mxu0 %v13641_v59 }
 0x4a3   : > { %7882 = vmatmul.mubr.msk.f32.gmra.mrb[120].mxu0 %vm4281_vm3, %v11930_v2 }
 0x4a4   : > { %5177 = vmatprep.mubr.f32.mxu0 %v13641_v59 }
 0x4a7   : > { %7883 = vmatmul.mubr.msk.f32.gmra.mrb[122].mxu0 %vm4281_vm3, %v11926_v13  ;;  %v12401_v13 = vpop.permute.xlu1 %4243 }
 0x4a8   : > { %5183 = vmatprep.mubr.f32.mxu0 %v13641_v59 }
 0x4ab   : > { %7884 = vmatmul.mubr.msk.f32.gmra.mrb[124].mxu0 %vm4281_vm3, %v11936_v29  ;;  %v12403_v29 = vpop.permute.xlu0 %4248 }
 0x4ac   : > { %5189 = vmatprep.mubr.f32.mxu0 %v13641_v59 }
 0x4af   : > { %7885 = vmatmul.mubr.msk.f32.gmra.mrb[126].mxu0 %vm4281_vm3, %v11932_v52 }
 0x4b0   : > { %5195 = vmatprep.mubr.f32.mxu0 %v13641_v59 }
 0x4b3   : > { %7886 = vmatmul.mubr.msk.f32.gmra.mrb[128].mxu0 %vm4281_vm3, %v11939_v17  ;;  %v12407_v17 = vpop.permute.xlu1 %4253 }
 0x4b4   : > { %5473 = vmatprep.mubr.f32.mxu0 %v13641_v59 }
 0x4b7   : > { %v12411_v22 = vpop.permute.xlu1 %4258 }
 0x4bb   : > { %v12419_v9 = vpop.permute.xlu1 %4268 }
 0x4bf   : > { %v12427_v28 = vpop.permute.xlu1 %4278 }
 0x4cc   : > { %v4364_v30 = vpop.f32.mrb[66].mxu1 }
 0x4cd   : > { %v4366_v2 = vpop.f32.mrb[67].mxu1  ;;  %v4365_v52 = vadd.f32 %v4364_v30, %v12401_v13 }
 0x4ce   : > { %v4367_v33 = vadd.f32 %v4366_v2, %v12401_v13 }
 0x4cf   : > { %v5202_v12 = vmax.f32 %v4365_v52, 0.0 }
 0x4d0   : > { %v4370_v25 = vpop.f32.mrb[68].mxu1  ;;  %v5203_v49 = vmax.f32 %v4367_v33, 0.0 }
 0x4d1   : > { %v4372_v40 = vpop.f32.mrb[69].mxu1  ;;  %v4371_v43 = vadd.f32 %v4370_v25, %v12403_v29 }
 0x4d2   : > { %v4373_v63 = vadd.f32 %v4372_v40, %v12403_v29 }
 0x4d3   : > { %v5218_v54 = vmax.f32 %v4371_v43, 0.0 }
 0x4d4   : > { %v5219_v11 = vmax.f32 %v4373_v63, 0.0  ;;  %v4376_v14 = vpop.f32.mrb[70].mxu1 }
 0x4d5   : > { %v4378_v34 = vpop.f32.mrb[71].mxu1  ;;  %v9177_v4 = vpack.c.bf16 %v5218_v54, %v5202_v12  ;;  %v4377_v30 = vadd.f32 %v4376_v14, %v12407_v17 }
 0x4d6   : > { %v9175_v58 = vpack.c.bf16 %v5219_v11, %v5203_v49  ;;  %v4379_v2 = vadd.f32 %v4378_v34, %v12407_v17  ;;  %v12417_v11 = vpop.permute.xlu0 %4263 }
 0x4d7   : > { %v5234_v33 = vmax.f32 %v4377_v30, 0.0 }
 0x4d8   : > { %v4382_v53 = vpop.f32.mrb[72].mxu1  ;;  %9176 = vmatprep.subr.bf16.mxu1 %v9175_v58  ;;  %v5235_v43 = vmax.f32 %v4379_v2, 0.0 }
 0x4d9   : > { %v4384_v27 = vpop.f32.mrb[73].mxu1  ;;  %9178 = vmatpush1.bf16.msra.mxu1 %v9177_v4  ;;  %v4383_v25 = vadd.f32 %v4382_v53, %v12411_v22 }
 0x4da   : > { %v4385_v52 = vadd.f32 %v4384_v27, %v12411_v22 }
 0x4db   : > { %v5250_v40 = vmax.f32 %v4383_v25, 0.0 }
 0x4dc   : > { %v5251_v63 = vmax.f32 %v4385_v52, 0.0  ;;  %v4388_v12 = vpop.f32.mrb[74].mxu1 }
 0x4dd   : > { %v4390_v54 = vpop.f32.mrb[75].mxu1  ;;  %v9181_v49 = vpack.c.bf16 %v5250_v40, %v5234_v33  ;;  %v4389_v58 = vadd.f32 %v4388_v12, %v12417_v11  ;;  %v12425_v40 = vpop.permute.xlu0 %4273 }
 0x4de   : > { %v9179_v14 = vpack.c.bf16 %v5251_v63, %v5235_v43  ;;  %v4391_v4 = vadd.f32 %v4390_v54, %v12417_v11 }
 0x4df   : > { %v5266_v2 = vmax.f32 %v4389_v58, 0.0 }
 0x4e0   : > { %v4394_v34 = vpop.f32.mrb[76].mxu1  ;;  %9180 = vmatprep.subr.bf16.mxu1 %v9179_v14  ;;  %v5267_v52 = vmax.f32 %v4391_v4, 0.0 }
 0x4e1   : > { %v4396_v53 = vpop.f32.mrb[77].mxu1  ;;  %9182 = vmatpush1.bf16.msra.mxu1 %v9181_v49  ;;  %v4395_v27 = vadd.f32 %v4394_v34, %v12419_v9 }
 0x4e2   : > { %v4397_v30 = vadd.f32 %v4396_v53, %v12419_v9 }
 0x4e3   : > { %v5282_v25 = vmax.f32 %v4395_v27, 0.0 }
 0x4e4   : > { %v5283_v47 = vmax.f32 %v4397_v30, 0.0  ;;  %v4400_v33 = vpop.f32.mrb[78].mxu1 }
 0x4e5   : > { %v4402_v43 = vpop.f32.mrb[79].mxu1  ;;  %v9185_v63 = vpack.c.bf16 %v5282_v25, %v5266_v2  ;;  %v4401_v54 = vadd.f32 %v4400_v33, %v12425_v40 }
 0x4e6   : > { %v9183_v12 = vpack.c.bf16 %v5283_v47, %v5267_v52  ;;  %v4403_v49 = vadd.f32 %v4402_v43, %v12425_v40 }
 0x4e7   : > { %v5298_v53 = vmax.f32 %v4401_v54, 0.0 }
 0x4e8   : > { %v4406_v14 = vpop.f32.mrb[80].mxu1  ;;  %9184 = vmatprep.subr.bf16.mxu1 %v9183_v12  ;;  %v5299_v30 = vmax.f32 %v4403_v49, 0.0 }
 0x4e9   : > { %v4408_v34 = vpop.f32.mrb[81].mxu1  ;;  %9186 = vmatpush1.bf16.msra.mxu1 %v9185_v63  ;;  %v4407_v58 = vadd.f32 %v4406_v14, %v12427_v28 }
 0x4ea   : > { %v4409_v4 = vadd.f32 %v4408_v34, %v12427_v28 }
 0x4eb   : > { %v5314_v27 = vmax.f32 %v4407_v58, 0.0 }
 0x4ec   : > { %v5315_v46 = vmax.f32 %v4409_v4, 0.0  ;;  %v4590_v2 = vpop.f32.mrb[82].mxu1 }
 0x4ed   : > { %v9189_v47 = vpack.c.bf16 %v5314_v27, %v5298_v53  ;;  %v4592_v25 = vpop.f32.mrb[83].mxu1  ;;  %v4591_v33 = vadd.f32 %v4590_v2, %v12401_v13 }
 0x4ee   : > { %v9187_v52 = vpack.c.bf16 %v5315_v46, %v5299_v30  ;;  %v4593_v43 = vadd.f32 %v4592_v25, %v12401_v13 }
 0x4ef   : > { %v5206_v34 = vmax.f32 %v4591_v33, 0.0 }
 0x4f0   : > { %9188 = vmatprep.subr.bf16.mxu1 %v9187_v52  ;;  %v4596_v12 = vpop.f32.mrb[84].mxu1  ;;  %v5207_v58 = vmax.f32 %v4593_v43, 0.0 }
 0x4f1   : > { %9190 = vmatpush1.bf16.msra.mxu1 %v9189_v47  ;;  %v4597_v63 = vadd.f32 %v4596_v12, %v12403_v29  ;;  %v4598_v14 = vpop.f32.mrb[85].mxu1 }
 0x4f2   : > { %v4599_v54 = vadd.f32 %v4598_v14, %v12403_v29 }
 0x4f3   : > { %v5222_v49 = vmax.f32 %v4597_v63, 0.0 }
 0x4f4   : > { %7887 = vmatmul.mubr.msk.f32.vlgmr.msra.gmra.mrb[130].mxu1 %vm5335_vm4, %v12398_v41  ;;  %v5223_v46 = vmax.f32 %v4599_v54, 0.0  ;;  %v4602_v4 = vpop.f32.mrb[86].mxu1 }
 0x4f5   : > { %v9209_v53 = vpack.c.bf16 %v5222_v49, %v5206_v34  ;;  %v4604_v27 = vpop.f32.mrb[87].mxu1  ;;  %5544 = vmatprep.mubr.f32.mxu1 %v13641_v59  ;;  %v4603_v2 = vadd.f32 %v4602_v4, %v12407_v17 }
 0x4f6   : > { %v9207_v30 = vpack.c.bf16 %v5223_v46, %v5207_v58  ;;  %v4605_v47 = vadd.f32 %v4604_v27, %v12407_v17 }
 0x4f7   : > { %v5238_v43 = vmax.f32 %v4603_v2, 0.0 }
 0x4f8   : > { %v4608_v25 = vpop.f32.mrb[88].mxu1  ;;  %9208 = vmatprep.subr.bf16.mxu1 %v9207_v30  ;;  %v5239_v14 = vmax.f32 %v4605_v47, 0.0 }
 0x4f9   : > { %v4609_v52 = vadd.f32 %v4608_v25, %v12411_v22  ;;  %v4610_v33 = vpop.f32.mrb[89].mxu1  ;;  %9210 = vmatpush1.bf16.msra.mxu1 %v9209_v53 }
 0x4fa   : > { %v4611_v12 = vadd.f32 %v4610_v33, %v12411_v22 }
 0x4fb   : > { %v5254_v63 = vmax.f32 %v4609_v52, 0.0 }
 0x4fc   : > { %v5255_v54 = vmax.f32 %v4611_v12, 0.0  ;;  %v4614_v34 = vpop.f32.mrb[90].mxu1 }
 0x4fd   : > { %v9213_v49 = vpack.c.bf16 %v5254_v63, %v5238_v43  ;;  %v4616_v31 = vpop.f32.mrb[91].mxu1  ;;  %v4615_v46 = vadd.f32 %v4614_v34, %v12417_v11 }
 0x4fe   : > { %v9211_v58 = vpack.c.bf16 %v5255_v54, %v5239_v14  ;;  %v4617_v4 = vadd.f32 %v4616_v31, %v12417_v11 }
 0x4ff   : > { %v5270_v2 = vmax.f32 %v4615_v46, 0.0 }
 0x500   : > { %v4620_v27 = vpop.f32.mrb[92].mxu1  ;;  %9212 = vmatprep.subr.bf16.mxu1 %v9211_v58  ;;  %v5271_v47 = vmax.f32 %v4617_v4, 0.0 }
 0x501   : > { %v4621_v30 = vadd.f32 %v4620_v27, %v12419_v9  ;;  %v4622_v25 = vpop.f32.mrb[93].mxu1  ;;  %9214 = vmatpush1.bf16.msra.mxu1 %v9213_v49 }
 0x502   : > { %v4623_v53 = vadd.f32 %v4622_v25, %v12419_v9 }
 0x503   : > { %v5286_v52 = vmax.f32 %v4621_v30, 0.0 }
 0x504   : > { %v5287_v33 = vmax.f32 %v4623_v53, 0.0  ;;  %v4626_v12 = vpop.f32.mrb[94].mxu1 }
 0x505   : > { %v9217_v43 = vpack.c.bf16 %v5286_v52, %v5270_v2  ;;  %v4628_v63 = vpop.f32.mrb[95].mxu1  ;;  %v4627_v54 = vadd.f32 %v4626_v12, %v12425_v40 }
 0x506   : > { %v9215_v14 = vpack.c.bf16 %v5287_v33, %v5271_v47  ;;  %v4629_v31 = vadd.f32 %v4628_v63, %v12425_v40 }
 0x507   : > { %v5302_v46 = vmax.f32 %v4627_v54, 0.0 }
 0x508   : > { %v4632_v34 = vpop.f32.mrb[96].mxu1  ;;  %9216 = vmatprep.subr.bf16.mxu1 %v9215_v14  ;;  %v5303_v4 = vmax.f32 %v4629_v31, 0.0 }
 0x509   : > { %v4633_v58 = vadd.f32 %v4632_v34, %v12427_v28  ;;  %v4634_v27 = vpop.f32.mrb[97].mxu1  ;;  %9218 = vmatpush1.bf16.msra.mxu1 %v9217_v43 }
 0x50a   : > { %v4635_v49 = vadd.f32 %v4634_v27, %v12427_v28  ;;  %v4477_v53 = vpop.f32.mrb[66].mxu0 }
 0x50b   : > { %v5318_v30 = vmax.f32 %v4633_v58, 0.0  ;;  %v4479_v47 = vpop.f32.mrb[67].mxu0  ;;  %v4478_v63 = vadd.f32 %v4477_v53, %v12401_v13 }
 0x50c   : > { %v5319_v25 = vmax.f32 %v4635_v49, 0.0  ;;  %v4816_v2 = vpop.f32.mrb[98].mxu1  ;;  %v4480_v34 = vadd.f32 %v4479_v47, %v12401_v13 }
 0x50d   : > { %v9221_v52 = vpack.c.bf16 %v5318_v30, %v5302_v46  ;;  %v4818_v33 = vpop.f32.mrb[99].mxu1  ;;  %v4817_v14 = vadd.f32 %v4816_v2, %v12401_v13 }
 0x50e   : > { %v9219_v12 = vpack.c.bf16 %v5319_v25, %v5303_v4  ;;  %v4819_v43 = vadd.f32 %v4818_v33, %v12401_v13  ;;  %v4483_v32 = vpop.f32.mrb[68].mxu0  ;;  %v5204_v4 = vmax.f32 %v4478_v63, 0.0  ;;  %v5205_v47 = vmax.f32 %v4480_v34, 0.0 }
 0x50f   : > { %v4484_v54 = vadd.f32 %v4483_v32, %v12403_v29  ;;  %v4485_v58 = vpop.f32.mrb[69].mxu0  ;;  %v5210_v25 = vmax.f32 %v4817_v14, 0.0 }
 0x510   : > { %v4822_v27 = vpop.f32.mrb[100].mxu1  ;;  %9220 = vmatprep.subr.bf16.mxu1 %v9219_v12  ;;  %v4486_v46 = vadd.f32 %v4485_v58, %v12403_v29  ;;  %v5211_v33 = vmax.f32 %v4819_v43, 0.0 }
 0x511   : > { %v4823_v31 = vadd.f32 %v4822_v27, %v12403_v29  ;;  %v4824_v49 = vpop.f32.mrb[101].mxu1  ;;  %9222 = vmatpush1.bf16.msra.mxu1 %v9221_v52  ;;  %v5220_v53 = vmax.f32 %v4484_v54, 0.0 }
 0x512   : > { %v4825_v30 = vadd.f32 %v4824_v49, %v12403_v29  ;;  %v5221_v3 = vmax.f32 %v4486_v46, 0.0  ;;  %v4489_v12 = vpop.f32.mrb[70].mxu0 }
 0x513   : > { %v5226_v2 = vmax.f32 %v4823_v31, 0.0  ;;  %v9193_v32 = vpack.c.bf16 %v5220_v53, %v5204_v4  ;;  %v4491_v52 = vpop.f32.mrb[71].mxu0  ;;  %v4490_v14 = vadd.f32 %v4489_v12, %v12407_v17 }
 0x514   : > { %v5227_v56 = vmax.f32 %v4825_v30, 0.0  ;;  %v4828_v38 = vpop.f32.mrb[102].mxu1  ;;  %7889 = vmatmul.mubr.msk.f32.vlgmr.msra.gmra.mrb[132].mxu1 %vm5335_vm4, %v12398_v41  ;;  %v9191_v58 = vpack.c.bf16 %v5221_v3, %v5205_v47  ;;  %v4492_v43 = vadd.f32 %v4491_v52, %v12407_v17 }
 0x515   : > { %v9241_v27 = vpack.c.bf16 %v5226_v2, %v5210_v25  ;;  %v4830_v62 = vpop.f32.mrb[103].mxu1  ;;  %5686 = vmatprep.mubr.f32.mxu1 %v13641_v59  ;;  %v4829_v34 = vadd.f32 %v4828_v38, %v12407_v17  ;;  %v5236_v38 = vmax.f32 %v4490_v14, 0.0 }
 0x516   : > { %v9239_v63 = vpack.c.bf16 %v5227_v56, %v5211_v33  ;;  %v4831_v54 = vadd.f32 %v4830_v62, %v12407_v17  ;;  %v4495_v31 = vpop.f32.mrb[72].mxu0  ;;  %9192 = vmatprep.subr.bf16.mxu0 %v9191_v58  ;;  %v5237_v47 = vmax.f32 %v4492_v43, 0.0 }
 0x517   : > { %v4496_v46 = vadd.f32 %v4495_v31, %v12411_v22  ;;  %v4497_v4 = vpop.f32.mrb[73].mxu0  ;;  %9194 = vmatpush1.bf16.msra.mxu0 %v9193_v32  ;;  %v5242_v53 = vmax.f32 %v4829_v34, 0.0 }
 0x518   : > { %v4834_v49 = vpop.f32.mrb[104].mxu1  ;;  %9240 = vmatprep.subr.bf16.mxu1 %v9239_v63  ;;  %v4498_v56 = vadd.f32 %v4497_v4, %v12411_v22  ;;  %v5243_v33 = vmax.f32 %v4831_v54, 0.0 }
 0x519   : > { %v4835_v30 = vadd.f32 %v4834_v49, %v12411_v22  ;;  %v4836_v25 = vpop.f32.mrb[105].mxu1  ;;  %9242 = vmatpush1.bf16.msra.mxu1 %v9241_v27  ;;  %v5252_v2 = vmax.f32 %v4496_v46, 0.0 }
 0x51a   : > { %v4837_v3 = vadd.f32 %v4836_v25, %v12411_v22  ;;  %v5253_v12 = vmax.f32 %v4498_v56, 0.0  ;;  %v4501_v58 = vpop.f32.mrb[74].mxu0 }
 0x51b   : > { %v5258_v62 = vmax.f32 %v4835_v30, 0.0  ;;  %v9197_v31 = vpack.c.bf16 %v5252_v2, %v5236_v38  ;;  %v4503_v0 = vpop.f32.mrb[75].mxu0  ;;  %v4502_v4 = vadd.f32 %v4501_v58, %v12417_v11 }
 0x51c   : > { %v5259_v52 = vmax.f32 %v4837_v3, 0.0  ;;  %v4840_v63 = vpop.f32.mrb[106].mxu1  ;;  %v9195_v32 = vpack.c.bf16 %v5253_v12, %v5237_v47  ;;  %v4504_v14 = vadd.f32 %v4503_v0, %v12417_v11 }
 0x51d   : > { %v9245_v49 = vpack.c.bf16 %v5258_v62, %v5242_v53  ;;  %v4842_v35 = vpop.f32.mrb[107].mxu1  ;;  %v4841_v25 = vadd.f32 %v4840_v63, %v12417_v11  ;;  %v5268_v2 = vmax.f32 %v4502_v4, 0.0 }
 0x51e   : > { %v9243_v27 = vpack.c.bf16 %v5259_v52, %v5243_v33  ;;  %v4843_v34 = vadd.f32 %v4842_v35, %v12417_v11  ;;  %v4507_v43 = vpop.f32.mrb[76].mxu0  ;;  %9196 = vmatprep.subr.bf16.mxu0 %v9195_v32  ;;  %v5269_v47 = vmax.f32 %v4504_v14, 0.0 }
 0x51f   : > { %v4508_v46 = vadd.f32 %v4507_v43, %v12419_v9  ;;  %v4509_v56 = vpop.f32.mrb[77].mxu0  ;;  %9198 = vmatpush1.bf16.msra.mxu0 %v9197_v31  ;;  %v5274_v0 = vmax.f32 %v4841_v25, 0.0 }
 0x520   : > { %v4846_v54 = vpop.f32.mrb[108].mxu1  ;;  %9244 = vmatprep.subr.bf16.mxu1 %v9243_v27  ;;  %v4510_v38 = vadd.f32 %v4509_v56, %v12419_v9  ;;  %v5275_v33 = vmax.f32 %v4843_v34, 0.0 }
 0x521   : > { %v4847_v30 = vadd.f32 %v4846_v54, %v12419_v9  ;;  %v4848_v3 = vpop.f32.mrb[109].mxu1  ;;  %9246 = vmatpush1.bf16.msra.mxu1 %v9245_v49  ;;  %v5284_v62 = vmax.f32 %v4508_v46, 0.0 }
 0x522   : > { %v4849_v53 = vadd.f32 %v4848_v3, %v12419_v9  ;;  %v5285_v12 = vmax.f32 %v4510_v38, 0.0  ;;  %v4513_v58 = vpop.f32.mrb[78].mxu0 }
 0x523   : > { %v5290_v35 = vmax.f32 %v4847_v30, 0.0  ;;  %v9201_v32 = vpack.c.bf16 %v5284_v62, %v5268_v2  ;;  %v4515_v43 = vpop.f32.mrb[79].mxu0  ;;  %v4514_v56 = vadd.f32 %v4513_v58, %v12425_v40 }
 0x524   : > { %v5291_v52 = vmax.f32 %v4849_v53, 0.0  ;;  %v4852_v63 = vpop.f32.mrb[110].mxu1  ;;  %v9199_v31 = vpack.c.bf16 %v5285_v12, %v5269_v47  ;;  %v4516_v4 = vadd.f32 %v4515_v43, %v12425_v40 }
 0x525   : > { %v9249_v27 = vpack.c.bf16 %v5290_v35, %v5274_v0  ;;  %v4854_v54 = vpop.f32.mrb[111].mxu1  ;;  %v4853_v3 = vadd.f32 %v4852_v63, %v12425_v40  ;;  %v5300_v62 = vmax.f32 %v4514_v56, 0.0 }
 0x526   : > { %v9247_v49 = vpack.c.bf16 %v5291_v52, %v5275_v33  ;;  %v4855_v25 = vadd.f32 %v4854_v54, %v12425_v40  ;;  %v4519_v14 = vpop.f32.mrb[80].mxu0  ;;  %9200 = vmatprep.subr.bf16.mxu0 %v9199_v31  ;;  %v5301_v12 = vmax.f32 %v4516_v4, 0.0 }
 0x527   : > { %v4520_v46 = vadd.f32 %v4519_v14, %v12427_v28  ;;  %v4521_v38 = vpop.f32.mrb[81].mxu0  ;;  %9202 = vmatpush1.bf16.msra.mxu0 %v9201_v32  ;;  %v5306_v35 = vmax.f32 %v4853_v3, 0.0 }
 0x528   : > { %v4858_v34 = vpop.f32.mrb[112].mxu1  ;;  %9248 = vmatprep.subr.bf16.mxu1 %v9247_v49  ;;  %v4522_v2 = vadd.f32 %v4521_v38, %v12427_v28  ;;  %v5307_v52 = vmax.f32 %v4855_v25, 0.0 }
 0x529   : > { %v4859_v30 = vadd.f32 %v4858_v34, %v12427_v28  ;;  %v4860_v53 = vpop.f32.mrb[113].mxu1  ;;  %9250 = vmatpush1.bf16.msra.mxu1 %v9249_v27  ;;  %v5316_v47 = vmax.f32 %v4520_v46, 0.0 }
 0x52a   : > { %v4861_v0 = vadd.f32 %v4860_v53, %v12427_v28  ;;  %v5317_v58 = vmax.f32 %v4522_v2, 0.0  ;;  %v4703_v43 = vpop.f32.mrb[82].mxu0 }
 0x52b   : > { %v5322_v33 = vmax.f32 %v4859_v30, 0.0  ;;  %v9205_v54 = vpack.c.bf16 %v5316_v47, %v5300_v62  ;;  %v4705_v14 = vpop.f32.mrb[83].mxu0  ;;  %v4704_v38 = vadd.f32 %v4703_v43, %v12401_v13 }
 0x52c   : > { %v5323_v63 = vmax.f32 %v4861_v0, 0.0  ;;  %v5042_v49 = vpop.f32.mrb[114].mxu1  ;;  %v9203_v34 = vpack.c.bf16 %v5317_v58, %v5301_v12  ;;  %v4706_v56 = vadd.f32 %v4705_v14, %v12401_v13 }
 0x52d   : > { %v9253_v31 = vpack.c.bf16 %v5322_v33, %v5306_v35  ;;  %v5044_v27 = vpop.f32.mrb[115].mxu1  ;;  %v5043_v53 = vadd.f32 %v5042_v49, %v12401_v13  ;;  %v5208_v35 = vmax.f32 %v4704_v38, 0.0 }
 0x52e   : > { %v9251_v32 = vpack.c.bf16 %v5323_v63, %v5307_v52  ;;  %v4709_v3 = vpop.f32.mrb[84].mxu0  ;;  %9204 = vmatprep.subr.bf16.mxu0 %v9203_v34  ;;  %v5045_v4 = vadd.f32 %v5044_v27, %v12401_v13  ;;  %v5209_v52 = vmax.f32 %v4706_v56, 0.0 }
 0x52f   : > { %v4710_v25 = vadd.f32 %v4709_v3, %v12403_v29  ;;  %v4711_v30 = vpop.f32.mrb[85].mxu0  ;;  %9206 = vmatpush1.bf16.msra.mxu0 %v9205_v54  ;;  %v5214_v12 = vmax.f32 %v5043_v53, 0.0 }
 0x530   : > { %9252 = vmatprep.subr.bf16.mxu1 %v9251_v32  ;;  %v5048_v46 = vpop.f32.mrb[116].mxu1  ;;  %v4712_v0 = vadd.f32 %v4711_v30, %v12403_v29  ;;  %v5215_v54 = vmax.f32 %v5045_v4, 0.0 }
 0x531   : > { %9254 = vmatpush1.bf16.msra.mxu1 %v9253_v31  ;;  %v5049_v2 = vadd.f32 %v5048_v46, %v12403_v29  ;;  %v5050_v62 = vpop.f32.mrb[117].mxu1  ;;  %v5224_v47 = vmax.f32 %v4710_v25, 0.0 }
 0x532   : > { %v5051_v33 = vadd.f32 %v5050_v62, %v12403_v29  ;;  %v5225_v63 = vmax.f32 %v4712_v0, 0.0  ;;  %v4715_v43 = vpop.f32.mrb[86].mxu0  ;;  %7888 = vmatmul.mubr.msk.f32.vlgmr.msra.gmra.mrb[130].mxu0 %vm5335_vm4, %v12398_v41 }
 0x533   : > { %v5230_v58 = vmax.f32 %v5049_v2, 0.0  ;;  %v9225_v31 = vpack.c.bf16 %v5224_v47, %v5208_v35  ;;  %v4717_v34 = vpop.f32.mrb[87].mxu0  ;;  %5615 = vmatprep.mubr.f32.mxu0 %v13641_v59  ;;  %v4716_v56 = vadd.f32 %v4715_v43, %v12407_v17 }
 0x534   : > { %7891 = vmatmul.mubr.msk.f32.vlgmr.msra.gmra.mrb[134].mxu1 %vm5335_vm4, %v12398_v41  ;;  %v5231_v49 = vmax.f32 %v5051_v33, 0.0  ;;  %v5054_v14 = vpop.f32.mrb[118].mxu1  ;;  %v9223_v27 = vpack.c.bf16 %v5225_v63, %v5209_v52  ;;  %v4718_v25 = vadd.f32 %v4717_v34, %v12407_v17 }
 0x535   : > { %5828 = vmatprep.mubr.f32.mxu1 %v13641_v59  ;;  %v9273_v32 = vpack.c.bf16 %v5230_v58, %v5214_v12  ;;  %v5056_v38 = vpop.f32.mrb[119].mxu1  ;;  %v5055_v3 = vadd.f32 %v5054_v14, %v12407_v17  ;;  %v5240_v33 = vmax.f32 %v4716_v56, 0.0 }
 0x536   : > { %v9271_v53 = vpack.c.bf16 %v5231_v49, %v5215_v54  ;;  %v4721_v46 = vpop.f32.mrb[88].mxu0  ;;  %9224 = vmatprep.subr.bf16.mxu0 %v9223_v27  ;;  %v5057_v4 = vadd.f32 %v5056_v38, %v12407_v17  ;;  %v5241_v63 = vmax.f32 %v4718_v25, 0.0 }
 0x537   : > { %v4722_v30 = vadd.f32 %v4721_v46, %v12411_v22  ;;  %v4723_v0 = vpop.f32.mrb[89].mxu0  ;;  %9226 = vmatpush1.bf16.msra.mxu0 %v9225_v31  ;;  %v5246_v58 = vmax.f32 %v5055_v3, 0.0 }
 0x538   : > { %v5060_v2 = vpop.f32.mrb[120].mxu1  ;;  %9272 = vmatprep.subr.bf16.mxu1 %v9271_v53  ;;  %v4724_v35 = vadd.f32 %v4723_v0, %v12411_v22  ;;  %v5247_v14 = vmax.f32 %v5057_v4, 0.0 }
 0x539   : > { %v5061_v62 = vadd.f32 %v5060_v2, %v12411_v22  ;;  %v5062_v47 = vpop.f32.mrb[121].mxu1  ;;  %9274 = vmatpush1.bf16.msra.mxu1 %v9273_v32  ;;  %v5256_v12 = vmax.f32 %v4722_v30, 0.0 }
 0x53a   : > { %v5063_v52 = vadd.f32 %v5062_v47, %v12411_v22  ;;  %v5257_v54 = vmax.f32 %v4724_v35, 0.0  ;;  %v4727_v49 = vpop.f32.mrb[90].mxu0 }
 0x53b   : > { %v5262_v43 = vmax.f32 %v5061_v62, 0.0  ;;  %v9229_v34 = vpack.c.bf16 %v5256_v12, %v5240_v33  ;;  %v4729_v31 = vpop.f32.mrb[91].mxu0  ;;  %v4728_v32 = vadd.f32 %v4727_v49, %v12417_v11 }
 0x53c   : > { %v5263_v27 = vmax.f32 %v5063_v52, 0.0  ;;  %v5066_v38 = vpop.f32.mrb[122].mxu1  ;;  %v9227_v46 = vpack.c.bf16 %v5257_v54, %v5241_v63  ;;  %v4730_v30 = vadd.f32 %v4729_v31, %v12417_v11 }
 0x53d   : > { %v9277_v53 = vpack.c.bf16 %v5262_v43, %v5246_v58  ;;  %v5068_v2 = vpop.f32.mrb[123].mxu1  ;;  %v5067_v56 = vadd.f32 %v5066_v38, %v12417_v11  ;;  %v5272_v52 = vmax.f32 %v4728_v32, 0.0 }
 0x53e   : > { %v9275_v0 = vpack.c.bf16 %v5263_v27, %v5247_v14  ;;  %v4733_v3 = vpop.f32.mrb[92].mxu0  ;;  %9228 = vmatprep.subr.bf16.mxu0 %v9227_v46  ;;  %v5069_v25 = vadd.f32 %v5068_v2, %v12417_v11  ;;  %v5273_v54 = vmax.f32 %v4730_v30, 0.0 }
 0x53f   : > { %v4734_v4 = vadd.f32 %v4733_v3, %v12419_v9  ;;  %v4735_v35 = vpop.f32.mrb[93].mxu0  ;;  %9230 = vmatpush1.bf16.msra.mxu0 %v9229_v34  ;;  %v5278_v43 = vmax.f32 %v5067_v56, 0.0 }
 0x540   : > { %v5072_v62 = vpop.f32.mrb[124].mxu1  ;;  %9276 = vmatprep.subr.bf16.mxu1 %v9275_v0  ;;  %v4736_v33 = vadd.f32 %v4735_v35, %v12419_v9  ;;  %v5279_v38 = vmax.f32 %v5069_v25, 0.0 }
 0x541   : > { %v5073_v47 = vadd.f32 %v5072_v62, %v12419_v9  ;;  %v5074_v12 = vpop.f32.mrb[125].mxu1  ;;  %9278 = vmatpush1.bf16.msra.mxu1 %v9277_v53  ;;  %v5288_v58 = vmax.f32 %v4734_v4, 0.0 }
 0x542   : > { %v5075_v63 = vadd.f32 %v5074_v12, %v12419_v9  ;;  %v5289_v14 = vmax.f32 %v4736_v33, 0.0  ;;  %v4739_v27 = vpop.f32.mrb[94].mxu0 }
 0x543   : > { %v5294_v49 = vmax.f32 %v5073_v47, 0.0  ;;  %v9233_v31 = vpack.c.bf16 %v5288_v58, %v5272_v52  ;;  %v4741_v34 = vpop.f32.mrb[95].mxu0  ;;  %v4740_v53 = vadd.f32 %v4739_v27, %v12425_v40 }
 0x544   : > { %v5295_v46 = vmax.f32 %v5075_v63, 0.0  ;;  %v5078_v2 = vpop.f32.mrb[126].mxu1  ;;  %v9231_v3 = vpack.c.bf16 %v5289_v14, %v5273_v54  ;;  %v4742_v4 = vadd.f32 %v4741_v34, %v12425_v40 }
 0x545   : > { %v9281_v0 = vpack.c.bf16 %v5294_v49, %v5278_v43  ;;  %v5080_v62 = vpop.f32.mrb[127].mxu1  ;;  %v5079_v32 = vadd.f32 %v5078_v2, %v12425_v40  ;;  %v5304_v63 = vmax.f32 %v4740_v53, 0.0 }
 0x546   : > { %v9279_v35 = vpack.c.bf16 %v5295_v46, %v5279_v38  ;;  %v4745_v56 = vpop.f32.mrb[96].mxu0  ;;  %9232 = vmatprep.subr.bf16.mxu0 %v9231_v3  ;;  %v5081_v30 = vadd.f32 %v5080_v62, %v12425_v40  ;;  %v5305_v14 = vmax.f32 %v4742_v4, 0.0 }
 0x547   : > { %v4746_v25 = vadd.f32 %v4745_v56, %v12427_v28  ;;  %v4747_v33 = vpop.f32.mrb[97].mxu0  ;;  %9234 = vmatpush1.bf16.msra.mxu0 %v9233_v31  ;;  %v5310_v49 = vmax.f32 %v5079_v32, 0.0 }
 0x548   : > { %v5084_v47 = vpop.f32.mrb[128].mxu1  ;;  %9280 = vmatprep.subr.bf16.mxu1 %v9279_v35  ;;  %v4748_v52 = vadd.f32 %v4747_v33, %v12427_v28  ;;  %v5311_v2 = vmax.f32 %v5081_v30, 0.0 }
 0x549   : > { %v5085_v12 = vadd.f32 %v5084_v47, %v12427_v28  ;;  %v5086_v58 = vpop.f32.mrb[129].mxu1  ;;  %9282 = vmatpush1.bf16.msra.mxu1 %v9281_v0  ;;  %v5320_v43 = vmax.f32 %v4746_v25, 0.0 }
 0x54a   : > { %v5087_v54 = vadd.f32 %v5086_v58, %v12427_v28  ;;  %v5321_v38 = vmax.f32 %v4748_v52, 0.0  ;;  %v4929_v46 = vpop.f32.mrb[98].mxu0 }
 0x54b   : > { %v5326_v27 = vmax.f32 %v5085_v12, 0.0  ;;  %v9237_v34 = vpack.c.bf16 %v5320_v43, %v5304_v63  ;;  %v4931_v62 = vpop.f32.mrb[99].mxu0  ;;  %v4930_v47 = vadd.f32 %v4929_v46, %v12401_v13 }
 0x54c   : > { %v5327_v3 = vmax.f32 %v5087_v54, 0.0  ;;  %v9235_v35 = vpack.c.bf16 %v5321_v38, %v5305_v14  ;;  %v4932_v0 = vadd.f32 %v4931_v62, %v12401_v13 }
 0x54d   : > { %v9285_v31 = vpack.c.bf16 %v5326_v27, %v5310_v49  ;;  %v5212_v30 = vmax.f32 %v4930_v47, 0.0 }
 0x54e   : > { %v9283_v56 = vpack.c.bf16 %v5327_v3, %v5311_v2  ;;  %v4935_v53 = vpop.f32.mrb[100].mxu0  ;;  %9236 = vmatprep.subr.bf16.mxu0 %v9235_v35  ;;  %v5213_v12 = vmax.f32 %v4932_v0, 0.0 }
 0x54f   : > { %v4936_v25 = vadd.f32 %v4935_v53, %v12403_v29  ;;  %v4937_v32 = vpop.f32.mrb[101].mxu0  ;;  %9238 = vmatpush1.bf16.msra.mxu0 %v9237_v34 }
 0x550   : > { %9284 = vmatprep.subr.bf16.mxu1 %v9283_v56  ;;  %v4938_v4 = vadd.f32 %v4937_v32, %v12403_v29 }
 0x551   : > { %9286 = vmatpush1.bf16.msra.mxu1 %v9285_v31  ;;  %v5228_v33 = vmax.f32 %v4936_v25, 0.0 }
 0x552   : > { %9496 = vmatprep.subr.bf16.mxu1 %v13884_v24  ;;  %v5229_v52 = vmax.f32 %v4938_v4, 0.0  ;;  %v4941_v58 = vpop.f32.mrb[102].mxu0  ;;  %7890 = vmatmul.mubr.msk.f32.vlgmr.msra.gmra.mrb[132].mxu0 %vm5335_vm4, %v12398_v41 }
 0x553   : > { %v9257_v63 = vpack.c.bf16 %v5228_v33, %v5212_v30  ;;  %v4943_v43 = vpop.f32.mrb[103].mxu0  ;;  %5757 = vmatprep.mubr.f32.mxu0 %v13641_v59  ;;  %v4942_v49 = vadd.f32 %v4941_v58, %v12407_v17 }
 0x554   : > { %7893 = vmatmul.mubr.msk.f32.vlgmr.msra.gmra.mrb[136].mxu1 %vm5335_vm4, %v12398_v41  ;;  %v9255_v54 = vpack.c.bf16 %v5229_v52, %v5213_v12  ;;  %v4944_v14 = vadd.f32 %v4943_v43, %v12407_v17 }
 0x555   : > { %v5244_v34 = vmax.f32 %v4942_v49, 0.0 }
 0x556   : > { %v4947_v27 = vpop.f32.mrb[104].mxu0  ;;  %9256 = vmatprep.subr.bf16.mxu0 %v9255_v54  ;;  %v5245_v62 = vmax.f32 %v4944_v14, 0.0 }
 0x557   : > { %v4948_v38 = vadd.f32 %v4947_v27, %v12411_v22  ;;  %v4949_v46 = vpop.f32.mrb[105].mxu0  ;;  %9258 = vmatpush1.bf16.msra.mxu0 %v9257_v63 }
 0x558   : > { %v4950_v2 = vadd.f32 %v4949_v46, %v12411_v22 }
 0x559   : > { %v5260_v3 = vmax.f32 %v4948_v38, 0.0 }
 0x55a   : > { %9498 = vmatpush1.bf16.xpose.msra.mxu1 %v13886_v50  ;;  %v5261_v31 = vmax.f32 %v4950_v2, 0.0  ;;  %v4953_v35 = vpop.f32.mrb[106].mxu0 }
 0x55b   : > { %9500 = vmatprep.subr.bf16.mxu1 %v13888_v1  ;;  %v9261_v56 = vpack.c.bf16 %v5260_v3, %v5244_v34  ;;  %v4955_v47 = vpop.f32.mrb[107].mxu0  ;;  %v4954_v53 = vadd.f32 %v4953_v35, %v12417_v11 }
 0x55c   : > { %v9259_v0 = vpack.c.bf16 %v5261_v31, %v5245_v62  ;;  %v4956_v25 = vadd.f32 %v4955_v47, %v12417_v11 }
 0x55d   : > { %v5276_v12 = vmax.f32 %v4954_v53, 0.0 }
 0x55e   : > { %v4959_v32 = vpop.f32.mrb[108].mxu0  ;;  %9260 = vmatprep.subr.bf16.mxu0 %v9259_v0  ;;  %v5277_v58 = vmax.f32 %v4956_v25, 0.0 }
 0x55f   : > { %v4960_v4 = vadd.f32 %v4959_v32, %v12419_v9  ;;  %v4961_v30 = vpop.f32.mrb[109].mxu0  ;;  %9262 = vmatpush1.bf16.msra.mxu0 %v9261_v56 }
 0x560   : > { %v4962_v33 = vadd.f32 %v4961_v30, %v12419_v9 }
 0x561   : > { %v5292_v52 = vmax.f32 %v4960_v4, 0.0 }
 0x562   : > { %9502 = vmatpush1.bf16.xpose.msra.mxu1 %v13890_v39  ;;  %v5293_v63 = vmax.f32 %v4962_v33, 0.0  ;;  %v4965_v43 = vpop.f32.mrb[110].mxu0 }
 0x563   : > { %9504 = vmatprep.subr.bf16.mxu1 %v13892_v57  ;;  %v9265_v54 = vpack.c.bf16 %v5292_v52, %v5276_v12  ;;  %v4967_v49 = vpop.f32.mrb[111].mxu0  ;;  %v4966_v27 = vadd.f32 %v4965_v43, %v12425_v40  ;;  %v14048_v57 = vld [vmem:[#allocation163_spill] sm:$0xff] }
 0x564   : > { %v9263_v14 = vpack.c.bf16 %v5293_v63, %v5277_v58  ;;  %v4968_v38 = vadd.f32 %v4967_v49, %v12425_v40 }
 0x565   : > { %v5308_v62 = vmax.f32 %v4966_v27, 0.0 }
 0x566   : > { %v4971_v46 = vpop.f32.mrb[112].mxu0  ;;  %9264 = vmatprep.subr.bf16.mxu0 %v9263_v14  ;;  %v5309_v35 = vmax.f32 %v4968_v38, 0.0 }
 0x567   : > { %v4972_v2 = vadd.f32 %v4971_v46, %v12427_v28  ;;  %v4973_v34 = vpop.f32.mrb[113].mxu0  ;;  %9266 = vmatpush1.bf16.msra.mxu0 %v9265_v54 }
 0x568   : > { %v4974_v3 = vadd.f32 %v4973_v34, %v12427_v28 }
 0x569   : > { %v5324_v31 = vmax.f32 %v4972_v2, 0.0 }
 0x56a   : > { %9506 = vmatpush1.bf16.xpose.msra.mxu1 %v13894_v44  ;;  %v5325_v56 = vmax.f32 %v4974_v3, 0.0  ;;  %v5155_v47 = vpop.f32.mrb[114].mxu0 }
 0x56b   : > { %9508 = vmatprep.subr.bf16.mxu1 %v13896_v15  ;;  %v9269_v0 = vpack.c.bf16 %v5324_v31, %v5308_v62  ;;  %v5157_v53 = vpop.f32.mrb[115].mxu0  ;;  %v5156_v32 = vadd.f32 %v5155_v47, %v12401_v13  ;;  %v14042_v15 = vld [vmem:[#allocation29_spill] sm:$0xff] }
 0x56c   : > { %v9267_v25 = vpack.c.bf16 %v5325_v56, %v5309_v35  ;;  %v5158_v4 = vadd.f32 %v5157_v53, %v12401_v13 }
 0x56d   : > { %v5216_v58 = vmax.f32 %v5156_v32, 0.0 }
 0x56e   : > { %v5161_v30 = vpop.f32.mrb[116].mxu0  ;;  %9268 = vmatprep.subr.bf16.mxu0 %v9267_v25  ;;  %v5217_v43 = vmax.f32 %v5158_v4, 0.0 }
 0x56f   : > { %v5162_v33 = vadd.f32 %v5161_v30, %v12403_v29  ;;  %v5163_v12 = vpop.f32.mrb[117].mxu0  ;;  %9270 = vmatpush1.bf16.msra.mxu0 %v9269_v0 }
 0x570   : > { %v5164_v52 = vadd.f32 %v5163_v12, %v12403_v29 }
 0x571   : > { %v5232_v63 = vmax.f32 %v5162_v33, 0.0 }
 0x572   : > { %9510 = vmatpush1.bf16.xpose.msra.mxu1 %v13898_v55  ;;  %v5233_v54 = vmax.f32 %v5164_v52, 0.0  ;;  %v5167_v49 = vpop.f32.mrb[118].mxu0  ;;  %7892 = vmatmul.mubr.msk.f32.vlgmr.msra.gmra.mrb[134].mxu0 %vm5335_vm4, %v12398_v41 }
 0x573   : > { %9512 = vmatprep.subr.bf16.mxu1 %v13900_v18  ;;  %v9289_v13 = vpack.c.bf16 %v5232_v63, %v5216_v58  ;;  %v5169_v14 = vpop.f32.mrb[119].mxu0  ;;  %5899 = vmatprep.mubr.f32.mxu0 %v13641_v59  ;;  %v5168_v38 = vadd.f32 %v5167_v49, %v12407_v17  ;;  %v14037_v59 = vld [vmem:[#allocation161_spill] sm:$0xff] }
 0x574   : > { %v9287_v27 = vpack.c.bf16 %v5233_v54, %v5217_v43  ;;  %v5170_v29 = vadd.f32 %v5169_v14, %v12407_v17 }
 0x575   : > { %v5248_v41 = vmax.f32 %v5168_v38, 0.0 }
 0x576   : > { %v5173_v46 = vpop.f32.mrb[120].mxu0  ;;  %9288 = vmatprep.subr.bf16.mxu0 %v9287_v27  ;;  %v5249_v31 = vmax.f32 %v5170_v29, 0.0 }
 0x577   : > { %v5174_v2 = vadd.f32 %v5173_v46, %v12411_v22  ;;  %v5175_v34 = vpop.f32.mrb[121].mxu0  ;;  %9290 = vmatpush1.bf16.msra.mxu0 %v9289_v13 }
 0x578   : > { %v5176_v3 = vadd.f32 %v5175_v34, %v12411_v22 }
 0x579   : > { %v5264_v62 = vmax.f32 %v5174_v2, 0.0 }
 0x57a   : > { %9514 = vmatpush1.bf16.xpose.msra.mxu1 %v13902_v45  ;;  %v5265_v35 = vmax.f32 %v5176_v3, 0.0  ;;  %v5179_v56 = vpop.f32.mrb[122].mxu0  ;;  %v14040_v45 = vld [vmem:[#allocation160_spill] sm:$0xff] }
 0x57b   : > { %9516 = vmatprep.subr.bf16.mxu1 %v13904_v48  ;;  %v9293_v47 = vpack.c.bf16 %v5264_v62, %v5248_v41  ;;  %v5181_v0 = vpop.f32.mrb[123].mxu0  ;;  %v5180_v53 = vadd.f32 %v5179_v56, %v12417_v11  ;;  %v14010_v62 = vld [vmem:[#allocation38_spill] sm:$0xff]  ;;  %v14013_v56 = vld [vmem:[#allocation44_spill] sm:$0xff]  ;;  %v14039_v48 = vld [vmem:[#allocation27_spill] sm:$0xff] }
 0x57c   : > { %v9291_v17 = vpack.c.bf16 %v5265_v35, %v5249_v31  ;;  %v5182_v25 = vadd.f32 %v5181_v0, %v12417_v11  ;;  %v14011_v31 = vld [vmem:[#allocation40_spill] sm:$0xff]  ;;  %v14012_v35 = vld [vmem:[#allocation42_spill] sm:$0xff] }
 0x57d   : > { %v5280_v33 = vmax.f32 %v5180_v53, 0.0  ;;  %v14015_v0 = vld [vmem:[#allocation48_spill] sm:$0xff]  ;;  %v14016_v53 = vld [vmem:[#allocation50_spill] sm:$0xff] }
 0x57e   : > { %v5185_v32 = vpop.f32.mrb[124].mxu0  ;;  %9292 = vmatprep.subr.bf16.mxu0 %v9291_v17  ;;  %v5281_v52 = vmax.f32 %v5182_v25, 0.0  ;;  %v12596_v25 = vpop.permute.xlu0 %5332 }
 0x57f   : > { %v5186_v22 = vadd.f32 %v5185_v32, %v12419_v9  ;;  %v5187_v4 = vpop.f32.mrb[125].mxu0  ;;  %9294 = vmatpush1.bf16.msra.mxu0 %v9293_v47  ;;  %v14014_v47 = vld [vmem:[#allocation46_spill] sm:$0xff] }
 0x580   : > { %v5188_v30 = vadd.f32 %v5187_v4, %v12419_v9 }
 0x581   : > { %v5296_v12 = vmax.f32 %v5186_v22, 0.0 }
 0x582   : > { %9518 = vmatpush1.bf16.xpose.msra.mxu1 %v13908_v37  ;;  %v5297_v58 = vmax.f32 %v5188_v30, 0.0  ;;  %v5191_v63 = vpop.f32.mrb[126].mxu0 }
 0x583   : > { %9520 = vmatprep.subr.bf16.mxu1 %v13910_v5  ;;  %v9297_v43 = vpack.c.bf16 %v5296_v12, %v5280_v33  ;;  %v5193_v54 = vpop.f32.mrb[127].mxu0  ;;  %v5192_v49 = vadd.f32 %v5191_v63, %v12425_v40  ;;  %v14017_v33 = vld [vmem:[#allocation52_spill] sm:$0xff] }
 0x584   : > { %v9295_v11 = vpack.c.bf16 %v5297_v58, %v5281_v52  ;;  %v5194_v13 = vadd.f32 %v5193_v54, %v12425_v40  ;;  %v10008_v40 = vld [vmem:[#allocation4 + $0x80] sm:$0xff]  ;;  %v14018_v52 = vld [vmem:[#allocation54_spill] sm:$0xff]  ;;  %v14019_v58 = vld [vmem:[#allocation155_spill] sm:$0xff] }
 0x585   : > { %v5312_v29 = vmax.f32 %v5192_v49, 0.0  ;;  %v14020_v54 = vld [vmem:[#allocation56_spill] sm:$0xff]  ;;  %v14021_v49 = vld [vmem:[#allocation58_spill] sm:$0xff] }
 0x586   : > { %v5197_v14 = vpop.f32.mrb[128].mxu0  ;;  %9296 = vmatprep.subr.bf16.mxu0 %v9295_v11  ;;  %v5313_v2 = vmax.f32 %v5194_v13, 0.0  ;;  %v14022_v13 = vld [vmem:[#allocation154_spill] sm:$0xff]  ;;  %v14038_v5 = vld [vmem:[#allocation88_spill] sm:$0xff] }
 0x587   : > { %v5198_v9 = vadd.f32 %v5197_v14, %v12427_v28  ;;  %v5199_v27 = vpop.f32.mrb[129].mxu0  ;;  %9298 = vmatpush1.bf16.msra.mxu0 %v9297_v43 }
 0x588   : > { %v5200_v38 = vadd.f32 %v5199_v27, %v12427_v28  ;;  %v14009_v28 = vld [vmem:[#allocation36_spill] sm:$0xff]  ;;  %v14024_v27 = vld [vmem:[#allocation62_spill] sm:$0xff] }
 0x589   : > { %v5328_v46 = vmax.f32 %v5198_v9, 0.0  ;;  %v14023_v9 = vld [vmem:[#allocation60_spill] sm:$0xff] }
 0x58a   : > { %9522 = vmatpush1.bf16.xpose.msra.mxu1 %v13912_v20  ;;  %v5329_v34 = vmax.f32 %v5200_v38, 0.0  ;;  %v14025_v38 = vld [vmem:[#allocation64_spill] sm:$0xff] }
 0x58b   : > { %9524 = vmatprep.subr.bf16.mxu1 %v13914_v23  ;;  %v9301_v3 = vpack.c.bf16 %v5328_v46, %v5312_v29  ;;  %v14026_v29 = vld [vmem:[#allocation66_spill] sm:$0xff] }
 0x58c   : > { %v9299_v41 = vpack.c.bf16 %v5329_v34, %v5313_v2  ;;  %v14027_v34 = vld [vmem:[#allocation68_spill] sm:$0xff] }
 0x58e   : > { %9300 = vmatprep.subr.bf16.mxu0 %v9299_v41  ;;  %v14029_v41 = vld [vmem:[#allocation72_spill] sm:$0xff] }
 0x58f   : > { %9302 = vmatpush1.bf16.msra.mxu0 %v9301_v3  ;;  %v14028_v3 = vld [vmem:[#allocation70_spill] sm:$0xff] }
 0x590   : > { %9304 = vmatprep.subr.bf16.mxu0 %v13801_v21 }
 0x592   : > { %9526 = vmatpush1.bf16.xpose.msra.mxu1 %v13916_v51  ;;  %7894 = vmatmul.mubr.msk.f32.vlgmr.msra.gmra.mrb[136].mxu0 %vm5335_vm4, %v10008_v40  ;;  %v14030_v40 = vld [vmem:[#allocation74_spill] sm:$0xff] }
 0x593   : > { %9560 = vmatprep.subr.bf16.mxu1 %v13801_v21  ;;  %v5906_v21 = vlaneseq }
 0x595   : > { %v5907_v17 = vshrl.u32 %v5906_v21, 7  ;;  %v14031_v21 = vld [vmem:[#allocation76_spill] sm:$0xff] }
 0x597   : > { %v12598_v22 = vsub.s32 0, %v5907_v17  ;;  %v14032_v17 = vld [vmem:[#allocation78_spill] sm:$0xff] }
 0x598   : > { %9306 = vmatpush1.bf16.xpose.msra.mxu0 %v13803_v16 }
 0x599   : > { %9308 = vmatprep.subr.bf16.mxu0 %v13805_v8 }
 0x5a0   : > { %9310 = vmatpush1.bf16.xpose.msra.mxu0 %v13806_v61 }
 0x5a1   : > { %9312 = vmatprep.subr.bf16.mxu0 %v13807_v6 }
 0x5a8   : > { %9314 = vmatpush1.bf16.xpose.msra.mxu0 %v14009_v28 }
 0x5a9   : > { %9316 = vmatprep.subr.bf16.mxu0 %v14010_v62 }
 0x5b0   : > { %9318 = vmatpush1.bf16.xpose.msra.mxu0 %v14011_v31 }
 0x5b1   : > { %9320 = vmatprep.subr.bf16.mxu0 %v14012_v35 }
 0x5b8   : > { %9322 = vmatpush1.bf16.xpose.msra.mxu0 %v14013_v56 }
 0x5b9   : > { %9324 = vmatprep.subr.bf16.mxu0 %v14014_v47 }
 0x5c0   : > { %9326 = vmatpush1.bf16.xpose.msra.mxu0 %v14015_v0 }
 0x5c1   : > { %9328 = vmatprep.subr.bf16.mxu0 %v14016_v53 }
 0x5c7   : > { %v5404_v32 = vpop.f32.mrb[130].mxu1 }
 0x5c8   : > { %v5406_v4 = vpop.f32.mrb[131].mxu1  ;;  %9330 = vmatpush1.bf16.xpose.msra.mxu0 %v14017_v33  ;;  %v5405_v43 = vadd.f32 %v5404_v32, %v12596_v25  ;;  %v14033_v32 = vld [vmem:[#allocation80_spill] sm:$0xff] }
 0x5c9   : > { %v5407_v30 = vadd.f32 %v5406_v4, %v12596_v25  ;;  %9332 = vmatprep.subr.bf16.mxu0 %v14018_v52  ;;  %v14034_v4 = vld [vmem:[#allocation82_spill] sm:$0xff] }
 0x5ca   : > { %v5909_v11 = vrot.slane %v5405_v43, %v12598_v22 }
 0x5cb   : > { %v5913_v12 = vrot.slane %v5407_v30, %v12598_v22 }
 0x5cc   : > { %v5970_v14 = vmul.f32 %v5909_v11, %v14022_v13  ;;  %v14035_v11 = vld [vmem:[#allocation84_spill] sm:$0xff] }
 0x5cd   : > { %v5971_v63 = vmul.f32 %v5913_v12, %v14019_v58 }
 0x5cf   : > { %6050 = vmatprep.mubr.f32.mxu0 %v5971_v63 }
 0x5d0   : > { %9334 = vmatpush1.bf16.xpose.msra.mxu0 %v14020_v54 }
 0x5d1   : > { %9336 = vmatprep.subr.bf16.mxu0 %v14021_v49 }
 0x5d7   : > { %6051 = vmatmul.mubr.f32.vlgmr.msra.gmra.mrb[138].mxu0 %v5970_v14  ;;  %v14036_v14 = vld [vmem:[#allocation86_spill] sm:$0xff] }
 0x5d8   : > { %9338 = vmatpush1.bf16.xpose.msra.mxu0 %v14023_v9 }
 0x5d9   : > { %9340 = vmatprep.subr.bf16.mxu0 %v14024_v27 }
 0x5e0   : > { %9342 = vmatpush1.bf16.xpose.msra.mxu0 %v14025_v38 }
 0x5e1   : > { %9344 = vmatprep.subr.bf16.mxu0 %v14026_v29 }
 0x5e7   : > { %v12614_v46 = vpop.f32.mrb[132].mxu1 }
 0x5e8   : > { %v5548_v2 = vpop.f32.mrb[133].mxu1  ;;  %9346 = vmatpush1.bf16.xpose.msra.mxu0 %v14027_v34 }
 0x5e9   : > { %9348 = vmatprep.subr.bf16.mxu0 %v14028_v3  ;;  %v5549_v20 = vadd.f32 %v5548_v2, %v12596_v25  ;;  %v14045_v2 = vld [vmem:[#allocation35_spill] sm:$0xff] }
 0x5f0   : > { %9350 = vmatpush1.bf16.xpose.msra.mxu0 %v14029_v41 }
 0x5f1   : > { %9352 = vmatprep.subr.bf16.mxu0 %v14030_v40 }
 0x5f8   : > { %9354 = vmatpush1.bf16.xpose.msra.mxu0 %v14031_v21 }
 0x5f9   : > { %9356 = vmatprep.subr.bf16.mxu0 %v14032_v17 }
 0x600   : > { %9358 = vmatpush1.bf16.xpose.msra.mxu0 %v14033_v32 }
 0x601   : > { %9360 = vmatprep.subr.bf16.mxu0 %v14034_v4 }
 0x605   : > { %v5475_v30 = vpop.f32.mrb[130].mxu0 }
 0x606   : > { %v5477_v58 = vpop.f32.mrb[131].mxu0  ;;  %v5476_v23 = vadd.f32 %v5475_v30, %v12596_v25 }
 0x607   : > { %v12624_v12 = vpop.f32.mrb[134].mxu1  ;;  %v5478_v43 = vadd.f32 %v5477_v58, %v12596_v25  ;;  %v5929_v58 = vrot.slane %v5549_v20, %v12598_v22 }
 0x608   : > { %v12626_v63 = vpop.f32.mrb[135].mxu1  ;;  %9362 = vmatpush1.bf16.xpose.msra.mxu0 %v14035_v11  ;;  %v5917_v37 = vrot.slane %v5476_v23, %v12598_v22 }
 0x609   : > { %v5921_v13 = vrot.slane %v5478_v43, %v12598_v22  ;;  %9364 = vmatprep.subr.bf16.mxu0 %v14036_v14  ;;  %v14041_v43 = vld [vmem:[#allocation157_spill] sm:$0xff] }
 0x60a   : > { %v5972_v18 = vmul.f32 %v5917_v37, %v14040_v45  ;;  %v5975_v55 = vmul.f32 %v5929_v58, %v14041_v43  ;;  %v14046_v45 = vld [vmem:[#allocation37_spill] sm:$0xff] }
 0x60b   : > { %v5973_v51 = vmul.f32 %v5921_v13, %v14037_v59  ;;  %v14043_v59 = vld [vmem:[#allocation31_spill] sm:$0xff] }
 0x60d   : > { %6120 = vmatprep.mubr.f32.mxu0 %v5973_v51  ;;  %v14044_v51 = vld [vmem:[#allocation33_spill] sm:$0xff] }
 0x610   : > { %9366 = vmatpush1.bf16.xpose.msra.mxu0 %v14038_v5 }
 0x611   : > { %9368 = vmatprep.subr.bf16.mxu0 %v14039_v48 }
 0x617   : > { %6121 = vmatmul.mubr.f32.vlgmr.msra.gmra.mrb[140].mxu0 %v5972_v18 }
 0x618   : > { %9370 = vmatpush1.bf16.xpose.msra.mxu0 %v14042_v15  ;;  %6190 = vmatprep.mubr.f32.mxu0 %v5975_v55  ;;  %v14047_v55 = vld [vmem:[#allocation39_spill] sm:$0xff] }
 0x619   : > { %9372 = vmatprep.subr.bf16.mxu0 %v14043_v59 }
 0x620   : > { %9374 = vmatpush1.bf16.xpose.msra.mxu0 %v14044_v51 }
 0x621   : > { %9376 = vmatprep.subr.bf16.mxu0 %v14045_v2 }
 0x625   : > { %v12645_v30 = vpop.f32.mrb[132].mxu0 }
 0x626   : > { %v5619_v13 = vpop.f32.mrb[133].mxu0 }
 0x627   : > { %v5830_v23 = vpop.f32.mrb[136].mxu1 }
 0x628   : > { %v5831_v20 = vadd.f32 %v5830_v23, %v12596_v25  ;;  %v5832_v44 = vpop.f32.mrb[137].mxu1  ;;  %9378 = vmatpush1.bf16.xpose.msra.mxu0 %v14046_v45  ;;  %v14049_v23 = vld [vmem:[#allocation41_spill] sm:$0xff] }
 0x629   : > { %v5833_v37 = vadd.f32 %v5832_v44, %v12596_v25  ;;  %9380 = vmatprep.subr.bf16.mxu0 %v14047_v55  ;;  %v14050_v44 = vld [vmem:[#allocation43_spill] sm:$0xff] }
 0x62a   : > { %v5957_v18 = vrot.slane %v5831_v20, %v12598_v22  ;;  %v14051_v20 = vld [vmem:[#allocation45_spill] sm:$0xff] }
 0x62b   : > { %v5961_v58 = vrot.slane %v5833_v37, %v12598_v22 }
 0x62c   : > { %v5982_v39 = vmul.f32 %v5957_v18, %v14048_v57 }
 0x62d   : > { %v5983_v43 = vmul.f32 %v5961_v58, %v11631_v7  ;;  %v14052_v7 = vld [vmem:[#allocation47_spill] sm:$0xff] }
 0x62f   : > { %6470 = vmatprep.mubr.f32.mxu1 %v5983_v43  ;;  %v14060_v43 = vld [vmem:[#allocation164_spill] sm:$0xff] }
 0x630   : > { %6471 = vmatmul.mubr.f32.vlgmr.msra.gmra.mrb[138].mxu1 %v5982_v39  ;;  %9382 = vmatpush1.bf16.xpose.msra.mxu0 %v14049_v23  ;;  %v14053_v39 = vld [vmem:[#allocation49_spill] sm:$0xff] }
 0x631   : > { %9562 = vmatpush1.bf16.xpose.msra.mxu1 %v13803_v16  ;;  %6611 = vmatprep.mubr.f32.mxu1 %v11950_v60  ;;  %v14054_v16 = vld [vmem:[#allocation51_spill] sm:$0xff]  ;;  %v5547_v60 = vadd.f32 %v12614_v46, %v12596_v25  ;;  %v14061_v46 = vld [vmem:[#allocation92_spill] sm:$0xff] }
 0x632   : > { %9564 = vmatprep.subr.bf16.mxu1 %v13805_v8  ;;  %9384 = vmatprep.subr.bf16.mxu0 %v14050_v44 }
 0x633   : > { %v5925_v37 = vrot.slane %v5547_v60, %v12598_v22 }
 0x638   : > { %9386 = vmatpush1.bf16.xpose.msra.mxu0 %v14051_v20 }
 0x639   : > { %9566 = vmatpush1.bf16.xpose.msra.mxu1 %v13806_v61  ;;  %9388 = vmatprep.subr.bf16.mxu0 %v14052_v7  ;;  %v14055_v61 = vld [vmem:[#allocation53_spill] sm:$0xff] }
 0x63a   : > { %9568 = vmatprep.subr.bf16.mxu1 %v13807_v6  ;;  %v14056_v6 = vld [vmem:[#allocation55_spill] sm:$0xff] }
 0x640   : > { %9390 = vmatpush1.bf16.xpose.msra.mxu0 %v14053_v39 }
 0x641   : > { %9570 = vmatpush1.bf16.xpose.msra.mxu1 %v14009_v28  ;;  %9392 = vmatprep.subr.bf16.mxu0 %v14054_v16  ;;  %v5620_v28 = vadd.f32 %v5619_v13, %v12596_v25  ;;  %v14064_v13 = vld [vmem:[#allocation98_spill] sm:$0xff] }
 0x642   : > { %9572 = vmatprep.subr.bf16.mxu1 %v14010_v62  ;;  %v14057_v62 = vld [vmem:[#allocation57_spill] sm:$0xff] }
 0x643   : > { %v5937_v18 = vrot.slane %v5620_v28, %v12598_v22 }
 0x645   : > { %v12668_v57 = vpop.f32.mrb[134].mxu0  ;;  %v5977_v1 = vmul.f32 %v5937_v18, %v14060_v43  ;;  %v14081_v18 = vld [vmem:[#allocation159_spill] sm:$0xff] }
 0x646   : > { %v12670_v8 = vpop.f32.mrb[135].mxu0  ;;  %v14087_v43 = vld [vmem:[#allocation71_spill] sm:$0xff] }
 0x648   : > { %9394 = vmatpush1.bf16.xpose.msra.mxu0 %v14055_v61 }
 0x649   : > { %9574 = vmatpush1.bf16.xpose.msra.mxu1 %v14011_v31  ;;  %9396 = vmatprep.subr.bf16.mxu0 %v14056_v6  ;;  %v14058_v31 = vld [vmem:[#allocation90_spill] sm:$0xff] }
 0x64a   : > { %9576 = vmatprep.subr.bf16.mxu1 %v14012_v35  ;;  %v14059_v35 = vld [vmem:[#allocation156_spill] sm:$0xff] }
 0x64b   : > { %v5974_v58 = vmul.f32 %v5925_v37, %v14059_v35 }
 0x650   : > { %9398 = vmatpush1.bf16.xpose.msra.mxu0 %v14057_v62 }
 0x651   : > { %9578 = vmatpush1.bf16.xpose.msra.mxu1 %v14013_v56  ;;  %9400 = vmatprep.subr.bf16.mxu0 %v14058_v31  ;;  %v14062_v56 = vld [vmem:[#allocation94_spill] sm:$0xff] }
 0x652   : > { %9580 = vmatprep.subr.bf16.mxu1 %v14014_v47  ;;  %v14063_v47 = vld [vmem:[#allocation96_spill] sm:$0xff] }
 0x657   : > { %6191 = vmatmul.mubr.f32.vlgmr.msra.gmra.mrb[142].mxu0 %v5974_v58  ;;  %v14086_v58 = vld [vmem:[#allocation69_spill] sm:$0xff] }
 0x658   : > { %9402 = vmatpush1.bf16.xpose.msra.mxu0 %v14061_v46  ;;  %6260 = vmatprep.mubr.f32.mxu0 %v5977_v1  ;;  %v14066_v1 = vld [vmem:[#allocation102_spill] sm:$0xff] }
 0x659   : > { %9582 = vmatpush1.bf16.xpose.msra.mxu1 %v14015_v0  ;;  %9404 = vmatprep.subr.bf16.mxu0 %v14062_v56  ;;  %v14065_v0 = vld [vmem:[#allocation100_spill] sm:$0xff] }
 0x65a   : > { %9584 = vmatprep.subr.bf16.mxu1 %v14016_v53  ;;  %v14067_v53 = vld [vmem:[#allocation104_spill] sm:$0xff] }
 0x660   : > { %9406 = vmatpush1.bf16.xpose.msra.mxu0 %v14063_v47 }
 0x661   : > { %9586 = vmatpush1.bf16.xpose.msra.mxu1 %v14017_v33  ;;  %9408 = vmatprep.subr.bf16.mxu0 %v14064_v13  ;;  %v14068_v33 = vld [vmem:[#allocation106_spill] sm:$0xff] }
 0x662   : > { %9588 = vmatprep.subr.bf16.mxu1 %v14018_v52  ;;  %v14069_v52 = vld [vmem:[#allocation170_spill] sm:$0xff] }
 0x665   : > { %v12695_v60 = vpop.f32.mrb[136].mxu0 }
 0x666   : > { %v12697_v28 = vpop.f32.mrb[137].mxu0 }
 0x668   : > { %9410 = vmatpush1.bf16.xpose.msra.mxu0 %v14065_v0 }
 0x669   : > { %9590 = vmatpush1.bf16.xpose.msra.mxu1 %v14020_v54  ;;  %9412 = vmatprep.subr.bf16.mxu0 %v14066_v1  ;;  %v14072_v54 = vld [vmem:[#allocation169_spill] sm:$0xff] }
 0x66a   : > { %9592 = vmatprep.subr.bf16.mxu1 %v14021_v49  ;;  %v14073_v49 = vld [vmem:[#allocation179_spill] sm:$0xff] }
 0x670   : > { %6612 = vmatmul.mubr.f32.vlgmr.msra.gmra.mrb[140].mxu1 %v11956_v19  ;;  %9414 = vmatpush1.bf16.xpose.msra.mxu0 %v14067_v53  ;;  %v14070_v19 = vld [vmem:[#allocation108_spill] sm:$0xff] }
 0x671   : > { %6616 = vmatprep.mubr.f32.mxu1 %v11953_v26  ;;  %9594 = vmatpush1.bf16.xpose.msra.mxu1 %v14023_v9  ;;  %v14071_v26 = vld [vmem:[#allocation110_spill] sm:$0xff] }
 0x672   : > { %9596 = vmatprep.subr.bf16.mxu1 %v14024_v27  ;;  %9416 = vmatprep.subr.bf16.mxu0 %v14068_v33  ;;  %v14077_v9 = vld [vmem:[#allocation118_spill] sm:$0xff]  ;;  %v5618_v27 = vadd.f32 %v12645_v30, %v12596_v25  ;;  %v14085_v30 = vld [vmem:[#allocation67_spill] sm:$0xff] }
 0x674   : > { %6617 = vmatmul.mubr.f32.gmra.mrb[142].mxu1 %v11947_v10  ;;  %v14074_v10 = vld [vmem:[#allocation112_spill] sm:$0xff] }
 0x675   : > { %6621 = vmatprep.mubr.f32.mxu1 %v11970_v36  ;;  %v14075_v36 = vld [vmem:[#allocation114_spill] sm:$0xff] }
 0x678   : > { %6622 = vmatmul.mubr.f32.gmra.mrb[144].mxu1 %v11976_v42  ;;  %9418 = vmatpush1.bf16.xpose.msra.mxu0 %v14070_v19  ;;  %v14076_v42 = vld [vmem:[#allocation116_spill] sm:$0xff] }
 0x679   : > { %6626 = vmatprep.mubr.f32.mxu1 %v14069_v52  ;;  %9598 = vmatpush1.bf16.xpose.msra.mxu1 %v14025_v38  ;;  %v5691_v38 = vadd.f32 %v12626_v63, %v12596_v25  ;;  %v14082_v63 = vld [vmem:[#allocation61_spill] sm:$0xff] }
 0x67a   : > { %9600 = vmatprep.subr.bf16.mxu1 %v14026_v29  ;;  %9420 = vmatprep.subr.bf16.mxu0 %v14071_v26  ;;  %v14078_v29 = vld [vmem:[#allocation120_spill] sm:$0xff]  ;;  %v14088_v52 = vld [vmem:[#allocation185_spill] sm:$0xff] }
 0x67c   : > { %6627 = vmatmul.mubr.f32.gmra.mrb[146].mxu1 %v14072_v54  ;;  %v14089_v54 = vld [vmem:[#allocation182_spill] sm:$0xff] }
 0x67d   : > { %6696 = vmatprep.mubr.f32.mxu1 %v14073_v49  ;;  %v14093_v49 = vld [vmem:[#allocation187_spill] sm:$0xff] }
 0x680   : > { %9422 = vmatpush1.bf16.xpose.msra.mxu0 %v14074_v10 }
 0x681   : > { %9602 = vmatpush1.bf16.xpose.msra.mxu1 %v14027_v34  ;;  %9424 = vmatprep.subr.bf16.mxu0 %v14075_v36  ;;  %v5933_v34 = vrot.slane %v5618_v27, %v12598_v22  ;;  %v14095_v27 = vld [vmem:[#allocation190_spill] sm:$0xff] }
 0x682   : > { %9604 = vmatprep.subr.bf16.mxu1 %v14028_v3  ;;  %v14079_v3 = vld [vmem:[#allocation59_spill] sm:$0xff] }
 0x688   : > { %9426 = vmatpush1.bf16.xpose.msra.mxu0 %v14076_v42 }
 0x689   : > { %9606 = vmatpush1.bf16.xpose.msra.mxu1 %v14029_v41  ;;  %9428 = vmatprep.subr.bf16.mxu0 %v14077_v9  ;;  %v5945_v41 = vrot.slane %v5691_v38, %v12598_v22  ;;  %v14096_v38 = vld [vmem:[#allocation77_spill] sm:$0xff] }
 0x68a   : > { %9608 = vmatprep.subr.bf16.mxu1 %v14030_v40  ;;  %v14080_v40 = vld [vmem:[#allocation162_spill] sm:$0xff] }
 0x68b   : > { %v5976_v37 = vmul.f32 %v5933_v34, %v14080_v40  ;;  %v5979_v35 = vmul.f32 %v5945_v41, %v14081_v18  ;;  %v14098_v34 = vld [vmem:[#allocation188_spill] sm:$0xff]  ;;  %v14100_v41 = vld [vmem:[#allocation81_spill] sm:$0xff]  ;;  %v14101_v40 = vld [vmem:[#allocation83_spill] sm:$0xff] }
 0x68c   : > { %v14104_v18 = vld [vmem:[#allocation89_spill] sm:$0xff] }
 0x690   : > { %9430 = vmatpush1.bf16.xpose.msra.mxu0 %v14078_v29 }
 0x691   : > { %9610 = vmatpush1.bf16.xpose.msra.mxu1 %v14031_v21  ;;  %9432 = vmatprep.subr.bf16.mxu0 %v14079_v3  ;;  %v14083_v21 = vld [vmem:[#allocation63_spill] sm:$0xff] }
 0x692   : > { %9612 = vmatprep.subr.bf16.mxu1 %v14032_v17  ;;  %v14084_v17 = vld [vmem:[#allocation65_spill] sm:$0xff] }
 0x697   : > { %6261 = vmatmul.mubr.f32.vlgmr.msra.gmra.mrb[144].mxu0 %v5976_v37  ;;  %v5689_v37 = vadd.f32 %v12624_v12, %v12596_v25  ;;  %v14108_v12 = vld [vmem:[#allocation123_spill] sm:$0xff] }
 0x698   : > { %9434 = vmatpush1.bf16.xpose.msra.mxu0 %v14082_v63  ;;  %6330 = vmatprep.mubr.f32.mxu0 %v5979_v35  ;;  %v14106_v35 = vld [vmem:[#allocation158_spill] sm:$0xff] }
 0x699   : > { %9614 = vmatpush1.bf16.xpose.msra.mxu1 %v14033_v32  ;;  %9436 = vmatprep.subr.bf16.mxu0 %v14083_v21 }
 0x69a   : > { %9616 = vmatprep.subr.bf16.mxu1 %v14034_v4 }
 0x6a0   : > { %9438 = vmatpush1.bf16.xpose.msra.mxu0 %v14084_v17 }
 0x6a1   : > { %9618 = vmatpush1.bf16.xpose.msra.mxu1 %v14035_v11  ;;  %9440 = vmatprep.subr.bf16.mxu0 %v14085_v30  ;;  %v14090_v11 = vld [vmem:[#allocation73_spill] sm:$0xff] }
 0x6a2   : > { %9620 = vmatprep.subr.bf16.mxu1 %v14036_v14  ;;  %v14091_v14 = vld [vmem:[#allocation75_spill] sm:$0xff] }
 0x6a8   : > { %9442 = vmatpush1.bf16.xpose.msra.mxu0 %v14086_v58 }
 0x6a9   : > { %9622 = vmatpush1.bf16.xpose.msra.mxu1 %v14038_v5  ;;  %9444 = vmatprep.subr.bf16.mxu0 %v14087_v43  ;;  %v14092_v5 = vld [vmem:[#allocation180_spill] sm:$0xff] }
 0x6aa   : > { %9624 = vmatprep.subr.bf16.mxu1 %v14039_v48  ;;  %v6052_v32 = vpop.f32.mrb[138].mxu0  ;;  %v14094_v48 = vld [vmem:[#allocation193_spill] sm:$0xff] }
 0x6ab   : > { %v6054_v4 = vpop.f32.mrb[139].mxu0 }
 0x6b0   : > { %6697 = vmatmul.mubr.f32.vlgmr.msra.gmra.mrb[140].mxu1 %v14088_v52  ;;  %9446 = vmatpush1.bf16.xpose.msra.mxu0 %v14090_v11  ;;  %v14107_v52 = vld [vmem:[#allocation166_spill] sm:$0xff] }
 0x6b1   : > { %6701 = vmatprep.mubr.f32.mxu1 %v14089_v54  ;;  %9626 = vmatpush1.bf16.xpose.msra.mxu1 %v14042_v15  ;;  %v14097_v15 = vld [vmem:[#allocation79_spill] sm:$0xff] }
 0x6b2   : > { %9628 = vmatprep.subr.bf16.mxu1 %v14043_v59  ;;  %9448 = vmatprep.subr.bf16.mxu0 %v14091_v14  ;;  %v14099_v59 = vld [vmem:[#allocation172_spill] sm:$0xff] }
 0x6b4   : > { %6702 = vmatmul.mubr.f32.gmra.mrb[142].mxu1 %v14092_v5  ;;  %v14112_v5 = vld [vmem:[#allocation127_spill] sm:$0xff] }
 0x6b5   : > { %6706 = vmatprep.mubr.f32.mxu1 %v14093_v49  ;;  %v14113_v49 = vld [vmem:[#allocation128_spill] sm:$0xff] }
 0x6b8   : > { %6707 = vmatmul.mubr.f32.gmra.mrb[144].mxu1 %v14094_v48  ;;  %9450 = vmatpush1.bf16.xpose.msra.mxu0 %v14096_v38 }
 0x6b9   : > { %6711 = vmatprep.mubr.f32.mxu1 %v14095_v27  ;;  %9630 = vmatpush1.bf16.xpose.msra.mxu1 %v14044_v51  ;;  %v14102_v51 = vld [vmem:[#allocation85_spill] sm:$0xff]  ;;  %v14114_v27 = vld [vmem:[#allocation174_spill] sm:$0xff] }
 0x6ba   : > { %9632 = vmatprep.subr.bf16.mxu1 %v14045_v2  ;;  %9452 = vmatprep.subr.bf16.mxu0 %v14097_v15  ;;  %v14103_v2 = vld [vmem:[#allocation87_spill] sm:$0xff] }
 0x6bc   : > { %6712 = vmatmul.mubr.f32.gmra.mrb[146].mxu1 %v14098_v34  ;;  %v14118_v34 = vld [vmem:[#allocation171_spill] sm:$0xff] }
 0x6bd   : > { %6781 = vmatprep.mubr.f32.mxu1 %v14099_v59  ;;  %v14120_v59 = vld [vmem:[#allocation178_spill] sm:$0xff] }
 0x6c0   : > { %9454 = vmatpush1.bf16.xpose.msra.mxu0 %v14100_v41 }
 0x6c1   : > { %9634 = vmatpush1.bf16.xpose.msra.mxu1 %v14046_v45  ;;  %9456 = vmatprep.subr.bf16.mxu0 %v14101_v40  ;;  %v5762_v45 = vadd.f32 %v12670_v8, %v12596_v25  ;;  %v14111_v8 = vld [vmem:[#allocation126_spill] sm:$0xff] }
 0x6c2   : > { %9636 = vmatprep.subr.bf16.mxu1 %v14047_v55  ;;  %v5941_v55 = vrot.slane %v5689_v37, %v12598_v22  ;;  %v14122_v37 = vld [vmem:[#allocation131_spill] sm:$0xff] }
 0x6c4   : > { %v5978_v4 = vmul.f32 %v5941_v55, %v14106_v35  ;;  %v14126_v55 = vld [vmem:[#allocation133_spill] sm:$0xff]  ;;  %v14127_v35 = vld [vmem:[#allocation134_spill] sm:$0xff] }
 0x6c8   : > { %9458 = vmatpush1.bf16.xpose.msra.mxu0 %v14102_v51 }
 0x6c9   : > { %9638 = vmatpush1.bf16.xpose.msra.mxu1 %v14049_v23  ;;  %9460 = vmatprep.subr.bf16.mxu0 %v14103_v2  ;;  %v14105_v23 = vld [vmem:[#allocation122_spill] sm:$0xff] }
 0x6ca   : > { %9640 = vmatprep.subr.bf16.mxu1 %v14050_v44  ;;  %v5953_v44 = vrot.slane %v5762_v45, %v12598_v22  ;;  %v14124_v45 = vld [vmem:[#allocation175_spill] sm:$0xff] }
 0x6cc   : > { %v5981_v54 = vmul.f32 %v5953_v44, %v14107_v52  ;;  %v5904_v52 = vadd.f32 %v12697_v28, %v12596_v25  ;;  %v14135_v28 = vld [vmem:[#allocation140_spill] sm:$0xff] }
 0x6d0   : > { %9462 = vmatpush1.bf16.xpose.msra.mxu0 %v14104_v18 }
 0x6d1   : > { %9642 = vmatpush1.bf16.xpose.msra.mxu1 %v14051_v20  ;;  %9464 = vmatprep.subr.bf16.mxu0 %v14105_v23  ;;  %v14109_v20 = vld [vmem:[#allocation124_spill] sm:$0xff] }
 0x6d2   : > { %9644 = vmatprep.subr.bf16.mxu1 %v14052_v7  ;;  %v14110_v7 = vld [vmem:[#allocation125_spill] sm:$0xff] }
 0x6d7   : > { %6331 = vmatmul.mubr.f32.vlgmr.msra.gmra.mrb[146].mxu0 %v5978_v4  ;;  %v14129_v4 = vld [vmem:[#allocation136_spill] sm:$0xff] }
 0x6d8   : > { %9466 = vmatpush1.bf16.xpose.msra.mxu0 %v14108_v12  ;;  %6400 = vmatprep.mubr.f32.mxu0 %v5981_v54  ;;  %v14131_v54 = vld [vmem:[#allocation138_spill] sm:$0xff] }
 0x6d9   : > { %9646 = vmatpush1.bf16.xpose.msra.mxu1 %v14053_v39  ;;  %9468 = vmatprep.subr.bf16.mxu0 %v14109_v20 }
 0x6da   : > { %9648 = vmatprep.subr.bf16.mxu1 %v14054_v16 }
 0x6e0   : > { %9470 = vmatpush1.bf16.xpose.msra.mxu0 %v14110_v7 }
 0x6e1   : > { %9650 = vmatpush1.bf16.xpose.msra.mxu1 %v14055_v61  ;;  %9472 = vmatprep.subr.bf16.mxu0 %v14111_v8  ;;  %v14115_v61 = vld [vmem:[#allocation173_spill] sm:$0xff] }
 0x6e2   : > { %9652 = vmatprep.subr.bf16.mxu1 %v14056_v6  ;;  %v14116_v6 = vld [vmem:[#allocation129_spill] sm:$0xff] }
 0x6e8   : > { %9474 = vmatpush1.bf16.xpose.msra.mxu0 %v14112_v5 }
 0x6e9   : > { %9654 = vmatpush1.bf16.xpose.msra.mxu1 %v14057_v62  ;;  %9476 = vmatprep.subr.bf16.mxu0 %v14113_v49  ;;  %v14117_v62 = vld [vmem:[#allocation130_spill] sm:$0xff] }
 0x6ea   : > { %9656 = vmatprep.subr.bf16.mxu1 %v14058_v31  ;;  %v6122_v39 = vpop.f32.mrb[140].mxu0  ;;  %v14119_v31 = vld [vmem:[#allocation176_spill] sm:$0xff] }
 0x6eb   : > { %v6123_v16 = vadd.f32 %v6122_v39, %v6052_v32  ;;  %v6124_v48 = vpop.f32.mrb[141].mxu0  ;;  %v14121_v32 = vld [vmem:[#allocation177_spill] sm:$0xff] }
 0x6ec   : > { %v14132_v39 = vld [vmem:[#allocation165_spill] sm:$0xff] }
 0x6f0   : > { %6782 = vmatmul.mubr.f32.vlgmr.msra.gmra.mrb[140].mxu1 %v14114_v27  ;;  %9478 = vmatpush1.bf16.xpose.msra.mxu0 %v14116_v6  ;;  %v14133_v27 = vld [vmem:[#allocation168_spill] sm:$0xff] }
 0x6f1   : > { %6786 = vmatprep.mubr.f32.mxu1 %v14115_v61  ;;  %9658 = vmatpush1.bf16.xpose.msra.mxu1 %v14061_v46  ;;  %v14123_v46 = vld [vmem:[#allocation132_spill] sm:$0xff] }
 0x6f2   : > { %9660 = vmatprep.subr.bf16.mxu1 %v14062_v56  ;;  %9480 = vmatprep.subr.bf16.mxu0 %v14117_v62  ;;  %v14125_v56 = vld [vmem:[#allocation195_spill] sm:$0xff] }
 0x6f4   : > { %6787 = vmatmul.mubr.f32.gmra.mrb[142].mxu1 %v14118_v34  ;;  %v14138_v34 = vld [vmem:[#allocation143_spill] sm:$0xff] }
 0x6f5   : > { %6791 = vmatprep.mubr.f32.mxu1 %v14119_v31 }
 0x6f8   : > { %6792 = vmatmul.mubr.f32.gmra.mrb[144].mxu1 %v14120_v59  ;;  %9482 = vmatpush1.bf16.xpose.msra.mxu0 %v14122_v37 }
 0x6f9   : > { %6796 = vmatprep.mubr.f32.mxu1 %v14121_v32  ;;  %9662 = vmatpush1.bf16.xpose.msra.mxu1 %v14063_v47  ;;  %v14140_v32 = vld [vmem:[#allocation26_spill] sm:$0xff] }
 0x6fa   : > { %9664 = vmatprep.subr.bf16.mxu1 %v14064_v13  ;;  %9484 = vmatprep.subr.bf16.mxu0 %v14123_v46  ;;  %v14128_v13 = vld [vmem:[#allocation135_spill] sm:$0xff] }
 0x6fc   : > { %6797 = vmatmul.mubr.f32.gmra.mrb[146].mxu1 %v14124_v45  ;;  %v14144_v45 = vld [vmem:[#allocation196_spill] sm:$0xff] }
 0x6fd   : > { %6866 = vmatprep.mubr.f32.mxu1 %v14125_v56  ;;  %v14146_v56 = vld [vmem:[#allocation206_spill] sm:$0xff] }
 0x700   : > { %9486 = vmatpush1.bf16.xpose.msra.mxu0 %v14126_v55 }
 0x701   : > { %9666 = vmatpush1.bf16.xpose.msra.mxu1 %v14065_v0  ;;  %9488 = vmatprep.subr.bf16.mxu0 %v14127_v35  ;;  %v5760_v0 = vadd.f32 %v12668_v57, %v12596_v25  ;;  %v14134_v57 = vld [vmem:[#allocation139_spill] sm:$0xff] }
 0x702   : > { %9668 = vmatprep.subr.bf16.mxu1 %v14066_v1  ;;  %v14130_v1 = vld [vmem:[#allocation137_spill] sm:$0xff] }
 0x703   : > { %v12818_v44 = vpop.f32.mrb[138].mxu1 }
 0x704   : > { %v6474_v47 = vpop.f32.mrb[139].mxu1 }
 0x705   : > { %v14148_v47 = vld [vmem:[#allocation147_spill] sm:$0xff] }
 0x708   : > { %9490 = vmatpush1.bf16.xpose.msra.mxu0 %v14128_v13 }
 0x709   : > { %9670 = vmatpush1.bf16.xpose.msra.mxu1 %v14067_v53  ;;  %9492 = vmatprep.subr.bf16.mxu0 %v14129_v4  ;;  %v5949_v53 = vrot.slane %v5760_v0, %v12598_v22  ;;  %v14150_v0 = vld [vmem:[#allocation204_spill] sm:$0xff] }
 0x70a   : > { %9672 = vmatprep.subr.bf16.mxu1 %v14068_v33  ;;  %v5969_v33 = vrot.slane %v5904_v52, %v12598_v22  ;;  %v14152_v52 = vld [vmem:[#allocation149_spill] sm:$0xff] }
 0x70b   : > { %v5980_v48 = vmul.f32 %v5949_v53, %v14132_v39  ;;  %v14153_v53 = vld [vmem:[#allocation150_spill] sm:$0xff]  ;;  %v14157_v39 = vld [vmem:[#allocation167_spill] sm:$0xff] }
 0x70c   : > { %v5985_v61 = vmul.f32 %v5969_v33, %v14133_v27  ;;  %v5902_v33 = vadd.f32 %v12695_v60, %v12596_v25  ;;  %v14178_v27 = vld [vmem:[#allocation103_spill] sm:$0xff] }
 0x710   : > { %9494 = vmatpush1.bf16.xpose.msra.mxu0 %v14130_v1 }
 0x711   : > { %9674 = vmatpush1.bf16.xpose.msra.mxu1 %v14070_v19  ;;  %9528 = vmatprep.subr.bf16.mxu0 %v14131_v54  ;;  %v14136_v19 = vld [vmem:[#allocation141_spill] sm:$0xff] }
 0x712   : > { %9676 = vmatprep.subr.bf16.mxu1 %v14071_v26  ;;  %v14137_v26 = vld [vmem:[#allocation142_spill] sm:$0xff] }
 0x717   : > { %6401 = vmatmul.mubr.f32.vlgmr.msra.gmra.mrb[148].mxu0 %v5980_v48 }
 0x718   : > { %9530 = vmatpush1.bf16.xpose.msra.mxu0 %v14134_v57  ;;  %6540 = vmatprep.mubr.f32.mxu0 %v5985_v61  ;;  %v12935_v61 = vld [vmem:[#allocation4 + $0xa0] sm:$0xff] }
 0x719   : > { %9678 = vmatpush1.bf16.xpose.msra.mxu1 %v14074_v10  ;;  %9532 = vmatprep.subr.bf16.mxu0 %v14135_v28  ;;  %v14139_v10 = vld [vmem:[#allocation144_spill] sm:$0xff] }
 0x71a   : > { %9680 = vmatprep.subr.bf16.mxu1 %v14075_v36 }
 0x720   : > { %9534 = vmatpush1.bf16.xpose.msra.mxu0 %v14136_v19 }
 0x721   : > { %9682 = vmatpush1.bf16.xpose.msra.mxu1 %v14076_v42  ;;  %9536 = vmatprep.subr.bf16.mxu0 %v14137_v26  ;;  %v14141_v42 = vld [vmem:[#allocation197_spill] sm:$0xff] }
 0x722   : > { %9684 = vmatprep.subr.bf16.mxu1 %v14077_v9  ;;  %v14142_v9 = vld [vmem:[#allocation145_spill] sm:$0xff] }
 0x728   : > { %9538 = vmatpush1.bf16.xpose.msra.mxu0 %v14138_v34 }
 0x729   : > { %9686 = vmatpush1.bf16.xpose.msra.mxu1 %v14078_v29  ;;  %9540 = vmatprep.subr.bf16.mxu0 %v14139_v10  ;;  %v14143_v29 = vld [vmem:[#allocation146_spill] sm:$0xff] }
 0x72a   : > { %9688 = vmatprep.subr.bf16.mxu1 %v14079_v3  ;;  %v6192_v31 = vpop.f32.mrb[142].mxu0  ;;  %v14145_v3 = vld [vmem:[#allocation28_spill] sm:$0xff] }
 0x72b   : > { %v6193_v36 = vadd.f32 %v6192_v31, %v6123_v16  ;;  %v6194_v59 = vpop.f32.mrb[143].mxu0  ;;  %v14147_v16 = vld [vmem:[#allocation30_spill] sm:$0xff]  ;;  %v12938_v31 = vld [vmem:[#allocation4 + $0xb8] sm:$0xff] }
 0x72c   : > { %v12944_v59 = vld [vmem:[#allocation4 + $0xc8] sm:$0xff] }
 0x730   : > { %6867 = vmatmul.mubr.f32.vlgmr.msra.gmra.mrb[140].mxu1 %v14140_v32  ;;  %9542 = vmatpush1.bf16.xpose.msra.mxu0 %v14142_v9  ;;  %v14179_v32 = vld [vmem:[#allocation105_spill] sm:$0xff] }
 0x731   : > { %6871 = vmatprep.mubr.f32.mxu1 %v14141_v42  ;;  %9690 = vmatpush1.bf16.xpose.msra.mxu1 %v14082_v63  ;;  %v14149_v63 = vld [vmem:[#allocation148_spill] sm:$0xff]  ;;  %v14180_v42 = vld [vmem:[#allocation107_spill] sm:$0xff] }
 0x732   : > { %9692 = vmatprep.subr.bf16.mxu1 %v14083_v21  ;;  %9544 = vmatprep.subr.bf16.mxu0 %v14143_v29  ;;  %v14151_v21 = vld [vmem:[#allocation183_spill] sm:$0xff] }
 0x734   : > { %6872 = vmatmul.mubr.f32.gmra.mrb[142].mxu1 %v14144_v45  ;;  %v12949_v45 = vld [vmem:[#allocation4 + $0xc0] sm:$0xff] }
 0x735   : > { %6876 = vmatprep.mubr.f32.mxu1 %v14145_v3  ;;  %v14181_v3 = vld [vmem:[#allocation109_spill] sm:$0xff] }
 0x738   : > { %6877 = vmatmul.mubr.f32.gmra.mrb[144].mxu1 %v14146_v56  ;;  %9546 = vmatpush1.bf16.xpose.msra.mxu0 %v14148_v47  ;;  %v14182_v56 = vld [vmem:[#allocation111_spill] sm:$0xff] }
 0x739   : > { %6881 = vmatprep.mubr.f32.mxu1 %v14147_v16  ;;  %9694 = vmatpush1.bf16.xpose.msra.mxu1 %v14084_v17  ;;  %v14154_v17 = vld [vmem:[#allocation151_spill] sm:$0xff]  ;;  %v14183_v16 = vld [vmem:[#allocation113_spill] sm:$0xff] }
 0x73a   : > { %9696 = vmatprep.subr.bf16.mxu1 %v14085_v30  ;;  %9548 = vmatprep.subr.bf16.mxu0 %v14149_v63  ;;  %v14155_v30 = vld [vmem:[#allocation152_spill] sm:$0xff] }
 0x73c   : > { %6882 = vmatmul.mubr.f32.gmra.mrb[146].mxu1 %v14150_v0  ;;  %v14184_v0 = vld [vmem:[#allocation115_spill] sm:$0xff] }
 0x73d   : > { %6951 = vmatprep.mubr.f32.mxu1 %v14151_v21  ;;  %v14185_v21 = vld [vmem:[#allocation117_spill] sm:$0xff] }
 0x740   : > { %9550 = vmatpush1.bf16.xpose.msra.mxu0 %v14152_v52 }
 0x741   : > { %9698 = vmatpush1.bf16.xpose.msra.mxu1 %v14086_v58  ;;  %9552 = vmatprep.subr.bf16.mxu0 %v14153_v53  ;;  %v14156_v58 = vld [vmem:[#allocation153_spill] sm:$0xff] }
 0x742   : > { %9700 = vmatprep.subr.bf16.mxu1 %v14087_v43  ;;  %v5965_v43 = vrot.slane %v5902_v33, %v12598_v22  ;;  %v14159_v22 = vld [vmem:[#allocation184_spill] sm:$0xff]  ;;  %v14186_v33 = vld [vmem:[#allocation119_spill] sm:$0xff] }
 0x744   : > { %v5984_v48 = vmul.f32 %v5965_v43, %v14157_v39  ;;  %v14187_v43 = vld [vmem:[#allocation121_spill] sm:$0xff] }
 0x748   : > { %9554 = vmatpush1.bf16.xpose.msra.mxu0 %v14154_v17 }
 0x749   : > { %9702 = vmatpush1.bf16.xpose.msra.mxu1 %v14090_v11  ;;  %9556 = vmatprep.subr.bf16.mxu0 %v14155_v30 }
 0x74a   : > { %9704 = vmatprep.subr.bf16.mxu1 %v14091_v14  ;;  %v14158_v14 = vld [vmem:[#allocation186_spill] sm:$0xff] }
 0x750   : > { %9558 = vmatpush1.bf16.xpose.msra.mxu0 %v14156_v58 }
 0x751   : > { %9706 = vmatpush1.bf16.xpose.msra.mxu1 %v14096_v38  ;;  %v14160_v38 = vld [vmem:[#allocation181_spill] sm:$0xff] }
 0x752   : > { %9708 = vmatprep.subr.bf16.mxu1 %v14097_v15  ;;  %v14161_v15 = vld [vmem:[#allocation191_spill] sm:$0xff] }
 0x757   : > { %6541 = vmatmul.mubr.f32.vlgmr.msra.gmra.mrb[150].mxu0 %v5984_v48 }
 0x759   : > { %9710 = vmatpush1.bf16.xpose.msra.mxu1 %v14100_v41  ;;  %v14162_v41 = vld [vmem:[#allocation194_spill] sm:$0xff] }
 0x75a   : > { %9712 = vmatprep.subr.bf16.mxu1 %v14101_v40  ;;  %v14163_v40 = vld [vmem:[#allocation192_spill] sm:$0xff] }
 0x761   : > { %9714 = vmatpush1.bf16.xpose.msra.mxu1 %v14102_v51  ;;  %v14164_v51 = vld [vmem:[#allocation189_spill] sm:$0xff] }
 0x762   : > { %9716 = vmatprep.subr.bf16.mxu1 %v14103_v2  ;;  %v14165_v2 = vld [vmem:[#allocation208_spill] sm:$0xff] }
 0x769   : > { %9718 = vmatpush1.bf16.xpose.msra.mxu1 %v14104_v18 }
 0x76a   : > { %9720 = vmatprep.subr.bf16.mxu1 %v14105_v23  ;;  %v6262_v25 = vpop.f32.mrb[144].mxu0 }
 0x76b   : > { %v6263_v60 = vadd.f32 %v6262_v25, %v6193_v36  ;;  %v6264_v11 = vpop.f32.mrb[145].mxu0  ;;  %v12941_v36 = vld [vmem:[#allocation4 + $0xb0] sm:$0xff] }
 0x76c   : > { %v14188_v11 = vld [vmem:[#allocation203_spill] sm:$0xff] }
 0x770   : > { %6952 = vmatmul.mubr.f32.vlgmr.msra.gmra.mrb[140].mxu1 %v14158_v14  ;;  %v14189_v14 = vld [vmem:[#allocation202_spill] sm:$0xff] }
 0x771   : > { %6956 = vmatprep.mubr.f32.mxu1 %v14159_v22  ;;  %9722 = vmatpush1.bf16.xpose.msra.mxu1 %v14108_v12  ;;  %v14190_v22 = vld [vmem:[#allocation199_spill] sm:$0xff] }
 0x772   : > { %9724 = vmatprep.subr.bf16.mxu1 %v14109_v20  ;;  %v14166_v20 = vld [vmem:[#allocation209_spill] sm:$0xff] }
 0x774   : > { %6957 = vmatmul.mubr.f32.gmra.mrb[142].mxu1 %v14160_v38  ;;  %v14191_v38 = vld [vmem:[#allocation32_spill] sm:$0xff] }
 0x775   : > { %6961 = vmatprep.mubr.f32.mxu1 %v14161_v15  ;;  %v14192_v15 = vld [vmem:[#allocation207_spill] sm:$0xff] }
 0x778   : > { %6962 = vmatmul.mubr.f32.gmra.mrb[144].mxu1 %v14162_v41  ;;  %v14195_v41 = vld [vmem:[#allocation212_spill] sm:$0xff] }
 0x779   : > { %6966 = vmatprep.mubr.f32.mxu1 %v14163_v40  ;;  %9726 = vmatpush1.bf16.xpose.msra.mxu1 %v14110_v7  ;;  %v14167_v7 = vld [vmem:[#allocation200_spill] sm:$0xff] }
 0x77a   : > { %9728 = vmatprep.subr.bf16.mxu1 %v14111_v8  ;;  %v14168_v8 = vld [vmem:[#allocation95_spill] sm:$0xff] }
 0x77c   : > { %6967 = vmatmul.mubr.f32.gmra.mrb[146].mxu1 %v14164_v51 }
 0x77d   : > { %7036 = vmatprep.mubr.f32.mxu1 %v14165_v2 }
 0x781   : > { %9730 = vmatpush1.bf16.xpose.msra.mxu1 %v14112_v5  ;;  %v14169_v5 = vld [vmem:[#allocation201_spill] sm:$0xff] }
 0x782   : > { %9732 = vmatprep.subr.bf16.mxu1 %v14113_v49  ;;  %v14170_v49 = vld [vmem:[#allocation91_spill] sm:$0xff] }
 0x789   : > { %9734 = vmatpush1.bf16.xpose.msra.mxu1 %v14116_v6  ;;  %v14171_v6 = vld [vmem:[#allocation211_spill] sm:$0xff] }
 0x78a   : > { %9736 = vmatprep.subr.bf16.mxu1 %v14117_v62  ;;  %v14172_v62 = vld [vmem:[#allocation210_spill] sm:$0xff] }
 0x791   : > { %9738 = vmatpush1.bf16.xpose.msra.mxu1 %v14122_v37  ;;  %v14174_v37 = vld [vmem:[#allocation99_spill] sm:$0xff] }
 0x792   : > { %9740 = vmatprep.subr.bf16.mxu1 %v14123_v46  ;;  %v14175_v46 = vld [vmem:[#allocation93_spill] sm:$0xff] }
 0x799   : > { %9742 = vmatpush1.bf16.xpose.msra.mxu1 %v14126_v55  ;;  %v12921_v55 = vld [vmem:[#allocation4 + $0x88] sm:$0xff] }
 0x79a   : > { %9744 = vmatprep.subr.bf16.mxu1 %v14127_v35  ;;  %v12923_v35 = vld [vmem:[#allocation4 + $0x98] sm:$0xff]  ;;  %7236 = vrot.lane.b32.xlu1 %v12921_v55, %s10244_s10 }
 0x79b   : > { %7240 = vrot.lane.b32.xlu0 %v12923_v35, %s10244_s10 }
 0x7a1   : > { %9746 = vmatpush1.bf16.xpose.msra.mxu1 %v14128_v13  ;;  %v12927_v13 = vld [vmem:[#allocation4 + $0x90] sm:$0xff] }
 0x7a2   : > { %9748 = vmatprep.subr.bf16.mxu1 %v14129_v4  ;;  %v12930_v4 = vld [vmem:[#allocation4 + $0xa8] sm:$0xff]  ;;  %7238 = vrot.lane.b32.xlu1 %v12927_v13, %s10244_s10 }
 0x7a3   : > { %7244 = vrot.lane.b32.xlu0 %v12930_v4, %s10244_s10 }
 0x7a6   : > { %7242 = vrot.lane.b32.xlu1 %v12935_v61, %s10244_s10 }
 0x7a7   : > { %7248 = vrot.lane.b32.xlu0 %v12938_v31, %s10244_s10 }
 0x7a9   : > { %9750 = vmatpush1.bf16.xpose.msra.mxu1 %v14130_v1  ;;  %v14177_v1 = vld [vmem:[#allocation101_spill] sm:$0xff] }
 0x7aa   : > { %9752 = vmatprep.subr.bf16.mxu1 %v13884_v24  ;;  %v6332_v18 = vpop.f32.mrb[146].mxu0  ;;  %v14173_v24 = vld [vmem:[#allocation97_spill] sm:$0xff]  ;;  %7246 = vrot.lane.b32.xlu1 %v12941_v36, %s10244_s10 }
 0x7ab   : > { %v6333_v23 = vadd.f32 %v6332_v18, %v6263_v60  ;;  %v6334_v12 = vpop.f32.mrb[147].mxu0  ;;  %7252 = vrot.lane.b32.xlu0 %v12944_v59, %s10244_s10 }
 0x7ae   : > { %7250 = vrot.lane.b32.xlu1 %v12949_v45, %s10244_s10 }
 0x7b0   : > { %7037 = vmatmul.mubr.f32.vlgmr.msra.gmra.mrb[140].mxu1 %v14166_v20 }
 0x7b1   : > { %7041 = vmatprep.mubr.f32.mxu1 %v14167_v7  ;;  %9754 = vmatpush1.bf16.xpose.msra.mxu1 %v13886_v50  ;;  %v14176_v50 = vld [vmem:[#allocation198_spill] sm:$0xff] }
 0x7b2   : > { %9756 = vmatprep.subr.bf16.mxu1 %v14168_v8 }
 0x7b4   : > { %7042 = vmatmul.mubr.f32.gmra.mrb[142].mxu1 %v14169_v5 }
 0x7b5   : > { %7046 = vmatprep.mubr.f32.mxu1 %v14170_v49 }
 0x7b8   : > { %7047 = vmatmul.mubr.f32.gmra.mrb[144].mxu1 %v14171_v6 }
 0x7b9   : > { %7051 = vmatprep.mubr.f32.mxu1 %v14172_v62  ;;  %9758 = vmatpush1.bf16.xpose.msra.mxu1 %v14173_v24  ;;  %v10010_v62 = vld [vmem:[%s10438_s8] sm:$0xf]  ;;  %s7658_s8 = sshll.u32 %s10501_s26, 4  ;;  %s13089_s8 = int_to_ptr.vmem [resolvable:$true] %s7658_s8 }
 0x7ba   : > { %9760 = vmatprep.subr.bf16.mxu1 %v14174_v37  ;;  %s10149_s11 = scalar_lea.vmem %s13089_s8, 256 }
 0x7bb   : > { %p10150_p12 = scmp.ne.s32.totalorder %s13089_s8, %s10149_s11 }
 0x7bc   : > { %7052 = vmatmul.mubr.f32.gmra.mrb[146].mxu1 %v14175_v46 }
 0x7bd   : > { %7121 = vmatprep.mubr.f32.mxu1 %v14176_v50  ;;  %p10151_p7 = pnand %p10150_p12, %p14204_p2 }
 0x7bf   : > { %p10152_p8 = pneg %p10151_p7 }
 0x7c1   : > { %9762 = vmatpush1.bf16.xpose.msra.mxu1 %v14177_v1 }
 0x7c2   : > { %9764 = vmatprep.subr.bf16.mxu1 %v14178_v27 }
 0x7c9   : > { %9766 = vmatpush1.bf16.xpose.msra.mxu1 %v14179_v32 }
 0x7ca   : > { %9768 = vmatprep.subr.bf16.mxu1 %v14180_v42 }
 0x7d1   : > { %9770 = vmatpush1.bf16.xpose.msra.mxu1 %v14181_v3 }
 0x7d2   : > { %9772 = vmatprep.subr.bf16.mxu1 %v14182_v56 }
 0x7d9   : > { %9774 = vmatpush1.bf16.xpose.msra.mxu1 %v14183_v16 }
 0x7da   : > { %9776 = vmatprep.subr.bf16.mxu1 %v14184_v0 }
 0x7e1   : > { %9778 = vmatpush1.bf16.xpose.msra.mxu1 %v14185_v21 }
 0x7e2   : > { %9780 = vmatprep.subr.bf16.mxu1 %v14186_v33 }
 0x7e9   : > { %9782 = vmatpush1.bf16.xpose.msra.mxu1 %v14187_v43 }
 0x7ea   : > { %9784 = vmatprep.subr.bf16.mxu1 %v14131_v54  ;;  %v6402_v39 = vpop.f32.mrb[148].mxu0  ;;  %v14193_v54 = vld [vmem:[#allocation205_spill] sm:$0xff] }
 0x7eb   : > { %v6403_v48 = vadd.f32 %v6402_v39, %v6333_v23  ;;  %v6404_v25 = vpop.f32.mrb[149].mxu0 }
 0x7ed   : > { %v6473_v60 = vadd.f32 %v12818_v44, %v6403_v48  ;;  %v14194_v44 = vld [vmem:[#allocation34_spill] sm:$0xff] }
 0x7f0   : > { %7122 = vmatmul.mubr.f32.vlgmr.msra.gmra.mrb[140].mxu1 %v14188_v11 }
 0x7f1   : > { %7126 = vmatprep.mubr.f32.mxu1 %v14189_v14  ;;  %9786 = vmatpush1.bf16.xpose.msra.mxu1 %v14134_v57 }
 0x7f2   : > { %9788 = vmatprep.subr.bf16.mxu1 %v14135_v28 }
 0x7f4   : > { %7127 = vmatmul.mubr.f32.gmra.mrb[142].mxu1 %v14190_v22 }
 0x7f5   : > { %7131 = vmatprep.mubr.f32.mxu1 %v14191_v38 }
 0x7f8   : > { %7132 = vmatmul.mubr.f32.gmra.mrb[144].mxu1 %v14192_v15 }
 0x7f9   : > { %7136 = vmatprep.mubr.f32.mxu1 %v14193_v54  ;;  %9790 = vmatpush1.bf16.xpose.msra.mxu1 %v14136_v19 }
 0x7fa   : > { %9792 = vmatprep.subr.bf16.mxu1 %v14137_v26  ;;  %v10009_v26 = vld [vmem:[%s10430_s13] sm:$0xff]  ;;  %s7923_s13 = sshll.u32 %s10303_s22, 8  ;;  %s10249_s22 = smov [#allocation11]  }
 0x7fb   : > { %s13087_s9 = scalar_lea.hbm %s13139_s5, %s7923_s13  ;;  %s10153_s29 = sshll.u32 %s10249_s22, 4  ;;  %s10154_s29 = int_to_ptr.vmem [resolvable:$false] %s10153_s29 }
 0x7fc   : > { %7137 = vmatmul.mubr.f32.gmra.mrb[146].mxu1 %v14194_v44  ;;  %s10155_s15 = scalar_lea.vmem %s10154_s29, 512  ;;  %p10156_p6 = scmp.lt.s32.totalorder %s13089_s8, %s10154_s29 }
 0x7fd   : > { %7206 = vmatprep.mubr.f32.mxu1 %v14195_v41  ;;  %p10157_p13 = scmp.lt.s32.totalorder %s10155_s15, %s10149_s11 }
 0x7ff   : > { %p10158_p3 = por %p10157_p13, %p10156_p6 }
 0x801   : > { %9794 = vmatpush1.bf16.xpose.msra.mxu1 %v14138_v34  ;;  %p10159_p1 = pnand %p10158_p3, %p10152_p8 }
 0x802   : > { %9796 = vmatprep.subr.bf16.mxu1 %v14139_v10  ;;  %v14196_v10 = vld [vmem:[#allocation215_spill] sm:$0xff] }
 0x809   : > { %9798 = vmatpush1.bf16.xpose.msra.mxu1 %v14142_v9  ;;  %v14197_v9 = vld [vmem:[#allocation214_spill] sm:$0xff] }
 0x80a   : > { %9800 = vmatprep.subr.bf16.mxu1 %v14143_v29  ;;  %v14198_v29 = vld [vmem:[#allocation213_spill] sm:$0xff] }
 0x80c   : > { %v7237_v49 = vpop.permute.xlu1 %7236 }
 0x80d   : > { %v7241_v24 = vpop.permute.xlu0 %7240 }
 0x811   : > { %9802 = vmatpush1.bf16.xpose.msra.mxu1 %v14148_v47  ;;  %v14199_v47 = vld [vmem:[#allocation216_spill] sm:$0xff] }
 0x812   : > { %9804 = vmatprep.subr.bf16.mxu1 %v14149_v63  ;;  %v14200_v63 = vld [vmem:[#allocation219_spill] sm:$0xff] }
 0x814   : > { %v7239_v6 = vpop.permute.xlu1 %7238 }
 0x815   : > { %v7245_v46 = vpop.permute.xlu0 %7244 }
 0x818   : > { %v7243_v37 = vpop.permute.xlu1 %7242 }
 0x819   : > { %9806 = vmatpush1.bf16.xpose.msra.mxu1 %v14152_v52  ;;  %v14201_v52 = vld [vmem:[#allocation218_spill] sm:$0xff]  ;;  %v7249_v1 = vpop.permute.xlu0 %7248 }
 0x81a   : > { %9808 = vmatprep.subr.bf16.mxu1 %v14153_v53  ;;  %v14202_v53 = vld [vmem:[#allocation217_spill] sm:$0xff] }
 0x81c   : > { %v7247_v50 = vpop.permute.xlu1 %7246 }
 0x81d   : > { %v7253_v32 = vpop.permute.xlu0 %7252 }
 0x820   : > { %v7251_v27 = vpop.permute.xlu1 %7250 }
 0x821   : > { %9810 = vmatpush1.bf16.xpose.msra.mxu1 %v14154_v17  ;;  %v10245_v17 = vmov 0.0|0.0  }
 0x822   : > { %9812 = vmatprep.subr.bf16.mxu1 %v14155_v30  ;;  %9815 = vmatprep.subr.bf16.mxu0 %v10245_v17  ;;  %v14203_v30 = vmov 0.0  }
 0x823   : > { %7978 = vmatprep.mubr.msk.f32.mxu0 %vm10246_vm5, %v14203_v30 }
 0x829   : > { %9814 = vmatpush1.bf16.xpose.msra.mxu1 %v14156_v58  ;;  %v10247_v58 = vmov 36  }
 0x82a   : > { %v6542_v57 = vpop.f32.mrb[150].mxu0  ;;  %10003 = vset.pattern.permute.xlu1 %v10247_v58  ;;  %10004 = vset.pattern.permute.xlu0 %v10247_v58 }
 0x82b   : > { %v6543_v28 = vadd.f32 %v6542_v57, %v6473_v60  ;;  %v6544_v19 = vpop.f32.mrb[151].mxu0  ;;  %7511 = vperm.xlu1 %10003, %v12921_v55   ;;  %7515 = vperm.xlu0 %10004, %v12927_v13  }
 0x82d   : > { %v6546_v34 = vadd.f32 %v10009_v26, %v6543_v28 }
 0x82f   : > { %7642 = vst [vmem:[%s10501_s26] sm:$0xff] %v6546_v34  ;;  %7519 = vperm.xlu1 %10003, %v12923_v35   ;;  %7527 = vperm.xlu0 %10004, %v12930_v4  }
 0x830   : > { %7207 = vmatmul.mubr.f32.vlgmr.msra.gmra.mrb[140].mxu1 %v14196_v10 }
 0x831   : > { %7211 = vmatprep.mubr.f32.mxu1 %v14197_v9 }
 0x833   : > { %7523 = vperm.xlu1 %10003, %v12935_v61   ;;  %7535 = vperm.xlu0 %10004, %v12938_v31  }
 0x834   : > { %7212 = vmatmul.mubr.f32.gmra.mrb[142].mxu1 %v14198_v29 }
 0x835   : > { %7216 = vmatprep.mubr.f32.mxu1 %v14199_v47 }
 0x837   : > { %7531 = vperm.xlu1 %10003, %v12941_v36   ;;  %7543 = vperm.xlu0 %10004, %v12944_v59  }
 0x838   : > { %7217 = vmatmul.mubr.f32.gmra.mrb[144].mxu1 %v14200_v63 }
 0x839   : > { %7221 = vmatprep.mubr.f32.mxu1 %v14201_v52 }
 0x83b   : > { %7539 = vperm.xlu1 %10003, %v12949_v45  }
 0x83c   : > { %7222 = vmatmul.mubr.f32.gmra.mrb[146].mxu1 %v14202_v53 }
 0x8aa   : > { %v7512_v22 = vpop.permute.xlu1 %7511  ;;  %v7516_v15 = vpop.permute.xlu0 %7515 }
 0x8ae   : > { %v7520_v28 = vpop.permute.xlu1 %7519 }
 0x8b2   : > { %v7524_v58 = vpop.permute.xlu1 %7523 }
 0x903   : > { %v7208_v40 = vpop.f32.mrb[140].mxu1 }
 0x904   : > { %v7210_v51 = vpop.f32.mrb[141].mxu1 }
 0x907   : > { %v7213_v2 = vpop.f32.mrb[142].mxu1 }
 0x908   : > { %v9816_v18 = vpack.c.bf16 %v7213_v2, %v7208_v40  ;;  %v7215_v23 = vpop.f32.mrb[143].mxu1 }
 0x90a   : > { %9817 = vmatpush3.bf16.msra.mxu0 %v9816_v18 }
 0x90b   : > { %v7218_v12 = vpop.f32.mrb[144].mxu1  ;;  %9818 = vmatprep.subr.bf16.mxu0 %v10245_v17 }
 0x90c   : > { %v7220_v20 = vpop.f32.mrb[145].mxu1 }
 0x90f   : > { %v7223_v7 = vpop.f32.mrb[146].mxu1 }
 0x910   : > { %v9819_v8 = vpack.c.bf16 %v7223_v7, %v7218_v12  ;;  %v7225_v5 = vpop.f32.mrb[147].mxu1  ;;  %v7528_v7 = vpop.permute.xlu0 %7527 }
 0x912   : > { %9820 = vmatpush3.bf16.msra.mxu0 %v9819_v8 }
 0x913   : > { %8005 = vmatprep.subr.mxu0 %v14203_v30 }
 0x915   : > { %7979 = vmatmul.mubr.msk.f32.vlgmr.msra.gmra.mrb[152].mxu0 %vm4281_vm3, %v7237_v49 }
 0x916   : > { %7981 = vmatprep.mubr.msk.f32.mxu0 %vm10246_vm5, %v14203_v30  ;;  %8006 = vmatpush3.msk.msra.mxu0 %vm801_vm0, %v10010_v62  ;;  %v7532_v62 = vpop.permute.xlu1 %7531 }
 0x917   : > { %9821 = vmatprep.subr.bf16.mxu0 %v10245_v17 }
 0x919   : > { %7982 = vmatmul.mubr.msk.f32.gmra.mrb[154].mxu0 %vm4281_vm3, %v7239_v6 }
 0x91a   : > { %7984 = vmatprep.mubr.msk.f32.mxu0 %vm10246_vm5, %v14203_v30 }
 0x91d   : > { %7985 = vmatmul.mubr.msk.f32.gmra.mrb[156].mxu0 %vm4281_vm3, %v7241_v24 }
 0x91e   : > { %7987 = vmatprep.mubr.msk.f32.mxu0 %vm10246_vm5, %v14203_v30 }
 0x921   : > { %7988 = vmatmul.mubr.msk.f32.gmra.mrb[158].mxu0 %vm4281_vm3, %v7243_v37 }
 0x922   : > { %7990 = vmatprep.mubr.msk.f32.mxu0 %vm10246_vm5, %v14203_v30 }
 0x925   : > { %7991 = vmatmul.mubr.msk.f32.gmra.mrb[160].mxu0 %vm4281_vm3, %v7245_v46 }
 0x926   : > { %7993 = vmatprep.mubr.msk.f32.mxu0 %vm10246_vm5, %v14203_v30 }
 0x929   : > { %7994 = vmatmul.mubr.msk.f32.gmra.mrb[162].mxu0 %vm4281_vm3, %v7247_v50 }
 0x92a   : > { %7996 = vmatprep.mubr.msk.f32.mxu0 %vm10246_vm5, %v14203_v30 }
 0x92d   : > { %7997 = vmatmul.mubr.msk.f32.gmra.mrb[164].mxu0 %vm4281_vm3, %v7249_v1 }
 0x92e   : > { %7999 = vmatprep.mubr.msk.f32.mxu0 %vm10246_vm5, %v14203_v30 }
 0x931   : > { %8000 = vmatmul.mubr.msk.f32.gmra.mrb[166].mxu0 %vm4281_vm3, %v7251_v27 }
 0x932   : > { %8002 = vmatprep.mubr.msk.f32.mxu0 %vm10246_vm5, %v14203_v30 }
 0x935   : > { %8003 = vmatmul.mubr.msk.f32.gmra.mrb[168].mxu0 %vm4281_vm3, %v7253_v32 }
 0x936   : > { %8007 = vmatprep.mubr.msk.f32.mxu0 %vm10246_vm5, %v14203_v30 }
 0x939   : > { %8008 = vmatmul.mubr.msk.f32.vlgmr.msra.gmra.mrb[170].mxu0 %vm788_vm1, %v12921_v55  ;;  %v13074_v55 = vld [vmem:[#allocation4 + $0xd0] sm:$0xff] }
 0x93a   : > { %8010 = vmatprep.mubr.msk.f32.mxu0 %vm10246_vm5, %v14203_v30 }
 0x93d   : > { %8011 = vmatmul.mubr.msk.f32.gmra.mrb[172].mxu0 %vm788_vm1, %v12927_v13 }
 0x93e   : > { %8013 = vmatprep.mubr.msk.f32.mxu0 %vm10246_vm5, %v14203_v30 }
 0x941   : > { %8014 = vmatmul.mubr.msk.f32.gmra.mrb[174].mxu0 %vm788_vm1, %v12923_v35  ;;  %v10248_v35 = vmov 72  }
 0x942   : > { %8016 = vmatprep.mubr.msk.f32.mxu0 %vm10246_vm5, %v14203_v30  ;;  %10005 = vset.pattern.permute.xlu1 %v10248_v35 }
 0x943   : > { %10006 = vset.pattern.permute.xlu0 %v10248_v35  ;;  %7566 = vperm.xlu1 %10005, %v13074_v55   ;;  %v7536_v35 = vpop.permute.xlu0 %7535 }
 0x945   : > { %8017 = vmatmul.mubr.msk.f32.gmra.mrb[176].mxu0 %vm788_vm1, %v12935_v61 }
 0x946   : > { %8019 = vmatprep.mubr.msk.f32.mxu0 %vm10246_vm5, %v14203_v30 }
 0x949   : > { %8020 = vmatmul.mubr.msk.f32.gmra.mrb[178].mxu0 %vm788_vm1, %v12930_v4 }
 0x94a   : > { %8022 = vmatprep.mubr.msk.f32.mxu0 %vm10246_vm5, %v14203_v30 }
 0x94d   : > { %8023 = vmatmul.mubr.msk.f32.gmra.mrb[180].mxu0 %vm788_vm1, %v12941_v36 }
 0x94e   : > { %8025 = vmatprep.mubr.msk.f32.mxu0 %vm10246_vm5, %v14203_v30 }
 0x951   : > { %8026 = vmatmul.mubr.msk.f32.gmra.mrb[182].mxu0 %vm788_vm1, %v12938_v31 }
 0x952   : > { %8028 = vmatprep.mubr.msk.f32.mxu0 %vm10246_vm5, %v14203_v30 }
 0x955   : > { %8029 = vmatmul.mubr.msk.f32.gmra.mrb[184].mxu0 %vm788_vm1, %v12949_v45 }
 0x956   : > { %8031 = vmatprep.mubr.msk.f32.mxu0 %vm10246_vm5, %v14203_v30 }
 0x959   : > { %8032 = vmatmul.mubr.msk.f32.gmra.mrb[186].mxu0 %vm788_vm1, %v12944_v59 }
 0x95a   : > { %8052 = vmatprep.mubr.msk.f32.mxu0 %vm10246_vm5, %v14203_v30 }
 0x9e8   : > { %v7338_v13 = vpop.f32.mrb[152].mxu0 }
 0x9e9   : > { %v7980_v4 = vpop.f32.mrb[153].mxu0 }
 0x9ec   : > { %v7343_v61 = vpop.f32.mrb[154].mxu0 }
 0x9ed   : > { %v7983_v31 = vpop.f32.mrb[155].mxu0 }
 0x9f0   : > { %v7348_v36 = vpop.f32.mrb[156].mxu0 }
 0x9f1   : > { %v7986_v42 = vpop.f32.mrb[157].mxu0 }
 0x9f4   : > { %v7353_v45 = vpop.f32.mrb[158].mxu0 }
 0x9f5   : > { %v7989_v3 = vpop.f32.mrb[159].mxu0 }
 0x9f8   : > { %v7358_v56 = vpop.f32.mrb[160].mxu0 }
 0x9f9   : > { %v7992_v59 = vpop.f32.mrb[161].mxu0 }
 0x9fc   : > { %v7363_v16 = vpop.f32.mrb[162].mxu0 }
 0x9fd   : > { %v7995_v0 = vpop.f32.mrb[163].mxu0 }
 0x9fe   : > { %v7544_v0 = vpop.permute.xlu0 %7543 }
 0xa00   : > { %v7368_v21 = vpop.f32.mrb[164].mxu0 }
 0xa01   : > { %v7998_v33 = vpop.f32.mrb[165].mxu0 }
 0xa04   : > { %v7373_v43 = vpop.f32.mrb[166].mxu0 }
 0xa05   : > { %v8001_v39 = vpop.f32.mrb[167].mxu0 }
 0xa08   : > { %v7378_v48 = vpop.f32.mrb[168].mxu0 }
 0xa09   : > { %v8004_v25 = vpop.f32.mrb[169].mxu0 }
 0xa0c   : > { %v7466_v60 = vpop.f32.mrb[170].mxu0 }
 0xa0d   : > { %v7467_v11 = vadd.f32 %v7466_v60, %v7338_v13  ;;  %v8009_v14 = vpop.f32.mrb[171].mxu0 }
 0xa0f   : > { %v7546_v54 = vadd.f32 %v7512_v22, %v7467_v11 }
 0xa10   : > { %v7471_v38 = vpop.f32.mrb[172].mxu0 }
 0xa11   : > { %v7472_v44 = vadd.f32 %v7471_v38, %v7343_v61  ;;  %v8012_v41 = vpop.f32.mrb[173].mxu0  ;;  %v7555_v26 = vmax.f32 %v7546_v54, 0.0 }
 0xa13   : > { %v7547_v57 = vadd.f32 %v7516_v15, %v7472_v44 }
 0xa14   : > { %v7476_v19 = vpop.f32.mrb[174].mxu0 }
 0xa15   : > { %v7556_v34 = vmax.f32 %v7547_v57, 0.0  ;;  %v7477_v10 = vadd.f32 %v7476_v19, %v7348_v36  ;;  %v8015_v9 = vpop.f32.mrb[175].mxu0  ;;  %v7540_v36 = vpop.permute.xlu1 %7539 }
 0xa17   : > { %v9822_v29 = vpack.c.bf16 %v7556_v34, %v7555_v26  ;;  %v7548_v63 = vadd.f32 %v7520_v28, %v7477_v10 }
 0xa18   : > { %v7481_v47 = vpop.f32.mrb[176].mxu0 }
 0xa19   : > { %v7482_v52 = vadd.f32 %v7481_v47, %v7353_v45  ;;  %9823 = vmatpush3.bf16.msra.mxu0 %v9822_v29  ;;  %v8018_v53 = vpop.f32.mrb[177].mxu0  ;;  %v7557_v2 = vmax.f32 %v7548_v63, 0.0 }
 0xa1a   : > { %9824 = vmatprep.subr.bf16.mxu0 %v10245_v17 }
 0xa1b   : > { %v7549_v40 = vadd.f32 %v7524_v58, %v7482_v52 }
 0xa1c   : > { %v7486_v51 = vpop.f32.mrb[178].mxu0 }
 0xa1d   : > { %v7558_v18 = vmax.f32 %v7549_v40, 0.0  ;;  %v7487_v23 = vadd.f32 %v7486_v51, %v7358_v56  ;;  %v8021_v12 = vpop.f32.mrb[179].mxu0 }
 0xa1f   : > { %v9825_v20 = vpack.c.bf16 %v7558_v18, %v7557_v2  ;;  %v7550_v5 = vadd.f32 %v7528_v7, %v7487_v23 }
 0xa20   : > { %v7491_v8 = vpop.f32.mrb[180].mxu0 }
 0xa21   : > { %v7492_v49 = vadd.f32 %v7491_v8, %v7363_v16  ;;  %9826 = vmatpush3.bf16.msra.mxu0 %v9825_v20  ;;  %v8024_v6 = vpop.f32.mrb[181].mxu0  ;;  %v7559_v46 = vmax.f32 %v7550_v5, 0.0 }
 0xa22   : > { %9827 = vmatprep.subr.bf16.mxu0 %v10245_v17 }
 0xa23   : > { %v7551_v24 = vadd.f32 %v7532_v62, %v7492_v49 }
 0xa24   : > { %v7496_v37 = vpop.f32.mrb[182].mxu0 }
 0xa25   : > { %v7560_v50 = vmax.f32 %v7551_v24, 0.0  ;;  %v7497_v1 = vadd.f32 %v7496_v37, %v7368_v21  ;;  %v8027_v27 = vpop.f32.mrb[183].mxu0 }
 0xa27   : > { %v9828_v32 = vpack.c.bf16 %v7560_v50, %v7559_v46  ;;  %v7552_v4 = vadd.f32 %v7536_v35, %v7497_v1 }
 0xa28   : > { %v7501_v13 = vpop.f32.mrb[184].mxu0 }
 0xa29   : > { %v7502_v61 = vadd.f32 %v7501_v13, %v7373_v43  ;;  %9829 = vmatpush3.bf16.msra.mxu0 %v9828_v32  ;;  %v8030_v31 = vpop.f32.mrb[185].mxu0  ;;  %v7561_v3 = vmax.f32 %v7552_v4, 0.0 }
 0xa2a   : > { %9830 = vmatprep.subr.bf16.mxu0 %v10245_v17  ;;  %v7567_v17 = vpop.permute.xlu1 %7566 }
 0xa2b   : > { %v7553_v42 = vadd.f32 %v7540_v36, %v7502_v61 }
 0xa2c   : > { %v7506_v45 = vpop.f32.mrb[186].mxu0 }
 0xa2d   : > { %v7562_v56 = vmax.f32 %v7553_v42, 0.0  ;;  %v7507_v59 = vadd.f32 %v7506_v45, %v7378_v48  ;;  %v8033_v16 = vpop.f32.mrb[187].mxu0 }
 0xa2f   : > { %v9831_v21 = vpack.c.bf16 %v7562_v56, %v7561_v3  ;;  %v7554_v33 = vadd.f32 %v7544_v0, %v7507_v59 }
 0xa31   : > { %9832 = vmatpush3.bf16.msra.mxu0 %v9831_v21  ;;  %v7563_v43 = vmax.f32 %v7554_v33, 0.0 }
 0xa32   : > { %8050 = vmatprep.subr.mxu0 %v14203_v30 }
 0xa35   : > { %8051 = vmatpush3.msra.mxu0 %v7563_v43 }
 0xa36   : > { %8053 = vmatmul.mubr.msk.f32.vlgmr.msra.gmra.mrb[188].mxu0 %vm7569_vm6, %v13074_v55 }
 0xb09   : > { %v7638_v39 = vpop.f32.mrb[188].mxu0 }
 0xb0a   : > { %v7639_v30 = vadd.f32 %v7638_v39, %v7567_v17  ;;  %v8054_v48 = vpop.f32.mrb[189].mxu0 }
 0xb0c   : > { %7643 = vst [vmem:[%s10501_s26 + $0x8] sm:$0xff] %v7639_v30 }
 0xb0d   : > { %10162 = shalt.err (!%p10159_p1)
}
 0xb0e   : > { %s10163_s17 = scalar_lea.hbm %s13087_s9, 256  ;;  %s10167_s12 = scalar_lea.hbm %s13139_s5, 512 }
 0xb0f   : > { %p10164_p5 = scmp.ne.s32.totalorder %s13087_s9, %s10163_s17  ;;  %p10168_p9 = scmp.lt.u32.totalorder %s13087_s9, %s13139_s5 }
 0xb10   : > { %p10169_p0 = scmp.lt.u32.totalorder %s10167_s12, %s10163_s17  ;;  %p10171_p12 = scmp.lt.u32.totalorder %s10163_s17, %s13087_s9 }
 0xb11   : > { %p10165_p10 = pnand %p10164_p5, %p14204_p2 }
 0xb12   : > { %p10170_p11 = por %p10169_p0, %p10168_p9 }
 0xb13   : > { %p10166_p4 = pneg %p10165_p10 }
 0xb14   : > { %p10172_p7 = por %p10171_p12, %p10170_p11 }
 0xb16   : > { %p10173_p8 = pnand %p10172_p7, %p10166_p4 }
 0xb18   : > { %10176 = shalt.err (!%p10173_p8)
}
 0xb19   : > { %s10250_s13 = smov 128   ;;  %s10251_s23 = smov 8  }
 0xb1a   : > { %9932 = dma.vmem_to_hbm [thread:$0]  (%p14204_p2), %s13089_s8, 256, %s13087_s9, %s7645_s16, %s10250_s13, %s10250_s13, %s10251_s23  }
 0xb1b PF: > { %s7673_s28 = sand.u32 1, %s10219_s18   ;;  %p14205_p6 = scmp.ne.s32.totalorder %s13545_s6, 0 }
 0xb1c   : > { %p14206_p13 = scmp.ge.s32.totalorder %s10231_s21, 2  ;;  %s7674_s11 = scalar_lea.sflag [#allocation8], %s7673_s28 }
 0xb1e   : > { %p9942_p3 = pnand %p14206_p13, %p14205_p6 }
 0xb20   : > { %10214 = dma.done.wait (!%p9942_p3), %s7674_s11, 256  }
 0xb21   : > { %10216 = vsyncadd (!%p9942_p3), %s7674_s11, 4294967040  ;;  %p21_p1 = scmp.ge.s32.totalorder %s10307_s24, 4   ;;  %s14207_s18 = smov %s10223_s19 }
 0xb22   : > { %s14208_s19 = smov %s10227_s20  ;;  %s14209_s20 = smov %s10319_s27 }
 0xb23   : > { %s14210_s21 = smov %s10307_s24  ;;  %23 = sbr.rel (!%p21_p1) target bundleno = 7 (0x7), region = 106 }
 0xb2a   :  { %7679 = vsyncpa [#allocation7], 1 }
 0xb2b   :  { %7681 = vsyncpa [#allocation7 + $0x1], 1 }
 0xb2c   :  { %7682 = vsyncpa [#allocation10], 1 }
 0xb2d   :  { %7684 = vsyncpa [#allocation10 + $0x1], 1 }
 0xb2e   :  { %7685 = vsyncpa [#allocation8], 1 }
 0xb2f   :  { %7687 = vsyncpa [#allocation8 + $0x1], 1 }
 0xb30   :  { %7688 = vsyncmov [#allocation5] }
 0xb33   :  { %s7689_s21 = vpop.sfrf %7688 }
 0xb34   :  { %p7920_p2 = scmp.ne.s32.totalorder %s7689_s21, 0 }
 0xb36   :  { %7693 = shalt.err (%p7920_p2)  }
 0xb37   :  { %7695 = vsyncmov [#allocation5 + $0x1] }
 0xb3a   :  { %s7696_s30 = vpop.sfrf %7695 }
 0xb3b   :  { %p7921_p5 = scmp.ne.s32.totalorder %s7696_s30, 0 }
 0xb3d   :  { %7700 = shalt.err (%p7921_p5)  }
 0xb3e   :  { %7702 = vsyncmov [#allocation5 + $0x2] }
 0xb41   :  { %s7703_s6 = vpop.sfrf %7702 }
 0xb42   :  { %p7922_p10 = scmp.ne.s32.totalorder %s7703_s6, 0 }
 0xb44   :  { %7707 = shalt.err (%p7922_p10)  }

</bundles_post_ra>
